<compile_context>
chip_gen: v7x
topology: tpu7x:2x2x1
jax: 0.10.0
libtpu: 0.0.40
codegen_flags: <defaults>
</compile_context>

<pallas_src>
import jax
import jax.numpy as jnp
from jax.experimental import pallas as pl
from jax.experimental.pallas import tpu as pltpu

IN_FEATURES = 4096
OUT_FEATURES = 1000
N_PAD = 1024          # pad 1000 -> 1024 (multiple of 128) for lane-dense stores
DROP_P = 0.5
TN = 512              # output tile -> 2 parallel N blocks (v7x: one per TC)


def _dropout_linear_kernel(x_ref, m_ref, w_ref, b_ref, o_ref):
    """Fused (x * dropout_mask) @ W_tile + b_tile.  Whole K resident: no accum."""
    x_drop = x_ref[...] * m_ref[...]          # mask holds 0.0 or 1/(1-p)
    o_ref[...] = jnp.dot(x_drop, w_ref[...],
                         preferred_element_type=jnp.float32) + b_ref[...]


def prepare_params(weight, bias):
    """One-time (load-time) layout prep: W (1000,4096) -> (4096,1024), b -> (1,1024).

    Call this ONCE per parameter set and reuse the result; do NOT rebuild per
    forward call (that would triple HBM traffic of this HBM-bound GEMV).
    """
    K = weight.shape[1]
    w_t = jnp.zeros((K, N_PAD), jnp.float32).at[:, :OUT_FEATURES].set(
        weight.T.astype(jnp.float32))
    b2d = jnp.zeros((1, N_PAD), jnp.float32).at[:, :OUT_FEATURES].set(
        bias.astype(jnp.float32))
    return w_t, b2d


def dropout_linear(x, w_t, b2d, key, *, training=True):
    """x: (B, 4096) f32; w_t: (4096, 1024) f32 (pre-laid-out); b2d: (1, 1024)."""
    B, K = x.shape
    assert w_t.shape == (K, N_PAD) and N_PAD % TN == 0

    # Dropout mask computed once per call (hoisted out of the kernel grid).
    if training:
        keep = jax.random.bernoulli(key, 1.0 - DROP_P, (B, K))
        mask = keep.astype(jnp.float32) * jnp.float32(1.0 / (1.0 - DROP_P))
    else:
        mask = jnp.ones((B, K), jnp.float32)

    grid_spec = pltpu.PrefetchScalarGridSpec(
        num_scalar_prefetch=0,
        grid=(N_PAD // TN,),                              # single parallel N axis
        in_specs=[
            pl.BlockSpec((B, K), lambda n: (0, 0)),       # x: fully resident
            pl.BlockSpec((B, K), lambda n: (0, 0)),       # mask: fully resident
            pl.BlockSpec((K, TN), lambda n: (0, n)),      # W: streamed per N block
            pl.BlockSpec((1, TN), lambda n: (0, n)),      # bias tile
        ],
        out_specs=pl.BlockSpec((B, TN), lambda n: (0, n)),
    )

    cost = pl.CostEstimate(
        flops=2 * B * K * N_PAD,
        bytes_accessed=(K * N_PAD + 2 * B * K + N_PAD + B * N_PAD) * 4,
        transcendentals=0,
    )

    out = pl.pallas_call(
        _dropout_linear_kernel,
        out_shape=jax.ShapeDtypeStruct((B, N_PAD), jnp.float32),
        grid_spec=grid_spec,
        compiler_params=pltpu.CompilerParams(
            dimension_semantics=("parallel",),
            vmem_limit_bytes=40 * 1024 * 1024,   # 16 MiB double-buffered W + slack
        ),
        cost_estimate=cost,
    )(x, mask, w_t, b2d)

    return out[:, :OUT_FEATURES]


if __name__ == "__main__":
    key = jax.random.PRNGKey(0)
    kx, kw, kb, kd = jax.random.split(key, 4)

    # Input consistent with the module's forward: x60 of shape (1, 4096).
    x = jax.random.normal(kx, (1, IN_FEATURES), dtype=jnp.float32)

    # Deterministic parameters (torch Linear layout: W (1000, 4096), b (1000,)).
    bound = 1.0 / (IN_FEATURES ** 0.5)
    weight = jax.random.uniform(kw, (OUT_FEATURES, IN_FEATURES),
                                dtype=jnp.float32, minval=-bound, maxval=bound)
    bias = jax.random.uniform(kb, (OUT_FEATURES,), dtype=jnp.float32,
                              minval=-bound, maxval=bound)

    # One-time layout prep (hoisted out of the forward path).
    w_t, b2d = prepare_params(weight, bias)
    w_t, b2d = jax.block_until_ready((w_t, b2d))

    fwd = jax.jit(dropout_linear, static_argnames=("training",))
    out = fwd(x, w_t, b2d, kd, training=True)
    out = jax.block_until_ready(out)

    # Pure-JAX reference using the same dropout mask/key.
    keep = jax.random.bernoulli(kd, 1.0 - DROP_P, x.shape)
    x_drop = jnp.where(keep, x / (1.0 - DROP_P), jnp.float32(0.0))
    ref = x_drop @ weight.T + bias

    assert out.shape == (1, OUT_FEATURES)
    assert jnp.all(jnp.isfinite(out))
    assert jnp.allclose(out, ref, atol=1e-3, rtol=1e-3), \
        float(jnp.max(jnp.abs(out - ref)))
    print("KERNEL_OK")
</pallas_src>

<mosaic_0001>
module attributes {stable_mosaic.version = 11 : i64} {
  func.func @_dropout_linear_kernel(%arg0: i32, %arg1: memref<1x4096xf32, #tpu.memory_space<vmem>>, %arg2: memref<1x4096xf32, #tpu.memory_space<vmem>>, %arg3: memref<4096x512xf32, #tpu.memory_space<vmem>>, %arg4: memref<1x512xf32, #tpu.memory_space<vmem>>, %arg5: memref<1x512xf32, #tpu.memory_space<vmem>>) attributes {dimension_semantics = [#tpu.dimension_semantics<parallel>], iteration_bounds = array<i64: 2>, scalar_prefetch = 0 : i64, scratch_operands = 0 : i64, tpu.core_type = #tpu.core_type<tc>, window_params = [{pipeline_mode = #tpu.pipeline_mode<synchronous>, transform_indices = @transform_0, window_bounds = array<i64: 1, 4096>}, {pipeline_mode = #tpu.pipeline_mode<synchronous>, transform_indices = @transform_1, window_bounds = array<i64: 1, 4096>}, {transform_indices = @transform_2, window_bounds = array<i64: 4096, 512>}, {transform_indices = @transform_3, window_bounds = array<i64: 1, 512>}, {transform_indices = @transform_4, window_bounds = array<i64: 1, 512>}]} {
    %c0 = arith.constant 0 : index
    %c0_0 = arith.constant 0 : index
    %0 = vector.load %arg1[%c0, %c0_0] : memref<1x4096xf32, #tpu.memory_space<vmem>>, vector<1x4096xf32>
    %c0_1 = arith.constant 0 : index
    %c0_2 = arith.constant 0 : index
    %1 = vector.load %arg2[%c0_1, %c0_2] : memref<1x4096xf32, #tpu.memory_space<vmem>>, vector<1x4096xf32>
    %2 = arith.mulf %0, %1 : vector<1x4096xf32>
    %c0_3 = arith.constant 0 : index
    %c0_4 = arith.constant 0 : index
    %3 = vector.load %arg3[%c0_3, %c0_4] : memref<4096x512xf32, #tpu.memory_space<vmem>>, vector<4096x512xf32>
    %cst = arith.constant dense<0.000000e+00> : vector<1x512xf32>
    %4 = tpu.matmul %2, %3, %cst {dimension_numbers = #tpu.dot_dimension_numbers<[1], [0], [0], [1], [0, 0, 1, 1], [], []>} : vector<1x4096xf32>, vector<4096x512xf32>, vector<1x512xf32> -> vector<1x512xf32>
    %c0_5 = arith.constant 0 : index
    %c0_6 = arith.constant 0 : index
    %5 = vector.load %arg4[%c0_5, %c0_6] : memref<1x512xf32, #tpu.memory_space<vmem>>, vector<1x512xf32>
    %6 = arith.addf %4, %5 : vector<1x512xf32>
    %c0_7 = arith.constant 0 : index
    %c0_8 = arith.constant 0 : index
    %7 = vector.load %arg5[%c0_7, %c0_8] : memref<1x512xf32, #tpu.memory_space<vmem>>, vector<1x512xf32>
    tpu.vector_store %arg5[%c0_7, %c0_8], %6 {strides = array<i32>} : memref<1x512xf32, #tpu.memory_space<vmem>>, vector<1x512xf32>,
    return
  }
  func.func @transform_0(%arg0: i32) -> (i32, i32) {
    %c0_i32 = arith.constant 0 : i32
    %c0_i32_0 = arith.constant 0 : i32
    %c0_i32_1 = arith.constant 0 : i32
    return %c0_i32, %c0_i32_0 : i32, i32
  }
  func.func @transform_1(%arg0: i32) -> (i32, i32) {
    %c0_i32 = arith.constant 0 : i32
    %c0_i32_0 = arith.constant 0 : i32
    %c0_i32_1 = arith.constant 0 : i32
    return %c0_i32, %c0_i32_0 : i32, i32
  }
  func.func @transform_2(%arg0: i32) -> (i32, i32) {
    %c0_i32 = arith.constant 0 : i32
    %c0_i32_0 = arith.constant 0 : i32
    return %c0_i32, %arg0 : i32, i32
  }
  func.func @transform_3(%arg0: i32) -> (i32, i32) {
    %c0_i32 = arith.constant 0 : i32
    %c0_i32_0 = arith.constant 0 : i32
    return %c0_i32, %arg0 : i32, i32
  }
  func.func @transform_4(%arg0: i32) -> (i32, i32) {
    %c0_i32 = arith.constant 0 : i32
    %c0_i32_0 = arith.constant 0 : i32
    return %c0_i32, %arg0 : i32, i32
  }
}

</mosaic_0001>

<bundles_post_ra>
// kernel: dropout_linear.1
= control target key start
LH: loop header
LB: loop body
LE: loop exit
PB: predicated region body
PF: predicated region fallthrough
CT: control target
= control target key end

     0   :  { %s9731_s0 = inlined_call_operand.hbm [shape: f32[1,4096], index: 0, kind: input, shape index: {}]   ;;  %s9732_s1 = inlined_call_operand.vmem [shape: f32[1,4096], index: 1, kind: input, shape index: {}]   ;;  %s9733_s2 = inlined_call_operand.hbm [shape: f32[4096,1024], index: 2, kind: input, shape index: {}]   ;;  %s9734_s3 = inlined_call_operand.hbm [shape: f32[1,1024], index: 3, kind: input, shape index: {}]   ;;  %s9735_s4 = inlined_call_operand.hbm [shape: f32[1,1024], index: 4, kind: output, shape index: {}]  }
   0x1   :  { %9743 = sst [smem:[#allocation12_spill]] %s9733_s2 }
   0x2   :  { %9 = vsyncpa [#allocation3], 0 }
   0x3   :  { %10 = vsyncpa [#allocation6], 0 }
   0x4   :  { %12 = vsyncpa [#allocation6 + $0x1], 0 }
   0x5   :  { %13 = vsyncpa [#allocation4], 0 }
   0x6   :  { %15 = vsyncpa [#allocation4 + $0x1], 0  ;;  %s7330_s15 = smov 0   ;;  %s7332_s16 = smov 0  }
   0x7   :  { %s7334_s17 = smov 0   ;;  %s7336_s18 = smov 0  }
   0x8 LB: > { %s7351_s19 = sadd.s32 1, %s7295_s18   ;;  %s70_s20 = sadd.s32 1, %s7291_s17  ;;  %s7295_s18 = sphi %s7336_s18, %s9764_s18   ;;  %s7291_s17 = sphi %s7334_s17, %s9763_s17   ;;  %s7287_s16 = sphi %s7332_s16, %s9762_s16   ;;  %s7283_s15 = sphi %s7330_s15, %s9761_s15  }
   0x9   : > { %s67_s21 = ssub.s32 %s7295_s18, %s7351_s19  ;;  %p77_p0 = scmp.ne.s32.totalorder %s7291_s17, %s7287_s16 }
   0xa   : > { %p68_p1 = scmp.eq.s32.totalorder %s67_s21, 0  ;;  %p78_p2 = scmp.eq.s32.totalorder %s7295_s18, 0 }
   0xb   : > { %p7097_p4 = scmp.lt.s32.totalorder %s7295_s18, 2  ;;  %s173_s23 = sand.u32 1, %s7295_s18  }
   0xc   : > { %s7362_s22 = scalar_select %p68_p1, %s7291_s17, %s70_s20  }
   0xd   : > { %p79_p5 = por %p78_p2, %p77_p0  ;;  %s175_s24 = sand.u32 1, %s7291_s17  }
   0xe   : > { %s4940_s25 = sshll.u32 %s175_s24, 14  ;;  %s4956_s26 = sshll.u32 %s7295_s18, 9 }
   0xf   : > { %s9744_s2 = sld [smem:[#allocation12_spill]]  ;;  %s177_s30 = scalar_lea.vmem [#allocation5], %s4940_s25 }
  0x10   : > { %s184_s5 = sshll.u32 %s177_s30, 4  ;;  %p7377_p6 = pnand %p7097_p4, %p79_p5  ;;  %s7381_s5 = int_to_ptr.vmem [resolvable:$true] %s184_s5 }
  0x11   : > { %s7383_s7 = scalar_lea.sflag [#allocation6], %s173_s23 }
  0x12   : > { %s9745_s6 = scalar_select %p7377_p6, 1, 0 }
  0x13   : > { %p9737_p8 = pneg %p7377_p6 }
  0x15   : > { %s7375_s29 = scalar_lea.hbm %s9744_s2, %s4956_s26  ;;  %s7142_s11 = scalar_lea.hbm %s9744_s2, 524288 }
  0x16   : > { %s7137_s8 = scalar_lea.hbm %s7375_s29, 262144  ;;  %p7143_p11 = scmp.lt.u32.totalorder %s7375_s29, %s9744_s2 }
  0x17   : > { %p7138_p7 = scmp.ne.s32.totalorder %s7375_s29, %s7137_s8  ;;  %p7144_p12 = scmp.lt.u32.totalorder %s7142_s11, %s7137_s8 }
  0x18   : > { %p7146_p1 = scmp.lt.u32.totalorder %s7137_s8, %s7375_s29 }
  0x19   : > { %p7140_p9 = pnand %p9737_p8, %p7138_p7  ;;  %p7145_p13 = por %p7144_p12, %p7143_p11 }
  0x1b   : > { %p7141_p10 = pneg %p7140_p9  ;;  %p7147_p2 = por %p7146_p1, %p7145_p13 }
  0x1d   : > { %p7148_p4 = pnand %p7147_p2, %p7141_p10 }
  0x1f   : > { %7151 = shalt.err (!%p7148_p4)
}
  0x20   : > { %s7152_s14 = scalar_lea.vmem %s7381_s5, 262144  ;;  %s7297_s20 = smov [#allocation5]  }
  0x21   : > { %p7153_p5 = scmp.ne.s32.totalorder %s7381_s5, %s7152_s14  ;;  %s7157_s21 = sshll.u32 %s7297_s20, 4  ;;  %s7158_s21 = int_to_ptr.vmem [resolvable:$false] %s7157_s21 }
  0x22   : > { %s7159_s23 = scalar_lea.vmem %s7158_s21, 524288  ;;  %p7160_p3 = scmp.lt.s32.totalorder %s7381_s5, %s7158_s21 }
  0x23   : > { %p7155_p7 = pnand %p7153_p5, %p9737_p8  ;;  %p7161_p11 = scmp.lt.s32.totalorder %s7159_s23, %s7152_s14 }
  0x25   : > { %p7156_p9 = pneg %p7155_p7  ;;  %p7162_p12 = por %p7161_p11, %p7160_p3 }
  0x27   : > { %p7163_p13 = pnand %p7162_p12, %p7156_p9 }
  0x29   : > { %7166 = shalt.err (!%p7163_p13)
}
  0x2a   : > { %s7298_s25 = smov 1024   ;;  %s7299_s26 = smov 512  }
  0x2b   : > { %s7300_s27 = smov 32   ;;  %s7412_s28 = sadd.s32 4294967295, %s7295_s18  }
  0x2c   : > { %7088 = dma.hbm_to_vmem [thread:$0]  (!%p7377_p6), %s7375_s29, 262144, %s7381_s5, %s7383_s7, %s7298_s25, %s7299_s26, %s7300_s27  }
  0x2d   : > { %s4936_s30 = sadd.s32 4294967294, %s7295_s18   ;;  %p83_p3 = scmp.ne.s32.totalorder %s7287_s16, %s7283_s15 }
  0x2e   : > { %p9736_p10 = scmp.eq.s32.totalorder %s7412_s28, 0  ;;  %p133_p1 = scmp.eq.s32.totalorder %s7412_s28, 1 }
  0x2f   : > { %p139_p2 = scmp.eq.s32.totalorder %s4936_s30, 1  ;;  %p4937_p4 = scmp.ge.s32.totalorder %s7295_s18, 1 }
  0x30   : > { %p7422_p5 = por %p9736_p10, %p83_p3  ;;  %p7429_p7 = por %p133_p1, %p77_p0 }
  0x31   : > { %p7433_p9 = por %p139_p2, %p83_p3  ;;  %p146_p11 = scmp.lt.s32.totalorder %s7295_s18, 3 }
  0x32   : > { %s9746_s8 = scalar_select %p7422_p5, 1, 0 }
  0x33   : > { %s9747_s29 = scalar_select %p7429_p7, 1, 0 }
  0x34   : > { %s9748_s5 = scalar_select %p7433_p9, 1, 0 }
  0x35   : > { %p7438_p12 = pnand %p4937_p4, %p146_p11  ;;  %s7301_s10 = smov [#allocation2]  }
  0x36   : > { %s159_s11 = sshll.u32 %s7301_s10, 4  ;;  %s4943_s12 = sshll.u32 %s175_s24, 2  ;;  %s160_s11 = int_to_ptr.vmem [resolvable:$true] %s159_s11 }
  0x37   : > { %s9749_s9 = scalar_select %p7438_p12, 1, 0 }
  0x38   : > { %p7081_p13 = pneg %p7438_p12  ;;  %s4957_s13 = sshll.u32 %s7295_s18, 6 }
  0x39   : > { %s198_s14 = scalar_lea.vmem [#allocation7], %s4943_s12  ;;  %s7456_s26 = scalar_lea.hbm %s9734_s3, %s4957_s13 }
  0x3a   : > { %s206_s20 = sshll.u32 %s198_s14, 4  ;;  %p7449_p0 = pnand %p7081_p13, %p9736_p10  ;;  %s7458_s20 = int_to_ptr.vmem [resolvable:$true] %s206_s20 }
  0x3b   : > { %s7167_s30 = scalar_lea.hbm %s9731_s0, 512 }
  0x3c   : > { %p7168_p3 = scmp.ne.s32.totalorder %s9731_s0, %s7167_s30  ;;  %p7169_p1 = pneg %p7449_p0 }
  0x3d   : > { %p7174_p11 = scmp.lt.u32.totalorder %s7167_s30, %s9731_s0 }
  0x3e   : > { %p7170_p2 = pnand %p7169_p1, %p7168_p3 }
  0x40   : > { %p7171_p4 = pneg %p7170_p2 }
  0x42   : > { %p7176_p13 = pnand %p7174_p11, %p7171_p4 }
  0x44   : > { %7179 = shalt.err (!%p7176_p13)
}
  0x45   : > { %s7180_s13 = scalar_lea.vmem %s160_s11, 512  ;;  %p7188_p7 = scmp.lt.s32.totalorder %s160_s11, %s160_s11 }
  0x46   : > { %p7181_p10 = scmp.ne.s32.totalorder %s160_s11, %s7180_s13  ;;  %p7189_p5 = scmp.lt.s32.totalorder %s7180_s13, %s7180_s13 }
  0x48   : > { %p7183_p8 = pnand %p7181_p10, %p7169_p1  ;;  %p7190_p12 = por %p7189_p5, %p7188_p7 }
  0x4a   : > { %p7184_p9 = pneg %p7183_p8 }
  0x4c   : > { %p7191_p6 = pnand %p7190_p12, %p7184_p9 }
  0x4e   : > { %7194 = shalt.err (!%p7191_p6)
}
  0x4f   : > { %7084 = dma.hbm_to_vmem [thread:$0]  (!%p7449_p0), %s9731_s0, 512, %s160_s11, [#allocation3]  }
  0x50   : > { %s7195_s2 = scalar_lea.hbm %s7456_s26, 64  ;;  %p9751_p10 = scmp.ne.s32.totalorder %s9745_s6, 0 }
  0x51   : > { %p7196_p3 = scmp.ne.s32.totalorder %s7456_s26, %s7195_s2  ;;  %s7200_s30 = scalar_lea.hbm %s9734_s3, 128 }
  0x52   : > { %p9752_p8 = pneg %p9751_p10  ;;  %p7201_p6 = scmp.lt.u32.totalorder %s7456_s26, %s9734_s3 }
  0x53   : > { %p7202_p5 = scmp.lt.u32.totalorder %s7200_s30, %s7195_s2  ;;  %p7204_p9 = scmp.lt.u32.totalorder %s7195_s2, %s7456_s26 }
  0x54   : > { %p7198_p1 = pnand %p7196_p3, %p9752_p8 }
  0x55   : > { %p7203_p7 = por %p7202_p5, %p7201_p6 }
  0x56   : > { %p7199_p2 = pneg %p7198_p1 }
  0x57   : > { %p7205_p12 = por %p7204_p9, %p7203_p7 }
  0x59   : > { %p7206_p4 = pnand %p7205_p12, %p7199_p2 }
  0x5b   : > { %7209 = shalt.err (!%p7206_p4)
}
  0x5c   : > { %s7210_s11 = scalar_lea.vmem %s7458_s20, 64  ;;  %p9753_p11 = pmov %p9752_p8 }
  0x5d   : > { %p7211_p0 = scmp.ne.s32.totalorder %s7458_s20, %s7210_s11  ;;  %s7302_s12 = smov [#allocation7]  }
  0x5e   : > { %s7215_s14 = sshll.u32 %s7302_s12, 4  ;;  %s7216_s14 = int_to_ptr.vmem [resolvable:$false] %s7215_s14 }
  0x5f   : > { %p7213_p13 = pnand %p7211_p0, %p9753_p11  ;;  %s7217_s13 = scalar_lea.vmem %s7216_s14, 128 }
  0x60   : > { %p7218_p8 = scmp.lt.s32.totalorder %s7458_s20, %s7216_s14  ;;  %p7219_p1 = scmp.lt.s32.totalorder %s7217_s13, %s7210_s11 }
  0x61   : > { %p7214_p3 = pneg %p7213_p13 }
  0x62   : > { %p7220_p6 = por %p7219_p1, %p7218_p8 }
  0x64   : > { %p7221_p5 = pnand %p7220_p6, %p7214_p3 }
  0x66   : > { %7224 = shalt.err (!%p7221_p5)
}
  0x67   : > { %7091 = dma.hbm_to_vmem [thread:$0]  (!%p9751_p10), %s7456_s26, 64, %s7458_s20, %s7383_s7  }
  0x68   : > { %p9754_p2 = scmp.ne.s32.totalorder %s9749_s9, 0 }
  0x69   : > { %p9755_p7 = scmp.eq.s32.totalorder (!%p9754_p2), %s7412_s28, 0 }
  0x6a   : > { %215 = sbr.rel (%p9754_p2) target bundleno = 1385 (0x569), region = 36 }
  0x71   : > { %7270 = dma.done.wait (%p9755_p7), [#allocation3], 512   ;;  %p9756_p9 = pmov %p9755_p7 }
  0x72   : > { %s221_s23 = sand.u32 1, %s7412_s28   ;;  %s7508_s25 = sand.u32 1, %s7287_s16  }
  0x73   : > { %7272 = vsyncadd (%p9756_p9), [#allocation3], 4294966784  ;;  %s4948_s6 = sshll.u32 %s7508_s25, 14  ;;  %s222_s2 = scalar_lea.sflag [#allocation6], %s221_s23 }
  0x74   : > { %s7511_s24 = scalar_lea.vmem [#allocation5], %s4948_s6  ;;  %p9757_p10 = scmp.ne.s32.totalorder %s9746_s8, 0 }
  0x76   : > { %7274 = dma.done.wait (%p9757_p10), %s222_s2, 262208  }
  0x77   : > { %7276 = vsyncadd (%p9757_p10), %s222_s2, 4294705088  ;;  %v280_v0 = vld [vmem:[%s7511_s24 + $0x8] sm:$0xff]  ;;  %v282_v2 = vld [vmem:[%s7511_s24 + $0x18] sm:$0xff]  ;;  %s4949_s10 = sshll.u32 %s7508_s25, 2  ;;  %s4958_s12 = sshll.u32 %s7412_s28, 6 }
  0x78   : > { %v284_v1 = vld [vmem:[%s7511_s24 + $0x28] sm:$0xff]  ;;  %v286_v4 = vld [vmem:[%s7511_s24 + $0x38] sm:$0xff]  ;;  %v279_v5 = vld [vmem:[%s7511_s24] sm:$0xff]  ;;  %s234_s11 = scalar_lea.vmem [#allocation7], %s4949_s10  ;;  %s263_s14 = scalar_lea.vmem [#allocation8], %s4949_s10 }
  0x79   : > { %v4959_v3 = vpack.c.bf16 %v284_v1, %v280_v0  ;;  %v283_v6 = vld [vmem:[%s7511_s24 + $0x20] sm:$0xff]  ;;  %v5983_v7 = vpack.c.bf16 %v286_v4, %v282_v2  ;;  %v281_v9 = vld [vmem:[%s7511_s24 + $0x10] sm:$0xff]  ;;  %v288_v11 = vld [vmem:[%s7511_s24 + $0x48] sm:$0xff]  ;;  %s4834_s13 = sshll.u32 %s263_s14, 4  ;;  %s9687_s2 = scalar_lea.hbm %s9735_s4, %s4958_s12  ;;  %s9689_s13 = int_to_ptr.vmem [resolvable:$true] %s4834_s13 }
  0x7a   : > { %v4961_v8 = vpack.c.bf16 %v283_v6, %v279_v5  ;;  %v285_v10 = vld [vmem:[%s7511_s24 + $0x30] sm:$0xff]  ;;  %v292_v13 = vld [vmem:[%s7511_s24 + $0x68] sm:$0xff]  ;;  %v290_v14 = vld [vmem:[%s7511_s24 + $0x58] sm:$0xff]  ;;  %s7225_s7 = scalar_lea.vmem %s9689_s13, 64  ;;  %p9758_p4 = scmp.ne.s32.totalorder %s9747_s29, 0 }
  0x7b   : > { %4960 = vmatprep.subr.bf16.mxu0 %v4959_v3  ;;  %v5985_v12 = vpack.c.bf16 %v285_v10, %v281_v9  ;;  %v294_v15 = vld [vmem:[%s7511_s24 + $0x78] sm:$0xff]  ;;  %5984 = vmatprep.subr.bf16.mxu1 %v5983_v7  ;;  %v4963_v16 = vpack.c.bf16 %v292_v13, %v288_v11  ;;  %v287_v18 = vld [vmem:[%s7511_s24 + $0x40] sm:$0xff]  ;;  %v289_v20 = vld [vmem:[%s7511_s24 + $0x50] sm:$0xff]  ;;  %p7226_p12 = scmp.ne.s32.totalorder %s9689_s13, %s7225_s7  ;;  %s7304_s28 = smov [#allocation8]  }
  0x7c   : > { %4962 = vmatpush1.bf16.msra.mxu0 %v4961_v8  ;;  %v5987_v17 = vpack.c.bf16 %v294_v15, %v290_v14  ;;  %v291_v19 = vld [vmem:[%s7511_s24 + $0x60] sm:$0xff]  ;;  %v293_v22 = vld [vmem:[%s7511_s24 + $0x70] sm:$0xff]  ;;  %v296_v23 = vld [vmem:[%s7511_s24 + $0x88] sm:$0xff]  ;;  %s7229_s8 = sshll.u32 %s7304_s28, 4  ;;  %s7230_s8 = int_to_ptr.vmem [resolvable:$false] %s7229_s8 }
  0x7d   : > { %5986 = vmatpush1.bf16.msra.mxu1 %v5985_v12  ;;  %v4965_v21 = vpack.c.bf16 %v291_v19, %v287_v18  ;;  %v300_v24 = vld [vmem:[%s7511_s24 + $0xa8] sm:$0xff]  ;;  %4964 = vmatprep.subr.bf16.mxu0 %v4963_v16  ;;  %v5989_v25 = vpack.c.bf16 %v293_v22, %v289_v20  ;;  %v298_v27 = vld [vmem:[%s7511_s24 + $0x98] sm:$0xff]  ;;  %v295_v29 = vld [vmem:[%s7511_s24 + $0x80] sm:$0xff]  ;;  %p7227_p0 = pnand %p7226_p12, %p9758_p4  ;;  %s7231_s9 = scalar_lea.vmem %s7230_s8, 128 }
  0x7e   : > { %5988 = vmatprep.subr.bf16.mxu1 %v5987_v17  ;;  %v4967_v26 = vpack.c.bf16 %v300_v24, %v296_v23  ;;  %v302_v28 = vld [vmem:[%s7511_s24 + $0xb8] sm:$0xff]  ;;  %v299_v31 = vld [vmem:[%s7511_s24 + $0xa0] sm:$0xff]  ;;  %v297_v32 = vld [vmem:[%s7511_s24 + $0x90] sm:$0xff]  ;;  %p7232_p13 = scmp.lt.s32.totalorder %s9689_s13, %s7230_s8  ;;  %p7233_p3 = scmp.lt.s32.totalorder %s7231_s9, %s7225_s7 }
  0x7f   : > { %v5991_v30 = vpack.c.bf16 %v302_v28, %v298_v27  ;;  %v301_v33 = vld [vmem:[%s7511_s24 + $0xb0] sm:$0xff]  ;;  %v4969_v34 = vpack.c.bf16 %v299_v31, %v295_v29  ;;  %v304_v35 = vld [vmem:[%s7511_s24 + $0xc8] sm:$0xff]  ;;  %v306_v37 = vld [vmem:[%s7511_s24 + $0xd8] sm:$0xff]  ;;  %p7228_p11 = pneg %p7227_p0 }
  0x80   : > { %4966 = vmatpush1.bf16.msra.mxu0 %v4965_v21  ;;  %v308_v36 = vld [vmem:[%s7511_s24 + $0xe8] sm:$0xff]  ;;  %v5993_v38 = vpack.c.bf16 %v301_v33, %v297_v32  ;;  %v310_v40 = vld [vmem:[%s7511_s24 + $0xf8] sm:$0xff]  ;;  %v303_v41 = vld [vmem:[%s7511_s24 + $0xc0] sm:$0xff]  ;;  %p7234_p8 = por %p7233_p3, %p7232_p13 }
  0x81   : > { %5990 = vmatpush1.bf16.msra.mxu1 %v5989_v25  ;;  %4968 = vmatprep.subr.bf16.mxu0 %v4967_v26  ;;  %v4971_v39 = vpack.c.bf16 %v308_v36, %v304_v35  ;;  %v307_v42 = vld [vmem:[%s7511_s24 + $0xe0] sm:$0xff]  ;;  %v5995_v43 = vpack.c.bf16 %v310_v40, %v306_v37  ;;  %v305_v44 = vld [vmem:[%s7511_s24 + $0xd0] sm:$0xff]  ;;  %v312_v46 = vld [vmem:[%s7511_s24 + $0x108] sm:$0xff] }
  0x82   : > { %5992 = vmatprep.subr.bf16.mxu1 %v5991_v30  ;;  %v309_v45 = vld [vmem:[%s7511_s24 + $0xf0] sm:$0xff]  ;;  %v316_v47 = vld [vmem:[%s7511_s24 + $0x128] sm:$0xff]  ;;  %v314_v48 = vld [vmem:[%s7511_s24 + $0x118] sm:$0xff]  ;;  %v4973_v50 = vpack.c.bf16 %v307_v42, %v303_v41  ;;  %p7235_p1 = pnand %p7234_p8, %p7228_p11 }
  0x83   : > { %v318_v49 = vld [vmem:[%s7511_s24 + $0x138] sm:$0xff]  ;;  %v5997_v51 = vpack.c.bf16 %v309_v45, %v305_v44  ;;  %v4975_v52 = vpack.c.bf16 %v316_v47, %v312_v46  ;;  %v311_v53 = vld [vmem:[%s7511_s24 + $0x100] sm:$0xff]  ;;  %v313_v55 = vld [vmem:[%s7511_s24 + $0x110] sm:$0xff] }
  0x84   : > { %4970 = vmatpush1.bf16.msra.mxu0 %v4969_v34  ;;  %v315_v54 = vld [vmem:[%s7511_s24 + $0x120] sm:$0xff]  ;;  %v5999_v56 = vpack.c.bf16 %v318_v49, %v314_v48  ;;  %v317_v57 = vld [vmem:[%s7511_s24 + $0x130] sm:$0xff]  ;;  %v320_v58 = vld [vmem:[%s7511_s24 + $0x148] sm:$0xff] }
  0x85   : > { %5994 = vmatpush1.bf16.msra.mxu1 %v5993_v38  ;;  %4972 = vmatprep.subr.bf16.mxu0 %v4971_v39  ;;  %v324_v59 = vld [vmem:[%s7511_s24 + $0x168] sm:$0xff]  ;;  %v322_v60 = vld [vmem:[%s7511_s24 + $0x158] sm:$0xff]  ;;  %v4977_v62 = vpack.c.bf16 %v315_v54, %v311_v53  ;;  %v6001_v63 = vpack.c.bf16 %v317_v57, %v313_v55  ;;  %v319_v1 = vld [vmem:[%s7511_s24 + $0x140] sm:$0xff] }
  0x86   : > { %5996 = vmatprep.subr.bf16.mxu1 %v5995_v43  ;;  %v326_v61 = vld [vmem:[%s7511_s24 + $0x178] sm:$0xff]  ;;  %v4979_v0 = vpack.c.bf16 %v324_v59, %v320_v58  ;;  %v323_v2 = vld [vmem:[%s7511_s24 + $0x160] sm:$0xff]  ;;  %v321_v3 = vld [vmem:[%s7511_s24 + $0x150] sm:$0xff] }
  0x87   : > { %v6003_v4 = vpack.c.bf16 %v326_v61, %v322_v60  ;;  %v325_v5 = vld [vmem:[%s7511_s24 + $0x170] sm:$0xff]  ;;  %v328_v6 = vld [vmem:[%s7511_s24 + $0x188] sm:$0xff]  ;;  %v330_v8 = vld [vmem:[%s7511_s24 + $0x198] sm:$0xff]  ;;  %v4981_v10 = vpack.c.bf16 %v323_v2, %v319_v1 }
  0x88   : > { %4974 = vmatpush1.bf16.msra.mxu0 %v4973_v50  ;;  %v332_v7 = vld [vmem:[%s7511_s24 + $0x1a8] sm:$0xff]  ;;  %v334_v9 = vld [vmem:[%s7511_s24 + $0x1b8] sm:$0xff]  ;;  %v6005_v11 = vpack.c.bf16 %v325_v5, %v321_v3  ;;  %v327_v13 = vld [vmem:[%s7511_s24 + $0x180] sm:$0xff] }
  0x89   : > { %5998 = vmatpush1.bf16.msra.mxu1 %v5997_v51  ;;  %4976 = vmatprep.subr.bf16.mxu0 %v4975_v52  ;;  %v4983_v12 = vpack.c.bf16 %v332_v7, %v328_v6  ;;  %v331_v14 = vld [vmem:[%s7511_s24 + $0x1a0] sm:$0xff]  ;;  %v329_v15 = vld [vmem:[%s7511_s24 + $0x190] sm:$0xff]  ;;  %v6007_v16 = vpack.c.bf16 %v334_v9, %v330_v8  ;;  %v336_v18 = vld [vmem:[%s7511_s24 + $0x1c8] sm:$0xff] }
  0x8a   : > { %6000 = vmatprep.subr.bf16.mxu1 %v5999_v56  ;;  %v333_v17 = vld [vmem:[%s7511_s24 + $0x1b0] sm:$0xff]  ;;  %v340_v19 = vld [vmem:[%s7511_s24 + $0x1e8] sm:$0xff]  ;;  %v338_v20 = vld [vmem:[%s7511_s24 + $0x1d8] sm:$0xff]  ;;  %v4985_v22 = vpack.c.bf16 %v331_v14, %v327_v13  ;;  %v2332_v56 = vlaneseq }
  0x8b   : > { %v342_v21 = vld [vmem:[%s7511_s24 + $0x1f8] sm:$0xff]  ;;  %v6009_v23 = vpack.c.bf16 %v333_v17, %v329_v15  ;;  %v4987_v24 = vpack.c.bf16 %v340_v19, %v336_v18  ;;  %v335_v25 = vld [vmem:[%s7511_s24 + $0x1c0] sm:$0xff]  ;;  %v337_v27 = vld [vmem:[%s7511_s24 + $0x1d0] sm:$0xff] }
  0x8c   : > { %4978 = vmatpush1.bf16.msra.mxu0 %v4977_v62  ;;  %v339_v26 = vld [vmem:[%s7511_s24 + $0x1e0] sm:$0xff]  ;;  %v6011_v28 = vpack.c.bf16 %v342_v21, %v338_v20  ;;  %v341_v29 = vld [vmem:[%s7511_s24 + $0x1f0] sm:$0xff]  ;;  %v344_v30 = vld [vmem:[%s7511_s24 + $0x208] sm:$0xff]  ;;  %v7608_v5 = vshrl.u32 %v2332_v56, 7  ;;  %vm4816_vm0 = vcmp.lt.s32.totalorder %v2332_v56, 512 }
  0x8d   : > { %6002 = vmatpush1.bf16.msra.mxu1 %v6001_v63  ;;  %4980 = vmatprep.subr.bf16.mxu0 %v4979_v0  ;;  %v348_v31 = vld [vmem:[%s7511_s24 + $0x228] sm:$0xff]  ;;  %v346_v32 = vld [vmem:[%s7511_s24 + $0x218] sm:$0xff]  ;;  %v4989_v34 = vpack.c.bf16 %v339_v26, %v335_v25  ;;  %v6013_v35 = vpack.c.bf16 %v341_v29, %v337_v27  ;;  %v343_v37 = vld [vmem:[%s7511_s24 + $0x200] sm:$0xff] }
  0x8e   : > { %6004 = vmatprep.subr.bf16.mxu1 %v6003_v4  ;;  %v350_v33 = vld [vmem:[%s7511_s24 + $0x238] sm:$0xff]  ;;  %v4991_v36 = vpack.c.bf16 %v348_v31, %v344_v30  ;;  %v347_v38 = vld [vmem:[%s7511_s24 + $0x220] sm:$0xff]  ;;  %v345_v39 = vld [vmem:[%s7511_s24 + $0x210] sm:$0xff]  ;;  %v7619_v19 = vsub.s32 1, %v7608_v5 }
  0x8f   : > { %v6015_v40 = vpack.c.bf16 %v350_v33, %v346_v32  ;;  %v349_v41 = vld [vmem:[%s7511_s24 + $0x230] sm:$0xff]  ;;  %v352_v42 = vld [vmem:[%s7511_s24 + $0x248] sm:$0xff]  ;;  %v354_v44 = vld [vmem:[%s7511_s24 + $0x258] sm:$0xff]  ;;  %v4993_v46 = vpack.c.bf16 %v347_v38, %v343_v37 }
  0x90   : > { %4982 = vmatpush1.bf16.msra.mxu0 %v4981_v10  ;;  %v356_v43 = vld [vmem:[%s7511_s24 + $0x268] sm:$0xff]  ;;  %v358_v45 = vld [vmem:[%s7511_s24 + $0x278] sm:$0xff]  ;;  %v6017_v47 = vpack.c.bf16 %v349_v41, %v345_v39  ;;  %v351_v49 = vld [vmem:[%s7511_s24 + $0x240] sm:$0xff] }
  0x91   : > { %6006 = vmatpush1.bf16.msra.mxu1 %v6005_v11  ;;  %4984 = vmatprep.subr.bf16.mxu0 %v4983_v12  ;;  %v4995_v48 = vpack.c.bf16 %v356_v43, %v352_v42  ;;  %v355_v50 = vld [vmem:[%s7511_s24 + $0x260] sm:$0xff]  ;;  %v353_v51 = vld [vmem:[%s7511_s24 + $0x250] sm:$0xff]  ;;  %v6019_v52 = vpack.c.bf16 %v358_v45, %v354_v44  ;;  %v360_v54 = vld [vmem:[%s7511_s24 + $0x288] sm:$0xff] }
  0x92   : > { %6008 = vmatprep.subr.bf16.mxu1 %v6007_v16  ;;  %v357_v53 = vld [vmem:[%s7511_s24 + $0x270] sm:$0xff]  ;;  %v364_v55 = vld [vmem:[%s7511_s24 + $0x2a8] sm:$0xff]  ;;  %v362_v57 = vld [vmem:[%s7511_s24 + $0x298] sm:$0xff]  ;;  %v4997_v59 = vpack.c.bf16 %v355_v50, %v351_v49 }
  0x93   : > { %v366_v58 = vld [vmem:[%s7511_s24 + $0x2b8] sm:$0xff]  ;;  %v6021_v60 = vpack.c.bf16 %v357_v53, %v353_v51  ;;  %v4999_v61 = vpack.c.bf16 %v364_v55, %v360_v54  ;;  %v359_v62 = vld [vmem:[%s7511_s24 + $0x280] sm:$0xff]  ;;  %v361_v0 = vld [vmem:[%s7511_s24 + $0x290] sm:$0xff] }
  0x94   : > { %4986 = vmatpush1.bf16.msra.mxu0 %v4985_v22  ;;  %v363_v63 = vld [vmem:[%s7511_s24 + $0x2a0] sm:$0xff]  ;;  %v6023_v1 = vpack.c.bf16 %v366_v58, %v362_v57  ;;  %v365_v2 = vld [vmem:[%s7511_s24 + $0x2b0] sm:$0xff]  ;;  %v368_v3 = vld [vmem:[%s7511_s24 + $0x2c8] sm:$0xff] }
  0x95   : > { %6010 = vmatpush1.bf16.msra.mxu1 %v6009_v23  ;;  %4988 = vmatprep.subr.bf16.mxu0 %v4987_v24  ;;  %v372_v4 = vld [vmem:[%s7511_s24 + $0x2e8] sm:$0xff]  ;;  %v370_v6 = vld [vmem:[%s7511_s24 + $0x2d8] sm:$0xff]  ;;  %v5001_v8 = vpack.c.bf16 %v363_v63, %v359_v62  ;;  %v367_v9 = vld [vmem:[%s7511_s24 + $0x2c0] sm:$0xff]  ;;  %v6025_v10 = vpack.c.bf16 %v365_v2, %v361_v0 }
  0x96   : > { %6012 = vmatprep.subr.bf16.mxu1 %v6011_v28  ;;  %v374_v7 = vld [vmem:[%s7511_s24 + $0x2f8] sm:$0xff]  ;;  %v5003_v11 = vpack.c.bf16 %v372_v4, %v368_v3  ;;  %v371_v12 = vld [vmem:[%s7511_s24 + $0x2e0] sm:$0xff]  ;;  %v369_v13 = vld [vmem:[%s7511_s24 + $0x2d0] sm:$0xff] }
  0x97   : > { %v373_v14 = vld [vmem:[%s7511_s24 + $0x2f0] sm:$0xff]  ;;  %v6027_v15 = vpack.c.bf16 %v374_v7, %v370_v6  ;;  %v376_v16 = vld [vmem:[%s7511_s24 + $0x308] sm:$0xff]  ;;  %v267_v18 = vld [vmem:[#allocation2] sm:$0xff]  ;;  %v5005_v23 = vpack.c.bf16 %v371_v12, %v367_v9 }
  0x98   : > { %4990 = vmatpush1.bf16.msra.mxu0 %v4989_v34  ;;  %v380_v17 = vld [vmem:[%s7511_s24 + $0x328] sm:$0xff]  ;;  %v378_v20 = vld [vmem:[%s7511_s24 + $0x318] sm:$0xff]  ;;  %v271_v22 = vld [vmem:[%s9732_s1] sm:$0xff]  ;;  %v6029_v25 = vpack.c.bf16 %v373_v14, %v369_v13 }
  0x99   : > { %6014 = vmatpush1.bf16.msra.mxu1 %v6013_v35  ;;  %4992 = vmatprep.subr.bf16.mxu0 %v4991_v36  ;;  %v382_v21 = vld [vmem:[%s7511_s24 + $0x338] sm:$0xff]  ;;  %v7626_v24 = vmul.f32 %v271_v22, %v267_v18  ;;  %v5007_v26 = vpack.c.bf16 %v380_v17, %v376_v16  ;;  %v375_v27 = vld [vmem:[%s7511_s24 + $0x300] sm:$0xff]  ;;  %v377_v29 = vld [vmem:[%s7511_s24 + $0x310] sm:$0xff] }
  0x9a   : > { %6016 = vmatprep.subr.bf16.mxu1 %v6015_v40  ;;  %v379_v28 = vld [vmem:[%s7511_s24 + $0x320] sm:$0xff]  ;;  %v6031_v30 = vpack.c.bf16 %v382_v21, %v378_v20  ;;  %v381_v31 = vld [vmem:[%s7511_s24 + $0x330] sm:$0xff]  ;;  %v384_v32 = vld [vmem:[%s7511_s24 + $0x348] sm:$0xff] }
  0x9b   : > { %v388_v33 = vld [vmem:[%s7511_s24 + $0x368] sm:$0xff]  ;;  %v2339_v34 = vrot.slane %v7626_v24, %v7619_v19  ;;  %v386_v35 = vld [vmem:[%s7511_s24 + $0x358] sm:$0xff]  ;;  %v5009_v37 = vpack.c.bf16 %v379_v28, %v375_v27  ;;  %v6033_v38 = vpack.c.bf16 %v381_v31, %v377_v29  ;;  %v383_v40 = vld [vmem:[%s7511_s24 + $0x340] sm:$0xff] }
  0x9c   : > { %4994 = vmatpush1.bf16.msra.mxu0 %v4993_v46  ;;  %v390_v36 = vld [vmem:[%s7511_s24 + $0x378] sm:$0xff]  ;;  %v5011_v39 = vpack.c.bf16 %v388_v33, %v384_v32  ;;  %v387_v41 = vld [vmem:[%s7511_s24 + $0x360] sm:$0xff]  ;;  %v385_v42 = vld [vmem:[%s7511_s24 + $0x350] sm:$0xff] }
  0x9d   : > { %6018 = vmatpush1.bf16.msra.mxu1 %v6017_v47  ;;  %4996 = vmatprep.subr.bf16.mxu0 %v4995_v48  ;;  %v6035_v43 = vpack.c.bf16 %v390_v36, %v386_v35  ;;  %v389_v44 = vld [vmem:[%s7511_s24 + $0x370] sm:$0xff]  ;;  %v392_v45 = vld [vmem:[%s7511_s24 + $0x388] sm:$0xff]  ;;  %v394_v47 = vld [vmem:[%s7511_s24 + $0x398] sm:$0xff]  ;;  %v5013_v49 = vpack.c.bf16 %v387_v41, %v383_v40 }
  0x9e   : > { %6020 = vmatprep.subr.bf16.mxu1 %v6019_v52  ;;  %2577 = vmatprep.mubr.f32.mxu0 %v2339_v34  ;;  %v396_v46 = vld [vmem:[%s7511_s24 + $0x3a8] sm:$0xff]  ;;  %v398_v48 = vld [vmem:[%s7511_s24 + $0x3b8] sm:$0xff]  ;;  %v6037_v50 = vpack.c.bf16 %v389_v44, %v385_v42  ;;  %v391_v52 = vld [vmem:[%s7511_s24 + $0x380] sm:$0xff] }
  0x9f   : > { %3713 = vmatprep.mubr.f32.mxu1 %v2339_v34  ;;  %v5015_v51 = vpack.c.bf16 %v396_v46, %v392_v45  ;;  %v395_v53 = vld [vmem:[%s7511_s24 + $0x3a0] sm:$0xff]  ;;  %v393_v54 = vld [vmem:[%s7511_s24 + $0x390] sm:$0xff]  ;;  %v6039_v55 = vpack.c.bf16 %v398_v48, %v394_v47  ;;  %v400_v58 = vld [vmem:[%s7511_s24 + $0x3c8] sm:$0xff] }
  0xa0   : > { %4998 = vmatpush1.bf16.msra.mxu0 %v4997_v59  ;;  %v397_v57 = vld [vmem:[%s7511_s24 + $0x3b0] sm:$0xff]  ;;  %v404_v59 = vld [vmem:[%s7511_s24 + $0x3e8] sm:$0xff]  ;;  %v5017_v62 = vpack.c.bf16 %v395_v53, %v391_v52  ;;  %v403_v2 = vld [vmem:[%s7511_s24 + $0x3e0] sm:$0xff] }
  0xa1   : > { %6022 = vmatpush1.bf16.msra.mxu1 %v6021_v60  ;;  %5000 = vmatprep.subr.bf16.mxu0 %v4999_v61  ;;  %v402_v60 = vld [vmem:[%s7511_s24 + $0x3d8] sm:$0xff]  ;;  %v6041_v63 = vpack.c.bf16 %v397_v57, %v393_v54  ;;  %v5019_v0 = vpack.c.bf16 %v404_v59, %v400_v58  ;;  %v401_v3 = vld [vmem:[%s7511_s24 + $0x3d0] sm:$0xff]  ;;  %v408_v7 = vld [vmem:[%s7511_s24 + $0x408] sm:$0xff] }
  0xa2   : > { %6024 = vmatprep.subr.bf16.mxu1 %v6023_v1  ;;  %v406_v61 = vld [vmem:[%s7511_s24 + $0x3f8] sm:$0xff]  ;;  %v399_v1 = vld [vmem:[%s7511_s24 + $0x3c0] sm:$0xff]  ;;  %v405_v6 = vld [vmem:[%s7511_s24 + $0x3f0] sm:$0xff] }
  0xa3   : > { %v6043_v4 = vpack.c.bf16 %v406_v61, %v402_v60  ;;  %v410_v9 = vld [vmem:[%s7511_s24 + $0x418] sm:$0xff]  ;;  %v5021_v12 = vpack.c.bf16 %v403_v2, %v399_v1  ;;  %v6045_v13 = vpack.c.bf16 %v405_v6, %v401_v3  ;;  %v411_v16 = vld [vmem:[%s7511_s24 + $0x420] sm:$0xff]  ;;  %v409_v17 = vld [vmem:[%s7511_s24 + $0x410] sm:$0xff] }
  0xa4   : > { %5002 = vmatpush1.bf16.msra.mxu0 %v5001_v8  ;;  %v412_v8 = vld [vmem:[%s7511_s24 + $0x428] sm:$0xff]  ;;  %v413_v20 = vld [vmem:[%s7511_s24 + $0x430] sm:$0xff]  ;;  %v422_v27 = vld [vmem:[%s7511_s24 + $0x478] sm:$0xff] }
  0xa5   : > { %6026 = vmatpush1.bf16.msra.mxu1 %v6025_v10  ;;  %5004 = vmatprep.subr.bf16.mxu0 %v5003_v11  ;;  %v414_v10 = vld [vmem:[%s7511_s24 + $0x438] sm:$0xff]  ;;  %v7663_v11 = vsub.s32 0, %v7608_v5  ;;  %v5023_v14 = vpack.c.bf16 %v412_v8, %v408_v7  ;;  %v416_v21 = vld [vmem:[%s7511_s24 + $0x448] sm:$0xff]  ;;  %v6049_v29 = vpack.c.bf16 %v413_v20, %v409_v17  ;;  %v415_v31 = vld [vmem:[%s7511_s24 + $0x440] sm:$0xff] }
  0xa6   : > { %6028 = vmatprep.subr.bf16.mxu1 %v6027_v15  ;;  %v407_v15 = vld [vmem:[%s7511_s24 + $0x400] sm:$0xff]  ;;  %v6047_v18 = vpack.c.bf16 %v414_v10, %v410_v9  ;;  %v420_v22 = vld [vmem:[%s7511_s24 + $0x468] sm:$0xff]  ;;  %v417_v33 = vld [vmem:[%s7511_s24 + $0x450] sm:$0xff] }
  0xa7   : > { %v5025_v28 = vpack.c.bf16 %v411_v16, %v407_v15  ;;  %v419_v32 = vld [vmem:[%s7511_s24 + $0x460] sm:$0xff]  ;;  %v421_v35 = vld [vmem:[%s7511_s24 + $0x470] sm:$0xff]  ;;  %v424_v36 = vld [vmem:[%s7511_s24 + $0x488] sm:$0xff] }
  0xa8   : > { %5006 = vmatpush1.bf16.msra.mxu0 %v5005_v23  ;;  %v7672_v23 = vsub.s32 3, %v7608_v5  ;;  %v430_v40 = vld [vmem:[%s7511_s24 + $0x4b8] sm:$0xff]  ;;  %v5029_v41 = vpack.c.bf16 %v419_v32, %v415_v31  ;;  %v6053_v42 = vpack.c.bf16 %v421_v35, %v417_v33  ;;  %v423_v44 = vld [vmem:[%s7511_s24 + $0x480] sm:$0xff]  ;;  %v425_v46 = vld [vmem:[%s7511_s24 + $0x490] sm:$0xff] }
  0xa9   : > { %6030 = vmatpush1.bf16.msra.mxu1 %v6029_v25  ;;  %5008 = vmatprep.subr.bf16.mxu0 %v5007_v26  ;;  %v2335_v25 = vrot.slane %v7626_v24, %v7663_v11  ;;  %v418_v26 = vld [vmem:[%s7511_s24 + $0x458] sm:$0xff]  ;;  %v427_v45 = vld [vmem:[%s7511_s24 + $0x4a0] sm:$0xff]  ;;  %v429_v48 = vld [vmem:[%s7511_s24 + $0x4b0] sm:$0xff] }
  0xaa   : > { %6032 = vmatprep.subr.bf16.mxu1 %v6031_v30  ;;  %v5027_v30 = vpack.c.bf16 %v420_v22, %v416_v21  ;;  %v6051_v34 = vpack.c.bf16 %v422_v27, %v418_v26  ;;  %v438_v52 = vld [vmem:[%s7511_s24 + $0x4f8] sm:$0xff]  ;;  %v5033_v53 = vpack.c.bf16 %v427_v45, %v423_v44  ;;  %v6057_v54 = vpack.c.bf16 %v429_v48, %v425_v46  ;;  %v431_v57 = vld [vmem:[%s7511_s24 + $0x4c0] sm:$0xff]  ;;  %v433_v59 = vld [vmem:[%s7511_s24 + $0x4d0] sm:$0xff] }
  0xab   : > { %v435_v58 = vld [vmem:[%s7511_s24 + $0x4e0] sm:$0xff]  ;;  %v437_v61 = vld [vmem:[%s7511_s24 + $0x4f0] sm:$0xff]  ;;  %v446_v1 = vld [vmem:[%s7511_s24 + $0x538] sm:$0xff] }
  0xac   : > { %5010 = vmatpush1.bf16.msra.mxu0 %v5009_v37  ;;  %v428_v37 = vld [vmem:[%s7511_s24 + $0x4a8] sm:$0xff]  ;;  %v5037_v2 = vpack.c.bf16 %v435_v58, %v431_v57  ;;  %v6061_v3 = vpack.c.bf16 %v437_v61, %v433_v59  ;;  %v439_v6 = vld [vmem:[%s7511_s24 + $0x500] sm:$0xff]  ;;  %v441_v8 = vld [vmem:[%s7511_s24 + $0x510] sm:$0xff] }
  0xad   : > { %6034 = vmatpush1.bf16.msra.mxu1 %v6033_v38  ;;  %5012 = vmatprep.subr.bf16.mxu0 %v5011_v39  ;;  %v2347_v38 = vrot.slane %v7626_v24, %v7672_v23  ;;  %v426_v39 = vld [vmem:[%s7511_s24 + $0x498] sm:$0xff]  ;;  %v443_v7 = vld [vmem:[%s7511_s24 + $0x520] sm:$0xff]  ;;  %v445_v10 = vld [vmem:[%s7511_s24 + $0x530] sm:$0xff] }
  0xae   : > { %6036 = vmatprep.subr.bf16.mxu1 %v6035_v43  ;;  %v5031_v43 = vpack.c.bf16 %v428_v37, %v424_v36  ;;  %v6055_v47 = vpack.c.bf16 %v430_v40, %v426_v39  ;;  %v454_v15 = vld [vmem:[%s7511_s24 + $0x578] sm:$0xff]  ;;  %v5041_v16 = vpack.c.bf16 %v443_v7, %v439_v6  ;;  %v6065_v17 = vpack.c.bf16 %v445_v10, %v441_v8  ;;  %v447_v20 = vld [vmem:[%s7511_s24 + $0x540] sm:$0xff]  ;;  %v449_v22 = vld [vmem:[%s7511_s24 + $0x550] sm:$0xff] }
  0xaf   : > { %v451_v21 = vld [vmem:[%s7511_s24 + $0x560] sm:$0xff]  ;;  %v453_v26 = vld [vmem:[%s7511_s24 + $0x570] sm:$0xff]  ;;  %v456_v27 = vld [vmem:[%s7511_s24 + $0x588] sm:$0xff] }
  0xb0   : > { %5014 = vmatpush1.bf16.msra.mxu0 %v5013_v49  ;;  %v432_v49 = vld [vmem:[%s7511_s24 + $0x4c8] sm:$0xff]  ;;  %v5045_v31 = vpack.c.bf16 %v451_v21, %v447_v20  ;;  %v6069_v32 = vpack.c.bf16 %v453_v26, %v449_v22  ;;  %v459_v35 = vld [vmem:[%s7511_s24 + $0x5a0] sm:$0xff]  ;;  %v457_v36 = vld [vmem:[%s7511_s24 + $0x590] sm:$0xff] }
  0xb1   : > { %6038 = vmatpush1.bf16.msra.mxu1 %v6037_v50  ;;  %5016 = vmatprep.subr.bf16.mxu0 %v5015_v51  ;;  %v436_v50 = vld [vmem:[%s7511_s24 + $0x4e8] sm:$0xff]  ;;  %v434_v51 = vld [vmem:[%s7511_s24 + $0x4d8] sm:$0xff]  ;;  %v463_v46 = vld [vmem:[%s7511_s24 + $0x5c0] sm:$0xff] }
  0xb2   : > { %6040 = vmatprep.subr.bf16.mxu1 %v6039_v55  ;;  %v5035_v55 = vpack.c.bf16 %v436_v50, %v432_v49  ;;  %v6059_v60 = vpack.c.bf16 %v438_v52, %v434_v51  ;;  %v464_v39 = vld [vmem:[%s7511_s24 + $0x5c8] sm:$0xff]  ;;  %v465_v48 = vld [vmem:[%s7511_s24 + $0x5d0] sm:$0xff]  ;;  %v471_v59 = vld [vmem:[%s7511_s24 + $0x600] sm:$0xff] }
  0xb3   : > { %v468_v40 = vld [vmem:[%s7511_s24 + $0x5e8] sm:$0xff]  ;;  %v469_v50 = vld [vmem:[%s7511_s24 + $0x5f0] sm:$0xff]  ;;  %v479_v8 = vld [vmem:[%s7511_s24 + $0x640] sm:$0xff] }
  0xb4   : > { %5018 = vmatpush1.bf16.msra.mxu0 %v5017_v62  ;;  %v440_v62 = vld [vmem:[%s7511_s24 + $0x508] sm:$0xff]  ;;  %v5051_v45 = vpack.c.bf16 %v468_v40, %v464_v39  ;;  %v6077_v57 = vpack.c.bf16 %v469_v50, %v465_v48  ;;  %v473_v61 = vld [vmem:[%s7511_s24 + $0x610] sm:$0xff]  ;;  %v487_v22 = vld [vmem:[%s7511_s24 + $0x680] sm:$0xff] }
  0xb5   : > { %6042 = vmatpush1.bf16.msra.mxu1 %v6041_v63  ;;  %5020 = vmatprep.subr.bf16.mxu0 %v5019_v0  ;;  %v444_v63 = vld [vmem:[%s7511_s24 + $0x528] sm:$0xff]  ;;  %v442_v0 = vld [vmem:[%s7511_s24 + $0x518] sm:$0xff]  ;;  %v481_v10 = vld [vmem:[%s7511_s24 + $0x650] sm:$0xff] }
  0xb6   : > { %6044 = vmatprep.subr.bf16.mxu1 %v6043_v4  ;;  %v5039_v4 = vpack.c.bf16 %v444_v63, %v440_v62  ;;  %v6063_v9 = vpack.c.bf16 %v446_v1, %v442_v0  ;;  %v472_v51 = vld [vmem:[%s7511_s24 + $0x608] sm:$0xff]  ;;  %v477_v63 = vld [vmem:[%s7511_s24 + $0x630] sm:$0xff]  ;;  %v503_v48 = vld [vmem:[%s7511_s24 + $0x700] sm:$0xff] }
  0xb7   : > { %v476_v52 = vld [vmem:[%s7511_s24 + $0x628] sm:$0xff]  ;;  %v6081_v6 = vpack.c.bf16 %v477_v63, %v473_v61  ;;  %v489_v26 = vld [vmem:[%s7511_s24 + $0x690] sm:$0xff]  ;;  %v511_v61 = vld [vmem:[%s7511_s24 + $0x740] sm:$0xff] }
  0xb8   : > { %5022 = vmatpush1.bf16.msra.mxu0 %v5021_v12  ;;  %v448_v12 = vld [vmem:[%s7511_s24 + $0x548] sm:$0xff]  ;;  %v5055_v58 = vpack.c.bf16 %v476_v52, %v472_v51  ;;  %v501_v40 = vld [vmem:[%s7511_s24 + $0x6f0] sm:$0xff] }
  0xb9   : > { %6046 = vmatpush1.bf16.msra.mxu1 %v6045_v13  ;;  %5024 = vmatprep.subr.bf16.mxu0 %v5023_v14  ;;  %v452_v13 = vld [vmem:[%s7511_s24 + $0x568] sm:$0xff]  ;;  %v450_v14 = vld [vmem:[%s7511_s24 + $0x558] sm:$0xff]  ;;  %v505_v50 = vld [vmem:[%s7511_s24 + $0x710] sm:$0xff] }
  0xba   : > { %6048 = vmatprep.subr.bf16.mxu1 %v6047_v18  ;;  %v5043_v18 = vpack.c.bf16 %v452_v13, %v448_v12  ;;  %v480_v0 = vld [vmem:[%s7511_s24 + $0x648] sm:$0xff]  ;;  %v485_v13 = vld [vmem:[%s7511_s24 + $0x670] sm:$0xff] }
  0xbb   : > { %2578 = vmatmul.mubr.f32.vlgmr.msra.gmra.mrb[0].mxu0 %v2335_v25  ;;  %v484_v1 = vld [vmem:[%s7511_s24 + $0x668] sm:$0xff]  ;;  %v6085_v20 = vpack.c.bf16 %v485_v13, %v481_v10  ;;  %v509_v52 = vld [vmem:[%s7511_s24 + $0x730] sm:$0xff]  ;;  %v519_v10 = vld [vmem:[%s7511_s24 + $0x780] sm:$0xff] }
  0xbc   : > { %5026 = vmatpush1.bf16.msra.mxu0 %v5025_v28  ;;  %3714 = vmatmul.mubr.f32.vlgmr.msra.gmra.mrb[0].mxu1 %v2335_v25  ;;  %v6067_v25 = vpack.c.bf16 %v454_v15, %v450_v14  ;;  %v460_v28 = vld [vmem:[%s7511_s24 + $0x5a8] sm:$0xff]  ;;  %v5059_v7 = vpack.c.bf16 %v484_v1, %v480_v0  ;;  %v513_v63 = vld [vmem:[%s7511_s24 + $0x750] sm:$0xff] }
  0xbd   : > { %6050 = vmatpush1.bf16.msra.mxu1 %v6049_v29  ;;  %5028 = vmatprep.subr.bf16.mxu0 %v5027_v30  ;;  %v458_v29 = vld [vmem:[%s7511_s24 + $0x598] sm:$0xff]  ;;  %v5047_v33 = vpack.c.bf16 %v460_v28, %v456_v27  ;;  %v488_v14 = vld [vmem:[%s7511_s24 + $0x688] sm:$0xff]  ;;  %v493_v28 = vld [vmem:[%s7511_s24 + $0x6b0] sm:$0xff] }
  0xbe   : > { %6052 = vmatprep.subr.bf16.mxu1 %v6051_v34  ;;  %2648 = vmatprep.mubr.f32.mxu0 %v2347_v38  ;;  %v462_v30 = vld [vmem:[%s7511_s24 + $0x5b8] sm:$0xff]  ;;  %v455_v34 = vld [vmem:[%s7511_s24 + $0x580] sm:$0xff]  ;;  %v492_v15 = vld [vmem:[%s7511_s24 + $0x6a8] sm:$0xff] }
  0xbf   : > { %3784 = vmatprep.mubr.f32.mxu1 %v2347_v38  ;;  %v6071_v37 = vpack.c.bf16 %v462_v30, %v458_v29  ;;  %v461_v38 = vld [vmem:[%s7511_s24 + $0x5b0] sm:$0xff]  ;;  %v5063_v21 = vpack.c.bf16 %v492_v15, %v488_v14  ;;  %v496_v29 = vld [vmem:[%s7511_s24 + $0x6c8] sm:$0xff] }
  0xc0   : > { %5030 = vmatpush1.bf16.msra.mxu0 %v5029_v41  ;;  %v466_v41 = vld [vmem:[%s7511_s24 + $0x5d8] sm:$0xff]  ;;  %v6073_v44 = vpack.c.bf16 %v461_v38, %v457_v36  ;;  %v500_v30 = vld [vmem:[%s7511_s24 + $0x6e8] sm:$0xff]  ;;  %v495_v36 = vld [vmem:[%s7511_s24 + $0x6c0] sm:$0xff] }
  0xc1   : > { %6054 = vmatpush1.bf16.msra.mxu1 %v6053_v42  ;;  %5032 = vmatprep.subr.bf16.mxu0 %v5031_v43  ;;  %v470_v42 = vld [vmem:[%s7511_s24 + $0x5f8] sm:$0xff]  ;;  %v5049_v43 = vpack.c.bf16 %v459_v35, %v455_v34  ;;  %v6089_v34 = vpack.c.bf16 %v493_v28, %v489_v26  ;;  %v5067_v35 = vpack.c.bf16 %v500_v30, %v496_v29  ;;  %v497_v38 = vld [vmem:[%s7511_s24 + $0x6d0] sm:$0xff]  ;;  %v527_v26 = vld [vmem:[%s7511_s24 + $0x7c0] sm:$0xff] }
  0xc2   : > { %6056 = vmatprep.subr.bf16.mxu1 %v6055_v47  ;;  %v467_v47 = vld [vmem:[%s7511_s24 + $0x5e0] sm:$0xff]  ;;  %v6075_v49 = vpack.c.bf16 %v470_v42, %v466_v41  ;;  %v504_v41 = vld [vmem:[%s7511_s24 + $0x708] sm:$0xff]  ;;  %v517_v1 = vld [vmem:[%s7511_s24 + $0x770] sm:$0xff] }
  0xc3   : > { %v508_v42 = vld [vmem:[%s7511_s24 + $0x728] sm:$0xff]  ;;  %v521_v13 = vld [vmem:[%s7511_s24 + $0x790] sm:$0xff] }
  0xc4   : > { %5034 = vmatpush1.bf16.msra.mxu0 %v5033_v53  ;;  %v474_v53 = vld [vmem:[%s7511_s24 + $0x618] sm:$0xff]  ;;  %v525_v15 = vld [vmem:[%s7511_s24 + $0x7b0] sm:$0xff] }
  0xc5   : > { %6058 = vmatpush1.bf16.msra.mxu1 %v6057_v54  ;;  %5036 = vmatprep.subr.bf16.mxu0 %v5035_v55  ;;  %v478_v54 = vld [vmem:[%s7511_s24 + $0x638] sm:$0xff]  ;;  %v5053_v55 = vpack.c.bf16 %v467_v47, %v463_v46  ;;  %v6093_v46 = vpack.c.bf16 %v501_v40, %v497_v38  ;;  %v5071_v47 = vpack.c.bf16 %v508_v42, %v504_v41  ;;  %v529_v28 = vld [vmem:[%s7511_s24 + $0x7d0] sm:$0xff]  ;;  %v539_v40 = vld [vmem:[%s7511_s24 + $0x820] sm:$0xff] }
  0xc6   : > { %6060 = vmatprep.subr.bf16.mxu1 %v6059_v60  ;;  %v475_v60 = vld [vmem:[%s7511_s24 + $0x620] sm:$0xff]  ;;  %v6079_v62 = vpack.c.bf16 %v478_v54, %v474_v53  ;;  %v512_v53 = vld [vmem:[%s7511_s24 + $0x748] sm:$0xff]  ;;  %v533_v30 = vld [vmem:[%s7511_s24 + $0x7f0] sm:$0xff] }
  0xc7   : > { %v516_v54 = vld [vmem:[%s7511_s24 + $0x768] sm:$0xff]  ;;  %v537_v41 = vld [vmem:[%s7511_s24 + $0x810] sm:$0xff] }
  0xc8   : > { %5038 = vmatpush1.bf16.msra.mxu0 %v5037_v2  ;;  %v482_v2 = vld [vmem:[%s7511_s24 + $0x658] sm:$0xff] }
  0xc9   : > { %6062 = vmatpush1.bf16.msra.mxu1 %v6061_v3  ;;  %5040 = vmatprep.subr.bf16.mxu0 %v5039_v4  ;;  %v486_v3 = vld [vmem:[%s7511_s24 + $0x678] sm:$0xff]  ;;  %v5057_v4 = vpack.c.bf16 %v475_v60, %v471_v59  ;;  %v6097_v59 = vpack.c.bf16 %v509_v52, %v505_v50  ;;  %v5075_v60 = vpack.c.bf16 %v516_v54, %v512_v53  ;;  %v543_v53 = vld [vmem:[%s7511_s24 + $0x840] sm:$0xff] }
  0xca   : > { %6064 = vmatprep.subr.bf16.mxu1 %v6063_v9  ;;  %v483_v9 = vld [vmem:[%s7511_s24 + $0x660] sm:$0xff]  ;;  %v6083_v12 = vpack.c.bf16 %v486_v3, %v482_v2  ;;  %v520_v2 = vld [vmem:[%s7511_s24 + $0x788] sm:$0xff] }
  0xcb   : > { %v524_v3 = vld [vmem:[%s7511_s24 + $0x7a8] sm:$0xff]  ;;  %v547_v54 = vld [vmem:[%s7511_s24 + $0x860] sm:$0xff] }
  0xcc   : > { %5042 = vmatpush1.bf16.msra.mxu0 %v5041_v16  ;;  %v490_v16 = vld [vmem:[%s7511_s24 + $0x698] sm:$0xff] }
  0xcd   : > { %6066 = vmatpush1.bf16.msra.mxu1 %v6065_v17  ;;  %5044 = vmatprep.subr.bf16.mxu0 %v5043_v18  ;;  %v494_v17 = vld [vmem:[%s7511_s24 + $0x6b8] sm:$0xff]  ;;  %v5061_v18 = vpack.c.bf16 %v483_v9, %v479_v8  ;;  %v6101_v8 = vpack.c.bf16 %v517_v1, %v513_v63  ;;  %v5079_v9 = vpack.c.bf16 %v524_v3, %v520_v2  ;;  %v551_v3 = vld [vmem:[%s7511_s24 + $0x880] sm:$0xff] }
  0xce   : > { %6068 = vmatprep.subr.bf16.mxu1 %v6067_v25  ;;  %v491_v25 = vld [vmem:[%s7511_s24 + $0x6a0] sm:$0xff]  ;;  %v6087_v27 = vpack.c.bf16 %v494_v17, %v490_v16  ;;  %v528_v16 = vld [vmem:[%s7511_s24 + $0x7c8] sm:$0xff]  ;;  %v558_v63 = vld [vmem:[%s7511_s24 + $0x8b8] sm:$0xff] }
  0xcf   : > { %v532_v17 = vld [vmem:[%s7511_s24 + $0x7e8] sm:$0xff] }
  0xd0   : > { %5046 = vmatpush1.bf16.msra.mxu0 %v5045_v31  ;;  %v498_v31 = vld [vmem:[%s7511_s24 + $0x6d8] sm:$0xff] }
  0xd1   : > { %6070 = vmatpush1.bf16.msra.mxu1 %v6069_v32  ;;  %5048 = vmatprep.subr.bf16.mxu0 %v5047_v33  ;;  %v502_v32 = vld [vmem:[%s7511_s24 + $0x6f8] sm:$0xff]  ;;  %v5065_v33 = vpack.c.bf16 %v491_v25, %v487_v22  ;;  %v6105_v22 = vpack.c.bf16 %v525_v15, %v521_v13  ;;  %v5083_v25 = vpack.c.bf16 %v532_v17, %v528_v16  ;;  %v559_v17 = vld [vmem:[%s7511_s24 + $0x8c0] sm:$0xff] }
  0xd2   : > { %6072 = vmatprep.subr.bf16.mxu1 %v6071_v37  ;;  %v499_v37 = vld [vmem:[%s7511_s24 + $0x6e0] sm:$0xff]  ;;  %v6091_v39 = vpack.c.bf16 %v502_v32, %v498_v31  ;;  %v536_v31 = vld [vmem:[%s7511_s24 + $0x808] sm:$0xff]  ;;  %v566_v13 = vld [vmem:[%s7511_s24 + $0x8f8] sm:$0xff] }
  0xd3   : > { %v540_v32 = vld [vmem:[%s7511_s24 + $0x828] sm:$0xff] }
  0xd4   : > { %5050 = vmatpush1.bf16.msra.mxu0 %v5049_v43  ;;  %v506_v43 = vld [vmem:[%s7511_s24 + $0x718] sm:$0xff]  ;;  %v5087_v38 = vpack.c.bf16 %v540_v32, %v536_v31  ;;  %v567_v32 = vld [vmem:[%s7511_s24 + $0x900] sm:$0xff] }
  0xd5   : > { %6074 = vmatpush1.bf16.msra.mxu1 %v6073_v44  ;;  %5052 = vmatprep.subr.bf16.mxu0 %v5051_v45  ;;  %v510_v44 = vld [vmem:[%s7511_s24 + $0x738] sm:$0xff]  ;;  %v5069_v45 = vpack.c.bf16 %v499_v37, %v495_v36  ;;  %v6109_v37 = vpack.c.bf16 %v533_v30, %v529_v28 }
  0xd6   : > { %6076 = vmatprep.subr.bf16.mxu1 %v6075_v49  ;;  %v507_v49 = vld [vmem:[%s7511_s24 + $0x720] sm:$0xff]  ;;  %v6095_v51 = vpack.c.bf16 %v510_v44, %v506_v43  ;;  %v541_v43 = vld [vmem:[%s7511_s24 + $0x830] sm:$0xff]  ;;  %v544_v44 = vld [vmem:[%s7511_s24 + $0x848] sm:$0xff] }
  0xd7   : > { %v574_v28 = vld [vmem:[%s7511_s24 + $0x938] sm:$0xff] }
  0xd8   : > { %5054 = vmatpush1.bf16.msra.mxu0 %v5053_v55  ;;  %v514_v55 = vld [vmem:[%s7511_s24 + $0x758] sm:$0xff] }
  0xd9   : > { %6078 = vmatpush1.bf16.msra.mxu1 %v6077_v57  ;;  %5056 = vmatprep.subr.bf16.mxu0 %v5055_v58  ;;  %v518_v57 = vld [vmem:[%s7511_s24 + $0x778] sm:$0xff]  ;;  %v5073_v58 = vpack.c.bf16 %v507_v49, %v503_v48 }
  0xda   : > { %6080 = vmatprep.subr.bf16.mxu1 %v6079_v62  ;;  %v515_v62 = vld [vmem:[%s7511_s24 + $0x760] sm:$0xff]  ;;  %v6099_v0 = vpack.c.bf16 %v518_v57, %v514_v55  ;;  %v546_v48 = vld [vmem:[%s7511_s24 + $0x858] sm:$0xff]  ;;  %v545_v55 = vld [vmem:[%s7511_s24 + $0x850] sm:$0xff] }
  0xdb   : > { %v550_v49 = vld [vmem:[%s7511_s24 + $0x878] sm:$0xff] }
  0xdc   : > { %5058 = vmatpush1.bf16.msra.mxu0 %v5057_v4  ;;  %v522_v4 = vld [vmem:[%s7511_s24 + $0x798] sm:$0xff]  ;;  %v6115_v57 = vpack.c.bf16 %v550_v49, %v546_v48  ;;  %v577_v48 = vld [vmem:[%s7511_s24 + $0x950] sm:$0xff] }
  0xdd   : > { %6082 = vmatpush1.bf16.msra.mxu1 %v6081_v6  ;;  %5060 = vmatprep.subr.bf16.mxu0 %v5059_v7  ;;  %v526_v6 = vld [vmem:[%s7511_s24 + $0x7b8] sm:$0xff]  ;;  %v5077_v7 = vpack.c.bf16 %v515_v62, %v511_v61 }
  0xde   : > { %6084 = vmatprep.subr.bf16.mxu1 %v6083_v12  ;;  %v523_v12 = vld [vmem:[%s7511_s24 + $0x7a0] sm:$0xff]  ;;  %v6103_v14 = vpack.c.bf16 %v526_v6, %v522_v4  ;;  %v554_v62 = vld [vmem:[%s7511_s24 + $0x898] sm:$0xff]  ;;  %v553_v6 = vld [vmem:[%s7511_s24 + $0x890] sm:$0xff] }
  0xdf   : > { %v555_v4 = vld [vmem:[%s7511_s24 + $0x8a0] sm:$0xff] }
  0xe0   : > { %5062 = vmatpush1.bf16.msra.mxu0 %v5061_v18  ;;  %v530_v18 = vld [vmem:[%s7511_s24 + $0x7d8] sm:$0xff] }
  0xe1   : > { %6086 = vmatpush1.bf16.msra.mxu1 %v6085_v20  ;;  %5064 = vmatprep.subr.bf16.mxu0 %v5063_v21  ;;  %v534_v20 = vld [vmem:[%s7511_s24 + $0x7f8] sm:$0xff]  ;;  %v5081_v21 = vpack.c.bf16 %v523_v12, %v519_v10  ;;  %v564_v10 = vld [vmem:[%s7511_s24 + $0x8e8] sm:$0xff] }
  0xe2   : > { %6088 = vmatprep.subr.bf16.mxu1 %v6087_v27  ;;  %v531_v27 = vld [vmem:[%s7511_s24 + $0x7e0] sm:$0xff]  ;;  %v6107_v29 = vpack.c.bf16 %v534_v20, %v530_v18  ;;  %v562_v12 = vld [vmem:[%s7511_s24 + $0x8d8] sm:$0xff]  ;;  %v561_v20 = vld [vmem:[%s7511_s24 + $0x8d0] sm:$0xff] }
  0xe3   : > { %v5085_v36 = vpack.c.bf16 %v531_v27, %v527_v26  ;;  %v563_v18 = vld [vmem:[%s7511_s24 + $0x8e0] sm:$0xff]  ;;  %v572_v26 = vld [vmem:[%s7511_s24 + $0x928] sm:$0xff]  ;;  %v570_v27 = vld [vmem:[%s7511_s24 + $0x918] sm:$0xff] }
  0xe4   : > { %5066 = vmatpush1.bf16.msra.mxu0 %v5065_v33  ;;  %v538_v33 = vld [vmem:[%s7511_s24 + $0x818] sm:$0xff] }
  0xe5   : > { %6090 = vmatpush1.bf16.msra.mxu1 %v6089_v34  ;;  %5068 = vmatprep.subr.bf16.mxu0 %v5067_v35  ;;  %v542_v34 = vld [vmem:[%s7511_s24 + $0x838] sm:$0xff]  ;;  %v7801_v35 = vsub.s32 2, %v7608_v5 }
  0xe6   : > { %6092 = vmatprep.subr.bf16.mxu1 %v6091_v39  ;;  %v535_v39 = vld [vmem:[%s7511_s24 + $0x800] sm:$0xff]  ;;  %v6111_v42 = vpack.c.bf16 %v542_v34, %v538_v33  ;;  %v569_v34 = vld [vmem:[%s7511_s24 + $0x910] sm:$0xff] }
  0xe7   : > { %v5089_v50 = vpack.c.bf16 %v539_v40, %v535_v39  ;;  %v571_v33 = vld [vmem:[%s7511_s24 + $0x920] sm:$0xff]  ;;  %v580_v39 = vld [vmem:[%s7511_s24 + $0x968] sm:$0xff]  ;;  %v578_v40 = vld [vmem:[%s7511_s24 + $0x958] sm:$0xff] }
  0xe8   : > { %5070 = vmatpush1.bf16.msra.mxu0 %v5069_v45  ;;  %v548_v45 = vld [vmem:[%s7511_s24 + $0x868] sm:$0xff] }
  0xe9   : > { %6094 = vmatpush1.bf16.msra.mxu1 %v6093_v46  ;;  %5072 = vmatprep.subr.bf16.mxu0 %v5071_v47  ;;  %v7810_v46 = vsub.s32 5, %v7608_v5  ;;  %v2343_v47 = vrot.slane %v7626_v24, %v7801_v35  ;;  %v5091_v52 = vpack.c.bf16 %v548_v45, %v544_v44  ;;  %v575_v45 = vld [vmem:[%s7511_s24 + $0x940] sm:$0xff] }
  0xea   : > { %6096 = vmatprep.subr.bf16.mxu1 %v6095_v51  ;;  %v6113_v51 = vpack.c.bf16 %v541_v43, %v537_v41  ;;  %v582_v41 = vld [vmem:[%s7511_s24 + $0x978] sm:$0xff] }
  0xeb   : > { %v2355_v61 = vrot.slane %v7626_v24, %v7810_v46  ;;  %v6131_v49 = vpack.c.bf16 %v582_v41, %v578_v40  ;;  %v613_v41 = vld [vmem:[%s7511_s24 + $0xa70] sm:$0xff] }
  0xec   : > { %5074 = vmatpush1.bf16.msra.mxu0 %v5073_v58  ;;  %v549_v58 = vld [vmem:[%s7511_s24 + $0x870] sm:$0xff] }
  0xed   : > { %6098 = vmatpush1.bf16.msra.mxu1 %v6097_v59  ;;  %5076 = vmatprep.subr.bf16.mxu0 %v5075_v60  ;;  %v552_v59 = vld [vmem:[%s7511_s24 + $0x888] sm:$0xff]  ;;  %v6117_v1 = vpack.c.bf16 %v549_v58, %v545_v55 }
  0xee   : > { %6100 = vmatprep.subr.bf16.mxu1 %v6099_v0  ;;  %v556_v60 = vld [vmem:[%s7511_s24 + $0x8a8] sm:$0xff]  ;;  %v5093_v0 = vpack.c.bf16 %v547_v54, %v543_v53  ;;  %v586_v53 = vld [vmem:[%s7511_s24 + $0x998] sm:$0xff] }
  0xef   : > { %v5095_v2 = vpack.c.bf16 %v556_v60, %v552_v59  ;;  %v590_v54 = vld [vmem:[%s7511_s24 + $0x9b8] sm:$0xff]  ;;  %v583_v59 = vld [vmem:[%s7511_s24 + $0x980] sm:$0xff] }
  0xf0   : > { %5078 = vmatpush1.bf16.msra.mxu0 %v5077_v7  ;;  %v6119_v7 = vpack.c.bf16 %v558_v63, %v554_v62  ;;  %v587_v60 = vld [vmem:[%s7511_s24 + $0x9a0] sm:$0xff]  ;;  %v6135_v62 = vpack.c.bf16 %v590_v54, %v586_v53  ;;  %v589_v63 = vld [vmem:[%s7511_s24 + $0x9b0] sm:$0xff] }
  0xf1   : > { %6102 = vmatpush1.bf16.msra.mxu1 %v6101_v8  ;;  %5080 = vmatprep.subr.bf16.mxu0 %v5079_v9  ;;  %v557_v8 = vld [vmem:[%s7511_s24 + $0x8b0] sm:$0xff]  ;;  %v560_v9 = vld [vmem:[%s7511_s24 + $0x8c8] sm:$0xff] }
  0xf2   : > { %6104 = vmatprep.subr.bf16.mxu1 %v6103_v14  ;;  %v5097_v14 = vpack.c.bf16 %v555_v4, %v551_v3  ;;  %v6121_v15 = vpack.c.bf16 %v557_v8, %v553_v6  ;;  %v5099_v16 = vpack.c.bf16 %v564_v10, %v560_v9  ;;  %v598_v3 = vld [vmem:[%s7511_s24 + $0x9f8] sm:$0xff]  ;;  %v5113_v4 = vpack.c.bf16 %v587_v60, %v583_v59  ;;  %v591_v8 = vld [vmem:[%s7511_s24 + $0x9c0] sm:$0xff]  ;;  %v593_v10 = vld [vmem:[%s7511_s24 + $0x9d0] sm:$0xff] }
  0xf3   : > { %v595_v9 = vld [vmem:[%s7511_s24 + $0x9e0] sm:$0xff]  ;;  %v621_v54 = vld [vmem:[%s7511_s24 + $0xab0] sm:$0xff]  ;;  %v630_v59 = vld [vmem:[%s7511_s24 + $0xaf8] sm:$0xff] }
  0xf4   : > { %5082 = vmatpush1.bf16.msra.mxu0 %v5081_v21  ;;  %v6123_v21 = vpack.c.bf16 %v566_v13, %v562_v12  ;;  %v597_v13 = vld [vmem:[%s7511_s24 + $0x9f0] sm:$0xff] }
  0xf5   : > { %6106 = vmatpush1.bf16.msra.mxu1 %v6105_v22  ;;  %5084 = vmatprep.subr.bf16.mxu0 %v5083_v25  ;;  %v565_v22 = vld [vmem:[%s7511_s24 + $0x8f0] sm:$0xff]  ;;  %v568_v25 = vld [vmem:[%s7511_s24 + $0x908] sm:$0xff] }
  0xf6   : > { %6108 = vmatprep.subr.bf16.mxu1 %v6107_v29  ;;  %v5101_v29 = vpack.c.bf16 %v563_v18, %v559_v17  ;;  %v6125_v30 = vpack.c.bf16 %v565_v22, %v561_v20  ;;  %v5103_v31 = vpack.c.bf16 %v572_v26, %v568_v25  ;;  %v606_v17 = vld [vmem:[%s7511_s24 + $0xa38] sm:$0xff]  ;;  %v5117_v18 = vpack.c.bf16 %v595_v9, %v591_v8  ;;  %v599_v22 = vld [vmem:[%s7511_s24 + $0xa00] sm:$0xff]  ;;  %v601_v26 = vld [vmem:[%s7511_s24 + $0xa10] sm:$0xff] }
  0xf7   : > { %v6141_v20 = vpack.c.bf16 %v597_v13, %v593_v10  ;;  %v603_v25 = vld [vmem:[%s7511_s24 + $0xa20] sm:$0xff]  ;;  %v638_v8 = vld [vmem:[%s7511_s24 + $0xb38] sm:$0xff] }
  0xf8   : > { %5086 = vmatpush1.bf16.msra.mxu0 %v5085_v36  ;;  %v6127_v36 = vpack.c.bf16 %v574_v28, %v570_v27  ;;  %v605_v28 = vld [vmem:[%s7511_s24 + $0xa30] sm:$0xff]  ;;  %v631_v13 = vld [vmem:[%s7511_s24 + $0xb00] sm:$0xff] }
  0xf9   : > { %6110 = vmatpush1.bf16.msra.mxu1 %v6109_v37  ;;  %5088 = vmatprep.subr.bf16.mxu0 %v5087_v38  ;;  %v573_v37 = vld [vmem:[%s7511_s24 + $0x930] sm:$0xff]  ;;  %v576_v38 = vld [vmem:[%s7511_s24 + $0x948] sm:$0xff] }
  0xfa   : > { %6112 = vmatprep.subr.bf16.mxu1 %v6111_v42  ;;  %v5105_v42 = vpack.c.bf16 %v571_v33, %v567_v32  ;;  %v6129_v43 = vpack.c.bf16 %v573_v37, %v569_v34  ;;  %v5107_v44 = vpack.c.bf16 %v580_v39, %v576_v38  ;;  %v614_v32 = vld [vmem:[%s7511_s24 + $0xa78] sm:$0xff]  ;;  %v5121_v33 = vpack.c.bf16 %v603_v25, %v599_v22  ;;  %v607_v37 = vld [vmem:[%s7511_s24 + $0xa40] sm:$0xff]  ;;  %v609_v39 = vld [vmem:[%s7511_s24 + $0xa50] sm:$0xff] }
  0xfb   : > { %2649 = vmatmul.mubr.f32.vlgmr.msra.gmra.mrb[0].mxu0 %v2343_v47  ;;  %v6145_v34 = vpack.c.bf16 %v605_v28, %v601_v26  ;;  %v611_v38 = vld [vmem:[%s7511_s24 + $0xa60] sm:$0xff]  ;;  %v646_v22 = vld [vmem:[%s7511_s24 + $0xb78] sm:$0xff] }
  0xfc   : > { %5090 = vmatpush1.bf16.msra.mxu0 %v5089_v50  ;;  %3785 = vmatmul.mubr.f32.vlgmr.msra.gmra.mrb[0].mxu1 %v2343_v47  ;;  %v579_v47 = vld [vmem:[%s7511_s24 + $0x960] sm:$0xff]  ;;  %v581_v50 = vld [vmem:[%s7511_s24 + $0x970] sm:$0xff] }
  0xfd   : > { %6114 = vmatpush1.bf16.msra.mxu1 %v6113_v51  ;;  %5092 = vmatprep.subr.bf16.mxu0 %v5091_v52  ;;  %v584_v51 = vld [vmem:[%s7511_s24 + $0x988] sm:$0xff]  ;;  %v5109_v55 = vpack.c.bf16 %v579_v47, %v575_v45  ;;  %v622_v45 = vld [vmem:[%s7511_s24 + $0xab8] sm:$0xff]  ;;  %v5125_v47 = vpack.c.bf16 %v611_v38, %v607_v37  ;;  %v639_v28 = vld [vmem:[%s7511_s24 + $0xb40] sm:$0xff] }
  0xfe   : > { %6116 = vmatprep.subr.bf16.mxu1 %v6115_v57  ;;  %2719 = vmatprep.mubr.f32.mxu0 %v2355_v61  ;;  %v588_v52 = vld [vmem:[%s7511_s24 + $0x9a8] sm:$0xff]  ;;  %v6133_v57 = vpack.c.bf16 %v581_v50, %v577_v48  ;;  %v6149_v48 = vpack.c.bf16 %v613_v41, %v609_v39  ;;  %v615_v50 = vld [vmem:[%s7511_s24 + $0xa80] sm:$0xff]  ;;  %v654_v37 = vld [vmem:[%s7511_s24 + $0xbb8] sm:$0xff] }
  0xff   : > { %3855 = vmatprep.mubr.f32.mxu1 %v2355_v61  ;;  %v5111_v58 = vpack.c.bf16 %v588_v52, %v584_v51  ;;  %v585_v61 = vld [vmem:[%s7511_s24 + $0x990] sm:$0xff]  ;;  %v619_v51 = vld [vmem:[%s7511_s24 + $0xaa0] sm:$0xff] }
 0x100   : > { %5094 = vmatpush1.bf16.msra.mxu0 %v5093_v0  ;;  %v592_v0 = vld [vmem:[%s7511_s24 + $0x9c8] sm:$0xff]  ;;  %v6137_v6 = vpack.c.bf16 %v589_v63, %v585_v61  ;;  %v617_v52 = vld [vmem:[%s7511_s24 + $0xa90] sm:$0xff]  ;;  %v5129_v60 = vpack.c.bf16 %v619_v51, %v615_v50  ;;  %v623_v63 = vld [vmem:[%s7511_s24 + $0xac0] sm:$0xff] }
 0x101   : > { %6118 = vmatpush1.bf16.msra.mxu1 %v6117_v1  ;;  %5096 = vmatprep.subr.bf16.mxu0 %v5095_v2  ;;  %v596_v1 = vld [vmem:[%s7511_s24 + $0x9e8] sm:$0xff]  ;;  %v594_v2 = vld [vmem:[%s7511_s24 + $0x9d8] sm:$0xff]  ;;  %v6153_v61 = vpack.c.bf16 %v621_v54, %v617_v52  ;;  %v647_v41 = vld [vmem:[%s7511_s24 + $0xb80] sm:$0xff] }
 0x102   : > { %6120 = vmatprep.subr.bf16.mxu1 %v6119_v7  ;;  %v5115_v7 = vpack.c.bf16 %v596_v1, %v592_v0  ;;  %v6139_v12 = vpack.c.bf16 %v598_v3, %v594_v2  ;;  %v627_v0 = vld [vmem:[%s7511_s24 + $0xae0] sm:$0xff]  ;;  %v625_v1 = vld [vmem:[%s7511_s24 + $0xad0] sm:$0xff]  ;;  %v662_v50 = vld [vmem:[%s7511_s24 + $0xbf8] sm:$0xff] }
 0x103   : > { %v629_v3 = vld [vmem:[%s7511_s24 + $0xaf0] sm:$0xff]  ;;  %v5133_v9 = vpack.c.bf16 %v627_v0, %v623_v63  ;;  %v655_v54 = vld [vmem:[%s7511_s24 + $0xbc0] sm:$0xff]  ;;  %v670_v63 = vld [vmem:[%s7511_s24 + $0xc38] sm:$0xff]  ;;  %v7939_v0 = vsub.s32 4, %v7608_v5 }
 0x104   : > { %5098 = vmatpush1.bf16.msra.mxu0 %v5097_v14  ;;  %v600_v14 = vld [vmem:[%s7511_s24 + $0xa08] sm:$0xff]  ;;  %v6157_v10 = vpack.c.bf16 %v629_v3, %v625_v1 }
 0x105   : > { %6122 = vmatpush1.bf16.msra.mxu1 %v6121_v15  ;;  %5100 = vmatprep.subr.bf16.mxu0 %v5099_v16  ;;  %v604_v15 = vld [vmem:[%s7511_s24 + $0xa28] sm:$0xff]  ;;  %v602_v16 = vld [vmem:[%s7511_s24 + $0xa18] sm:$0xff] }
 0x106   : > { %6124 = vmatprep.subr.bf16.mxu1 %v6123_v21  ;;  %v5119_v21 = vpack.c.bf16 %v604_v15, %v600_v14  ;;  %v6143_v27 = vpack.c.bf16 %v606_v17, %v602_v16  ;;  %v635_v14 = vld [vmem:[%s7511_s24 + $0xb20] sm:$0xff]  ;;  %v633_v15 = vld [vmem:[%s7511_s24 + $0xb10] sm:$0xff] }
 0x107   : > { %v637_v17 = vld [vmem:[%s7511_s24 + $0xb30] sm:$0xff]  ;;  %v5137_v25 = vpack.c.bf16 %v635_v14, %v631_v13  ;;  %v7948_v13 = vsub.s32 7, %v7608_v5  ;;  %v2351_v14 = vrot.slane %v7626_v24, %v7939_v0 }
 0x108   : > { %5102 = vmatpush1.bf16.msra.mxu0 %v5101_v29  ;;  %v608_v29 = vld [vmem:[%s7511_s24 + $0xa48] sm:$0xff]  ;;  %v6161_v26 = vpack.c.bf16 %v637_v17, %v633_v15  ;;  %v674_v15 = vld [vmem:[%s7511_s24 + $0xc58] sm:$0xff] }
 0x109   : > { %6126 = vmatpush1.bf16.msra.mxu1 %v6125_v30  ;;  %5104 = vmatprep.subr.bf16.mxu0 %v5103_v31  ;;  %v612_v30 = vld [vmem:[%s7511_s24 + $0xa68] sm:$0xff]  ;;  %v610_v31 = vld [vmem:[%s7511_s24 + $0xa58] sm:$0xff] }
 0x10a   : > { %6128 = vmatprep.subr.bf16.mxu1 %v6127_v36  ;;  %v5123_v36 = vpack.c.bf16 %v612_v30, %v608_v29  ;;  %v6147_v40 = vpack.c.bf16 %v614_v32, %v610_v31  ;;  %v643_v29 = vld [vmem:[%s7511_s24 + $0xb60] sm:$0xff]  ;;  %v641_v30 = vld [vmem:[%s7511_s24 + $0xb50] sm:$0xff] }
 0x10b   : > { %v645_v32 = vld [vmem:[%s7511_s24 + $0xb70] sm:$0xff]  ;;  %v5141_v38 = vpack.c.bf16 %v643_v29, %v639_v28  ;;  %v680_v28 = vld [vmem:[%s7511_s24 + $0xc88] sm:$0xff] }
 0x10c   : > { %5106 = vmatpush1.bf16.msra.mxu0 %v5105_v42  ;;  %v616_v42 = vld [vmem:[%s7511_s24 + $0xa88] sm:$0xff]  ;;  %v6165_v39 = vpack.c.bf16 %v645_v32, %v641_v30  ;;  %v2363_v30 = vrot.slane %v7626_v24, %v7948_v13  ;;  %v686_v32 = vld [vmem:[%s7511_s24 + $0xcb8] sm:$0xff] }
 0x10d   : > { %6130 = vmatpush1.bf16.msra.mxu1 %v6129_v43  ;;  %5108 = vmatprep.subr.bf16.mxu0 %v5107_v44  ;;  %v620_v43 = vld [vmem:[%s7511_s24 + $0xaa8] sm:$0xff]  ;;  %v618_v44 = vld [vmem:[%s7511_s24 + $0xa98] sm:$0xff] }
 0x10e   : > { %6132 = vmatprep.subr.bf16.mxu1 %v6131_v49  ;;  %v5127_v49 = vpack.c.bf16 %v620_v43, %v616_v42  ;;  %v6151_v53 = vpack.c.bf16 %v622_v45, %v618_v44  ;;  %v651_v42 = vld [vmem:[%s7511_s24 + $0xba0] sm:$0xff]  ;;  %v649_v43 = vld [vmem:[%s7511_s24 + $0xb90] sm:$0xff]  ;;  %v684_v29 = vld [vmem:[%s7511_s24 + $0xca8] sm:$0xff] }
 0x10f   : > { %v653_v45 = vld [vmem:[%s7511_s24 + $0xbb0] sm:$0xff]  ;;  %v5145_v51 = vpack.c.bf16 %v651_v42, %v647_v41  ;;  %v688_v42 = vld [vmem:[%s7511_s24 + $0xcc8] sm:$0xff] }
 0x110   : > { %5110 = vmatpush1.bf16.msra.mxu0 %v5109_v55  ;;  %v624_v55 = vld [vmem:[%s7511_s24 + $0xac8] sm:$0xff]  ;;  %v6169_v52 = vpack.c.bf16 %v653_v45, %v649_v43  ;;  %v685_v41 = vld [vmem:[%s7511_s24 + $0xcb0] sm:$0xff]  ;;  %v694_v45 = vld [vmem:[%s7511_s24 + $0xcf8] sm:$0xff] }
 0x111   : > { %6134 = vmatpush1.bf16.msra.mxu1 %v6133_v57  ;;  %5112 = vmatprep.subr.bf16.mxu0 %v5111_v58  ;;  %v628_v57 = vld [vmem:[%s7511_s24 + $0xae8] sm:$0xff]  ;;  %v626_v58 = vld [vmem:[%s7511_s24 + $0xad8] sm:$0xff] }
 0x112   : > { %6136 = vmatprep.subr.bf16.mxu1 %v6135_v62  ;;  %v5131_v62 = vpack.c.bf16 %v628_v57, %v624_v55  ;;  %v6155_v2 = vpack.c.bf16 %v630_v59, %v626_v58  ;;  %v659_v55 = vld [vmem:[%s7511_s24 + $0xbe0] sm:$0xff]  ;;  %v657_v57 = vld [vmem:[%s7511_s24 + $0xbd0] sm:$0xff]  ;;  %v692_v43 = vld [vmem:[%s7511_s24 + $0xce8] sm:$0xff] }
 0x113   : > { %v661_v59 = vld [vmem:[%s7511_s24 + $0xbf0] sm:$0xff]  ;;  %v5149_v1 = vpack.c.bf16 %v659_v55, %v655_v54  ;;  %v696_v55 = vld [vmem:[%s7511_s24 + $0xd08] sm:$0xff] }
 0x114   : > { %5114 = vmatpush1.bf16.msra.mxu0 %v5113_v4  ;;  %v632_v4 = vld [vmem:[%s7511_s24 + $0xb08] sm:$0xff]  ;;  %v693_v54 = vld [vmem:[%s7511_s24 + $0xcf0] sm:$0xff] }
 0x115   : > { %6138 = vmatpush1.bf16.msra.mxu1 %v6137_v6  ;;  %5116 = vmatprep.subr.bf16.mxu0 %v5115_v7  ;;  %v636_v6 = vld [vmem:[%s7511_s24 + $0xb28] sm:$0xff]  ;;  %v634_v7 = vld [vmem:[%s7511_s24 + $0xb18] sm:$0xff] }
 0x116   : > { %6140 = vmatprep.subr.bf16.mxu1 %v6139_v12  ;;  %v5135_v12 = vpack.c.bf16 %v636_v6, %v632_v4  ;;  %v6159_v16 = vpack.c.bf16 %v638_v8, %v634_v7  ;;  %v663_v4 = vld [vmem:[%s7511_s24 + $0xc00] sm:$0xff]  ;;  %v665_v7 = vld [vmem:[%s7511_s24 + $0xc10] sm:$0xff] }
 0x117   : > { %v667_v6 = vld [vmem:[%s7511_s24 + $0xc20] sm:$0xff] }
 0x118   : > { %5118 = vmatpush1.bf16.msra.mxu0 %v5117_v18  ;;  %v640_v18 = vld [vmem:[%s7511_s24 + $0xb48] sm:$0xff]  ;;  %v5153_v17 = vpack.c.bf16 %v667_v6, %v663_v4  ;;  %v701_v4 = vld [vmem:[%s7511_s24 + $0xd30] sm:$0xff] }
 0x119   : > { %6142 = vmatpush1.bf16.msra.mxu1 %v6141_v20  ;;  %5120 = vmatprep.subr.bf16.mxu0 %v5119_v21  ;;  %v644_v20 = vld [vmem:[%s7511_s24 + $0xb68] sm:$0xff]  ;;  %v642_v21 = vld [vmem:[%s7511_s24 + $0xb58] sm:$0xff] }
 0x11a   : > { %6144 = vmatprep.subr.bf16.mxu1 %v6143_v27  ;;  %v5139_v27 = vpack.c.bf16 %v644_v20, %v640_v18  ;;  %v6163_v31 = vpack.c.bf16 %v646_v22, %v642_v21  ;;  %v671_v21 = vld [vmem:[%s7511_s24 + $0xc40] sm:$0xff]  ;;  %v704_v6 = vld [vmem:[%s7511_s24 + $0xd48] sm:$0xff] }
 0x11b   : > { %v675_v22 = vld [vmem:[%s7511_s24 + $0xc60] sm:$0xff] }
 0x11c   : > { %5122 = vmatpush1.bf16.msra.mxu0 %v5121_v33  ;;  %v648_v33 = vld [vmem:[%s7511_s24 + $0xb88] sm:$0xff] }
 0x11d   : > { %6146 = vmatpush1.bf16.msra.mxu1 %v6145_v34  ;;  %5124 = vmatprep.subr.bf16.mxu0 %v5123_v36  ;;  %v652_v34 = vld [vmem:[%s7511_s24 + $0xba8] sm:$0xff]  ;;  %v650_v36 = vld [vmem:[%s7511_s24 + $0xb98] sm:$0xff] }
 0x11e   : > { %6148 = vmatprep.subr.bf16.mxu1 %v6147_v40  ;;  %v5143_v40 = vpack.c.bf16 %v652_v34, %v648_v33  ;;  %v6167_v44 = vpack.c.bf16 %v654_v37, %v650_v36  ;;  %v5157_v33 = vpack.c.bf16 %v675_v22, %v671_v21  ;;  %v5159_v36 = vpack.c.bf16 %v684_v29, %v680_v28  ;;  %v679_v37 = vld [vmem:[%s7511_s24 + $0xc80] sm:$0xff]  ;;  %v712_v21 = vld [vmem:[%s7511_s24 + $0xd88] sm:$0xff] }
 0x11f   : > { %v716_v22 = vld [vmem:[%s7511_s24 + $0xda8] sm:$0xff] }
 0x120   : > { %5126 = vmatpush1.bf16.msra.mxu0 %v5125_v47  ;;  %v656_v47 = vld [vmem:[%s7511_s24 + $0xbc8] sm:$0xff]  ;;  %v5175_v29 = vpack.c.bf16 %v716_v22, %v712_v21  ;;  %v743_v22 = vld [vmem:[%s7511_s24 + $0xe80] sm:$0xff] }
 0x121   : > { %6150 = vmatpush1.bf16.msra.mxu1 %v6149_v48  ;;  %5128 = vmatprep.subr.bf16.mxu0 %v5127_v49  ;;  %v660_v48 = vld [vmem:[%s7511_s24 + $0xbe8] sm:$0xff]  ;;  %v658_v49 = vld [vmem:[%s7511_s24 + $0xbd8] sm:$0xff] }
 0x122   : > { %6152 = vmatprep.subr.bf16.mxu1 %v6151_v53  ;;  %v5147_v53 = vpack.c.bf16 %v660_v48, %v656_v47  ;;  %v6171_v58 = vpack.c.bf16 %v662_v50, %v658_v49  ;;  %v5163_v49 = vpack.c.bf16 %v692_v43, %v688_v42  ;;  %v687_v50 = vld [vmem:[%s7511_s24 + $0xcc0] sm:$0xff] }
 0x123   : > { %v719_v43 = vld [vmem:[%s7511_s24 + $0xdc0] sm:$0xff] }
 0x124   : > { %5130 = vmatpush1.bf16.msra.mxu0 %v5129_v60  ;;  %v664_v60 = vld [vmem:[%s7511_s24 + $0xc08] sm:$0xff] }
 0x125   : > { %6154 = vmatpush1.bf16.msra.mxu1 %v6153_v61  ;;  %5132 = vmatprep.subr.bf16.mxu0 %v5131_v62  ;;  %v668_v61 = vld [vmem:[%s7511_s24 + $0xc28] sm:$0xff]  ;;  %v666_v62 = vld [vmem:[%s7511_s24 + $0xc18] sm:$0xff] }
 0x126   : > { %6156 = vmatprep.subr.bf16.mxu1 %v6155_v2  ;;  %v6173_v2 = vpack.c.bf16 %v661_v59, %v657_v57  ;;  %v5151_v3 = vpack.c.bf16 %v668_v61, %v664_v60  ;;  %v6175_v8 = vpack.c.bf16 %v670_v63, %v666_v62  ;;  %v700_v57 = vld [vmem:[%s7511_s24 + $0xd28] sm:$0xff]  ;;  %v702_v59 = vld [vmem:[%s7511_s24 + $0xd38] sm:$0xff]  ;;  %v695_v63 = vld [vmem:[%s7511_s24 + $0xd00] sm:$0xff] }
 0x127   : > { %v5167_v62 = vpack.c.bf16 %v700_v57, %v696_v55  ;;  %v727_v57 = vld [vmem:[%s7511_s24 + $0xe00] sm:$0xff] }
 0x128   : > { %5134 = vmatpush1.bf16.msra.mxu0 %v5133_v9  ;;  %v669_v9 = vld [vmem:[%s7511_s24 + $0xc30] sm:$0xff] }
 0x129   : > { %6158 = vmatpush1.bf16.msra.mxu1 %v6157_v10  ;;  %5136 = vmatprep.subr.bf16.mxu0 %v5135_v12  ;;  %v672_v10 = vld [vmem:[%s7511_s24 + $0xc48] sm:$0xff]  ;;  %v6177_v18 = vpack.c.bf16 %v669_v9, %v665_v7  ;;  %v710_v9 = vld [vmem:[%s7511_s24 + $0xd78] sm:$0xff] }
 0x12a   : > { %6160 = vmatprep.subr.bf16.mxu1 %v6159_v16  ;;  %v676_v12 = vld [vmem:[%s7511_s24 + $0xc68] sm:$0xff]  ;;  %v678_v16 = vld [vmem:[%s7511_s24 + $0xc78] sm:$0xff] }
 0x12b   : > { %v5155_v20 = vpack.c.bf16 %v676_v12, %v672_v10  ;;  %v708_v7 = vld [vmem:[%s7511_s24 + $0xd68] sm:$0xff] }
 0x12c   : > { %5138 = vmatpush1.bf16.msra.mxu0 %v5137_v25  ;;  %v673_v25 = vld [vmem:[%s7511_s24 + $0xc50] sm:$0xff] }
 0x12d   : > { %6162 = vmatpush1.bf16.msra.mxu1 %v6161_v26  ;;  %5140 = vmatprep.subr.bf16.mxu0 %v5139_v27  ;;  %v6179_v26 = vpack.c.bf16 %v678_v16, %v674_v15  ;;  %v677_v27 = vld [vmem:[%s7511_s24 + $0xc70] sm:$0xff]  ;;  %v703_v15 = vld [vmem:[%s7511_s24 + $0xd40] sm:$0xff] }
 0x12e   : > { %6164 = vmatprep.subr.bf16.mxu1 %v6163_v31  ;;  %v682_v31 = vld [vmem:[%s7511_s24 + $0xc98] sm:$0xff]  ;;  %v6181_v34 = vpack.c.bf16 %v677_v27, %v673_v25  ;;  %v707_v16 = vld [vmem:[%s7511_s24 + $0xd60] sm:$0xff] }
 0x12f   : > { %v714_v25 = vld [vmem:[%s7511_s24 + $0xd98] sm:$0xff]  ;;  %v5173_v27 = vpack.c.bf16 %v707_v16, %v703_v15  ;;  %v748_v15 = vld [vmem:[%s7511_s24 + $0xea8] sm:$0xff] }
 0x130   : > { %5142 = vmatpush1.bf16.msra.mxu0 %v5141_v38  ;;  %v683_v38 = vld [vmem:[%s7511_s24 + $0xca0] sm:$0xff]  ;;  %v746_v16 = vld [vmem:[%s7511_s24 + $0xe98] sm:$0xff] }
 0x131   : > { %6166 = vmatpush1.bf16.msra.mxu1 %v6165_v39  ;;  %5144 = vmatprep.subr.bf16.mxu0 %v5143_v40  ;;  %v681_v39 = vld [vmem:[%s7511_s24 + $0xc90] sm:$0xff]  ;;  %v6183_v40 = vpack.c.bf16 %v686_v32, %v682_v31  ;;  %v5161_v47 = vpack.c.bf16 %v683_v38, %v679_v37  ;;  %v715_v31 = vld [vmem:[%s7511_s24 + $0xda0] sm:$0xff]  ;;  %v724_v37 = vld [vmem:[%s7511_s24 + $0xde8] sm:$0xff] }
 0x132   : > { %6168 = vmatprep.subr.bf16.mxu1 %v6167_v44  ;;  %v690_v44 = vld [vmem:[%s7511_s24 + $0xcd8] sm:$0xff]  ;;  %v6185_v48 = vpack.c.bf16 %v685_v41, %v681_v39  ;;  %v713_v32 = vld [vmem:[%s7511_s24 + $0xd90] sm:$0xff] }
 0x133   : > { %v722_v38 = vld [vmem:[%s7511_s24 + $0xdd8] sm:$0xff] }
 0x134   : > { %5146 = vmatpush1.bf16.msra.mxu0 %v5145_v51  ;;  %v691_v51 = vld [vmem:[%s7511_s24 + $0xce0] sm:$0xff]  ;;  %v726_v39 = vld [vmem:[%s7511_s24 + $0xdf8] sm:$0xff] }
 0x135   : > { %6170 = vmatpush1.bf16.msra.mxu1 %v6169_v52  ;;  %5148 = vmatprep.subr.bf16.mxu0 %v5147_v53  ;;  %v689_v52 = vld [vmem:[%s7511_s24 + $0xcd0] sm:$0xff]  ;;  %v6187_v53 = vpack.c.bf16 %v694_v45, %v690_v44  ;;  %v5165_v60 = vpack.c.bf16 %v691_v51, %v687_v50  ;;  %v723_v44 = vld [vmem:[%s7511_s24 + $0xde0] sm:$0xff]  ;;  %v732_v50 = vld [vmem:[%s7511_s24 + $0xe28] sm:$0xff] }
 0x136   : > { %6172 = vmatprep.subr.bf16.mxu1 %v6171_v58  ;;  %v698_v58 = vld [vmem:[%s7511_s24 + $0xd18] sm:$0xff]  ;;  %v6189_v61 = vpack.c.bf16 %v693_v54, %v689_v52  ;;  %v721_v45 = vld [vmem:[%s7511_s24 + $0xdd0] sm:$0xff] }
 0x137   : > { %v730_v51 = vld [vmem:[%s7511_s24 + $0xe18] sm:$0xff] }
 0x138   : > { %5150 = vmatpush1.bf16.msra.mxu0 %v5149_v1  ;;  %v699_v1 = vld [vmem:[%s7511_s24 + $0xd20] sm:$0xff]  ;;  %v734_v52 = vld [vmem:[%s7511_s24 + $0xe38] sm:$0xff] }
 0x139   : > { %6174 = vmatpush1.bf16.msra.mxu1 %v6173_v2  ;;  %5152 = vmatprep.subr.bf16.mxu0 %v5151_v3  ;;  %v697_v2 = vld [vmem:[%s7511_s24 + $0xd10] sm:$0xff]  ;;  %v6191_v3 = vpack.c.bf16 %v702_v59, %v698_v58  ;;  %v5169_v10 = vpack.c.bf16 %v699_v1, %v695_v63  ;;  %v731_v58 = vld [vmem:[%s7511_s24 + $0xe20] sm:$0xff]  ;;  %v740_v63 = vld [vmem:[%s7511_s24 + $0xe68] sm:$0xff] }
 0x13a   : > { %6176 = vmatprep.subr.bf16.mxu1 %v6175_v8  ;;  %v706_v8 = vld [vmem:[%s7511_s24 + $0xd58] sm:$0xff]  ;;  %v6193_v12 = vpack.c.bf16 %v701_v4, %v697_v2  ;;  %v729_v59 = vld [vmem:[%s7511_s24 + $0xe10] sm:$0xff] }
 0x13b   : > { %2720 = vmatmul.mubr.f32.vlgmr.msra.gmra.mrb[0].mxu0 %v2351_v14  ;;  %v738_v1 = vld [vmem:[%s7511_s24 + $0xe58] sm:$0xff] }
 0x13c   : > { %5154 = vmatpush1.bf16.msra.mxu0 %v5153_v17  ;;  %3856 = vmatmul.mubr.f32.vlgmr.msra.gmra.mrb[0].mxu1 %v2351_v14  ;;  %v5171_v14 = vpack.c.bf16 %v708_v7, %v704_v6  ;;  %v705_v17 = vld [vmem:[%s7511_s24 + $0xd50] sm:$0xff]  ;;  %v742_v2 = vld [vmem:[%s7511_s24 + $0xe78] sm:$0xff]  ;;  %v735_v7 = vld [vmem:[%s7511_s24 + $0xe40] sm:$0xff] }
 0x13d   : > { %6178 = vmatpush1.bf16.msra.mxu1 %v6177_v18  ;;  %5156 = vmatprep.subr.bf16.mxu0 %v5155_v20  ;;  %v6195_v18 = vpack.c.bf16 %v710_v9, %v706_v8  ;;  %v709_v20 = vld [vmem:[%s7511_s24 + $0xd70] sm:$0xff]  ;;  %v739_v8 = vld [vmem:[%s7511_s24 + $0xe60] sm:$0xff] }
 0x13e   : > { %6180 = vmatprep.subr.bf16.mxu1 %v6179_v26  ;;  %2790 = vmatprep.mubr.f32.mxu0 %v2363_v30  ;;  %v718_v26 = vld [vmem:[%s7511_s24 + $0xdb8] sm:$0xff]  ;;  %v6197_v28 = vpack.c.bf16 %v709_v20, %v705_v17  ;;  %v737_v9 = vld [vmem:[%s7511_s24 + $0xe50] sm:$0xff] }
 0x13f   : > { %3926 = vmatprep.mubr.f32.mxu1 %v2363_v30  ;;  %v711_v30 = vld [vmem:[%s7511_s24 + $0xd80] sm:$0xff]  ;;  %v750_v17 = vld [vmem:[%s7511_s24 + $0xeb8] sm:$0xff] }
 0x140   : > { %5158 = vmatpush1.bf16.msra.mxu0 %v5157_v33  ;;  %v6199_v33 = vpack.c.bf16 %v718_v26, %v714_v25  ;;  %v747_v25 = vld [vmem:[%s7511_s24 + $0xea0] sm:$0xff]  ;;  %v745_v26 = vld [vmem:[%s7511_s24 + $0xe90] sm:$0xff] }
 0x141   : > { %6182 = vmatpush1.bf16.msra.mxu1 %v6181_v34  ;;  %5160 = vmatprep.subr.bf16.mxu0 %v5159_v36  ;;  %v717_v34 = vld [vmem:[%s7511_s24 + $0xdb0] sm:$0xff]  ;;  %v720_v36 = vld [vmem:[%s7511_s24 + $0xdc8] sm:$0xff] }
 0x142   : > { %6184 = vmatprep.subr.bf16.mxu1 %v6183_v40  ;;  %v5177_v40 = vpack.c.bf16 %v715_v31, %v711_v30  ;;  %v6201_v41 = vpack.c.bf16 %v717_v34, %v713_v32  ;;  %v5179_v42 = vpack.c.bf16 %v724_v37, %v720_v36  ;;  %v756_v30 = vld [vmem:[%s7511_s24 + $0xee8] sm:$0xff]  ;;  %v754_v31 = vld [vmem:[%s7511_s24 + $0xed8] sm:$0xff]  ;;  %v751_v37 = vld [vmem:[%s7511_s24 + $0xec0] sm:$0xff] }
 0x143   : > { %v758_v32 = vld [vmem:[%s7511_s24 + $0xef8] sm:$0xff] }
 0x144   : > { %5162 = vmatpush1.bf16.msra.mxu0 %v5161_v47  ;;  %v6203_v47 = vpack.c.bf16 %v726_v39, %v722_v38  ;;  %v755_v38 = vld [vmem:[%s7511_s24 + $0xee0] sm:$0xff]  ;;  %v753_v39 = vld [vmem:[%s7511_s24 + $0xed0] sm:$0xff] }
 0x145   : > { %6186 = vmatpush1.bf16.msra.mxu1 %v6185_v48  ;;  %5164 = vmatprep.subr.bf16.mxu0 %v5163_v49  ;;  %v725_v48 = vld [vmem:[%s7511_s24 + $0xdf0] sm:$0xff]  ;;  %v728_v49 = vld [vmem:[%s7511_s24 + $0xe08] sm:$0xff] }
 0x146   : > { %6188 = vmatprep.subr.bf16.mxu1 %v6187_v53  ;;  %v5181_v53 = vpack.c.bf16 %v723_v44, %v719_v43  ;;  %v6205_v54 = vpack.c.bf16 %v725_v48, %v721_v45  ;;  %v5183_v55 = vpack.c.bf16 %v732_v50, %v728_v49  ;;  %v764_v43 = vld [vmem:[%s7511_s24 + $0xf28] sm:$0xff]  ;;  %v762_v44 = vld [vmem:[%s7511_s24 + $0xf18] sm:$0xff]  ;;  %v759_v50 = vld [vmem:[%s7511_s24 + $0xf00] sm:$0xff] }
 0x147   : > { %v766_v45 = vld [vmem:[%s7511_s24 + $0xf38] sm:$0xff] }
 0x148   : > { %5166 = vmatpush1.bf16.msra.mxu0 %v5165_v60  ;;  %v6207_v60 = vpack.c.bf16 %v734_v52, %v730_v51  ;;  %v763_v51 = vld [vmem:[%s7511_s24 + $0xf20] sm:$0xff]  ;;  %v761_v52 = vld [vmem:[%s7511_s24 + $0xf10] sm:$0xff] }
 0x149   : > { %6190 = vmatpush1.bf16.msra.mxu1 %v6189_v61  ;;  %5168 = vmatprep.subr.bf16.mxu0 %v5167_v62  ;;  %v733_v61 = vld [vmem:[%s7511_s24 + $0xe30] sm:$0xff]  ;;  %v736_v62 = vld [vmem:[%s7511_s24 + $0xe48] sm:$0xff] }
 0x14a   : > { %6192 = vmatprep.subr.bf16.mxu1 %v6191_v3  ;;  %v5185_v3 = vpack.c.bf16 %v731_v58, %v727_v57  ;;  %v6209_v4 = vpack.c.bf16 %v733_v61, %v729_v59  ;;  %v5187_v6 = vpack.c.bf16 %v740_v63, %v736_v62  ;;  %v772_v57 = vld [vmem:[%s7511_s24 + $0xf68] sm:$0xff]  ;;  %v770_v58 = vld [vmem:[%s7511_s24 + $0xf58] sm:$0xff]  ;;  %v767_v63 = vld [vmem:[%s7511_s24 + $0xf40] sm:$0xff] }
 0x14b   : > { %v774_v59 = vld [vmem:[%s7511_s24 + $0xf78] sm:$0xff] }
 0x14c   : > { %5170 = vmatpush1.bf16.msra.mxu0 %v5169_v10  ;;  %v6211_v10 = vpack.c.bf16 %v742_v2, %v738_v1  ;;  %v771_v1 = vld [vmem:[%s7511_s24 + $0xf60] sm:$0xff]  ;;  %v769_v2 = vld [vmem:[%s7511_s24 + $0xf50] sm:$0xff] }
 0x14d   : > { %6194 = vmatpush1.bf16.msra.mxu1 %v6193_v12  ;;  %5172 = vmatprep.subr.bf16.mxu0 %v5171_v14  ;;  %v741_v12 = vld [vmem:[%s7511_s24 + $0xe70] sm:$0xff]  ;;  %v744_v14 = vld [vmem:[%s7511_s24 + $0xe88] sm:$0xff] }
 0x14e   : > { %6196 = vmatprep.subr.bf16.mxu1 %v6195_v18  ;;  %v5189_v18 = vpack.c.bf16 %v739_v8, %v735_v7  ;;  %v6213_v20 = vpack.c.bf16 %v741_v12, %v737_v9  ;;  %v5191_v21 = vpack.c.bf16 %v748_v15, %v744_v14  ;;  %v780_v7 = vld [vmem:[%s7511_s24 + $0xfa8] sm:$0xff]  ;;  %v778_v8 = vld [vmem:[%s7511_s24 + $0xf98] sm:$0xff]  ;;  %v775_v15 = vld [vmem:[%s7511_s24 + $0xf80] sm:$0xff] }
 0x14f   : > { %v782_v9 = vld [vmem:[%s7511_s24 + $0xfb8] sm:$0xff] }
 0x150   : > { %5174 = vmatpush1.bf16.msra.mxu0 %v5173_v27  ;;  %v6215_v27 = vpack.c.bf16 %v750_v17, %v746_v16  ;;  %v779_v16 = vld [vmem:[%s7511_s24 + $0xfa0] sm:$0xff]  ;;  %v777_v17 = vld [vmem:[%s7511_s24 + $0xf90] sm:$0xff] }
 0x151   : > { %6198 = vmatpush1.bf16.msra.mxu1 %v6197_v28  ;;  %5176 = vmatprep.subr.bf16.mxu0 %v5175_v29  ;;  %v749_v28 = vld [vmem:[%s7511_s24 + $0xeb0] sm:$0xff]  ;;  %v752_v29 = vld [vmem:[%s7511_s24 + $0xec8] sm:$0xff] }
 0x152   : > { %6200 = vmatprep.subr.bf16.mxu1 %v6199_v33  ;;  %v5193_v33 = vpack.c.bf16 %v747_v25, %v743_v22  ;;  %v6217_v34 = vpack.c.bf16 %v749_v28, %v745_v26  ;;  %v5195_v36 = vpack.c.bf16 %v756_v30, %v752_v29  ;;  %v788_v22 = vld [vmem:[%s7511_s24 + $0xfe8] sm:$0xff]  ;;  %v786_v25 = vld [vmem:[%s7511_s24 + $0xfd8] sm:$0xff]  ;;  %v783_v28 = vld [vmem:[%s7511_s24 + $0xfc0] sm:$0xff] }
 0x153   : > { %v790_v26 = vld [vmem:[%s7511_s24 + $0xff8] sm:$0xff] }
 0x154   : > { %5178 = vmatpush1.bf16.msra.mxu0 %v5177_v40  ;;  %v6219_v40 = vpack.c.bf16 %v758_v32, %v754_v31  ;;  %v787_v31 = vld [vmem:[%s7511_s24 + $0xfe0] sm:$0xff]  ;;  %v785_v32 = vld [vmem:[%s7511_s24 + $0xfd0] sm:$0xff] }
 0x155   : > { %6202 = vmatpush1.bf16.msra.mxu1 %v6201_v41  ;;  %5180 = vmatprep.subr.bf16.mxu0 %v5179_v42  ;;  %v757_v41 = vld [vmem:[%s7511_s24 + $0xef0] sm:$0xff]  ;;  %v760_v42 = vld [vmem:[%s7511_s24 + $0xf08] sm:$0xff] }
 0x156   : > { %6204 = vmatprep.subr.bf16.mxu1 %v6203_v47  ;;  %v5197_v47 = vpack.c.bf16 %v755_v38, %v751_v37  ;;  %v6221_v48 = vpack.c.bf16 %v757_v41, %v753_v39  ;;  %v5199_v49 = vpack.c.bf16 %v764_v43, %v760_v42  ;;  %v796_v37 = vld [vmem:[%s7511_s24 + $0x1028] sm:$0xff]  ;;  %v794_v38 = vld [vmem:[%s7511_s24 + $0x1018] sm:$0xff]  ;;  %v5213_v43 = vpack.c.bf16 %v787_v31, %v783_v28  ;;  %v817_v31 = vld [vmem:[%s7511_s24 + $0x10d0] sm:$0xff] }
 0x157   : > { %v798_v39 = vld [vmem:[%s7511_s24 + $0x1038] sm:$0xff]  ;;  %v268_v41 = vld [vmem:[#allocation2 + $0x8] sm:$0xff] }
 0x158   : > { %5182 = vmatpush1.bf16.msra.mxu0 %v5181_v53  ;;  %v6223_v53 = vpack.c.bf16 %v766_v45, %v762_v44  ;;  %v272_v42 = vld [vmem:[%s9732_s1 + $0x8] sm:$0xff] }
 0x159   : > { %6206 = vmatpush1.bf16.msra.mxu1 %v6205_v54  ;;  %5184 = vmatprep.subr.bf16.mxu0 %v5183_v55  ;;  %v765_v54 = vld [vmem:[%s7511_s24 + $0xf30] sm:$0xff]  ;;  %v768_v55 = vld [vmem:[%s7511_s24 + $0xf48] sm:$0xff] }
 0x15a   : > { %6208 = vmatprep.subr.bf16.mxu1 %v6207_v60  ;;  %v5201_v60 = vpack.c.bf16 %v763_v51, %v759_v50  ;;  %v6225_v61 = vpack.c.bf16 %v765_v54, %v761_v52  ;;  %v5203_v62 = vpack.c.bf16 %v772_v57, %v768_v55  ;;  %v6239_v50 = vpack.c.bf16 %v798_v39, %v794_v38  ;;  %v797_v51 = vld [vmem:[%s7511_s24 + $0x1030] sm:$0xff]  ;;  %v800_v52 = vld [vmem:[%s7511_s24 + $0x1048] sm:$0xff]  ;;  %v802_v57 = vld [vmem:[%s7511_s24 + $0x1058] sm:$0xff] }
 0x15b   : > { %v8088_v54 = vmul.f32 %v272_v42, %v268_v41  ;;  %v830_v38 = vld [vmem:[%s7511_s24 + $0x1138] sm:$0xff] }
 0x15c   : > { %5186 = vmatpush1.bf16.msra.mxu0 %v5185_v3  ;;  %v6227_v3 = vpack.c.bf16 %v774_v59, %v770_v58  ;;  %v806_v58 = vld [vmem:[%s7511_s24 + $0x1078] sm:$0xff] }
 0x15d   : > { %6210 = vmatpush1.bf16.msra.mxu1 %v6209_v4  ;;  %5188 = vmatprep.subr.bf16.mxu0 %v5187_v6  ;;  %v773_v4 = vld [vmem:[%s7511_s24 + $0xf70] sm:$0xff]  ;;  %v776_v6 = vld [vmem:[%s7511_s24 + $0xf88] sm:$0xff] }
 0x15e   : > { %6212 = vmatprep.subr.bf16.mxu1 %v6211_v10  ;;  %v5205_v10 = vpack.c.bf16 %v771_v1, %v767_v63  ;;  %v6229_v12 = vpack.c.bf16 %v773_v4, %v769_v2  ;;  %v5207_v14 = vpack.c.bf16 %v780_v7, %v776_v6  ;;  %v803_v63 = vld [vmem:[%s7511_s24 + $0x1060] sm:$0xff]  ;;  %v801_v1 = vld [vmem:[%s7511_s24 + $0x1050] sm:$0xff]  ;;  %v6243_v2 = vpack.c.bf16 %v806_v58, %v802_v57  ;;  %v812_v4 = vld [vmem:[%s7511_s24 + $0x10a8] sm:$0xff] }
 0x15f   : > { %v2371_v6 = vrot.slane %v8088_v54, %v7619_v19  ;;  %v810_v7 = vld [vmem:[%s7511_s24 + $0x1098] sm:$0xff]  ;;  %v831_v58 = vld [vmem:[%s7511_s24 + $0x1140] sm:$0xff] }
 0x160   : > { %5190 = vmatpush1.bf16.msra.mxu0 %v5189_v18  ;;  %v6231_v18 = vpack.c.bf16 %v782_v9, %v778_v8  ;;  %v814_v8 = vld [vmem:[%s7511_s24 + $0x10b8] sm:$0xff] }
 0x161   : > { %6214 = vmatpush1.bf16.msra.mxu1 %v6213_v20  ;;  %5192 = vmatprep.subr.bf16.mxu0 %v5191_v21  ;;  %v781_v20 = vld [vmem:[%s7511_s24 + $0xfb0] sm:$0xff]  ;;  %v784_v21 = vld [vmem:[%s7511_s24 + $0xfc8] sm:$0xff] }
 0x162   : > { %6216 = vmatprep.subr.bf16.mxu1 %v6215_v27  ;;  %v5209_v27 = vpack.c.bf16 %v779_v16, %v775_v15  ;;  %v6233_v29 = vpack.c.bf16 %v781_v20, %v777_v17  ;;  %v5211_v30 = vpack.c.bf16 %v788_v22, %v784_v21  ;;  %v811_v15 = vld [vmem:[%s7511_s24 + $0x10a0] sm:$0xff]  ;;  %v809_v16 = vld [vmem:[%s7511_s24 + $0x1090] sm:$0xff]  ;;  %v6247_v17 = vpack.c.bf16 %v814_v8, %v810_v7  ;;  %v816_v20 = vld [vmem:[%s7511_s24 + $0x10c8] sm:$0xff] }
 0x163   : > { %v820_v21 = vld [vmem:[%s7511_s24 + $0x10e8] sm:$0xff]  ;;  %v818_v22 = vld [vmem:[%s7511_s24 + $0x10d8] sm:$0xff]  ;;  %v839_v7 = vld [vmem:[%s7511_s24 + $0x1180] sm:$0xff] }
 0x164   : > { %5194 = vmatpush1.bf16.msra.mxu0 %v5193_v33  ;;  %v789_v33 = vld [vmem:[%s7511_s24 + $0xff0] sm:$0xff]  ;;  %v5227_v28 = vpack.c.bf16 %v820_v21, %v816_v20  ;;  %v843_v8 = vld [vmem:[%s7511_s24 + $0x11a0] sm:$0xff] }
 0x165   : > { %6218 = vmatpush1.bf16.msra.mxu1 %v6217_v34  ;;  %5196 = vmatprep.subr.bf16.mxu0 %v5195_v36  ;;  %v6235_v34 = vpack.c.bf16 %v790_v26, %v786_v25  ;;  %v792_v36 = vld [vmem:[%s7511_s24 + $0x1008] sm:$0xff]  ;;  %v6237_v44 = vpack.c.bf16 %v789_v33, %v785_v32  ;;  %v822_v25 = vld [vmem:[%s7511_s24 + $0x10f8] sm:$0xff]  ;;  %v821_v33 = vld [vmem:[%s7511_s24 + $0x10f0] sm:$0xff] }
 0x166   : > { %6220 = vmatprep.subr.bf16.mxu1 %v6219_v40  ;;  %v8077_v40 = vsub.s32 6, %v7608_v5  ;;  %v5215_v45 = vpack.c.bf16 %v796_v37, %v792_v36  ;;  %v6251_v32 = vpack.c.bf16 %v822_v25, %v818_v22  ;;  %v828_v36 = vld [vmem:[%s7511_s24 + $0x1128] sm:$0xff]  ;;  %v826_v37 = vld [vmem:[%s7511_s24 + $0x1118] sm:$0xff]  ;;  %v6253_v41 = vpack.c.bf16 %v821_v33, %v817_v31  ;;  %v847_v22 = vld [vmem:[%s7511_s24 + $0x11c0] sm:$0xff] }
 0x167   : > { %v851_v25 = vld [vmem:[%s7511_s24 + $0x11e0] sm:$0xff]  ;;  %v858_v31 = vld [vmem:[%s7511_s24 + $0x1218] sm:$0xff] }
 0x168   : > { %5198 = vmatpush1.bf16.msra.mxu0 %v5197_v47  ;;  %v791_v47 = vld [vmem:[%s7511_s24 + $0x1000] sm:$0xff]  ;;  %v2359_v55 = vrot.slane %v7626_v24, %v8077_v40  ;;  %v808_v24 = vld [vmem:[%s7511_s24 + $0x1088] sm:$0xff]  ;;  %v5245_v33 = vpack.c.bf16 %v851_v25, %v847_v22 }
 0x169   : > { %6222 = vmatpush1.bf16.msra.mxu1 %v6221_v48  ;;  %5200 = vmatprep.subr.bf16.mxu0 %v5199_v49  ;;  %v795_v48 = vld [vmem:[%s7511_s24 + $0x1020] sm:$0xff]  ;;  %v793_v49 = vld [vmem:[%s7511_s24 + $0x1010] sm:$0xff]  ;;  %v888_v22 = vld [vmem:[%s7511_s24 + $0x1308] sm:$0xff] }
 0x16a   : > { %6224 = vmatprep.subr.bf16.mxu1 %v6223_v53  ;;  %v804_v53 = vld [vmem:[%s7511_s24 + $0x1068] sm:$0xff]  ;;  %v5217_v59 = vpack.c.bf16 %v795_v48, %v791_v47  ;;  %v6255_v47 = vpack.c.bf16 %v830_v38, %v826_v37  ;;  %v829_v48 = vld [vmem:[%s7511_s24 + $0x1130] sm:$0xff]  ;;  %v855_v37 = vld [vmem:[%s7511_s24 + $0x1200] sm:$0xff] }
 0x16b   : > { %v859_v38 = vld [vmem:[%s7511_s24 + $0x1220] sm:$0xff]  ;;  %v892_v25 = vld [vmem:[%s7511_s24 + $0x1328] sm:$0xff] }
 0x16c   : > { %5202 = vmatpush1.bf16.msra.mxu0 %v5201_v60  ;;  %v6241_v60 = vpack.c.bf16 %v797_v51, %v793_v49  ;;  %v832_v49 = vld [vmem:[%s7511_s24 + $0x1148] sm:$0xff]  ;;  %v834_v51 = vld [vmem:[%s7511_s24 + $0x1158] sm:$0xff] }
 0x16d   : > { %6226 = vmatpush1.bf16.msra.mxu1 %v6225_v61  ;;  %5204 = vmatprep.subr.bf16.mxu0 %v5203_v62  ;;  %v5219_v61 = vpack.c.bf16 %v804_v53, %v800_v52  ;;  %v799_v62 = vld [vmem:[%s7511_s24 + $0x1040] sm:$0xff]  ;;  %v838_v52 = vld [vmem:[%s7511_s24 + $0x1178] sm:$0xff] }
 0x16e   : > { %6228 = vmatprep.subr.bf16.mxu1 %v6227_v3  ;;  %v805_v3 = vld [vmem:[%s7511_s24 + $0x1070] sm:$0xff]  ;;  %v5221_v9 = vpack.c.bf16 %v803_v63, %v799_v62  ;;  %v840_v63 = vld [vmem:[%s7511_s24 + $0x1188] sm:$0xff] }
 0x16f   : > { %v837_v62 = vld [vmem:[%s7511_s24 + $0x1170] sm:$0xff] }
 0x170   : > { %5206 = vmatpush1.bf16.msra.mxu0 %v5205_v10  ;;  %v6245_v10 = vpack.c.bf16 %v805_v3, %v801_v1  ;;  %v844_v1 = vld [vmem:[%s7511_s24 + $0x11a8] sm:$0xff]  ;;  %v846_v3 = vld [vmem:[%s7511_s24 + $0x11b8] sm:$0xff] }
 0x171   : > { %6230 = vmatpush1.bf16.msra.mxu1 %v6229_v12  ;;  %5208 = vmatprep.subr.bf16.mxu0 %v5207_v14  ;;  %v5223_v12 = vpack.c.bf16 %v812_v4, %v808_v24  ;;  %v807_v14 = vld [vmem:[%s7511_s24 + $0x1080] sm:$0xff] }
 0x172   : > { %6232 = vmatprep.subr.bf16.mxu1 %v6231_v18  ;;  %v813_v18 = vld [vmem:[%s7511_s24 + $0x10b0] sm:$0xff]  ;;  %v5225_v26 = vpack.c.bf16 %v811_v15, %v807_v14  ;;  %v848_v14 = vld [vmem:[%s7511_s24 + $0x11c8] sm:$0xff] }
 0x173   : > { %v852_v15 = vld [vmem:[%s7511_s24 + $0x11e8] sm:$0xff] }
 0x174   : > { %5210 = vmatpush1.bf16.msra.mxu0 %v5209_v27  ;;  %v6249_v27 = vpack.c.bf16 %v813_v18, %v809_v16  ;;  %v850_v16 = vld [vmem:[%s7511_s24 + $0x11d8] sm:$0xff]  ;;  %v5241_v18 = vpack.c.bf16 %v843_v8, %v839_v7  ;;  %v5243_v21 = vpack.c.bf16 %v852_v15, %v848_v14  ;;  %v880_v7 = vld [vmem:[%s7511_s24 + $0x12c8] sm:$0xff] }
 0x175   : > { %6234 = vmatpush1.bf16.msra.mxu1 %v6233_v29  ;;  %5212 = vmatprep.subr.bf16.mxu0 %v5211_v30  ;;  %v815_v29 = vld [vmem:[%s7511_s24 + $0x10c0] sm:$0xff]  ;;  %v884_v8 = vld [vmem:[%s7511_s24 + $0x12e8] sm:$0xff] }
 0x176   : > { %6236 = vmatprep.subr.bf16.mxu1 %v6235_v34  ;;  %v819_v30 = vld [vmem:[%s7511_s24 + $0x10e0] sm:$0xff]  ;;  %v824_v34 = vld [vmem:[%s7511_s24 + $0x1108] sm:$0xff]  ;;  %v5259_v15 = vpack.c.bf16 %v884_v8, %v880_v7 }
 0x177   : > { %v5229_v39 = vpack.c.bf16 %v819_v30, %v815_v29  ;;  %v5231_v42 = vpack.c.bf16 %v828_v36, %v824_v34  ;;  %v856_v29 = vld [vmem:[%s7511_s24 + $0x1208] sm:$0xff] }
 0x178   : > { %5214 = vmatpush1.bf16.msra.mxu0 %v5213_v43  ;;  %v823_v43 = vld [vmem:[%s7511_s24 + $0x1100] sm:$0xff]  ;;  %v860_v30 = vld [vmem:[%s7511_s24 + $0x1228] sm:$0xff] }
 0x179   : > { %6238 = vmatpush1.bf16.msra.mxu1 %v6237_v44  ;;  %5216 = vmatprep.subr.bf16.mxu0 %v5215_v45  ;;  %v827_v44 = vld [vmem:[%s7511_s24 + $0x1120] sm:$0xff]  ;;  %v825_v45 = vld [vmem:[%s7511_s24 + $0x1110] sm:$0xff]  ;;  %v5247_v36 = vpack.c.bf16 %v860_v30, %v856_v29  ;;  %v5263_v30 = vpack.c.bf16 %v892_v25, %v888_v22 }
 0x17a   : > { %6240 = vmatprep.subr.bf16.mxu1 %v6239_v50  ;;  %v836_v50 = vld [vmem:[%s7511_s24 + $0x1168] sm:$0xff]  ;;  %v5233_v53 = vpack.c.bf16 %v827_v44, %v823_v43 }
 0x17b   : > { %2791 = vmatmul.mubr.f32.vlgmr.msra.gmra.mrb[0].mxu0 %v2359_v55  ;;  %v5235_v57 = vpack.c.bf16 %v836_v50, %v832_v49  ;;  %v864_v43 = vld [vmem:[%s7511_s24 + $0x1248] sm:$0xff] }
 0x17c   : > { %5218 = vmatpush1.bf16.msra.mxu0 %v5217_v59  ;;  %3927 = vmatmul.mubr.f32.vlgmr.msra.gmra.mrb[0].mxu1 %v2359_v55  ;;  %v6257_v55 = vpack.c.bf16 %v829_v48, %v825_v45  ;;  %v835_v59 = vld [vmem:[%s7511_s24 + $0x1160] sm:$0xff]  ;;  %v868_v44 = vld [vmem:[%s7511_s24 + $0x1268] sm:$0xff]  ;;  %v866_v45 = vld [vmem:[%s7511_s24 + $0x1258] sm:$0xff]  ;;  %v5249_v48 = vpack.c.bf16 %v859_v38, %v855_v37 }
 0x17d   : > { %6242 = vmatpush1.bf16.msra.mxu1 %v6241_v60  ;;  %5220 = vmatprep.subr.bf16.mxu0 %v5219_v61  ;;  %v833_v60 = vld [vmem:[%s7511_s24 + $0x1150] sm:$0xff]  ;;  %v6259_v61 = vpack.c.bf16 %v838_v52, %v834_v51  ;;  %v5237_v24 = vpack.c.bf16 %v835_v59, %v831_v58  ;;  %v5251_v50 = vpack.c.bf16 %v868_v44, %v864_v43  ;;  %v863_v51 = vld [vmem:[%s7511_s24 + $0x1240] sm:$0xff]  ;;  %v872_v58 = vld [vmem:[%s7511_s24 + $0x1288] sm:$0xff] }
 0x17e   : > { %6244 = vmatprep.subr.bf16.mxu1 %v6243_v2  ;;  %2861 = vmatprep.mubr.f32.mxu0 %v2371_v6  ;;  %v842_v2 = vld [vmem:[%s7511_s24 + $0x1198] sm:$0xff]  ;;  %v6261_v4 = vpack.c.bf16 %v837_v62, %v833_v60  ;;  %v867_v52 = vld [vmem:[%s7511_s24 + $0x1260] sm:$0xff]  ;;  %v876_v59 = vld [vmem:[%s7511_s24 + $0x12a8] sm:$0xff] }
 0x17f   : > { %3997 = vmatprep.mubr.f32.mxu1 %v2371_v6  ;;  %v5239_v6 = vpack.c.bf16 %v844_v1, %v840_v63  ;;  %v874_v60 = vld [vmem:[%s7511_s24 + $0x1298] sm:$0xff]  ;;  %v5253_v62 = vpack.c.bf16 %v867_v52, %v863_v51  ;;  %v5255_v1 = vpack.c.bf16 %v876_v59, %v872_v58  ;;  %v896_v37 = vld [vmem:[%s7511_s24 + $0x1348] sm:$0xff] }
 0x180   : > { %5222 = vmatpush1.bf16.msra.mxu0 %v5221_v9  ;;  %v841_v9 = vld [vmem:[%s7511_s24 + $0x1190] sm:$0xff]  ;;  %v900_v38 = vld [vmem:[%s7511_s24 + $0x1368] sm:$0xff] }
 0x181   : > { %6246 = vmatpush1.bf16.msra.mxu1 %v6245_v10  ;;  %5224 = vmatprep.subr.bf16.mxu0 %v5223_v12  ;;  %v6263_v10 = vpack.c.bf16 %v846_v3, %v842_v2  ;;  %v845_v12 = vld [vmem:[%s7511_s24 + $0x11b0] sm:$0xff]  ;;  %v871_v2 = vld [vmem:[%s7511_s24 + $0x1280] sm:$0xff]  ;;  %v5267_v44 = vpack.c.bf16 %v900_v38, %v896_v37  ;;  %v904_v51 = vld [vmem:[%s7511_s24 + $0x1388] sm:$0xff] }
 0x182   : > { %6248 = vmatprep.subr.bf16.mxu1 %v6247_v17  ;;  %v854_v17 = vld [vmem:[%s7511_s24 + $0x11f8] sm:$0xff]  ;;  %v6265_v20 = vpack.c.bf16 %v845_v12, %v841_v9  ;;  %v875_v3 = vld [vmem:[%s7511_s24 + $0x12a0] sm:$0xff]  ;;  %v908_v52 = vld [vmem:[%s7511_s24 + $0x13a8] sm:$0xff] }
 0x183   : > { %v882_v9 = vld [vmem:[%s7511_s24 + $0x12d8] sm:$0xff]  ;;  %v5257_v12 = vpack.c.bf16 %v875_v3, %v871_v2  ;;  %v5271_v59 = vpack.c.bf16 %v908_v52, %v904_v51  ;;  %v912_v2 = vld [vmem:[%s7511_s24 + $0x13c8] sm:$0xff] }
 0x184   : > { %5226 = vmatpush1.bf16.msra.mxu0 %v5225_v26  ;;  %v849_v26 = vld [vmem:[%s7511_s24 + $0x11d0] sm:$0xff]  ;;  %v916_v3 = vld [vmem:[%s7511_s24 + $0x13e8] sm:$0xff]  ;;  %v942_v51 = vld [vmem:[%s7511_s24 + $0x14b8] sm:$0xff] }
 0x185   : > { %6250 = vmatpush1.bf16.msra.mxu1 %v6249_v27  ;;  %5228 = vmatprep.subr.bf16.mxu0 %v5227_v28  ;;  %v6267_v27 = vpack.c.bf16 %v854_v17, %v850_v16  ;;  %v853_v28 = vld [vmem:[%s7511_s24 + $0x11f0] sm:$0xff]  ;;  %v879_v16 = vld [vmem:[%s7511_s24 + $0x12c0] sm:$0xff]  ;;  %v5275_v8 = vpack.c.bf16 %v916_v3, %v912_v2  ;;  %v950_v2 = vld [vmem:[%s7511_s24 + $0x14f8] sm:$0xff] }
 0x186   : > { %6252 = vmatprep.subr.bf16.mxu1 %v6251_v32  ;;  %v862_v32 = vld [vmem:[%s7511_s24 + $0x1238] sm:$0xff]  ;;  %v6269_v34 = vpack.c.bf16 %v853_v28, %v849_v26  ;;  %v883_v17 = vld [vmem:[%s7511_s24 + $0x12e0] sm:$0xff] }
 0x187   : > { %v890_v26 = vld [vmem:[%s7511_s24 + $0x1318] sm:$0xff]  ;;  %v5261_v28 = vpack.c.bf16 %v883_v17, %v879_v16  ;;  %v920_v16 = vld [vmem:[%s7511_s24 + $0x1408] sm:$0xff] }
 0x188   : > { %5230 = vmatpush1.bf16.msra.mxu0 %v5229_v39  ;;  %v857_v39 = vld [vmem:[%s7511_s24 + $0x1210] sm:$0xff]  ;;  %v924_v17 = vld [vmem:[%s7511_s24 + $0x1428] sm:$0xff] }
 0x189   : > { %6254 = vmatpush1.bf16.msra.mxu1 %v6253_v41  ;;  %5232 = vmatprep.subr.bf16.mxu0 %v5231_v42  ;;  %v6271_v41 = vpack.c.bf16 %v862_v32, %v858_v31  ;;  %v861_v42 = vld [vmem:[%s7511_s24 + $0x1230] sm:$0xff]  ;;  %v887_v31 = vld [vmem:[%s7511_s24 + $0x1300] sm:$0xff]  ;;  %v5279_v25 = vpack.c.bf16 %v924_v17, %v920_v16  ;;  %v958_v16 = vld [vmem:[%s7511_s24 + $0x1538] sm:$0xff] }
 0x18a   : > { %6256 = vmatprep.subr.bf16.mxu1 %v6255_v47  ;;  %v870_v47 = vld [vmem:[%s7511_s24 + $0x1278] sm:$0xff]  ;;  %v6273_v49 = vpack.c.bf16 %v861_v42, %v857_v39  ;;  %v891_v32 = vld [vmem:[%s7511_s24 + $0x1320] sm:$0xff] }
 0x18b   : > { %v898_v39 = vld [vmem:[%s7511_s24 + $0x1358] sm:$0xff]  ;;  %v5265_v42 = vpack.c.bf16 %v891_v32, %v887_v31  ;;  %v928_v31 = vld [vmem:[%s7511_s24 + $0x1448] sm:$0xff] }
 0x18c   : > { %5234 = vmatpush1.bf16.msra.mxu0 %v5233_v53  ;;  %v865_v53 = vld [vmem:[%s7511_s24 + $0x1250] sm:$0xff]  ;;  %v932_v32 = vld [vmem:[%s7511_s24 + $0x1468] sm:$0xff] }
 0x18d   : > { %6258 = vmatpush1.bf16.msra.mxu1 %v6257_v55  ;;  %5236 = vmatprep.subr.bf16.mxu0 %v5235_v57  ;;  %v6275_v55 = vpack.c.bf16 %v870_v47, %v866_v45  ;;  %v869_v57 = vld [vmem:[%s7511_s24 + $0x1270] sm:$0xff]  ;;  %v895_v45 = vld [vmem:[%s7511_s24 + $0x1340] sm:$0xff] }
 0x18e   : > { %6260 = vmatprep.subr.bf16.mxu1 %v6259_v61  ;;  %v878_v61 = vld [vmem:[%s7511_s24 + $0x12b8] sm:$0xff]  ;;  %v6277_v63 = vpack.c.bf16 %v869_v57, %v865_v53  ;;  %v899_v47 = vld [vmem:[%s7511_s24 + $0x1360] sm:$0xff] }
 0x18f   : > { %v906_v53 = vld [vmem:[%s7511_s24 + $0x1398] sm:$0xff]  ;;  %v5269_v57 = vpack.c.bf16 %v899_v47, %v895_v45  ;;  %v933_v45 = vld [vmem:[%s7511_s24 + $0x1470] sm:$0xff]  ;;  %v936_v47 = vld [vmem:[%s7511_s24 + $0x1488] sm:$0xff] }
 0x190   : > { %5238 = vmatpush1.bf16.msra.mxu0 %v5237_v24  ;;  %v873_v24 = vld [vmem:[%s7511_s24 + $0x1290] sm:$0xff] }
 0x191   : > { %6262 = vmatpush1.bf16.msra.mxu1 %v6261_v4  ;;  %5240 = vmatprep.subr.bf16.mxu0 %v5239_v6  ;;  %v6279_v4 = vpack.c.bf16 %v878_v61, %v874_v60  ;;  %v877_v6 = vld [vmem:[%s7511_s24 + $0x12b0] sm:$0xff]  ;;  %v903_v60 = vld [vmem:[%s7511_s24 + $0x1380] sm:$0xff] }
 0x192   : > { %6264 = vmatprep.subr.bf16.mxu1 %v6263_v10  ;;  %v886_v10 = vld [vmem:[%s7511_s24 + $0x12f8] sm:$0xff]  ;;  %v6281_v14 = vpack.c.bf16 %v877_v6, %v873_v24  ;;  %v907_v61 = vld [vmem:[%s7511_s24 + $0x13a0] sm:$0xff] }
 0x193   : > { %v914_v24 = vld [vmem:[%s7511_s24 + $0x13d8] sm:$0xff]  ;;  %v5273_v6 = vpack.c.bf16 %v907_v61, %v903_v60  ;;  %v941_v61 = vld [vmem:[%s7511_s24 + $0x14b0] sm:$0xff] }
 0x194   : > { %5242 = vmatpush1.bf16.msra.mxu0 %v5241_v18  ;;  %v881_v18 = vld [vmem:[%s7511_s24 + $0x12d0] sm:$0xff] }
 0x195   : > { %6266 = vmatpush1.bf16.msra.mxu1 %v6265_v20  ;;  %5244 = vmatprep.subr.bf16.mxu0 %v5243_v21  ;;  %v6283_v20 = vpack.c.bf16 %v886_v10, %v882_v9  ;;  %v885_v21 = vld [vmem:[%s7511_s24 + $0x12f0] sm:$0xff]  ;;  %v911_v9 = vld [vmem:[%s7511_s24 + $0x13c0] sm:$0xff] }
 0x196   : > { %6268 = vmatprep.subr.bf16.mxu1 %v6267_v27  ;;  %v894_v27 = vld [vmem:[%s7511_s24 + $0x1338] sm:$0xff]  ;;  %v6285_v29 = vpack.c.bf16 %v885_v21, %v881_v18  ;;  %v915_v10 = vld [vmem:[%s7511_s24 + $0x13e0] sm:$0xff] }
 0x197   : > { %v922_v18 = vld [vmem:[%s7511_s24 + $0x1418] sm:$0xff]  ;;  %v5277_v21 = vpack.c.bf16 %v915_v10, %v911_v9  ;;  %v949_v10 = vld [vmem:[%s7511_s24 + $0x14f0] sm:$0xff] }
 0x198   : > { %5246 = vmatpush1.bf16.msra.mxu0 %v5245_v33  ;;  %v889_v33 = vld [vmem:[%s7511_s24 + $0x1310] sm:$0xff] }
 0x199   : > { %6270 = vmatpush1.bf16.msra.mxu1 %v6269_v34  ;;  %5248 = vmatprep.subr.bf16.mxu0 %v5247_v36  ;;  %v6287_v34 = vpack.c.bf16 %v894_v27, %v890_v26  ;;  %v893_v36 = vld [vmem:[%s7511_s24 + $0x1330] sm:$0xff]  ;;  %v919_v26 = vld [vmem:[%s7511_s24 + $0x1400] sm:$0xff] }
 0x19a   : > { %6272 = vmatprep.subr.bf16.mxu1 %v6271_v41  ;;  %v902_v41 = vld [vmem:[%s7511_s24 + $0x1378] sm:$0xff]  ;;  %v6289_v43 = vpack.c.bf16 %v893_v36, %v889_v33  ;;  %v923_v27 = vld [vmem:[%s7511_s24 + $0x1420] sm:$0xff]  ;;  %v2367_v33 = vrot.slane %v8088_v54, %v7663_v11 }
 0x19b   : > { %v934_v36 = vld [vmem:[%s7511_s24 + $0x1478] sm:$0xff]  ;;  %v5281_v37 = vpack.c.bf16 %v923_v27, %v919_v26  ;;  %v957_v27 = vld [vmem:[%s7511_s24 + $0x1530] sm:$0xff] }
 0x19c   : > { %5250 = vmatpush1.bf16.msra.mxu0 %v5249_v48  ;;  %v897_v48 = vld [vmem:[%s7511_s24 + $0x1350] sm:$0xff] }
 0x19d   : > { %6274 = vmatpush1.bf16.msra.mxu1 %v6273_v49  ;;  %5252 = vmatprep.subr.bf16.mxu0 %v5251_v50  ;;  %v6291_v49 = vpack.c.bf16 %v902_v41, %v898_v39  ;;  %v901_v50 = vld [vmem:[%s7511_s24 + $0x1370] sm:$0xff]  ;;  %v5283_v39 = vpack.c.bf16 %v932_v32, %v928_v31  ;;  %v927_v41 = vld [vmem:[%s7511_s24 + $0x1440] sm:$0xff]  ;;  %v966_v31 = vld [vmem:[%s7511_s24 + $0x1578] sm:$0xff] }
 0x19e   : > { %6276 = vmatprep.subr.bf16.mxu1 %v6275_v55  ;;  %v910_v55 = vld [vmem:[%s7511_s24 + $0x13b8] sm:$0xff]  ;;  %v6293_v58 = vpack.c.bf16 %v901_v50, %v897_v48  ;;  %v940_v48 = vld [vmem:[%s7511_s24 + $0x14a8] sm:$0xff] }
 0x19f   : > { %v938_v50 = vld [vmem:[%s7511_s24 + $0x1498] sm:$0xff] }
 0x1a0   : > { %5254 = vmatpush1.bf16.msra.mxu0 %v5253_v62  ;;  %v905_v62 = vld [vmem:[%s7511_s24 + $0x1390] sm:$0xff]  ;;  %v6311_v60 = vpack.c.bf16 %v942_v51, %v938_v50  ;;  %v967_v50 = vld [vmem:[%s7511_s24 + $0x1580] sm:$0xff] }
 0x1a1   : > { %6278 = vmatpush1.bf16.msra.mxu1 %v6277_v63  ;;  %5256 = vmatprep.subr.bf16.mxu0 %v5255_v1  ;;  %v6295_v63 = vpack.c.bf16 %v910_v55, %v906_v53  ;;  %v909_v1 = vld [vmem:[%s7511_s24 + $0x13b0] sm:$0xff]  ;;  %v5287_v55 = vpack.c.bf16 %v940_v48, %v936_v47  ;;  %v971_v51 = vld [vmem:[%s7511_s24 + $0x15a0] sm:$0xff] }
 0x1a2   : > { %6280 = vmatprep.subr.bf16.mxu1 %v6279_v4  ;;  %v918_v4 = vld [vmem:[%s7511_s24 + $0x13f8] sm:$0xff]  ;;  %v6297_v7 = vpack.c.bf16 %v909_v1, %v905_v62  ;;  %v944_v62 = vld [vmem:[%s7511_s24 + $0x14c8] sm:$0xff] }
 0x1a3   : > { %v946_v1 = vld [vmem:[%s7511_s24 + $0x14d8] sm:$0xff] }
 0x1a4   : > { %5258 = vmatpush1.bf16.msra.mxu0 %v5257_v12  ;;  %v913_v12 = vld [vmem:[%s7511_s24 + $0x13d0] sm:$0xff]  ;;  %v6315_v9 = vpack.c.bf16 %v950_v2, %v946_v1  ;;  %v975_v1 = vld [vmem:[%s7511_s24 + $0x15c0] sm:$0xff] }
 0x1a5   : > { %6282 = vmatpush1.bf16.msra.mxu1 %v6281_v14  ;;  %5260 = vmatprep.subr.bf16.mxu0 %v5259_v15  ;;  %v6299_v14 = vpack.c.bf16 %v918_v4, %v914_v24  ;;  %v917_v15 = vld [vmem:[%s7511_s24 + $0x13f0] sm:$0xff]  ;;  %v979_v2 = vld [vmem:[%s7511_s24 + $0x15e0] sm:$0xff] }
 0x1a6   : > { %6284 = vmatprep.subr.bf16.mxu1 %v6283_v20  ;;  %v926_v20 = vld [vmem:[%s7511_s24 + $0x1438] sm:$0xff]  ;;  %v6301_v22 = vpack.c.bf16 %v917_v15, %v913_v12  ;;  %v952_v12 = vld [vmem:[%s7511_s24 + $0x1508] sm:$0xff] }
 0x1a7   : > { %v954_v15 = vld [vmem:[%s7511_s24 + $0x1518] sm:$0xff] }
 0x1a8   : > { %5262 = vmatpush1.bf16.msra.mxu0 %v5261_v28  ;;  %v921_v28 = vld [vmem:[%s7511_s24 + $0x1410] sm:$0xff]  ;;  %v6319_v26 = vpack.c.bf16 %v958_v16, %v954_v15  ;;  %v983_v15 = vld [vmem:[%s7511_s24 + $0x1600] sm:$0xff] }
 0x1a9   : > { %6286 = vmatpush1.bf16.msra.mxu1 %v6285_v29  ;;  %5264 = vmatprep.subr.bf16.mxu0 %v5263_v30  ;;  %v6303_v29 = vpack.c.bf16 %v926_v20, %v922_v18  ;;  %v925_v30 = vld [vmem:[%s7511_s24 + $0x1430] sm:$0xff]  ;;  %v987_v16 = vld [vmem:[%s7511_s24 + $0x1620] sm:$0xff] }
 0x1aa   : > { %6288 = vmatprep.subr.bf16.mxu1 %v6287_v34  ;;  %v930_v34 = vld [vmem:[%s7511_s24 + $0x1458] sm:$0xff]  ;;  %v6305_v38 = vpack.c.bf16 %v925_v30, %v921_v28  ;;  %v960_v28 = vld [vmem:[%s7511_s24 + $0x1548] sm:$0xff] }
 0x1ab   : > { %v962_v30 = vld [vmem:[%s7511_s24 + $0x1558] sm:$0xff] }
 0x1ac   : > { %5266 = vmatpush1.bf16.msra.mxu0 %v5265_v42  ;;  %v931_v42 = vld [vmem:[%s7511_s24 + $0x1460] sm:$0xff] }
 0x1ad   : > { %6290 = vmatpush1.bf16.msra.mxu1 %v6289_v43  ;;  %5268 = vmatprep.subr.bf16.mxu0 %v5267_v44  ;;  %v929_v43 = vld [vmem:[%s7511_s24 + $0x1450] sm:$0xff]  ;;  %v6307_v44 = vpack.c.bf16 %v934_v36, %v930_v34  ;;  %v5285_v52 = vpack.c.bf16 %v931_v42, %v927_v41  ;;  %v959_v36 = vld [vmem:[%s7511_s24 + $0x1540] sm:$0xff]  ;;  %v968_v42 = vld [vmem:[%s7511_s24 + $0x1588] sm:$0xff] }
 0x1ae   : > { %6292 = vmatprep.subr.bf16.mxu1 %v6291_v49  ;;  %v2379_v49 = vrot.slane %v8088_v54, %v7672_v23  ;;  %v6309_v53 = vpack.c.bf16 %v933_v45, %v929_v43  ;;  %v965_v41 = vld [vmem:[%s7511_s24 + $0x1570] sm:$0xff]  ;;  %v972_v43 = vld [vmem:[%s7511_s24 + $0x15a8] sm:$0xff]  ;;  %v974_v45 = vld [vmem:[%s7511_s24 + $0x15b8] sm:$0xff] }
 0x1b0   : > { %5270 = vmatpush1.bf16.msra.mxu0 %v5269_v57  ;;  %v935_v57 = vld [vmem:[%s7511_s24 + $0x1480] sm:$0xff] }
 0x1b1   : > { %6294 = vmatpush1.bf16.msra.mxu1 %v6293_v58  ;;  %5272 = vmatprep.subr.bf16.mxu0 %v5271_v59  ;;  %v939_v58 = vld [vmem:[%s7511_s24 + $0x14a0] sm:$0xff]  ;;  %v937_v59 = vld [vmem:[%s7511_s24 + $0x1490] sm:$0xff] }
 0x1b2   : > { %6296 = vmatprep.subr.bf16.mxu1 %v6295_v63  ;;  %v948_v63 = vld [vmem:[%s7511_s24 + $0x14e8] sm:$0xff]  ;;  %v5289_v3 = vpack.c.bf16 %v939_v58, %v935_v57  ;;  %v6313_v24 = vpack.c.bf16 %v941_v61, %v937_v59  ;;  %v978_v59 = vld [vmem:[%s7511_s24 + $0x15d8] sm:$0xff]  ;;  %v5305_v61 = vpack.c.bf16 %v971_v51, %v967_v50 }
 0x1b3   : > { %v5291_v4 = vpack.c.bf16 %v948_v63, %v944_v62  ;;  %v976_v57 = vld [vmem:[%s7511_s24 + $0x15c8] sm:$0xff] }
 0x1b4   : > { %5274 = vmatpush1.bf16.msra.mxu0 %v5273_v6  ;;  %v943_v6 = vld [vmem:[%s7511_s24 + $0x14c0] sm:$0xff]  ;;  %v980_v58 = vld [vmem:[%s7511_s24 + $0x15e8] sm:$0xff] }
 0x1b5   : > { %6298 = vmatpush1.bf16.msra.mxu1 %v6297_v7  ;;  %5276 = vmatprep.subr.bf16.mxu0 %v5275_v8  ;;  %v947_v7 = vld [vmem:[%s7511_s24 + $0x14e0] sm:$0xff]  ;;  %v945_v8 = vld [vmem:[%s7511_s24 + $0x14d0] sm:$0xff]  ;;  %v5307_v63 = vpack.c.bf16 %v980_v58, %v976_v57  ;;  %v1008_v50 = vld [vmem:[%s7511_s24 + $0x16c8] sm:$0xff] }
 0x1b6   : > { %6300 = vmatprep.subr.bf16.mxu1 %v6299_v14  ;;  %v956_v14 = vld [vmem:[%s7511_s24 + $0x1528] sm:$0xff]  ;;  %v5293_v17 = vpack.c.bf16 %v947_v7, %v943_v6  ;;  %v6317_v18 = vpack.c.bf16 %v949_v10, %v945_v8  ;;  %v986_v8 = vld [vmem:[%s7511_s24 + $0x1618] sm:$0xff]  ;;  %v5309_v10 = vpack.c.bf16 %v979_v2, %v975_v1 }
 0x1b7   : > { %v5295_v20 = vpack.c.bf16 %v956_v14, %v952_v12  ;;  %v984_v6 = vld [vmem:[%s7511_s24 + $0x1608] sm:$0xff] }
 0x1b8   : > { %5278 = vmatpush1.bf16.msra.mxu0 %v5277_v21  ;;  %v951_v21 = vld [vmem:[%s7511_s24 + $0x1500] sm:$0xff]  ;;  %v988_v7 = vld [vmem:[%s7511_s24 + $0x1628] sm:$0xff] }
 0x1b9   : > { %6302 = vmatpush1.bf16.msra.mxu1 %v6301_v22  ;;  %5280 = vmatprep.subr.bf16.mxu0 %v5279_v25  ;;  %v955_v22 = vld [vmem:[%s7511_s24 + $0x1520] sm:$0xff]  ;;  %v953_v25 = vld [vmem:[%s7511_s24 + $0x1510] sm:$0xff]  ;;  %v5311_v14 = vpack.c.bf16 %v988_v7, %v984_v6  ;;  %v1012_v51 = vld [vmem:[%s7511_s24 + $0x16e8] sm:$0xff] }
 0x1ba   : > { %6304 = vmatprep.subr.bf16.mxu1 %v6303_v29  ;;  %v964_v29 = vld [vmem:[%s7511_s24 + $0x1568] sm:$0xff]  ;;  %v5297_v32 = vpack.c.bf16 %v955_v22, %v951_v21  ;;  %v5323_v58 = vpack.c.bf16 %v1012_v51, %v1008_v50 }
 0x1bb   : > { %2862 = vmatmul.mubr.f32.vlgmr.msra.gmra.mrb[0].mxu0 %v2367_v33  ;;  %v5299_v34 = vpack.c.bf16 %v964_v29, %v960_v28  ;;  %v992_v21 = vld [vmem:[%s7511_s24 + $0x1648] sm:$0xff] }
 0x1bc   : > { %5282 = vmatpush1.bf16.msra.mxu0 %v5281_v37  ;;  %3998 = vmatmul.mubr.f32.vlgmr.msra.gmra.mrb[0].mxu1 %v2367_v33  ;;  %v6321_v33 = vpack.c.bf16 %v957_v27, %v953_v25  ;;  %v963_v37 = vld [vmem:[%s7511_s24 + $0x1560] sm:$0xff]  ;;  %v996_v22 = vld [vmem:[%s7511_s24 + $0x1668] sm:$0xff]  ;;  %v994_v25 = vld [vmem:[%s7511_s24 + $0x1658] sm:$0xff]  ;;  %v5313_v27 = vpack.c.bf16 %v987_v16, %v983_v15 }
 0x1bd   : > { %6306 = vmatpush1.bf16.msra.mxu1 %v6305_v38  ;;  %5284 = vmatprep.subr.bf16.mxu0 %v5283_v39  ;;  %v961_v38 = vld [vmem:[%s7511_s24 + $0x1550] sm:$0xff]  ;;  %v6323_v39 = vpack.c.bf16 %v966_v31, %v962_v30  ;;  %v5301_v47 = vpack.c.bf16 %v963_v37, %v959_v36  ;;  %v5315_v29 = vpack.c.bf16 %v996_v22, %v992_v21  ;;  %v991_v30 = vld [vmem:[%s7511_s24 + $0x1640] sm:$0xff]  ;;  %v1000_v36 = vld [vmem:[%s7511_s24 + $0x1688] sm:$0xff] }
 0x1be   : > { %6308 = vmatprep.subr.bf16.mxu1 %v6307_v44  ;;  %2932 = vmatprep.mubr.f32.mxu0 %v2379_v49  ;;  %v970_v44 = vld [vmem:[%s7511_s24 + $0x1598] sm:$0xff]  ;;  %v6325_v48 = vpack.c.bf16 %v965_v41, %v961_v38  ;;  %v995_v31 = vld [vmem:[%s7511_s24 + $0x1660] sm:$0xff]  ;;  %v1004_v37 = vld [vmem:[%s7511_s24 + $0x16a8] sm:$0xff] }
 0x1bf   : > { %4068 = vmatprep.mubr.f32.mxu1 %v2379_v49  ;;  %v5303_v49 = vpack.c.bf16 %v972_v43, %v968_v42  ;;  %v1002_v38 = vld [vmem:[%s7511_s24 + $0x1698] sm:$0xff]  ;;  %v5317_v41 = vpack.c.bf16 %v995_v31, %v991_v30  ;;  %v5319_v43 = vpack.c.bf16 %v1004_v37, %v1000_v36  ;;  %v1016_v1 = vld [vmem:[%s7511_s24 + $0x1708] sm:$0xff] }
 0x1c0   : > { %5286 = vmatpush1.bf16.msra.mxu0 %v5285_v52  ;;  %v969_v52 = vld [vmem:[%s7511_s24 + $0x1590] sm:$0xff]  ;;  %v1020_v2 = vld [vmem:[%s7511_s24 + $0x1728] sm:$0xff] }
 0x1c1   : > { %6310 = vmatpush1.bf16.msra.mxu1 %v6309_v53  ;;  %5288 = vmatprep.subr.bf16.mxu0 %v5287_v55  ;;  %v6327_v53 = vpack.c.bf16 %v974_v45, %v970_v44  ;;  %v973_v55 = vld [vmem:[%s7511_s24 + $0x15b0] sm:$0xff]  ;;  %v999_v44 = vld [vmem:[%s7511_s24 + $0x1680] sm:$0xff]  ;;  %v5327_v7 = vpack.c.bf16 %v1020_v2, %v1016_v1  ;;  %v1024_v15 = vld [vmem:[%s7511_s24 + $0x1748] sm:$0xff] }
 0x1c2   : > { %6312 = vmatprep.subr.bf16.mxu1 %v6311_v60  ;;  %v982_v60 = vld [vmem:[%s7511_s24 + $0x15f8] sm:$0xff]  ;;  %v6329_v62 = vpack.c.bf16 %v973_v55, %v969_v52  ;;  %v1003_v45 = vld [vmem:[%s7511_s24 + $0x16a0] sm:$0xff]  ;;  %v1028_v16 = vld [vmem:[%s7511_s24 + $0x1768] sm:$0xff] }
 0x1c3   : > { %v1010_v52 = vld [vmem:[%s7511_s24 + $0x16d8] sm:$0xff]  ;;  %v5321_v55 = vpack.c.bf16 %v1003_v45, %v999_v44  ;;  %v5331_v22 = vpack.c.bf16 %v1028_v16, %v1024_v15  ;;  %v1032_v30 = vld [vmem:[%s7511_s24 + $0x1788] sm:$0xff] }
 0x1c4   : > { %5290 = vmatpush1.bf16.msra.mxu0 %v5289_v3  ;;  %v977_v3 = vld [vmem:[%s7511_s24 + $0x15d0] sm:$0xff]  ;;  %v1036_v31 = vld [vmem:[%s7511_s24 + $0x17a8] sm:$0xff] }
 0x1c5   : > { %6314 = vmatpush1.bf16.msra.mxu1 %v6313_v24  ;;  %5292 = vmatprep.subr.bf16.mxu0 %v5291_v4  ;;  %v6331_v24 = vpack.c.bf16 %v982_v60, %v978_v59  ;;  %v981_v4 = vld [vmem:[%s7511_s24 + $0x15f0] sm:$0xff]  ;;  %v1007_v59 = vld [vmem:[%s7511_s24 + $0x16c0] sm:$0xff]  ;;  %v5335_v37 = vpack.c.bf16 %v1036_v31, %v1032_v30  ;;  %v1040_v44 = vld [vmem:[%s7511_s24 + $0x17c8] sm:$0xff] }
 0x1c6   : > { %6316 = vmatprep.subr.bf16.mxu1 %v6315_v9  ;;  %v990_v9 = vld [vmem:[%s7511_s24 + $0x1638] sm:$0xff]  ;;  %v6333_v12 = vpack.c.bf16 %v981_v4, %v977_v3  ;;  %v1011_v60 = vld [vmem:[%s7511_s24 + $0x16e0] sm:$0xff]  ;;  %v1044_v45 = vld [vmem:[%s7511_s24 + $0x17e8] sm:$0xff] }
 0x1c7   : > { %v1018_v3 = vld [vmem:[%s7511_s24 + $0x1718] sm:$0xff]  ;;  %v5325_v4 = vpack.c.bf16 %v1011_v60, %v1007_v59  ;;  %v5339_v51 = vpack.c.bf16 %v1044_v45, %v1040_v44  ;;  %v1048_v59 = vld [vmem:[%s7511_s24 + $0x1808] sm:$0xff] }
 0x1c8   : > { %5294 = vmatpush1.bf16.msra.mxu0 %v5293_v17  ;;  %v985_v17 = vld [vmem:[%s7511_s24 + $0x1610] sm:$0xff]  ;;  %v1052_v60 = vld [vmem:[%s7511_s24 + $0x1828] sm:$0xff]  ;;  %v1070_v30 = vld [vmem:[%s7511_s24 + $0x18b8] sm:$0xff] }
 0x1c9   : > { %6318 = vmatpush1.bf16.msra.mxu1 %v6317_v18  ;;  %5296 = vmatprep.subr.bf16.mxu0 %v5295_v20  ;;  %v6335_v18 = vpack.c.bf16 %v990_v9, %v986_v8  ;;  %v989_v20 = vld [vmem:[%s7511_s24 + $0x1630] sm:$0xff]  ;;  %v1015_v8 = vld [vmem:[%s7511_s24 + $0x1700] sm:$0xff]  ;;  %v5343_v2 = vpack.c.bf16 %v1052_v60, %v1048_v59  ;;  %v1078_v44 = vld [vmem:[%s7511_s24 + $0x18f8] sm:$0xff] }
 0x1ca   : > { %6320 = vmatprep.subr.bf16.mxu1 %v6319_v26  ;;  %v998_v26 = vld [vmem:[%s7511_s24 + $0x1678] sm:$0xff]  ;;  %v6337_v28 = vpack.c.bf16 %v989_v20, %v985_v17  ;;  %v1019_v9 = vld [vmem:[%s7511_s24 + $0x1720] sm:$0xff] }
 0x1cb   : > { %v1026_v17 = vld [vmem:[%s7511_s24 + $0x1758] sm:$0xff]  ;;  %v5329_v20 = vpack.c.bf16 %v1019_v9, %v1015_v8  ;;  %v1056_v8 = vld [vmem:[%s7511_s24 + $0x1848] sm:$0xff] }
 0x1cc   : > { %5298 = vmatpush1.bf16.msra.mxu0 %v5297_v32  ;;  %v993_v32 = vld [vmem:[%s7511_s24 + $0x1650] sm:$0xff]  ;;  %v1060_v9 = vld [vmem:[%s7511_s24 + $0x1868] sm:$0xff]  ;;  %v1086_v59 = vld [vmem:[%s7511_s24 + $0x1938] sm:$0xff] }
 0x1cd   : > { %6322 = vmatpush1.bf16.msra.mxu1 %v6321_v33  ;;  %5300 = vmatprep.subr.bf16.mxu0 %v5299_v34  ;;  %v6339_v33 = vpack.c.bf16 %v998_v26, %v994_v25  ;;  %v997_v34 = vld [vmem:[%s7511_s24 + $0x1670] sm:$0xff]  ;;  %v1023_v25 = vld [vmem:[%s7511_s24 + $0x1740] sm:$0xff] }
 0x1ce   : > { %6324 = vmatprep.subr.bf16.mxu1 %v6323_v39  ;;  %v1006_v39 = vld [vmem:[%s7511_s24 + $0x16b8] sm:$0xff]  ;;  %v6341_v42 = vpack.c.bf16 %v997_v34, %v993_v32  ;;  %v1027_v26 = vld [vmem:[%s7511_s24 + $0x1760] sm:$0xff] }
 0x1cf   : > { %v1034_v32 = vld [vmem:[%s7511_s24 + $0x1798] sm:$0xff]  ;;  %v5333_v34 = vpack.c.bf16 %v1027_v26, %v1023_v25  ;;  %v1061_v25 = vld [vmem:[%s7511_s24 + $0x1870] sm:$0xff]  ;;  %v1064_v26 = vld [vmem:[%s7511_s24 + $0x1888] sm:$0xff] }
 0x1d0   : > { %5302 = vmatpush1.bf16.msra.mxu0 %v5301_v47  ;;  %v1001_v47 = vld [vmem:[%s7511_s24 + $0x1690] sm:$0xff] }
 0x1d1   : > { %6326 = vmatpush1.bf16.msra.mxu1 %v6325_v48  ;;  %5304 = vmatprep.subr.bf16.mxu0 %v5303_v49  ;;  %v6343_v48 = vpack.c.bf16 %v1006_v39, %v1002_v38  ;;  %v1005_v49 = vld [vmem:[%s7511_s24 + $0x16b0] sm:$0xff]  ;;  %v1031_v38 = vld [vmem:[%s7511_s24 + $0x1780] sm:$0xff] }
 0x1d2   : > { %6328 = vmatprep.subr.bf16.mxu1 %v6327_v53  ;;  %v1014_v53 = vld [vmem:[%s7511_s24 + $0x16f8] sm:$0xff]  ;;  %v6345_v57 = vpack.c.bf16 %v1005_v49, %v1001_v47  ;;  %v1035_v39 = vld [vmem:[%s7511_s24 + $0x17a0] sm:$0xff] }
 0x1d3   : > { %v1042_v47 = vld [vmem:[%s7511_s24 + $0x17d8] sm:$0xff]  ;;  %v5337_v49 = vpack.c.bf16 %v1035_v39, %v1031_v38  ;;  %v1069_v39 = vld [vmem:[%s7511_s24 + $0x18b0] sm:$0xff] }
 0x1d4   : > { %5306 = vmatpush1.bf16.msra.mxu0 %v5305_v61  ;;  %v1009_v61 = vld [vmem:[%s7511_s24 + $0x16d0] sm:$0xff] }
 0x1d5   : > { %6330 = vmatpush1.bf16.msra.mxu1 %v6329_v62  ;;  %5308 = vmatprep.subr.bf16.mxu0 %v5307_v63  ;;  %v6347_v62 = vpack.c.bf16 %v1014_v53, %v1010_v52  ;;  %v1013_v63 = vld [vmem:[%s7511_s24 + $0x16f0] sm:$0xff]  ;;  %v1039_v52 = vld [vmem:[%s7511_s24 + $0x17c0] sm:$0xff] }
 0x1d6   : > { %6332 = vmatprep.subr.bf16.mxu1 %v6331_v24  ;;  %v1022_v24 = vld [vmem:[%s7511_s24 + $0x1738] sm:$0xff]  ;;  %v6349_v6 = vpack.c.bf16 %v1013_v63, %v1009_v61  ;;  %v1043_v53 = vld [vmem:[%s7511_s24 + $0x17e0] sm:$0xff] }
 0x1d7   : > { %v1050_v61 = vld [vmem:[%s7511_s24 + $0x1818] sm:$0xff]  ;;  %v5341_v63 = vpack.c.bf16 %v1043_v53, %v1039_v52  ;;  %v1077_v53 = vld [vmem:[%s7511_s24 + $0x18f0] sm:$0xff] }
 0x1d8   : > { %5310 = vmatpush1.bf16.msra.mxu0 %v5309_v10  ;;  %v1017_v10 = vld [vmem:[%s7511_s24 + $0x1710] sm:$0xff] }
 0x1d9   : > { %6334 = vmatpush1.bf16.msra.mxu1 %v6333_v12  ;;  %5312 = vmatprep.subr.bf16.mxu0 %v5311_v14  ;;  %v6351_v12 = vpack.c.bf16 %v1022_v24, %v1018_v3  ;;  %v1021_v14 = vld [vmem:[%s7511_s24 + $0x1730] sm:$0xff]  ;;  %v1047_v3 = vld [vmem:[%s7511_s24 + $0x1800] sm:$0xff] }
 0x1da   : > { %6336 = vmatprep.subr.bf16.mxu1 %v6335_v18  ;;  %v1030_v18 = vld [vmem:[%s7511_s24 + $0x1778] sm:$0xff]  ;;  %v6353_v21 = vpack.c.bf16 %v1021_v14, %v1017_v10  ;;  %v1051_v24 = vld [vmem:[%s7511_s24 + $0x1820] sm:$0xff]  ;;  %v2375_v10 = vrot.slane %v8088_v54, %v7801_v35 }
 0x1db   : > { %v1062_v14 = vld [vmem:[%s7511_s24 + $0x1878] sm:$0xff]  ;;  %v5345_v15 = vpack.c.bf16 %v1051_v24, %v1047_v3  ;;  %v1085_v24 = vld [vmem:[%s7511_s24 + $0x1930] sm:$0xff] }
 0x1dc   : > { %5314 = vmatpush1.bf16.msra.mxu0 %v5313_v27  ;;  %v1025_v27 = vld [vmem:[%s7511_s24 + $0x1750] sm:$0xff] }
 0x1dd   : > { %6338 = vmatpush1.bf16.msra.mxu1 %v6337_v28  ;;  %5316 = vmatprep.subr.bf16.mxu0 %v5315_v29  ;;  %v6355_v28 = vpack.c.bf16 %v1030_v18, %v1026_v17  ;;  %v1029_v29 = vld [vmem:[%s7511_s24 + $0x1770] sm:$0xff]  ;;  %v5347_v17 = vpack.c.bf16 %v1060_v9, %v1056_v8  ;;  %v1055_v18 = vld [vmem:[%s7511_s24 + $0x1840] sm:$0xff]  ;;  %v1094_v8 = vld [vmem:[%s7511_s24 + $0x1978] sm:$0xff] }
 0x1de   : > { %6340 = vmatprep.subr.bf16.mxu1 %v6339_v33  ;;  %v1038_v33 = vld [vmem:[%s7511_s24 + $0x17b8] sm:$0xff]  ;;  %v6357_v36 = vpack.c.bf16 %v1029_v29, %v1025_v27  ;;  %v1068_v27 = vld [vmem:[%s7511_s24 + $0x18a8] sm:$0xff] }
 0x1df   : > { %v1066_v29 = vld [vmem:[%s7511_s24 + $0x1898] sm:$0xff] }
 0x1e0   : > { %5318 = vmatpush1.bf16.msra.mxu0 %v5317_v41  ;;  %v1033_v41 = vld [vmem:[%s7511_s24 + $0x1790] sm:$0xff]  ;;  %v6375_v38 = vpack.c.bf16 %v1070_v30, %v1066_v29  ;;  %v1095_v29 = vld [vmem:[%s7511_s24 + $0x1980] sm:$0xff] }
 0x1e1   : > { %6342 = vmatpush1.bf16.msra.mxu1 %v6341_v42  ;;  %5320 = vmatprep.subr.bf16.mxu0 %v5319_v43  ;;  %v6359_v42 = vpack.c.bf16 %v1038_v33, %v1034_v32  ;;  %v1037_v43 = vld [vmem:[%s7511_s24 + $0x17b0] sm:$0xff]  ;;  %v5351_v33 = vpack.c.bf16 %v1068_v27, %v1064_v26  ;;  %v1099_v30 = vld [vmem:[%s7511_s24 + $0x19a0] sm:$0xff] }
 0x1e2   : > { %6344 = vmatprep.subr.bf16.mxu1 %v6343_v48  ;;  %v1046_v48 = vld [vmem:[%s7511_s24 + $0x17f8] sm:$0xff]  ;;  %v6361_v50 = vpack.c.bf16 %v1037_v43, %v1033_v41  ;;  %v1072_v41 = vld [vmem:[%s7511_s24 + $0x18c8] sm:$0xff] }
 0x1e3   : > { %v1074_v43 = vld [vmem:[%s7511_s24 + $0x18d8] sm:$0xff] }
 0x1e4   : > { %5322 = vmatpush1.bf16.msra.mxu0 %v5321_v55  ;;  %v1041_v55 = vld [vmem:[%s7511_s24 + $0x17d0] sm:$0xff]  ;;  %v6379_v52 = vpack.c.bf16 %v1078_v44, %v1074_v43  ;;  %v1103_v43 = vld [vmem:[%s7511_s24 + $0x19c0] sm:$0xff] }
 0x1e5   : > { %6346 = vmatpush1.bf16.msra.mxu1 %v6345_v57  ;;  %5324 = vmatprep.subr.bf16.mxu0 %v5323_v58  ;;  %v6363_v57 = vpack.c.bf16 %v1046_v48, %v1042_v47  ;;  %v1045_v58 = vld [vmem:[%s7511_s24 + $0x17f0] sm:$0xff]  ;;  %v1107_v44 = vld [vmem:[%s7511_s24 + $0x19e0] sm:$0xff] }
 0x1e6   : > { %6348 = vmatprep.subr.bf16.mxu1 %v6347_v62  ;;  %v1054_v62 = vld [vmem:[%s7511_s24 + $0x1838] sm:$0xff]  ;;  %v6365_v1 = vpack.c.bf16 %v1045_v58, %v1041_v55  ;;  %v1080_v55 = vld [vmem:[%s7511_s24 + $0x1908] sm:$0xff] }
 0x1e7   : > { %v1082_v58 = vld [vmem:[%s7511_s24 + $0x1918] sm:$0xff] }
 0x1e8   : > { %5326 = vmatpush1.bf16.msra.mxu0 %v5325_v4  ;;  %v1049_v4 = vld [vmem:[%s7511_s24 + $0x1810] sm:$0xff]  ;;  %v6383_v3 = vpack.c.bf16 %v1086_v59, %v1082_v58  ;;  %v1111_v58 = vld [vmem:[%s7511_s24 + $0x1a00] sm:$0xff] }
 0x1e9   : > { %6350 = vmatpush1.bf16.msra.mxu1 %v6349_v6  ;;  %5328 = vmatprep.subr.bf16.mxu0 %v5327_v7  ;;  %v6367_v6 = vpack.c.bf16 %v1054_v62, %v1050_v61  ;;  %v1053_v7 = vld [vmem:[%s7511_s24 + $0x1830] sm:$0xff]  ;;  %v1115_v59 = vld [vmem:[%s7511_s24 + $0x1a20] sm:$0xff] }
 0x1ea   : > { %6352 = vmatprep.subr.bf16.mxu1 %v6351_v12  ;;  %v1058_v12 = vld [vmem:[%s7511_s24 + $0x1858] sm:$0xff]  ;;  %v6369_v16 = vpack.c.bf16 %v1053_v7, %v1049_v4  ;;  %v1088_v4 = vld [vmem:[%s7511_s24 + $0x1948] sm:$0xff] }
 0x1eb   : > { %v1090_v7 = vld [vmem:[%s7511_s24 + $0x1958] sm:$0xff] }
 0x1ec   : > { %5330 = vmatpush1.bf16.msra.mxu0 %v5329_v20  ;;  %v1059_v20 = vld [vmem:[%s7511_s24 + $0x1860] sm:$0xff] }
 0x1ed   : > { %6354 = vmatpush1.bf16.msra.mxu1 %v6353_v21  ;;  %5332 = vmatprep.subr.bf16.mxu0 %v5331_v22  ;;  %v1057_v21 = vld [vmem:[%s7511_s24 + $0x1850] sm:$0xff]  ;;  %v6371_v22 = vpack.c.bf16 %v1062_v14, %v1058_v12  ;;  %v5349_v31 = vpack.c.bf16 %v1059_v20, %v1055_v18  ;;  %v1087_v14 = vld [vmem:[%s7511_s24 + $0x1940] sm:$0xff]  ;;  %v1096_v20 = vld [vmem:[%s7511_s24 + $0x1988] sm:$0xff] }
 0x1ee   : > { %6356 = vmatprep.subr.bf16.mxu1 %v6355_v28  ;;  %v2387_v28 = vrot.slane %v8088_v54, %v7810_v46  ;;  %v6373_v32 = vpack.c.bf16 %v1061_v25, %v1057_v21  ;;  %v1093_v18 = vld [vmem:[%s7511_s24 + $0x1970] sm:$0xff]  ;;  %v1100_v21 = vld [vmem:[%s7511_s24 + $0x19a8] sm:$0xff]  ;;  %v1102_v25 = vld [vmem:[%s7511_s24 + $0x19b8] sm:$0xff] }
 0x1f0   : > { %5334 = vmatpush1.bf16.msra.mxu0 %v5333_v34  ;;  %v1063_v34 = vld [vmem:[%s7511_s24 + $0x1880] sm:$0xff] }
 0x1f1   : > { %6358 = vmatpush1.bf16.msra.mxu1 %v6357_v36  ;;  %5336 = vmatprep.subr.bf16.mxu0 %v5335_v37  ;;  %v1067_v36 = vld [vmem:[%s7511_s24 + $0x18a0] sm:$0xff]  ;;  %v1065_v37 = vld [vmem:[%s7511_s24 + $0x1890] sm:$0xff] }
 0x1f2   : > { %6360 = vmatprep.subr.bf16.mxu1 %v6359_v42  ;;  %v1076_v42 = vld [vmem:[%s7511_s24 + $0x18e8] sm:$0xff]  ;;  %v5353_v45 = vpack.c.bf16 %v1067_v36, %v1063_v34  ;;  %v6377_v47 = vpack.c.bf16 %v1069_v39, %v1065_v37  ;;  %v1106_v37 = vld [vmem:[%s7511_s24 + $0x19d8] sm:$0xff]  ;;  %v5369_v39 = vpack.c.bf16 %v1099_v30, %v1095_v29 }
 0x1f3   : > { %v5355_v48 = vpack.c.bf16 %v1076_v42, %v1072_v41  ;;  %v1104_v34 = vld [vmem:[%s7511_s24 + $0x19c8] sm:$0xff] }
 0x1f4   : > { %5338 = vmatpush1.bf16.msra.mxu0 %v5337_v49  ;;  %v1071_v49 = vld [vmem:[%s7511_s24 + $0x18c0] sm:$0xff]  ;;  %v1108_v36 = vld [vmem:[%s7511_s24 + $0x19e8] sm:$0xff] }
 0x1f5   : > { %6362 = vmatpush1.bf16.msra.mxu1 %v6361_v50  ;;  %5340 = vmatprep.subr.bf16.mxu0 %v5339_v51  ;;  %v1075_v50 = vld [vmem:[%s7511_s24 + $0x18e0] sm:$0xff]  ;;  %v1073_v51 = vld [vmem:[%s7511_s24 + $0x18d0] sm:$0xff]  ;;  %v5371_v42 = vpack.c.bf16 %v1108_v36, %v1104_v34  ;;  %v1136_v29 = vld [vmem:[%s7511_s24 + $0x1ac8] sm:$0xff] }
 0x1f6   : > { %6364 = vmatprep.subr.bf16.mxu1 %v6363_v57  ;;  %v1084_v57 = vld [vmem:[%s7511_s24 + $0x1928] sm:$0xff]  ;;  %v5357_v60 = vpack.c.bf16 %v1075_v50, %v1071_v49  ;;  %v6381_v61 = vpack.c.bf16 %v1077_v53, %v1073_v51  ;;  %v1114_v51 = vld [vmem:[%s7511_s24 + $0x1a18] sm:$0xff]  ;;  %v5373_v53 = vpack.c.bf16 %v1107_v44, %v1103_v43 }
 0x1f7   : > { %v5359_v62 = vpack.c.bf16 %v1084_v57, %v1080_v55  ;;  %v1112_v49 = vld [vmem:[%s7511_s24 + $0x1a08] sm:$0xff] }
 0x1f8   : > { %5342 = vmatpush1.bf16.msra.mxu0 %v5341_v63  ;;  %v1079_v63 = vld [vmem:[%s7511_s24 + $0x1900] sm:$0xff]  ;;  %v1116_v50 = vld [vmem:[%s7511_s24 + $0x1a28] sm:$0xff] }
 0x1f9   : > { %6366 = vmatpush1.bf16.msra.mxu1 %v6365_v1  ;;  %5344 = vmatprep.subr.bf16.mxu0 %v5343_v2  ;;  %v1083_v1 = vld [vmem:[%s7511_s24 + $0x1920] sm:$0xff]  ;;  %v1081_v2 = vld [vmem:[%s7511_s24 + $0x1910] sm:$0xff]  ;;  %v5375_v57 = vpack.c.bf16 %v1116_v50, %v1112_v49  ;;  %v1140_v30 = vld [vmem:[%s7511_s24 + $0x1ae8] sm:$0xff] }
 0x1fa   : > { %6368 = vmatprep.subr.bf16.mxu1 %v6367_v6  ;;  %v1092_v6 = vld [vmem:[%s7511_s24 + $0x1968] sm:$0xff]  ;;  %v5361_v9 = vpack.c.bf16 %v1083_v1, %v1079_v63  ;;  %v5387_v36 = vpack.c.bf16 %v1140_v30, %v1136_v29 }
 0x1fb   : > { %2933 = vmatmul.mubr.f32.vlgmr.msra.gmra.mrb[0].mxu0 %v2375_v10  ;;  %v5363_v12 = vpack.c.bf16 %v1092_v6, %v1088_v4  ;;  %v1120_v63 = vld [vmem:[%s7511_s24 + $0x1a48] sm:$0xff] }
 0x1fc   : > { %5346 = vmatpush1.bf16.msra.mxu0 %v5345_v15  ;;  %4069 = vmatmul.mubr.f32.vlgmr.msra.gmra.mrb[0].mxu1 %v2375_v10  ;;  %v6385_v10 = vpack.c.bf16 %v1085_v24, %v1081_v2  ;;  %v1091_v15 = vld [vmem:[%s7511_s24 + $0x1960] sm:$0xff]  ;;  %v1124_v1 = vld [vmem:[%s7511_s24 + $0x1a68] sm:$0xff]  ;;  %v1122_v2 = vld [vmem:[%s7511_s24 + $0x1a58] sm:$0xff]  ;;  %v5377_v24 = vpack.c.bf16 %v1115_v59, %v1111_v58 }
 0x1fd   : > { %6370 = vmatpush1.bf16.msra.mxu1 %v6369_v16  ;;  %5348 = vmatprep.subr.bf16.mxu0 %v5347_v17  ;;  %v1089_v16 = vld [vmem:[%s7511_s24 + $0x1950] sm:$0xff]  ;;  %v6387_v17 = vpack.c.bf16 %v1094_v8, %v1090_v7  ;;  %v5365_v26 = vpack.c.bf16 %v1091_v15, %v1087_v14  ;;  %v5379_v6 = vpack.c.bf16 %v1124_v1, %v1120_v63  ;;  %v1119_v7 = vld [vmem:[%s7511_s24 + $0x1a40] sm:$0xff]  ;;  %v1128_v14 = vld [vmem:[%s7511_s24 + $0x1a88] sm:$0xff] }
 0x1fe   : > { %6372 = vmatprep.subr.bf16.mxu1 %v6371_v22  ;;  %3003 = vmatprep.mubr.f32.mxu0 %v2387_v28  ;;  %v1098_v22 = vld [vmem:[%s7511_s24 + $0x1998] sm:$0xff]  ;;  %v6389_v27 = vpack.c.bf16 %v1093_v18, %v1089_v16  ;;  %v1123_v8 = vld [vmem:[%s7511_s24 + $0x1a60] sm:$0xff]  ;;  %v1132_v15 = vld [vmem:[%s7511_s24 + $0x1aa8] sm:$0xff] }
 0x1ff   : > { %4139 = vmatprep.mubr.f32.mxu1 %v2387_v28  ;;  %v5367_v28 = vpack.c.bf16 %v1100_v21, %v1096_v20  ;;  %v1130_v16 = vld [vmem:[%s7511_s24 + $0x1a98] sm:$0xff]  ;;  %v5381_v18 = vpack.c.bf16 %v1123_v8, %v1119_v7  ;;  %v5383_v21 = vpack.c.bf16 %v1132_v15, %v1128_v14  ;;  %v1144_v43 = vld [vmem:[%s7511_s24 + $0x1b08] sm:$0xff] }
 0x200   : > { %5350 = vmatpush1.bf16.msra.mxu0 %v5349_v31  ;;  %v1097_v31 = vld [vmem:[%s7511_s24 + $0x1990] sm:$0xff]  ;;  %v1148_v44 = vld [vmem:[%s7511_s24 + $0x1b28] sm:$0xff] }
 0x201   : > { %6374 = vmatpush1.bf16.msra.mxu1 %v6373_v32  ;;  %5352 = vmatprep.subr.bf16.mxu0 %v5351_v33  ;;  %v6391_v32 = vpack.c.bf16 %v1102_v25, %v1098_v22  ;;  %v1101_v33 = vld [vmem:[%s7511_s24 + $0x19b0] sm:$0xff]  ;;  %v1127_v22 = vld [vmem:[%s7511_s24 + $0x1a80] sm:$0xff]  ;;  %v5391_v50 = vpack.c.bf16 %v1148_v44, %v1144_v43  ;;  %v1152_v58 = vld [vmem:[%s7511_s24 + $0x1b48] sm:$0xff] }
 0x202   : > { %6376 = vmatprep.subr.bf16.mxu1 %v6375_v38  ;;  %v1110_v38 = vld [vmem:[%s7511_s24 + $0x19f8] sm:$0xff]  ;;  %v6393_v41 = vpack.c.bf16 %v1101_v33, %v1097_v31  ;;  %v1131_v25 = vld [vmem:[%s7511_s24 + $0x1aa0] sm:$0xff]  ;;  %v1156_v59 = vld [vmem:[%s7511_s24 + $0x1b68] sm:$0xff] }
 0x203   : > { %v1138_v31 = vld [vmem:[%s7511_s24 + $0x1ad8] sm:$0xff]  ;;  %v5385_v33 = vpack.c.bf16 %v1131_v25, %v1127_v22  ;;  %v5395_v1 = vpack.c.bf16 %v1156_v59, %v1152_v58  ;;  %v1160_v7 = vld [vmem:[%s7511_s24 + $0x1b88] sm:$0xff] }
 0x204   : > { %5354 = vmatpush1.bf16.msra.mxu0 %v5353_v45  ;;  %v1105_v45 = vld [vmem:[%s7511_s24 + $0x19d0] sm:$0xff]  ;;  %v1164_v8 = vld [vmem:[%s7511_s24 + $0x1ba8] sm:$0xff] }
 0x205   : > { %6378 = vmatpush1.bf16.msra.mxu1 %v6377_v47  ;;  %5356 = vmatprep.subr.bf16.mxu0 %v5355_v48  ;;  %v6395_v47 = vpack.c.bf16 %v1110_v38, %v1106_v37  ;;  %v1109_v48 = vld [vmem:[%s7511_s24 + $0x19f0] sm:$0xff]  ;;  %v1135_v37 = vld [vmem:[%s7511_s24 + $0x1ac0] sm:$0xff]  ;;  %v5399_v15 = vpack.c.bf16 %v1164_v8, %v1160_v7  ;;  %v1168_v22 = vld [vmem:[%s7511_s24 + $0x1bc8] sm:$0xff] }
 0x206   : > { %6380 = vmatprep.subr.bf16.mxu1 %v6379_v52  ;;  %v1118_v52 = vld [vmem:[%s7511_s24 + $0x1a38] sm:$0xff]  ;;  %v6397_v55 = vpack.c.bf16 %v1109_v48, %v1105_v45  ;;  %v1139_v38 = vld [vmem:[%s7511_s24 + $0x1ae0] sm:$0xff]  ;;  %v1172_v25 = vld [vmem:[%s7511_s24 + $0x1be8] sm:$0xff] }
 0x207   : > { %v1146_v45 = vld [vmem:[%s7511_s24 + $0x1b18] sm:$0xff]  ;;  %v5389_v48 = vpack.c.bf16 %v1139_v38, %v1135_v37  ;;  %v5403_v30 = vpack.c.bf16 %v1172_v25, %v1168_v22  ;;  %v1176_v37 = vld [vmem:[%s7511_s24 + $0x1c08] sm:$0xff] }
 0x208   : > { %5358 = vmatpush1.bf16.msra.mxu0 %v5357_v60  ;;  %v1113_v60 = vld [vmem:[%s7511_s24 + $0x1a10] sm:$0xff]  ;;  %v1180_v38 = vld [vmem:[%s7511_s24 + $0x1c28] sm:$0xff]  ;;  %v1198_v7 = vld [vmem:[%s7511_s24 + $0x1cb8] sm:$0xff] }
 0x209   : > { %6382 = vmatpush1.bf16.msra.mxu1 %v6381_v61  ;;  %5360 = vmatprep.subr.bf16.mxu0 %v5359_v62  ;;  %v6399_v61 = vpack.c.bf16 %v1118_v52, %v1114_v51  ;;  %v1117_v62 = vld [vmem:[%s7511_s24 + $0x1a30] sm:$0xff]  ;;  %v1143_v51 = vld [vmem:[%s7511_s24 + $0x1b00] sm:$0xff]  ;;  %v5407_v44 = vpack.c.bf16 %v1180_v38, %v1176_v37  ;;  %v1206_v22 = vld [vmem:[%s7511_s24 + $0x1cf8] sm:$0xff] }
 0x20a   : > { %6384 = vmatprep.subr.bf16.mxu1 %v6383_v3  ;;  %v1126_v3 = vld [vmem:[%s7511_s24 + $0x1a78] sm:$0xff]  ;;  %v6401_v4 = vpack.c.bf16 %v1117_v62, %v1113_v60  ;;  %v1147_v52 = vld [vmem:[%s7511_s24 + $0x1b20] sm:$0xff] }
 0x20b   : > { %v1154_v60 = vld [vmem:[%s7511_s24 + $0x1b58] sm:$0xff]  ;;  %v5393_v62 = vpack.c.bf16 %v1147_v52, %v1143_v51  ;;  %v1184_v51 = vld [vmem:[%s7511_s24 + $0x1c48] sm:$0xff] }
 0x20c   : > { %5362 = vmatpush1.bf16.msra.mxu0 %v5361_v9  ;;  %v1121_v9 = vld [vmem:[%s7511_s24 + $0x1a50] sm:$0xff]  ;;  %v1188_v52 = vld [vmem:[%s7511_s24 + $0x1c68] sm:$0xff]  ;;  %v1214_v37 = vld [vmem:[%s7511_s24 + $0x1d38] sm:$0xff] }
 0x20d   : > { %6386 = vmatpush1.bf16.msra.mxu1 %v6385_v10  ;;  %5364 = vmatprep.subr.bf16.mxu0 %v5363_v12  ;;  %v6403_v10 = vpack.c.bf16 %v1126_v3, %v1122_v2  ;;  %v1125_v12 = vld [vmem:[%s7511_s24 + $0x1a70] sm:$0xff]  ;;  %v1151_v2 = vld [vmem:[%s7511_s24 + $0x1b40] sm:$0xff] }
 0x20e   : > { %6388 = vmatprep.subr.bf16.mxu1 %v6387_v17  ;;  %v1134_v17 = vld [vmem:[%s7511_s24 + $0x1ab8] sm:$0xff]  ;;  %v6405_v20 = vpack.c.bf16 %v1125_v12, %v1121_v9  ;;  %v1155_v3 = vld [vmem:[%s7511_s24 + $0x1b60] sm:$0xff] }
 0x20f   : > { %v1162_v9 = vld [vmem:[%s7511_s24 + $0x1b98] sm:$0xff]  ;;  %v5397_v12 = vpack.c.bf16 %v1155_v3, %v1151_v2  ;;  %v1189_v2 = vld [vmem:[%s7511_s24 + $0x1c70] sm:$0xff]  ;;  %v1192_v3 = vld [vmem:[%s7511_s24 + $0x1c88] sm:$0xff] }
 0x210   : > { %5366 = vmatpush1.bf16.msra.mxu0 %v5365_v26  ;;  %v1129_v26 = vld [vmem:[%s7511_s24 + $0x1a90] sm:$0xff] }
 0x211   : > { %6390 = vmatpush1.bf16.msra.mxu1 %v6389_v27  ;;  %5368 = vmatprep.subr.bf16.mxu0 %v5367_v28  ;;  %v6407_v27 = vpack.c.bf16 %v1134_v17, %v1130_v16  ;;  %v1133_v28 = vld [vmem:[%s7511_s24 + $0x1ab0] sm:$0xff]  ;;  %v1159_v16 = vld [vmem:[%s7511_s24 + $0x1b80] sm:$0xff] }
 0x212   : > { %6392 = vmatprep.subr.bf16.mxu1 %v6391_v32  ;;  %v1142_v32 = vld [vmem:[%s7511_s24 + $0x1af8] sm:$0xff]  ;;  %v6409_v34 = vpack.c.bf16 %v1133_v28, %v1129_v26  ;;  %v1163_v17 = vld [vmem:[%s7511_s24 + $0x1ba0] sm:$0xff] }
 0x213   : > { %v1170_v26 = vld [vmem:[%s7511_s24 + $0x1bd8] sm:$0xff]  ;;  %v5401_v28 = vpack.c.bf16 %v1163_v17, %v1159_v16  ;;  %v1197_v17 = vld [vmem:[%s7511_s24 + $0x1cb0] sm:$0xff] }
 0x214   : > { %5370 = vmatpush1.bf16.msra.mxu0 %v5369_v39  ;;  %v1137_v39 = vld [vmem:[%s7511_s24 + $0x1ad0] sm:$0xff] }
 0x215   : > { %6394 = vmatpush1.bf16.msra.mxu1 %v6393_v41  ;;  %5372 = vmatprep.subr.bf16.mxu0 %v5371_v42  ;;  %v6411_v41 = vpack.c.bf16 %v1142_v32, %v1138_v31  ;;  %v1141_v42 = vld [vmem:[%s7511_s24 + $0x1af0] sm:$0xff]  ;;  %v1167_v31 = vld [vmem:[%s7511_s24 + $0x1bc0] sm:$0xff] }
 0x216   : > { %6396 = vmatprep.subr.bf16.mxu1 %v6395_v47  ;;  %v1150_v47 = vld [vmem:[%s7511_s24 + $0x1b38] sm:$0xff]  ;;  %v6413_v49 = vpack.c.bf16 %v1141_v42, %v1137_v39  ;;  %v1171_v32 = vld [vmem:[%s7511_s24 + $0x1be0] sm:$0xff] }
 0x217   : > { %v1178_v39 = vld [vmem:[%s7511_s24 + $0x1c18] sm:$0xff]  ;;  %v5405_v42 = vpack.c.bf16 %v1171_v32, %v1167_v31  ;;  %v1205_v32 = vld [vmem:[%s7511_s24 + $0x1cf0] sm:$0xff] }
 0x218   : > { %5374 = vmatpush1.bf16.msra.mxu0 %v5373_v53  ;;  %v1145_v53 = vld [vmem:[%s7511_s24 + $0x1b10] sm:$0xff] }
 0x219   : > { %6398 = vmatpush1.bf16.msra.mxu1 %v6397_v55  ;;  %5376 = vmatprep.subr.bf16.mxu0 %v5375_v57  ;;  %v6415_v55 = vpack.c.bf16 %v1150_v47, %v1146_v45  ;;  %v1149_v57 = vld [vmem:[%s7511_s24 + $0x1b30] sm:$0xff]  ;;  %v1175_v45 = vld [vmem:[%s7511_s24 + $0x1c00] sm:$0xff] }
 0x21a   : > { %6400 = vmatprep.subr.bf16.mxu1 %v6399_v61  ;;  %v1158_v61 = vld [vmem:[%s7511_s24 + $0x1b78] sm:$0xff]  ;;  %v6417_v63 = vpack.c.bf16 %v1149_v57, %v1145_v53  ;;  %v1179_v47 = vld [vmem:[%s7511_s24 + $0x1c20] sm:$0xff]  ;;  %v2383_v53 = vrot.slane %v8088_v54, %v7939_v0 }
 0x21b   : > { %v1190_v57 = vld [vmem:[%s7511_s24 + $0x1c78] sm:$0xff]  ;;  %v5409_v58 = vpack.c.bf16 %v1179_v47, %v1175_v45  ;;  %v1213_v47 = vld [vmem:[%s7511_s24 + $0x1d30] sm:$0xff] }
 0x21c   : > { %5378 = vmatpush1.bf16.msra.mxu0 %v5377_v24  ;;  %v1153_v24 = vld [vmem:[%s7511_s24 + $0x1b50] sm:$0xff] }
 0x21d   : > { %6402 = vmatpush1.bf16.msra.mxu1 %v6401_v4  ;;  %5380 = vmatprep.subr.bf16.mxu0 %v5379_v6  ;;  %v6419_v4 = vpack.c.bf16 %v1158_v61, %v1154_v60  ;;  %v1157_v6 = vld [vmem:[%s7511_s24 + $0x1b70] sm:$0xff]  ;;  %v5411_v60 = vpack.c.bf16 %v1188_v52, %v1184_v51  ;;  %v1183_v61 = vld [vmem:[%s7511_s24 + $0x1c40] sm:$0xff]  ;;  %v1222_v51 = vld [vmem:[%s7511_s24 + $0x1d78] sm:$0xff] }
 0x21e   : > { %6404 = vmatprep.subr.bf16.mxu1 %v6403_v10  ;;  %v1166_v10 = vld [vmem:[%s7511_s24 + $0x1bb8] sm:$0xff]  ;;  %v6421_v14 = vpack.c.bf16 %v1157_v6, %v1153_v24  ;;  %v1196_v24 = vld [vmem:[%s7511_s24 + $0x1ca8] sm:$0xff] }
 0x21f   : > { %v1194_v6 = vld [vmem:[%s7511_s24 + $0x1c98] sm:$0xff] }
 0x220   : > { %5382 = vmatpush1.bf16.msra.mxu0 %v5381_v18  ;;  %v1161_v18 = vld [vmem:[%s7511_s24 + $0x1b90] sm:$0xff]  ;;  %v6439_v16 = vpack.c.bf16 %v1198_v7, %v1194_v6  ;;  %v1223_v6 = vld [vmem:[%s7511_s24 + $0x1d80] sm:$0xff] }
 0x221   : > { %6406 = vmatpush1.bf16.msra.mxu1 %v6405_v20  ;;  %5384 = vmatprep.subr.bf16.mxu0 %v5383_v21  ;;  %v6423_v20 = vpack.c.bf16 %v1166_v10, %v1162_v9  ;;  %v1165_v21 = vld [vmem:[%s7511_s24 + $0x1bb0] sm:$0xff]  ;;  %v5415_v10 = vpack.c.bf16 %v1196_v24, %v1192_v3  ;;  %v1227_v7 = vld [vmem:[%s7511_s24 + $0x1da0] sm:$0xff] }
 0x222   : > { %6408 = vmatprep.subr.bf16.mxu1 %v6407_v27  ;;  %v1174_v27 = vld [vmem:[%s7511_s24 + $0x1bf8] sm:$0xff]  ;;  %v6425_v29 = vpack.c.bf16 %v1165_v21, %v1161_v18  ;;  %v1200_v18 = vld [vmem:[%s7511_s24 + $0x1cc8] sm:$0xff] }
 0x223   : > { %v1202_v21 = vld [vmem:[%s7511_s24 + $0x1cd8] sm:$0xff] }
 0x224   : > { %5386 = vmatpush1.bf16.msra.mxu0 %v5385_v33  ;;  %v1169_v33 = vld [vmem:[%s7511_s24 + $0x1bd0] sm:$0xff]  ;;  %v6443_v31 = vpack.c.bf16 %v1206_v22, %v1202_v21  ;;  %v1231_v21 = vld [vmem:[%s7511_s24 + $0x1dc0] sm:$0xff] }
 0x225   : > { %6410 = vmatpush1.bf16.msra.mxu1 %v6409_v34  ;;  %5388 = vmatprep.subr.bf16.mxu0 %v5387_v36  ;;  %v6427_v34 = vpack.c.bf16 %v1174_v27, %v1170_v26  ;;  %v1173_v36 = vld [vmem:[%s7511_s24 + $0x1bf0] sm:$0xff]  ;;  %v1235_v22 = vld [vmem:[%s7511_s24 + $0x1de0] sm:$0xff] }
 0x226   : > { %6412 = vmatprep.subr.bf16.mxu1 %v6411_v41  ;;  %v1182_v41 = vld [vmem:[%s7511_s24 + $0x1c38] sm:$0xff]  ;;  %v6429_v43 = vpack.c.bf16 %v1173_v36, %v1169_v33  ;;  %v1208_v33 = vld [vmem:[%s7511_s24 + $0x1d08] sm:$0xff] }
 0x227   : > { %v1210_v36 = vld [vmem:[%s7511_s24 + $0x1d18] sm:$0xff] }
 0x228   : > { %5390 = vmatpush1.bf16.msra.mxu0 %v5389_v48  ;;  %v1177_v48 = vld [vmem:[%s7511_s24 + $0x1c10] sm:$0xff]  ;;  %v6447_v45 = vpack.c.bf16 %v1214_v37, %v1210_v36  ;;  %v1239_v36 = vld [vmem:[%s7511_s24 + $0x1e00] sm:$0xff] }
 0x229   : > { %6414 = vmatpush1.bf16.msra.mxu1 %v6413_v49  ;;  %5392 = vmatprep.subr.bf16.mxu0 %v5391_v50  ;;  %v6431_v49 = vpack.c.bf16 %v1182_v41, %v1178_v39  ;;  %v1181_v50 = vld [vmem:[%s7511_s24 + $0x1c30] sm:$0xff]  ;;  %v1243_v37 = vld [vmem:[%s7511_s24 + $0x1e20] sm:$0xff] }
 0x22a   : > { %6416 = vmatprep.subr.bf16.mxu1 %v6415_v55  ;;  %v1186_v55 = vld [vmem:[%s7511_s24 + $0x1c58] sm:$0xff]  ;;  %v6433_v59 = vpack.c.bf16 %v1181_v50, %v1177_v48  ;;  %v1216_v48 = vld [vmem:[%s7511_s24 + $0x1d48] sm:$0xff] }
 0x22b   : > { %v1218_v50 = vld [vmem:[%s7511_s24 + $0x1d58] sm:$0xff] }
 0x22c   : > { %5394 = vmatpush1.bf16.msra.mxu0 %v5393_v62  ;;  %v1187_v62 = vld [vmem:[%s7511_s24 + $0x1c60] sm:$0xff] }
 0x22d   : > { %6418 = vmatpush1.bf16.msra.mxu1 %v6417_v63  ;;  %5396 = vmatprep.subr.bf16.mxu0 %v5395_v1  ;;  %v1185_v63 = vld [vmem:[%s7511_s24 + $0x1c50] sm:$0xff]  ;;  %v6435_v1 = vpack.c.bf16 %v1190_v57, %v1186_v55  ;;  %v5413_v8 = vpack.c.bf16 %v1187_v62, %v1183_v61  ;;  %v1215_v57 = vld [vmem:[%s7511_s24 + $0x1d40] sm:$0xff]  ;;  %v1224_v62 = vld [vmem:[%s7511_s24 + $0x1d88] sm:$0xff] }
 0x22e   : > { %6420 = vmatprep.subr.bf16.mxu1 %v6419_v4  ;;  %v2395_v4 = vrot.slane %v8088_v54, %v7948_v13  ;;  %v6437_v9 = vpack.c.bf16 %v1189_v2, %v1185_v63  ;;  %v1221_v61 = vld [vmem:[%s7511_s24 + $0x1d70] sm:$0xff]  ;;  %v1228_v63 = vld [vmem:[%s7511_s24 + $0x1da8] sm:$0xff]  ;;  %v1230_v2 = vld [vmem:[%s7511_s24 + $0x1db8] sm:$0xff] }
 0x230   : > { %5398 = vmatpush1.bf16.msra.mxu0 %v5397_v12  ;;  %v1191_v12 = vld [vmem:[%s7511_s24 + $0x1c80] sm:$0xff] }
 0x231   : > { %6422 = vmatpush1.bf16.msra.mxu1 %v6421_v14  ;;  %5400 = vmatprep.subr.bf16.mxu0 %v5399_v15  ;;  %v1195_v14 = vld [vmem:[%s7511_s24 + $0x1ca0] sm:$0xff]  ;;  %v1193_v15 = vld [vmem:[%s7511_s24 + $0x1c90] sm:$0xff] }
 0x232   : > { %6424 = vmatprep.subr.bf16.mxu1 %v6423_v20  ;;  %v1204_v20 = vld [vmem:[%s7511_s24 + $0x1ce8] sm:$0xff]  ;;  %v5417_v25 = vpack.c.bf16 %v1195_v14, %v1191_v12  ;;  %v6441_v26 = vpack.c.bf16 %v1197_v17, %v1193_v15  ;;  %v1234_v15 = vld [vmem:[%s7511_s24 + $0x1dd8] sm:$0xff]  ;;  %v5433_v17 = vpack.c.bf16 %v1227_v7, %v1223_v6 }
 0x233   : > { %v5419_v27 = vpack.c.bf16 %v1204_v20, %v1200_v18  ;;  %v1232_v12 = vld [vmem:[%s7511_s24 + $0x1dc8] sm:$0xff] }
 0x234   : > { %5402 = vmatpush1.bf16.msra.mxu0 %v5401_v28  ;;  %v1199_v28 = vld [vmem:[%s7511_s24 + $0x1cc0] sm:$0xff]  ;;  %v1236_v14 = vld [vmem:[%s7511_s24 + $0x1de8] sm:$0xff] }
 0x235   : > { %6426 = vmatpush1.bf16.msra.mxu1 %v6425_v29  ;;  %5404 = vmatprep.subr.bf16.mxu0 %v5403_v30  ;;  %v1203_v29 = vld [vmem:[%s7511_s24 + $0x1ce0] sm:$0xff]  ;;  %v1201_v30 = vld [vmem:[%s7511_s24 + $0x1cd0] sm:$0xff]  ;;  %v5435_v20 = vpack.c.bf16 %v1236_v14, %v1232_v12  ;;  %v1264_v6 = vld [vmem:[%s7511_s24 + $0x1ec8] sm:$0xff] }
 0x236   : > { %6428 = vmatprep.subr.bf16.mxu1 %v6427_v34  ;;  %v1212_v34 = vld [vmem:[%s7511_s24 + $0x1d28] sm:$0xff]  ;;  %v5421_v38 = vpack.c.bf16 %v1203_v29, %v1199_v28  ;;  %v6445_v39 = vpack.c.bf16 %v1205_v32, %v1201_v30  ;;  %v1242_v30 = vld [vmem:[%s7511_s24 + $0x1e18] sm:$0xff]  ;;  %v5437_v32 = vpack.c.bf16 %v1235_v22, %v1231_v21 }
 0x237   : > { %v5423_v41 = vpack.c.bf16 %v1212_v34, %v1208_v33  ;;  %v1240_v28 = vld [vmem:[%s7511_s24 + $0x1e08] sm:$0xff] }
 0x238   : > { %5406 = vmatpush1.bf16.msra.mxu0 %v5405_v42  ;;  %v1207_v42 = vld [vmem:[%s7511_s24 + $0x1d00] sm:$0xff]  ;;  %v1244_v29 = vld [vmem:[%s7511_s24 + $0x1e28] sm:$0xff] }
 0x239   : > { %6430 = vmatpush1.bf16.msra.mxu1 %v6429_v43  ;;  %5408 = vmatprep.subr.bf16.mxu0 %v5407_v44  ;;  %v1211_v43 = vld [vmem:[%s7511_s24 + $0x1d20] sm:$0xff]  ;;  %v1209_v44 = vld [vmem:[%s7511_s24 + $0x1d10] sm:$0xff]  ;;  %v5439_v34 = vpack.c.bf16 %v1244_v29, %v1240_v28  ;;  %v1268_v7 = vld [vmem:[%s7511_s24 + $0x1ee8] sm:$0xff] }
 0x23a   : > { %6432 = vmatprep.subr.bf16.mxu1 %v6431_v49  ;;  %v1220_v49 = vld [vmem:[%s7511_s24 + $0x1d68] sm:$0xff]  ;;  %v5425_v52 = vpack.c.bf16 %v1211_v43, %v1207_v42  ;;  %v5451_v14 = vpack.c.bf16 %v1268_v7, %v1264_v6  ;;  %v1295_v6 = vld [vmem:[%s7511_s24 + $0x1fc0] sm:$0xff] }
 0x23b   : > { %3004 = vmatmul.mubr.f32.vlgmr.msra.gmra.mrb[0].mxu0 %v2383_v53  ;;  %v5427_v55 = vpack.c.bf16 %v1220_v49, %v1216_v48  ;;  %v1248_v42 = vld [vmem:[%s7511_s24 + $0x1e48] sm:$0xff] }
 0x23c   : > { %5410 = vmatpush1.bf16.msra.mxu0 %v5409_v58  ;;  %4140 = vmatmul.mubr.f32.vlgmr.msra.gmra.mrb[0].mxu1 %v2383_v53  ;;  %v6449_v53 = vpack.c.bf16 %v1213_v47, %v1209_v44  ;;  %v1219_v58 = vld [vmem:[%s7511_s24 + $0x1d60] sm:$0xff]  ;;  %v1252_v43 = vld [vmem:[%s7511_s24 + $0x1e68] sm:$0xff]  ;;  %v1250_v44 = vld [vmem:[%s7511_s24 + $0x1e58] sm:$0xff]  ;;  %v5441_v47 = vpack.c.bf16 %v1243_v37, %v1239_v36 }
 0x23d   : > { %6434 = vmatpush1.bf16.msra.mxu1 %v6433_v59  ;;  %5412 = vmatprep.subr.bf16.mxu0 %v5411_v60  ;;  %v1217_v59 = vld [vmem:[%s7511_s24 + $0x1d50] sm:$0xff]  ;;  %v6451_v60 = vpack.c.bf16 %v1222_v51, %v1218_v50  ;;  %v5429_v3 = vpack.c.bf16 %v1219_v58, %v1215_v57  ;;  %v5443_v49 = vpack.c.bf16 %v1252_v43, %v1248_v42  ;;  %v1247_v50 = vld [vmem:[%s7511_s24 + $0x1e40] sm:$0xff]  ;;  %v1256_v57 = vld [vmem:[%s7511_s24 + $0x1e88] sm:$0xff] }
 0x23e   : > { %6436 = vmatprep.subr.bf16.mxu1 %v6435_v1  ;;  %3074 = vmatprep.mubr.f32.mxu0 %v2395_v4  ;;  %v1226_v1 = vld [vmem:[%s7511_s24 + $0x1d98] sm:$0xff]  ;;  %v6453_v24 = vpack.c.bf16 %v1221_v61, %v1217_v59  ;;  %v1251_v51 = vld [vmem:[%s7511_s24 + $0x1e60] sm:$0xff]  ;;  %v1260_v58 = vld [vmem:[%s7511_s24 + $0x1ea8] sm:$0xff] }
 0x23f   : > { %4210 = vmatprep.mubr.f32.mxu1 %v2395_v4  ;;  %v5431_v4 = vpack.c.bf16 %v1228_v63, %v1224_v62  ;;  %v1258_v59 = vld [vmem:[%s7511_s24 + $0x1e98] sm:$0xff]  ;;  %v5445_v61 = vpack.c.bf16 %v1251_v51, %v1247_v50  ;;  %v5447_v63 = vpack.c.bf16 %v1260_v58, %v1256_v57  ;;  %v1272_v21 = vld [vmem:[%s7511_s24 + $0x1f08] sm:$0xff] }
 0x240   : > { %5414 = vmatpush1.bf16.msra.mxu0 %v5413_v8  ;;  %v1225_v8 = vld [vmem:[%s7511_s24 + $0x1d90] sm:$0xff]  ;;  %v1276_v22 = vld [vmem:[%s7511_s24 + $0x1f28] sm:$0xff] }
 0x241   : > { %6438 = vmatpush1.bf16.msra.mxu1 %v6437_v9  ;;  %5416 = vmatprep.subr.bf16.mxu0 %v5415_v10  ;;  %v6455_v9 = vpack.c.bf16 %v1230_v2, %v1226_v1  ;;  %v1229_v10 = vld [vmem:[%s7511_s24 + $0x1db0] sm:$0xff]  ;;  %v1255_v1 = vld [vmem:[%s7511_s24 + $0x1e80] sm:$0xff]  ;;  %v5455_v29 = vpack.c.bf16 %v1276_v22, %v1272_v21  ;;  %v1280_v36 = vld [vmem:[%s7511_s24 + $0x1f48] sm:$0xff] }
 0x242   : > { %6440 = vmatprep.subr.bf16.mxu1 %v6439_v16  ;;  %v1238_v16 = vld [vmem:[%s7511_s24 + $0x1df8] sm:$0xff]  ;;  %v6457_v18 = vpack.c.bf16 %v1229_v10, %v1225_v8  ;;  %v1259_v2 = vld [vmem:[%s7511_s24 + $0x1ea0] sm:$0xff]  ;;  %v1284_v37 = vld [vmem:[%s7511_s24 + $0x1f68] sm:$0xff] }
 0x243   : > { %v1266_v8 = vld [vmem:[%s7511_s24 + $0x1ed8] sm:$0xff]  ;;  %v5449_v10 = vpack.c.bf16 %v1259_v2, %v1255_v1  ;;  %v5459_v43 = vpack.c.bf16 %v1284_v37, %v1280_v36  ;;  %v1288_v50 = vld [vmem:[%s7511_s24 + $0x1f88] sm:$0xff]  ;;  %v273_v21 = vld [vmem:[%s9732_s1 + $0x10] sm:$0xff]  ;;  %v2391_v36 = vrot.slane %v8088_v54, %v8077_v40 }
 0x244   : > { %5418 = vmatpush1.bf16.msra.mxu0 %v5417_v25  ;;  %v1233_v25 = vld [vmem:[%s7511_s24 + $0x1dd0] sm:$0xff]  ;;  %v1292_v51 = vld [vmem:[%s7511_s24 + $0x1fa8] sm:$0xff]  ;;  %v1314_v37 = vld [vmem:[%s7511_s24 + $0x2058] sm:$0xff] }
 0x245   : > { %6442 = vmatpush1.bf16.msra.mxu1 %v6441_v26  ;;  %5420 = vmatprep.subr.bf16.mxu0 %v5419_v27  ;;  %v6459_v26 = vpack.c.bf16 %v1238_v16, %v1234_v15  ;;  %v1237_v27 = vld [vmem:[%s7511_s24 + $0x1df0] sm:$0xff]  ;;  %v1263_v15 = vld [vmem:[%s7511_s24 + $0x1ec0] sm:$0xff]  ;;  %v5463_v58 = vpack.c.bf16 %v1292_v51, %v1288_v50  ;;  %v1296_v1 = vld [vmem:[%s7511_s24 + $0x1fc8] sm:$0xff] }
 0x246   : > { %6444 = vmatprep.subr.bf16.mxu1 %v6443_v31  ;;  %v1246_v31 = vld [vmem:[%s7511_s24 + $0x1e38] sm:$0xff]  ;;  %v6461_v33 = vpack.c.bf16 %v1237_v27, %v1233_v25  ;;  %v1267_v16 = vld [vmem:[%s7511_s24 + $0x1ee0] sm:$0xff]  ;;  %v1300_v2 = vld [vmem:[%s7511_s24 + $0x1fe8] sm:$0xff] }
 0x247   : > { %v1274_v25 = vld [vmem:[%s7511_s24 + $0x1f18] sm:$0xff]  ;;  %v5453_v27 = vpack.c.bf16 %v1267_v16, %v1263_v15  ;;  %v1304_v15 = vld [vmem:[%s7511_s24 + $0x2008] sm:$0xff] }
 0x248   : > { %5422 = vmatpush1.bf16.msra.mxu0 %v5421_v38  ;;  %v1241_v38 = vld [vmem:[%s7511_s24 + $0x1e10] sm:$0xff]  ;;  %v1308_v16 = vld [vmem:[%s7511_s24 + $0x2028] sm:$0xff]  ;;  %v1322_v51 = vld [vmem:[%s7511_s24 + $0x2098] sm:$0xff] }
 0x249   : > { %6446 = vmatpush1.bf16.msra.mxu1 %v6445_v39  ;;  %5424 = vmatprep.subr.bf16.mxu0 %v5423_v41  ;;  %v6463_v39 = vpack.c.bf16 %v1246_v31, %v1242_v30  ;;  %v1245_v41 = vld [vmem:[%s7511_s24 + $0x1e30] sm:$0xff]  ;;  %v1271_v30 = vld [vmem:[%s7511_s24 + $0x1f00] sm:$0xff]  ;;  %v1320_v54 = vld [vmem:[%s7511_s24 + $0x2088] sm:$0xff] }
 0x24a   : > { %6448 = vmatprep.subr.bf16.mxu1 %v6447_v45  ;;  %v1254_v45 = vld [vmem:[%s7511_s24 + $0x1e78] sm:$0xff]  ;;  %v6465_v48 = vpack.c.bf16 %v1245_v41, %v1241_v38  ;;  %v1275_v31 = vld [vmem:[%s7511_s24 + $0x1f20] sm:$0xff] }
 0x24b   : > { %v1282_v38 = vld [vmem:[%s7511_s24 + $0x1f58] sm:$0xff]  ;;  %v5457_v41 = vpack.c.bf16 %v1275_v31, %v1271_v30  ;;  %v1309_v31 = vld [vmem:[%s7511_s24 + $0x2030] sm:$0xff] }
 0x24c   : > { %5426 = vmatpush1.bf16.msra.mxu0 %v5425_v52  ;;  %v1249_v52 = vld [vmem:[%s7511_s24 + $0x1e50] sm:$0xff] }
 0x24d   : > { %6450 = vmatpush1.bf16.msra.mxu1 %v6449_v53  ;;  %5428 = vmatprep.subr.bf16.mxu0 %v5427_v55  ;;  %v6467_v53 = vpack.c.bf16 %v1254_v45, %v1250_v44  ;;  %v1253_v55 = vld [vmem:[%s7511_s24 + $0x1e70] sm:$0xff]  ;;  %v1279_v44 = vld [vmem:[%s7511_s24 + $0x1f40] sm:$0xff] }
 0x24e   : > { %6452 = vmatprep.subr.bf16.mxu1 %v6451_v60  ;;  %v1262_v60 = vld [vmem:[%s7511_s24 + $0x1eb8] sm:$0xff]  ;;  %v6469_v62 = vpack.c.bf16 %v1253_v55, %v1249_v52  ;;  %v1283_v45 = vld [vmem:[%s7511_s24 + $0x1f60] sm:$0xff] }
 0x24f   : > { %v1290_v52 = vld [vmem:[%s7511_s24 + $0x1f98] sm:$0xff]  ;;  %v5461_v55 = vpack.c.bf16 %v1283_v45, %v1279_v44  ;;  %v1315_v44 = vld [vmem:[%s7511_s24 + $0x2060] sm:$0xff]  ;;  %v1313_v45 = vld [vmem:[%s7511_s24 + $0x2050] sm:$0xff] }
 0x250   : > { %5430 = vmatpush1.bf16.msra.mxu0 %v5429_v3  ;;  %v1257_v3 = vld [vmem:[%s7511_s24 + $0x1e90] sm:$0xff] }
 0x251   : > { %6454 = vmatpush1.bf16.msra.mxu1 %v6453_v24  ;;  %5432 = vmatprep.subr.bf16.mxu0 %v5431_v4  ;;  %v6471_v24 = vpack.c.bf16 %v1262_v60, %v1258_v59  ;;  %v1261_v4 = vld [vmem:[%s7511_s24 + $0x1eb0] sm:$0xff]  ;;  %v1287_v59 = vld [vmem:[%s7511_s24 + $0x1f80] sm:$0xff] }
 0x252   : > { %6456 = vmatprep.subr.bf16.mxu1 %v6455_v9  ;;  %v1270_v9 = vld [vmem:[%s7511_s24 + $0x1ef8] sm:$0xff]  ;;  %v6473_v12 = vpack.c.bf16 %v1261_v4, %v1257_v3  ;;  %v1291_v60 = vld [vmem:[%s7511_s24 + $0x1fa0] sm:$0xff] }
 0x253   : > { %v1298_v3 = vld [vmem:[%s7511_s24 + $0x1fd8] sm:$0xff]  ;;  %v5465_v4 = vpack.c.bf16 %v1291_v60, %v1287_v59  ;;  %v1323_v59 = vld [vmem:[%s7511_s24 + $0x20a0] sm:$0xff]  ;;  %v1321_v60 = vld [vmem:[%s7511_s24 + $0x2090] sm:$0xff] }
 0x254   : > { %5434 = vmatpush1.bf16.msra.mxu0 %v5433_v17  ;;  %v1265_v17 = vld [vmem:[%s7511_s24 + $0x1ed0] sm:$0xff] }
 0x255   : > { %6458 = vmatpush1.bf16.msra.mxu1 %v6457_v18  ;;  %5436 = vmatprep.subr.bf16.mxu0 %v5435_v20  ;;  %v6475_v18 = vpack.c.bf16 %v1270_v9, %v1266_v8  ;;  %v1269_v20 = vld [vmem:[%s7511_s24 + $0x1ef0] sm:$0xff]  ;;  %v5467_v8 = vpack.c.bf16 %v1300_v2, %v1296_v1  ;;  %v1299_v9 = vld [vmem:[%s7511_s24 + $0x1fe0] sm:$0xff]  ;;  %v1332_v1 = vld [vmem:[%s7511_s24 + $0x20e8] sm:$0xff] }
 0x256   : > { %6460 = vmatprep.subr.bf16.mxu1 %v6459_v26  ;;  %v1278_v26 = vld [vmem:[%s7511_s24 + $0x1f38] sm:$0xff]  ;;  %v6477_v28 = vpack.c.bf16 %v1269_v20, %v1265_v17  ;;  %v269_v20 = vld [vmem:[#allocation2 + $0x10] sm:$0xff]  ;;  %v5469_v22 = vpack.c.bf16 %v1299_v9, %v1295_v6 }
 0x257   : > { %v1306_v17 = vld [vmem:[%s7511_s24 + $0x2018] sm:$0xff]  ;;  %v1329_v9 = vld [vmem:[%s7511_s24 + $0x20d0] sm:$0xff] }
 0x258   : > { %5438 = vmatpush1.bf16.msra.mxu0 %v5437_v32  ;;  %v1273_v32 = vld [vmem:[%s7511_s24 + $0x1f10] sm:$0xff]  ;;  %v1330_v2 = vld [vmem:[%s7511_s24 + $0x20d8] sm:$0xff] }
 0x259   : > { %6462 = vmatpush1.bf16.msra.mxu1 %v6461_v33  ;;  %5440 = vmatprep.subr.bf16.mxu0 %v5439_v34  ;;  %v6479_v33 = vpack.c.bf16 %v1278_v26, %v1274_v25  ;;  %v1277_v34 = vld [vmem:[%s7511_s24 + $0x1f30] sm:$0xff]  ;;  %v5471_v26 = vpack.c.bf16 %v1308_v16, %v1304_v15  ;;  %v1340_v15 = vld [vmem:[%s7511_s24 + $0x2128] sm:$0xff]  ;;  %v1338_v16 = vld [vmem:[%s7511_s24 + $0x2118] sm:$0xff] }
 0x25a   : > { %6464 = vmatprep.subr.bf16.mxu1 %v6463_v39  ;;  %v1286_v39 = vld [vmem:[%s7511_s24 + $0x1f78] sm:$0xff]  ;;  %v6481_v42 = vpack.c.bf16 %v1277_v34, %v1273_v32  ;;  %v1312_v32 = vld [vmem:[%s7511_s24 + $0x2048] sm:$0xff]  ;;  %v8621_v34 = vmul.f32 %v273_v21, %v269_v20 }
 0x25c   : > { %5442 = vmatpush1.bf16.msra.mxu0 %v5441_v47  ;;  %v1281_v47 = vld [vmem:[%s7511_s24 + $0x1f50] sm:$0xff]  ;;  %v2403_v50 = vrot.slane %v8621_v34, %v7619_v19 }
 0x25d   : > { %6466 = vmatpush1.bf16.msra.mxu1 %v6465_v48  ;;  %5444 = vmatprep.subr.bf16.mxu0 %v5443_v49  ;;  %v6483_v48 = vpack.c.bf16 %v1286_v39, %v1282_v38  ;;  %v1285_v49 = vld [vmem:[%s7511_s24 + $0x1f70] sm:$0xff]  ;;  %v1318_v38 = vld [vmem:[%s7511_s24 + $0x2078] sm:$0xff] }
 0x25e   : > { %6468 = vmatprep.subr.bf16.mxu1 %v6467_v53  ;;  %v1294_v53 = vld [vmem:[%s7511_s24 + $0x1fb8] sm:$0xff]  ;;  %v6485_v57 = vpack.c.bf16 %v1285_v49, %v1281_v47  ;;  %v6499_v47 = vpack.c.bf16 %v1318_v38, %v1314_v37  ;;  %v1324_v49 = vld [vmem:[%s7511_s24 + $0x20a8] sm:$0xff]  ;;  %v1343_v38 = vld [vmem:[%s7511_s24 + $0x2140] sm:$0xff] }
 0x260   : > { %5446 = vmatpush1.bf16.msra.mxu0 %v5445_v61  ;;  %v1289_v61 = vld [vmem:[%s7511_s24 + $0x1f90] sm:$0xff] }
 0x261   : > { %6470 = vmatpush1.bf16.msra.mxu1 %v6469_v62  ;;  %5448 = vmatprep.subr.bf16.mxu0 %v5447_v63  ;;  %v6487_v62 = vpack.c.bf16 %v1294_v53, %v1290_v52  ;;  %v1293_v63 = vld [vmem:[%s7511_s24 + $0x1fb0] sm:$0xff]  ;;  %v1326_v52 = vld [vmem:[%s7511_s24 + $0x20b8] sm:$0xff] }
 0x262   : > { %6472 = vmatprep.subr.bf16.mxu1 %v6471_v24  ;;  %v1302_v24 = vld [vmem:[%s7511_s24 + $0x1ff8] sm:$0xff]  ;;  %v6489_v7 = vpack.c.bf16 %v1293_v63, %v1289_v61  ;;  %v6503_v61 = vpack.c.bf16 %v1326_v52, %v1322_v51  ;;  %v1328_v63 = vld [vmem:[%s7511_s24 + $0x20c8] sm:$0xff]  ;;  %v1351_v51 = vld [vmem:[%s7511_s24 + $0x2180] sm:$0xff] }
 0x263   : > { %v5483_v6 = vpack.c.bf16 %v1332_v1, %v1328_v63  ;;  %v1355_v52 = vld [vmem:[%s7511_s24 + $0x21a0] sm:$0xff] }
 0x264   : > { %5450 = vmatpush1.bf16.msra.mxu0 %v5449_v10  ;;  %v1297_v10 = vld [vmem:[%s7511_s24 + $0x1fd0] sm:$0xff] }
 0x265   : > { %6474 = vmatpush1.bf16.msra.mxu1 %v6473_v12  ;;  %5452 = vmatprep.subr.bf16.mxu0 %v5451_v14  ;;  %v1301_v12 = vld [vmem:[%s7511_s24 + $0x1ff0] sm:$0xff]  ;;  %v6491_v14 = vpack.c.bf16 %v1302_v24, %v1298_v3  ;;  %v1334_v3 = vld [vmem:[%s7511_s24 + $0x20f8] sm:$0xff] }
 0x266   : > { %6476 = vmatprep.subr.bf16.mxu1 %v6475_v18  ;;  %v1310_v18 = vld [vmem:[%s7511_s24 + $0x2038] sm:$0xff]  ;;  %v6493_v25 = vpack.c.bf16 %v1301_v12, %v1297_v10  ;;  %v6507_v10 = vpack.c.bf16 %v1334_v3, %v1330_v2  ;;  %v1333_v12 = vld [vmem:[%s7511_s24 + $0x20f0] sm:$0xff]  ;;  %v1359_v2 = vld [vmem:[%s7511_s24 + $0x21c0] sm:$0xff] }
 0x267   : > { %v6495_v30 = vpack.c.bf16 %v1310_v18, %v1306_v17  ;;  %v1342_v17 = vld [vmem:[%s7511_s24 + $0x2138] sm:$0xff]  ;;  %v6509_v20 = vpack.c.bf16 %v1333_v12, %v1329_v9  ;;  %v1363_v3 = vld [vmem:[%s7511_s24 + $0x21e0] sm:$0xff] }
 0x268   : > { %5454 = vmatpush1.bf16.msra.mxu0 %v5453_v27  ;;  %v1303_v27 = vld [vmem:[%s7511_s24 + $0x2000] sm:$0xff]  ;;  %v1370_v9 = vld [vmem:[%s7511_s24 + $0x2218] sm:$0xff]  ;;  %v5501_v12 = vpack.c.bf16 %v1363_v3, %v1359_v2  ;;  %v1400_v2 = vld [vmem:[%s7511_s24 + $0x2308] sm:$0xff] }
 0x269   : > { %6478 = vmatpush1.bf16.msra.mxu1 %v6477_v28  ;;  %5456 = vmatprep.subr.bf16.mxu0 %v5455_v29  ;;  %v1307_v28 = vld [vmem:[%s7511_s24 + $0x2020] sm:$0xff]  ;;  %v1305_v29 = vld [vmem:[%s7511_s24 + $0x2010] sm:$0xff]  ;;  %v1404_v3 = vld [vmem:[%s7511_s24 + $0x2328] sm:$0xff] }
 0x26a   : > { %6480 = vmatprep.subr.bf16.mxu1 %v6479_v33  ;;  %v1316_v33 = vld [vmem:[%s7511_s24 + $0x2068] sm:$0xff]  ;;  %v5473_v39 = vpack.c.bf16 %v1307_v28, %v1303_v27  ;;  %v6511_v27 = vpack.c.bf16 %v1342_v17, %v1338_v16  ;;  %v1341_v28 = vld [vmem:[%s7511_s24 + $0x2130] sm:$0xff]  ;;  %v1367_v16 = vld [vmem:[%s7511_s24 + $0x2200] sm:$0xff] }
 0x26b   : > { %v1371_v17 = vld [vmem:[%s7511_s24 + $0x2220] sm:$0xff] }
 0x26c   : > { %5458 = vmatpush1.bf16.msra.mxu0 %v5457_v41  ;;  %v6497_v41 = vpack.c.bf16 %v1309_v31, %v1305_v29  ;;  %v1344_v29 = vld [vmem:[%s7511_s24 + $0x2148] sm:$0xff]  ;;  %v1346_v31 = vld [vmem:[%s7511_s24 + $0x2158] sm:$0xff] }
 0x26d   : > { %6482 = vmatpush1.bf16.msra.mxu1 %v6481_v42  ;;  %5460 = vmatprep.subr.bf16.mxu0 %v5459_v43  ;;  %v5475_v42 = vpack.c.bf16 %v1316_v33, %v1312_v32  ;;  %v1311_v43 = vld [vmem:[%s7511_s24 + $0x2040] sm:$0xff]  ;;  %v1350_v32 = vld [vmem:[%s7511_s24 + $0x2178] sm:$0xff] }
 0x26e   : > { %6484 = vmatprep.subr.bf16.mxu1 %v6483_v48  ;;  %v1317_v48 = vld [vmem:[%s7511_s24 + $0x2070] sm:$0xff]  ;;  %v5477_v53 = vpack.c.bf16 %v1315_v44, %v1311_v43  ;;  %v1352_v44 = vld [vmem:[%s7511_s24 + $0x2188] sm:$0xff] }
 0x26f   : > { %v1349_v43 = vld [vmem:[%s7511_s24 + $0x2170] sm:$0xff] }
 0x270   : > { %5462 = vmatpush1.bf16.msra.mxu0 %v5461_v55  ;;  %v6501_v55 = vpack.c.bf16 %v1317_v48, %v1313_v45  ;;  %v1356_v45 = vld [vmem:[%s7511_s24 + $0x21a8] sm:$0xff]  ;;  %v1358_v48 = vld [vmem:[%s7511_s24 + $0x21b8] sm:$0xff] }
 0x271   : > { %6486 = vmatpush1.bf16.msra.mxu1 %v6485_v57  ;;  %5464 = vmatprep.subr.bf16.mxu0 %v5463_v58  ;;  %v5479_v57 = vpack.c.bf16 %v1324_v49, %v1320_v54  ;;  %v1319_v58 = vld [vmem:[%s7511_s24 + $0x2080] sm:$0xff] }
 0x272   : > { %6488 = vmatprep.subr.bf16.mxu1 %v6487_v62  ;;  %v1325_v62 = vld [vmem:[%s7511_s24 + $0x20b0] sm:$0xff]  ;;  %v5481_v24 = vpack.c.bf16 %v1323_v59, %v1319_v58  ;;  %v1360_v58 = vld [vmem:[%s7511_s24 + $0x21c8] sm:$0xff] }
 0x273   : > { %v1364_v59 = vld [vmem:[%s7511_s24 + $0x21e8] sm:$0xff] }
 0x274   : > { %5466 = vmatpush1.bf16.msra.mxu0 %v5465_v4  ;;  %v6505_v4 = vpack.c.bf16 %v1325_v62, %v1321_v60  ;;  %v1362_v60 = vld [vmem:[%s7511_s24 + $0x21d8] sm:$0xff]  ;;  %v5497_v62 = vpack.c.bf16 %v1355_v52, %v1351_v51  ;;  %v5499_v1 = vpack.c.bf16 %v1364_v59, %v1360_v58  ;;  %v1392_v51 = vld [vmem:[%s7511_s24 + $0x22c8] sm:$0xff] }
 0x275   : > { %6490 = vmatpush1.bf16.msra.mxu1 %v6489_v7  ;;  %5468 = vmatprep.subr.bf16.mxu0 %v5467_v8  ;;  %v1327_v7 = vld [vmem:[%s7511_s24 + $0x20c0] sm:$0xff]  ;;  %v1396_v52 = vld [vmem:[%s7511_s24 + $0x22e8] sm:$0xff] }
 0x276   : > { %6492 = vmatprep.subr.bf16.mxu1 %v6491_v14  ;;  %v1331_v8 = vld [vmem:[%s7511_s24 + $0x20e0] sm:$0xff]  ;;  %v1336_v14 = vld [vmem:[%s7511_s24 + $0x2108] sm:$0xff]  ;;  %v5515_v59 = vpack.c.bf16 %v1396_v52, %v1392_v51 }
 0x277   : > { %v5485_v18 = vpack.c.bf16 %v1331_v8, %v1327_v7  ;;  %v5487_v21 = vpack.c.bf16 %v1340_v15, %v1336_v14  ;;  %v1368_v7 = vld [vmem:[%s7511_s24 + $0x2208] sm:$0xff] }
 0x278   : > { %5470 = vmatpush1.bf16.msra.mxu0 %v5469_v22  ;;  %v1335_v22 = vld [vmem:[%s7511_s24 + $0x2100] sm:$0xff]  ;;  %v1372_v8 = vld [vmem:[%s7511_s24 + $0x2228] sm:$0xff] }
 0x279   : > { %6494 = vmatpush1.bf16.msra.mxu1 %v6493_v25  ;;  %5472 = vmatprep.subr.bf16.mxu0 %v5471_v26  ;;  %v1339_v25 = vld [vmem:[%s7511_s24 + $0x2120] sm:$0xff]  ;;  %v1337_v26 = vld [vmem:[%s7511_s24 + $0x2110] sm:$0xff]  ;;  %v5503_v15 = vpack.c.bf16 %v1372_v8, %v1368_v7  ;;  %v5519_v8 = vpack.c.bf16 %v1404_v3, %v1400_v2 }
 0x27a   : > { %6496 = vmatprep.subr.bf16.mxu1 %v6495_v30  ;;  %v1348_v30 = vld [vmem:[%s7511_s24 + $0x2168] sm:$0xff]  ;;  %v5489_v33 = vpack.c.bf16 %v1339_v25, %v1335_v22 }
 0x27b   : > { %3075 = vmatmul.mubr.f32.vlgmr.msra.gmra.mrb[0].mxu0 %v2391_v36  ;;  %v5491_v37 = vpack.c.bf16 %v1348_v30, %v1344_v29  ;;  %v1376_v22 = vld [vmem:[%s7511_s24 + $0x2248] sm:$0xff] }
 0x27c   : > { %5474 = vmatpush1.bf16.msra.mxu0 %v5473_v39  ;;  %4211 = vmatmul.mubr.f32.vlgmr.msra.gmra.mrb[0].mxu1 %v2391_v36  ;;  %v6513_v36 = vpack.c.bf16 %v1341_v28, %v1337_v26  ;;  %v1347_v39 = vld [vmem:[%s7511_s24 + $0x2160] sm:$0xff]  ;;  %v1380_v25 = vld [vmem:[%s7511_s24 + $0x2268] sm:$0xff]  ;;  %v1378_v26 = vld [vmem:[%s7511_s24 + $0x2258] sm:$0xff]  ;;  %v5505_v28 = vpack.c.bf16 %v1371_v17, %v1367_v16 }
 0x27d   : > { %6498 = vmatpush1.bf16.msra.mxu1 %v6497_v41  ;;  %5476 = vmatprep.subr.bf16.mxu0 %v5475_v42  ;;  %v1345_v41 = vld [vmem:[%s7511_s24 + $0x2150] sm:$0xff]  ;;  %v6515_v42 = vpack.c.bf16 %v1350_v32, %v1346_v31  ;;  %v5493_v54 = vpack.c.bf16 %v1347_v39, %v1343_v38  ;;  %v5507_v30 = vpack.c.bf16 %v1380_v25, %v1376_v22  ;;  %v1375_v31 = vld [vmem:[%s7511_s24 + $0x2240] sm:$0xff]  ;;  %v1384_v38 = vld [vmem:[%s7511_s24 + $0x2288] sm:$0xff] }
 0x27e   : > { %6500 = vmatprep.subr.bf16.mxu1 %v6499_v47  ;;  %3145 = vmatprep.mubr.f32.mxu0 %v2403_v50  ;;  %v1354_v47 = vld [vmem:[%s7511_s24 + $0x2198] sm:$0xff]  ;;  %v6517_v49 = vpack.c.bf16 %v1349_v43, %v1345_v41  ;;  %v1379_v32 = vld [vmem:[%s7511_s24 + $0x2260] sm:$0xff]  ;;  %v1388_v39 = vld [vmem:[%s7511_s24 + $0x22a8] sm:$0xff] }
 0x27f   : > { %4281 = vmatprep.mubr.f32.mxu1 %v2403_v50  ;;  %v5495_v50 = vpack.c.bf16 %v1356_v45, %v1352_v44  ;;  %v1386_v41 = vld [vmem:[%s7511_s24 + $0x2298] sm:$0xff]  ;;  %v5509_v43 = vpack.c.bf16 %v1379_v32, %v1375_v31  ;;  %v5511_v45 = vpack.c.bf16 %v1388_v39, %v1384_v38  ;;  %v1408_v16 = vld [vmem:[%s7511_s24 + $0x2348] sm:$0xff] }
 0x280   : > { %5478 = vmatpush1.bf16.msra.mxu0 %v5477_v53  ;;  %v1353_v53 = vld [vmem:[%s7511_s24 + $0x2190] sm:$0xff]  ;;  %v1412_v17 = vld [vmem:[%s7511_s24 + $0x2368] sm:$0xff] }
 0x281   : > { %6502 = vmatpush1.bf16.msra.mxu1 %v6501_v55  ;;  %5480 = vmatprep.subr.bf16.mxu0 %v5479_v57  ;;  %v6519_v55 = vpack.c.bf16 %v1358_v48, %v1354_v47  ;;  %v1357_v57 = vld [vmem:[%s7511_s24 + $0x21b0] sm:$0xff]  ;;  %v1383_v47 = vld [vmem:[%s7511_s24 + $0x2280] sm:$0xff]  ;;  %v5523_v25 = vpack.c.bf16 %v1412_v17, %v1408_v16  ;;  %v1416_v31 = vld [vmem:[%s7511_s24 + $0x2388] sm:$0xff] }
 0x282   : > { %6504 = vmatprep.subr.bf16.mxu1 %v6503_v61  ;;  %v1366_v61 = vld [vmem:[%s7511_s24 + $0x21f8] sm:$0xff]  ;;  %v6521_v63 = vpack.c.bf16 %v1357_v57, %v1353_v53  ;;  %v1387_v48 = vld [vmem:[%s7511_s24 + $0x22a0] sm:$0xff]  ;;  %v1420_v32 = vld [vmem:[%s7511_s24 + $0x23a8] sm:$0xff] }
 0x283   : > { %v1394_v53 = vld [vmem:[%s7511_s24 + $0x22d8] sm:$0xff]  ;;  %v5513_v57 = vpack.c.bf16 %v1387_v48, %v1383_v47  ;;  %v5527_v39 = vpack.c.bf16 %v1420_v32, %v1416_v31  ;;  %v1424_v47 = vld [vmem:[%s7511_s24 + $0x23c8] sm:$0xff] }
 0x284   : > { %5482 = vmatpush1.bf16.msra.mxu0 %v5481_v24  ;;  %v1361_v24 = vld [vmem:[%s7511_s24 + $0x21d0] sm:$0xff]  ;;  %v1428_v48 = vld [vmem:[%s7511_s24 + $0x23e8] sm:$0xff]  ;;  %v1454_v31 = vld [vmem:[%s7511_s24 + $0x24b8] sm:$0xff] }
 0x285   : > { %6506 = vmatpush1.bf16.msra.mxu1 %v6505_v4  ;;  %5484 = vmatprep.subr.bf16.mxu0 %v5483_v6  ;;  %v6523_v4 = vpack.c.bf16 %v1366_v61, %v1362_v60  ;;  %v1365_v6 = vld [vmem:[%s7511_s24 + $0x21f0] sm:$0xff]  ;;  %v1391_v60 = vld [vmem:[%s7511_s24 + $0x22c0] sm:$0xff]  ;;  %v5531_v52 = vpack.c.bf16 %v1428_v48, %v1424_v47  ;;  %v1462_v47 = vld [vmem:[%s7511_s24 + $0x24f8] sm:$0xff] }
 0x286   : > { %6508 = vmatprep.subr.bf16.mxu1 %v6507_v10  ;;  %v1374_v10 = vld [vmem:[%s7511_s24 + $0x2238] sm:$0xff]  ;;  %v6525_v14 = vpack.c.bf16 %v1365_v6, %v1361_v24  ;;  %v1395_v61 = vld [vmem:[%s7511_s24 + $0x22e0] sm:$0xff] }
 0x287   : > { %v1402_v24 = vld [vmem:[%s7511_s24 + $0x2318] sm:$0xff]  ;;  %v5517_v6 = vpack.c.bf16 %v1395_v61, %v1391_v60  ;;  %v1432_v60 = vld [vmem:[%s7511_s24 + $0x2408] sm:$0xff] }
 0x288   : > { %5486 = vmatpush1.bf16.msra.mxu0 %v5485_v18  ;;  %v1369_v18 = vld [vmem:[%s7511_s24 + $0x2210] sm:$0xff]  ;;  %v1436_v61 = vld [vmem:[%s7511_s24 + $0x2428] sm:$0xff] }
 0x289   : > { %6510 = vmatpush1.bf16.msra.mxu1 %v6509_v20  ;;  %5488 = vmatprep.subr.bf16.mxu0 %v5487_v21  ;;  %v6527_v20 = vpack.c.bf16 %v1374_v10, %v1370_v9  ;;  %v1373_v21 = vld [vmem:[%s7511_s24 + $0x2230] sm:$0xff]  ;;  %v1399_v9 = vld [vmem:[%s7511_s24 + $0x2300] sm:$0xff]  ;;  %v5535_v3 = vpack.c.bf16 %v1436_v61, %v1432_v60  ;;  %v1470_v60 = vld [vmem:[%s7511_s24 + $0x2538] sm:$0xff] }
 0x28a   : > { %6512 = vmatprep.subr.bf16.mxu1 %v6511_v27  ;;  %v1382_v27 = vld [vmem:[%s7511_s24 + $0x2278] sm:$0xff]  ;;  %v6529_v29 = vpack.c.bf16 %v1373_v21, %v1369_v18  ;;  %v1403_v10 = vld [vmem:[%s7511_s24 + $0x2320] sm:$0xff] }
 0x28b   : > { %v1410_v18 = vld [vmem:[%s7511_s24 + $0x2358] sm:$0xff]  ;;  %v5521_v21 = vpack.c.bf16 %v1403_v10, %v1399_v9  ;;  %v1440_v9 = vld [vmem:[%s7511_s24 + $0x2448] sm:$0xff] }
 0x28c   : > { %5490 = vmatpush1.bf16.msra.mxu0 %v5489_v33  ;;  %v1377_v33 = vld [vmem:[%s7511_s24 + $0x2250] sm:$0xff]  ;;  %v1444_v10 = vld [vmem:[%s7511_s24 + $0x2468] sm:$0xff] }
 0x28d   : > { %6514 = vmatpush1.bf16.msra.mxu1 %v6513_v36  ;;  %5492 = vmatprep.subr.bf16.mxu0 %v5491_v37  ;;  %v6531_v36 = vpack.c.bf16 %v1382_v27, %v1378_v26  ;;  %v1381_v37 = vld [vmem:[%s7511_s24 + $0x2270] sm:$0xff]  ;;  %v1407_v26 = vld [vmem:[%s7511_s24 + $0x2340] sm:$0xff] }
 0x28e   : > { %6516 = vmatprep.subr.bf16.mxu1 %v6515_v42  ;;  %v1390_v42 = vld [vmem:[%s7511_s24 + $0x22b8] sm:$0xff]  ;;  %v6533_v44 = vpack.c.bf16 %v1381_v37, %v1377_v33  ;;  %v1411_v27 = vld [vmem:[%s7511_s24 + $0x2360] sm:$0xff] }
 0x28f   : > { %v1418_v33 = vld [vmem:[%s7511_s24 + $0x2398] sm:$0xff]  ;;  %v5525_v37 = vpack.c.bf16 %v1411_v27, %v1407_v26  ;;  %v1445_v26 = vld [vmem:[%s7511_s24 + $0x2470] sm:$0xff]  ;;  %v1448_v27 = vld [vmem:[%s7511_s24 + $0x2488] sm:$0xff] }
 0x290   : > { %5494 = vmatpush1.bf16.msra.mxu0 %v5493_v54  ;;  %v1385_v54 = vld [vmem:[%s7511_s24 + $0x2290] sm:$0xff] }
 0x291   : > { %6518 = vmatpush1.bf16.msra.mxu1 %v6517_v49  ;;  %5496 = vmatprep.subr.bf16.mxu0 %v5495_v50  ;;  %v6535_v49 = vpack.c.bf16 %v1390_v42, %v1386_v41  ;;  %v1389_v50 = vld [vmem:[%s7511_s24 + $0x22b0] sm:$0xff]  ;;  %v1415_v41 = vld [vmem:[%s7511_s24 + $0x2380] sm:$0xff] }
 0x292   : > { %6520 = vmatprep.subr.bf16.mxu1 %v6519_v55  ;;  %v1398_v55 = vld [vmem:[%s7511_s24 + $0x22f8] sm:$0xff]  ;;  %v6537_v58 = vpack.c.bf16 %v1389_v50, %v1385_v54  ;;  %v1419_v42 = vld [vmem:[%s7511_s24 + $0x23a0] sm:$0xff] }
 0x293   : > { %v1426_v54 = vld [vmem:[%s7511_s24 + $0x23d8] sm:$0xff]  ;;  %v5529_v50 = vpack.c.bf16 %v1419_v42, %v1415_v41  ;;  %v1453_v42 = vld [vmem:[%s7511_s24 + $0x24b0] sm:$0xff] }
 0x294   : > { %5498 = vmatpush1.bf16.msra.mxu0 %v5497_v62  ;;  %v1393_v62 = vld [vmem:[%s7511_s24 + $0x22d0] sm:$0xff] }
 0x295   : > { %6522 = vmatpush1.bf16.msra.mxu1 %v6521_v63  ;;  %5500 = vmatprep.subr.bf16.mxu0 %v5499_v1  ;;  %v6539_v63 = vpack.c.bf16 %v1398_v55, %v1394_v53  ;;  %v1397_v1 = vld [vmem:[%s7511_s24 + $0x22f0] sm:$0xff]  ;;  %v1423_v53 = vld [vmem:[%s7511_s24 + $0x23c0] sm:$0xff] }
 0x296   : > { %6524 = vmatprep.subr.bf16.mxu1 %v6523_v4  ;;  %v1406_v4 = vld [vmem:[%s7511_s24 + $0x2338] sm:$0xff]  ;;  %v6541_v7 = vpack.c.bf16 %v1397_v1, %v1393_v62  ;;  %v1427_v55 = vld [vmem:[%s7511_s24 + $0x23e0] sm:$0xff] }
 0x297   : > { %v1434_v62 = vld [vmem:[%s7511_s24 + $0x2418] sm:$0xff]  ;;  %v5533_v1 = vpack.c.bf16 %v1427_v55, %v1423_v53  ;;  %v1461_v55 = vld [vmem:[%s7511_s24 + $0x24f0] sm:$0xff] }
 0x298   : > { %5502 = vmatpush1.bf16.msra.mxu0 %v5501_v12  ;;  %v1401_v12 = vld [vmem:[%s7511_s24 + $0x2310] sm:$0xff] }
 0x299   : > { %6526 = vmatpush1.bf16.msra.mxu1 %v6525_v14  ;;  %5504 = vmatprep.subr.bf16.mxu0 %v5503_v15  ;;  %v6543_v14 = vpack.c.bf16 %v1406_v4, %v1402_v24  ;;  %v1405_v15 = vld [vmem:[%s7511_s24 + $0x2330] sm:$0xff]  ;;  %v1431_v24 = vld [vmem:[%s7511_s24 + $0x2400] sm:$0xff] }
 0x29a   : > { %6528 = vmatprep.subr.bf16.mxu1 %v6527_v20  ;;  %v1414_v20 = vld [vmem:[%s7511_s24 + $0x2378] sm:$0xff]  ;;  %v6545_v22 = vpack.c.bf16 %v1405_v15, %v1401_v12  ;;  %v1435_v4 = vld [vmem:[%s7511_s24 + $0x2420] sm:$0xff]  ;;  %v2399_v12 = vrot.slane %v8621_v34, %v7663_v11 }
 0x29b   : > { %v1446_v15 = vld [vmem:[%s7511_s24 + $0x2478] sm:$0xff]  ;;  %v5537_v16 = vpack.c.bf16 %v1435_v4, %v1431_v24  ;;  %v1469_v4 = vld [vmem:[%s7511_s24 + $0x2530] sm:$0xff] }
 0x29c   : > { %5506 = vmatpush1.bf16.msra.mxu0 %v5505_v28  ;;  %v1409_v28 = vld [vmem:[%s7511_s24 + $0x2350] sm:$0xff] }
 0x29d   : > { %6530 = vmatpush1.bf16.msra.mxu1 %v6529_v29  ;;  %5508 = vmatprep.subr.bf16.mxu0 %v5507_v30  ;;  %v6547_v29 = vpack.c.bf16 %v1414_v20, %v1410_v18  ;;  %v1413_v30 = vld [vmem:[%s7511_s24 + $0x2370] sm:$0xff]  ;;  %v5539_v18 = vpack.c.bf16 %v1444_v10, %v1440_v9  ;;  %v1439_v20 = vld [vmem:[%s7511_s24 + $0x2440] sm:$0xff]  ;;  %v1478_v9 = vld [vmem:[%s7511_s24 + $0x2578] sm:$0xff] }
 0x29e   : > { %6532 = vmatprep.subr.bf16.mxu1 %v6531_v36  ;;  %v1422_v36 = vld [vmem:[%s7511_s24 + $0x23b8] sm:$0xff]  ;;  %v6549_v38 = vpack.c.bf16 %v1413_v30, %v1409_v28  ;;  %v1452_v28 = vld [vmem:[%s7511_s24 + $0x24a8] sm:$0xff] }
 0x29f   : > { %v1450_v30 = vld [vmem:[%s7511_s24 + $0x2498] sm:$0xff] }
 0x2a0   : > { %5510 = vmatpush1.bf16.msra.mxu0 %v5509_v43  ;;  %v1417_v43 = vld [vmem:[%s7511_s24 + $0x2390] sm:$0xff]  ;;  %v6567_v41 = vpack.c.bf16 %v1454_v31, %v1450_v30  ;;  %v1479_v30 = vld [vmem:[%s7511_s24 + $0x2580] sm:$0xff] }
 0x2a1   : > { %6534 = vmatpush1.bf16.msra.mxu1 %v6533_v44  ;;  %5512 = vmatprep.subr.bf16.mxu0 %v5511_v45  ;;  %v6551_v44 = vpack.c.bf16 %v1422_v36, %v1418_v33  ;;  %v1421_v45 = vld [vmem:[%s7511_s24 + $0x23b0] sm:$0xff]  ;;  %v5543_v36 = vpack.c.bf16 %v1452_v28, %v1448_v27  ;;  %v1483_v31 = vld [vmem:[%s7511_s24 + $0x25a0] sm:$0xff] }
 0x2a2   : > { %6536 = vmatprep.subr.bf16.mxu1 %v6535_v49  ;;  %v1430_v49 = vld [vmem:[%s7511_s24 + $0x23f8] sm:$0xff]  ;;  %v6553_v51 = vpack.c.bf16 %v1421_v45, %v1417_v43  ;;  %v1456_v43 = vld [vmem:[%s7511_s24 + $0x24c8] sm:$0xff] }
 0x2a3   : > { %v1458_v45 = vld [vmem:[%s7511_s24 + $0x24d8] sm:$0xff] }
 0x2a4   : > { %5514 = vmatpush1.bf16.msra.mxu0 %v5513_v57  ;;  %v1425_v57 = vld [vmem:[%s7511_s24 + $0x23d0] sm:$0xff]  ;;  %v6571_v53 = vpack.c.bf16 %v1462_v47, %v1458_v45  ;;  %v1487_v45 = vld [vmem:[%s7511_s24 + $0x25c0] sm:$0xff] }
 0x2a5   : > { %6538 = vmatpush1.bf16.msra.mxu1 %v6537_v58  ;;  %5516 = vmatprep.subr.bf16.mxu0 %v5515_v59  ;;  %v6555_v58 = vpack.c.bf16 %v1430_v49, %v1426_v54  ;;  %v1429_v59 = vld [vmem:[%s7511_s24 + $0x23f0] sm:$0xff]  ;;  %v1491_v47 = vld [vmem:[%s7511_s24 + $0x25e0] sm:$0xff] }
 0x2a6   : > { %6540 = vmatprep.subr.bf16.mxu1 %v6539_v63  ;;  %v1438_v63 = vld [vmem:[%s7511_s24 + $0x2438] sm:$0xff]  ;;  %v6557_v2 = vpack.c.bf16 %v1429_v59, %v1425_v57  ;;  %v1464_v57 = vld [vmem:[%s7511_s24 + $0x2508] sm:$0xff] }
 0x2a7   : > { %v1466_v59 = vld [vmem:[%s7511_s24 + $0x2518] sm:$0xff] }
 0x2a8   : > { %5518 = vmatpush1.bf16.msra.mxu0 %v5517_v6  ;;  %v1433_v6 = vld [vmem:[%s7511_s24 + $0x2410] sm:$0xff]  ;;  %v6575_v24 = vpack.c.bf16 %v1470_v60, %v1466_v59  ;;  %v1495_v59 = vld [vmem:[%s7511_s24 + $0x2600] sm:$0xff] }
 0x2a9   : > { %6542 = vmatpush1.bf16.msra.mxu1 %v6541_v7  ;;  %5520 = vmatprep.subr.bf16.mxu0 %v5519_v8  ;;  %v6559_v7 = vpack.c.bf16 %v1438_v63, %v1434_v62  ;;  %v1437_v8 = vld [vmem:[%s7511_s24 + $0x2430] sm:$0xff]  ;;  %v1499_v60 = vld [vmem:[%s7511_s24 + $0x2620] sm:$0xff] }
 0x2aa   : > { %6544 = vmatprep.subr.bf16.mxu1 %v6543_v14  ;;  %v1442_v14 = vld [vmem:[%s7511_s24 + $0x2458] sm:$0xff]  ;;  %v6561_v17 = vpack.c.bf16 %v1437_v8, %v1433_v6  ;;  %v1472_v6 = vld [vmem:[%s7511_s24 + $0x2548] sm:$0xff] }
 0x2ab   : > { %v1474_v8 = vld [vmem:[%s7511_s24 + $0x2558] sm:$0xff] }
 0x2ac   : > { %5522 = vmatpush1.bf16.msra.mxu0 %v5521_v21  ;;  %v1443_v21 = vld [vmem:[%s7511_s24 + $0x2460] sm:$0xff] }
 0x2ad   : > { %6546 = vmatpush1.bf16.msra.mxu1 %v6545_v22  ;;  %5524 = vmatprep.subr.bf16.mxu0 %v5523_v25  ;;  %v1441_v22 = vld [vmem:[%s7511_s24 + $0x2450] sm:$0xff]  ;;  %v6563_v25 = vpack.c.bf16 %v1446_v15, %v1442_v14  ;;  %v5541_v32 = vpack.c.bf16 %v1443_v21, %v1439_v20  ;;  %v1471_v15 = vld [vmem:[%s7511_s24 + $0x2540] sm:$0xff]  ;;  %v1480_v21 = vld [vmem:[%s7511_s24 + $0x2588] sm:$0xff] }
 0x2ae   : > { %6548 = vmatprep.subr.bf16.mxu1 %v6547_v29  ;;  %v2411_v29 = vrot.slane %v8621_v34, %v7672_v23  ;;  %v6565_v33 = vpack.c.bf16 %v1445_v26, %v1441_v22  ;;  %v1477_v20 = vld [vmem:[%s7511_s24 + $0x2570] sm:$0xff]  ;;  %v1484_v22 = vld [vmem:[%s7511_s24 + $0x25a8] sm:$0xff]  ;;  %v1486_v26 = vld [vmem:[%s7511_s24 + $0x25b8] sm:$0xff] }
 0x2b0   : > { %5526 = vmatpush1.bf16.msra.mxu0 %v5525_v37  ;;  %v1447_v37 = vld [vmem:[%s7511_s24 + $0x2480] sm:$0xff] }
 0x2b1   : > { %6550 = vmatpush1.bf16.msra.mxu1 %v6549_v38  ;;  %5528 = vmatprep.subr.bf16.mxu0 %v5527_v39  ;;  %v1451_v38 = vld [vmem:[%s7511_s24 + $0x24a0] sm:$0xff]  ;;  %v1449_v39 = vld [vmem:[%s7511_s24 + $0x2490] sm:$0xff] }
 0x2b2   : > { %6552 = vmatprep.subr.bf16.mxu1 %v6551_v44  ;;  %v1460_v44 = vld [vmem:[%s7511_s24 + $0x24e8] sm:$0xff]  ;;  %v5545_v48 = vpack.c.bf16 %v1451_v38, %v1447_v37  ;;  %v6569_v54 = vpack.c.bf16 %v1453_v42, %v1449_v39  ;;  %v1490_v39 = vld [vmem:[%s7511_s24 + $0x25d8] sm:$0xff]  ;;  %v5561_v42 = vpack.c.bf16 %v1483_v31, %v1479_v30 }
 0x2b3   : > { %v5547_v49 = vpack.c.bf16 %v1460_v44, %v1456_v43  ;;  %v1488_v37 = vld [vmem:[%s7511_s24 + $0x25c8] sm:$0xff] }
 0x2b4   : > { %5530 = vmatpush1.bf16.msra.mxu0 %v5529_v50  ;;  %v1455_v50 = vld [vmem:[%s7511_s24 + $0x24c0] sm:$0xff]  ;;  %v1492_v38 = vld [vmem:[%s7511_s24 + $0x25e8] sm:$0xff] }
 0x2b5   : > { %6554 = vmatpush1.bf16.msra.mxu1 %v6553_v51  ;;  %5532 = vmatprep.subr.bf16.mxu0 %v5531_v52  ;;  %v1459_v51 = vld [vmem:[%s7511_s24 + $0x24e0] sm:$0xff]  ;;  %v1457_v52 = vld [vmem:[%s7511_s24 + $0x24d0] sm:$0xff]  ;;  %v5563_v44 = vpack.c.bf16 %v1492_v38, %v1488_v37  ;;  %v1520_v30 = vld [vmem:[%s7511_s24 + $0x26c8] sm:$0xff] }
 0x2b6   : > { %6556 = vmatprep.subr.bf16.mxu1 %v6555_v58  ;;  %v1468_v58 = vld [vmem:[%s7511_s24 + $0x2528] sm:$0xff]  ;;  %v5549_v61 = vpack.c.bf16 %v1459_v51, %v1455_v50  ;;  %v6573_v62 = vpack.c.bf16 %v1461_v55, %v1457_v52  ;;  %v1498_v52 = vld [vmem:[%s7511_s24 + $0x2618] sm:$0xff]  ;;  %v5565_v55 = vpack.c.bf16 %v1491_v47, %v1487_v45 }
 0x2b7   : > { %v5551_v63 = vpack.c.bf16 %v1468_v58, %v1464_v57  ;;  %v1496_v50 = vld [vmem:[%s7511_s24 + $0x2608] sm:$0xff] }
 0x2b8   : > { %5534 = vmatpush1.bf16.msra.mxu0 %v5533_v1  ;;  %v1463_v1 = vld [vmem:[%s7511_s24 + $0x2500] sm:$0xff]  ;;  %v1500_v51 = vld [vmem:[%s7511_s24 + $0x2628] sm:$0xff] }
 0x2b9   : > { %6558 = vmatpush1.bf16.msra.mxu1 %v6557_v2  ;;  %5536 = vmatprep.subr.bf16.mxu0 %v5535_v3  ;;  %v1467_v2 = vld [vmem:[%s7511_s24 + $0x2520] sm:$0xff]  ;;  %v1465_v3 = vld [vmem:[%s7511_s24 + $0x2510] sm:$0xff]  ;;  %v5567_v58 = vpack.c.bf16 %v1500_v51, %v1496_v50  ;;  %v1524_v31 = vld [vmem:[%s7511_s24 + $0x26e8] sm:$0xff] }
 0x2ba   : > { %6560 = vmatprep.subr.bf16.mxu1 %v6559_v7  ;;  %v1476_v7 = vld [vmem:[%s7511_s24 + $0x2568] sm:$0xff]  ;;  %v5553_v10 = vpack.c.bf16 %v1467_v2, %v1463_v1  ;;  %v5579_v38 = vpack.c.bf16 %v1524_v31, %v1520_v30 }
 0x2bb   : > { %3146 = vmatmul.mubr.f32.vlgmr.msra.gmra.mrb[0].mxu0 %v2399_v12  ;;  %v5555_v14 = vpack.c.bf16 %v1476_v7, %v1472_v6  ;;  %v1504_v1 = vld [vmem:[%s7511_s24 + $0x2648] sm:$0xff] }
 0x2bc   : > { %5538 = vmatpush1.bf16.msra.mxu0 %v5537_v16  ;;  %4282 = vmatmul.mubr.f32.vlgmr.msra.gmra.mrb[0].mxu1 %v2399_v12  ;;  %v6577_v12 = vpack.c.bf16 %v1469_v4, %v1465_v3  ;;  %v1475_v16 = vld [vmem:[%s7511_s24 + $0x2560] sm:$0xff]  ;;  %v1508_v2 = vld [vmem:[%s7511_s24 + $0x2668] sm:$0xff]  ;;  %v1506_v3 = vld [vmem:[%s7511_s24 + $0x2658] sm:$0xff]  ;;  %v5569_v4 = vpack.c.bf16 %v1499_v60, %v1495_v59 }
 0x2bd   : > { %6562 = vmatpush1.bf16.msra.mxu1 %v6561_v17  ;;  %5540 = vmatprep.subr.bf16.mxu0 %v5539_v18  ;;  %v1473_v17 = vld [vmem:[%s7511_s24 + $0x2550] sm:$0xff]  ;;  %v6579_v18 = vpack.c.bf16 %v1478_v9, %v1474_v8  ;;  %v5557_v27 = vpack.c.bf16 %v1475_v16, %v1471_v15  ;;  %v5571_v7 = vpack.c.bf16 %v1508_v2, %v1504_v1  ;;  %v1503_v8 = vld [vmem:[%s7511_s24 + $0x2640] sm:$0xff]  ;;  %v1512_v15 = vld [vmem:[%s7511_s24 + $0x2688] sm:$0xff] }
 0x2be   : > { %6564 = vmatprep.subr.bf16.mxu1 %v6563_v25  ;;  %3216 = vmatprep.mubr.f32.mxu0 %v2411_v29  ;;  %v1482_v25 = vld [vmem:[%s7511_s24 + $0x2598] sm:$0xff]  ;;  %v6581_v28 = vpack.c.bf16 %v1477_v20, %v1473_v17  ;;  %v1507_v9 = vld [vmem:[%s7511_s24 + $0x2660] sm:$0xff]  ;;  %v1516_v16 = vld [vmem:[%s7511_s24 + $0x26a8] sm:$0xff] }
 0x2bf   : > { %4352 = vmatprep.mubr.f32.mxu1 %v2411_v29  ;;  %v5559_v29 = vpack.c.bf16 %v1484_v22, %v1480_v21  ;;  %v1514_v17 = vld [vmem:[%s7511_s24 + $0x2698] sm:$0xff]  ;;  %v5573_v20 = vpack.c.bf16 %v1507_v9, %v1503_v8  ;;  %v5575_v22 = vpack.c.bf16 %v1516_v16, %v1512_v15  ;;  %v1528_v45 = vld [vmem:[%s7511_s24 + $0x2708] sm:$0xff] }
 0x2c0   : > { %5542 = vmatpush1.bf16.msra.mxu0 %v5541_v32  ;;  %v1481_v32 = vld [vmem:[%s7511_s24 + $0x2590] sm:$0xff]  ;;  %v1532_v47 = vld [vmem:[%s7511_s24 + $0x2728] sm:$0xff] }
 0x2c1   : > { %6566 = vmatpush1.bf16.msra.mxu1 %v6565_v33  ;;  %5544 = vmatprep.subr.bf16.mxu0 %v5543_v36  ;;  %v6583_v33 = vpack.c.bf16 %v1486_v26, %v1482_v25  ;;  %v1485_v36 = vld [vmem:[%s7511_s24 + $0x25b0] sm:$0xff]  ;;  %v1511_v25 = vld [vmem:[%s7511_s24 + $0x2680] sm:$0xff]  ;;  %v5583_v51 = vpack.c.bf16 %v1532_v47, %v1528_v45  ;;  %v1536_v59 = vld [vmem:[%s7511_s24 + $0x2748] sm:$0xff] }
 0x2c2   : > { %6568 = vmatprep.subr.bf16.mxu1 %v6567_v41  ;;  %v1494_v41 = vld [vmem:[%s7511_s24 + $0x25f8] sm:$0xff]  ;;  %v6585_v43 = vpack.c.bf16 %v1485_v36, %v1481_v32  ;;  %v1515_v26 = vld [vmem:[%s7511_s24 + $0x26a0] sm:$0xff]  ;;  %v1540_v60 = vld [vmem:[%s7511_s24 + $0x2768] sm:$0xff] }
 0x2c3   : > { %v1522_v32 = vld [vmem:[%s7511_s24 + $0x26d8] sm:$0xff]  ;;  %v5577_v36 = vpack.c.bf16 %v1515_v26, %v1511_v25  ;;  %v5587_v2 = vpack.c.bf16 %v1540_v60, %v1536_v59  ;;  %v1544_v8 = vld [vmem:[%s7511_s24 + $0x2788] sm:$0xff] }
 0x2c4   : > { %5546 = vmatpush1.bf16.msra.mxu0 %v5545_v48  ;;  %v1489_v48 = vld [vmem:[%s7511_s24 + $0x25d0] sm:$0xff]  ;;  %v1548_v9 = vld [vmem:[%s7511_s24 + $0x27a8] sm:$0xff] }
 0x2c5   : > { %6570 = vmatpush1.bf16.msra.mxu1 %v6569_v54  ;;  %5548 = vmatprep.subr.bf16.mxu0 %v5547_v49  ;;  %v6587_v54 = vpack.c.bf16 %v1494_v41, %v1490_v39  ;;  %v1493_v49 = vld [vmem:[%s7511_s24 + $0x25f0] sm:$0xff]  ;;  %v1519_v39 = vld [vmem:[%s7511_s24 + $0x26c0] sm:$0xff]  ;;  %v5591_v16 = vpack.c.bf16 %v1548_v9, %v1544_v8  ;;  %v1552_v25 = vld [vmem:[%s7511_s24 + $0x27c8] sm:$0xff] }
 0x2c6   : > { %6572 = vmatprep.subr.bf16.mxu1 %v6571_v53  ;;  %v1502_v53 = vld [vmem:[%s7511_s24 + $0x2638] sm:$0xff]  ;;  %v6589_v57 = vpack.c.bf16 %v1493_v49, %v1489_v48  ;;  %v1523_v41 = vld [vmem:[%s7511_s24 + $0x26e0] sm:$0xff]  ;;  %v1556_v26 = vld [vmem:[%s7511_s24 + $0x27e8] sm:$0xff] }
 0x2c7   : > { %v1530_v48 = vld [vmem:[%s7511_s24 + $0x2718] sm:$0xff]  ;;  %v5581_v49 = vpack.c.bf16 %v1523_v41, %v1519_v39  ;;  %v5595_v31 = vpack.c.bf16 %v1556_v26, %v1552_v25  ;;  %v1560_v39 = vld [vmem:[%s7511_s24 + $0x2808] sm:$0xff] }
 0x2c8   : > { %5550 = vmatpush1.bf16.msra.mxu0 %v5549_v61  ;;  %v1497_v61 = vld [vmem:[%s7511_s24 + $0x2610] sm:$0xff]  ;;  %v1564_v41 = vld [vmem:[%s7511_s24 + $0x2828] sm:$0xff]  ;;  %v1582_v8 = vld [vmem:[%s7511_s24 + $0x28b8] sm:$0xff] }
 0x2c9   : > { %6574 = vmatpush1.bf16.msra.mxu1 %v6573_v62  ;;  %5552 = vmatprep.subr.bf16.mxu0 %v5551_v63  ;;  %v6591_v62 = vpack.c.bf16 %v1502_v53, %v1498_v52  ;;  %v1501_v63 = vld [vmem:[%s7511_s24 + $0x2630] sm:$0xff]  ;;  %v1527_v52 = vld [vmem:[%s7511_s24 + $0x2700] sm:$0xff]  ;;  %v5599_v47 = vpack.c.bf16 %v1564_v41, %v1560_v39  ;;  %v1590_v25 = vld [vmem:[%s7511_s24 + $0x28f8] sm:$0xff] }
 0x2ca   : > { %6576 = vmatprep.subr.bf16.mxu1 %v6575_v24  ;;  %v1510_v24 = vld [vmem:[%s7511_s24 + $0x2678] sm:$0xff]  ;;  %v6593_v6 = vpack.c.bf16 %v1501_v63, %v1497_v61  ;;  %v1531_v53 = vld [vmem:[%s7511_s24 + $0x2720] sm:$0xff] }
 0x2cb   : > { %v1538_v61 = vld [vmem:[%s7511_s24 + $0x2758] sm:$0xff]  ;;  %v5585_v63 = vpack.c.bf16 %v1531_v53, %v1527_v52  ;;  %v1568_v52 = vld [vmem:[%s7511_s24 + $0x2848] sm:$0xff] }
 0x2cc   : > { %5554 = vmatpush1.bf16.msra.mxu0 %v5553_v10  ;;  %v1505_v10 = vld [vmem:[%s7511_s24 + $0x2650] sm:$0xff]  ;;  %v1572_v53 = vld [vmem:[%s7511_s24 + $0x2868] sm:$0xff]  ;;  %v1598_v39 = vld [vmem:[%s7511_s24 + $0x2938] sm:$0xff] }
 0x2cd   : > { %6578 = vmatpush1.bf16.msra.mxu1 %v6577_v12  ;;  %5556 = vmatprep.subr.bf16.mxu0 %v5555_v14  ;;  %v6595_v12 = vpack.c.bf16 %v1510_v24, %v1506_v3  ;;  %v1509_v14 = vld [vmem:[%s7511_s24 + $0x2670] sm:$0xff]  ;;  %v1535_v3 = vld [vmem:[%s7511_s24 + $0x2740] sm:$0xff] }
 0x2ce   : > { %6580 = vmatprep.subr.bf16.mxu1 %v6579_v18  ;;  %v1518_v18 = vld [vmem:[%s7511_s24 + $0x26b8] sm:$0xff]  ;;  %v6597_v21 = vpack.c.bf16 %v1509_v14, %v1505_v10  ;;  %v1539_v24 = vld [vmem:[%s7511_s24 + $0x2760] sm:$0xff] }
 0x2cf   : > { %v1546_v10 = vld [vmem:[%s7511_s24 + $0x2798] sm:$0xff]  ;;  %v5589_v14 = vpack.c.bf16 %v1539_v24, %v1535_v3  ;;  %v1573_v3 = vld [vmem:[%s7511_s24 + $0x2870] sm:$0xff]  ;;  %v1576_v24 = vld [vmem:[%s7511_s24 + $0x2888] sm:$0xff] }
 0x2d0   : > { %5558 = vmatpush1.bf16.msra.mxu0 %v5557_v27  ;;  %v1513_v27 = vld [vmem:[%s7511_s24 + $0x2690] sm:$0xff] }
 0x2d1   : > { %6582 = vmatpush1.bf16.msra.mxu1 %v6581_v28  ;;  %5560 = vmatprep.subr.bf16.mxu0 %v5559_v29  ;;  %v6599_v28 = vpack.c.bf16 %v1518_v18, %v1514_v17  ;;  %v1517_v29 = vld [vmem:[%s7511_s24 + $0x26b0] sm:$0xff]  ;;  %v1543_v17 = vld [vmem:[%s7511_s24 + $0x2780] sm:$0xff] }
 0x2d2   : > { %6584 = vmatprep.subr.bf16.mxu1 %v6583_v33  ;;  %v1526_v33 = vld [vmem:[%s7511_s24 + $0x26f8] sm:$0xff]  ;;  %v6601_v37 = vpack.c.bf16 %v1517_v29, %v1513_v27  ;;  %v1547_v18 = vld [vmem:[%s7511_s24 + $0x27a0] sm:$0xff] }
 0x2d3   : > { %v1554_v27 = vld [vmem:[%s7511_s24 + $0x27d8] sm:$0xff]  ;;  %v5593_v29 = vpack.c.bf16 %v1547_v18, %v1543_v17  ;;  %v1581_v18 = vld [vmem:[%s7511_s24 + $0x28b0] sm:$0xff] }
 0x2d4   : > { %5562 = vmatpush1.bf16.msra.mxu0 %v5561_v42  ;;  %v1521_v42 = vld [vmem:[%s7511_s24 + $0x26d0] sm:$0xff] }
 0x2d5   : > { %6586 = vmatpush1.bf16.msra.mxu1 %v6585_v43  ;;  %5564 = vmatprep.subr.bf16.mxu0 %v5563_v44  ;;  %v6603_v43 = vpack.c.bf16 %v1526_v33, %v1522_v32  ;;  %v1525_v44 = vld [vmem:[%s7511_s24 + $0x26f0] sm:$0xff]  ;;  %v1551_v32 = vld [vmem:[%s7511_s24 + $0x27c0] sm:$0xff] }
 0x2d6   : > { %6588 = vmatprep.subr.bf16.mxu1 %v6587_v54  ;;  %v1534_v54 = vld [vmem:[%s7511_s24 + $0x2738] sm:$0xff]  ;;  %v6605_v50 = vpack.c.bf16 %v1525_v44, %v1521_v42  ;;  %v1555_v33 = vld [vmem:[%s7511_s24 + $0x27e0] sm:$0xff] }
 0x2d7   : > { %v1562_v42 = vld [vmem:[%s7511_s24 + $0x2818] sm:$0xff]  ;;  %v5597_v44 = vpack.c.bf16 %v1555_v33, %v1551_v32  ;;  %v1589_v33 = vld [vmem:[%s7511_s24 + $0x28f0] sm:$0xff] }
 0x2d8   : > { %5566 = vmatpush1.bf16.msra.mxu0 %v5565_v55  ;;  %v1529_v55 = vld [vmem:[%s7511_s24 + $0x2710] sm:$0xff] }
 0x2d9   : > { %6590 = vmatpush1.bf16.msra.mxu1 %v6589_v57  ;;  %5568 = vmatprep.subr.bf16.mxu0 %v5567_v58  ;;  %v6607_v57 = vpack.c.bf16 %v1534_v54, %v1530_v48  ;;  %v1533_v58 = vld [vmem:[%s7511_s24 + $0x2730] sm:$0xff]  ;;  %v1559_v48 = vld [vmem:[%s7511_s24 + $0x2800] sm:$0xff] }
 0x2da   : > { %6592 = vmatprep.subr.bf16.mxu1 %v6591_v62  ;;  %v1542_v62 = vld [vmem:[%s7511_s24 + $0x2778] sm:$0xff]  ;;  %v6609_v1 = vpack.c.bf16 %v1533_v58, %v1529_v55  ;;  %v1563_v54 = vld [vmem:[%s7511_s24 + $0x2820] sm:$0xff]  ;;  %v2407_v55 = vrot.slane %v8621_v34, %v7801_v35 }
 0x2db   : > { %v1574_v58 = vld [vmem:[%s7511_s24 + $0x2878] sm:$0xff]  ;;  %v5601_v59 = vpack.c.bf16 %v1563_v54, %v1559_v48  ;;  %v1597_v54 = vld [vmem:[%s7511_s24 + $0x2930] sm:$0xff] }
 0x2dc   : > { %5570 = vmatpush1.bf16.msra.mxu0 %v5569_v4  ;;  %v1537_v4 = vld [vmem:[%s7511_s24 + $0x2750] sm:$0xff] }
 0x2dd   : > { %6594 = vmatpush1.bf16.msra.mxu1 %v6593_v6  ;;  %5572 = vmatprep.subr.bf16.mxu0 %v5571_v7  ;;  %v6611_v6 = vpack.c.bf16 %v1542_v62, %v1538_v61  ;;  %v1541_v7 = vld [vmem:[%s7511_s24 + $0x2770] sm:$0xff]  ;;  %v5603_v61 = vpack.c.bf16 %v1572_v53, %v1568_v52  ;;  %v1567_v62 = vld [vmem:[%s7511_s24 + $0x2840] sm:$0xff]  ;;  %v1606_v52 = vld [vmem:[%s7511_s24 + $0x2978] sm:$0xff] }
 0x2de   : > { %6596 = vmatprep.subr.bf16.mxu1 %v6595_v12  ;;  %v1550_v12 = vld [vmem:[%s7511_s24 + $0x27b8] sm:$0xff]  ;;  %v6613_v15 = vpack.c.bf16 %v1541_v7, %v1537_v4  ;;  %v1580_v4 = vld [vmem:[%s7511_s24 + $0x28a8] sm:$0xff] }
 0x2df   : > { %v1578_v7 = vld [vmem:[%s7511_s24 + $0x2898] sm:$0xff] }
 0x2e0   : > { %5574 = vmatpush1.bf16.msra.mxu0 %v5573_v20  ;;  %v1545_v20 = vld [vmem:[%s7511_s24 + $0x2790] sm:$0xff]  ;;  %v6631_v17 = vpack.c.bf16 %v1582_v8, %v1578_v7  ;;  %v1607_v7 = vld [vmem:[%s7511_s24 + $0x2980] sm:$0xff] }
 0x2e1   : > { %6598 = vmatpush1.bf16.msra.mxu1 %v6597_v21  ;;  %5576 = vmatprep.subr.bf16.mxu0 %v5575_v22  ;;  %v6615_v21 = vpack.c.bf16 %v1550_v12, %v1546_v10  ;;  %v1549_v22 = vld [vmem:[%s7511_s24 + $0x27b0] sm:$0xff]  ;;  %v5607_v12 = vpack.c.bf16 %v1580_v4, %v1576_v24  ;;  %v1611_v8 = vld [vmem:[%s7511_s24 + $0x29a0] sm:$0xff] }
 0x2e2   : > { %6600 = vmatprep.subr.bf16.mxu1 %v6599_v28  ;;  %v1558_v28 = vld [vmem:[%s7511_s24 + $0x27f8] sm:$0xff]  ;;  %v6617_v30 = vpack.c.bf16 %v1549_v22, %v1545_v20  ;;  %v1584_v20 = vld [vmem:[%s7511_s24 + $0x28c8] sm:$0xff] }
 0x2e3   : > { %v1586_v22 = vld [vmem:[%s7511_s24 + $0x28d8] sm:$0xff] }
 0x2e4   : > { %5578 = vmatpush1.bf16.msra.mxu0 %v5577_v36  ;;  %v1553_v36 = vld [vmem:[%s7511_s24 + $0x27d0] sm:$0xff]  ;;  %v6635_v32 = vpack.c.bf16 %v1590_v25, %v1586_v22  ;;  %v1615_v22 = vld [vmem:[%s7511_s24 + $0x29c0] sm:$0xff] }
 0x2e5   : > { %6602 = vmatpush1.bf16.msra.mxu1 %v6601_v37  ;;  %5580 = vmatprep.subr.bf16.mxu0 %v5579_v38  ;;  %v6619_v37 = vpack.c.bf16 %v1558_v28, %v1554_v27  ;;  %v1557_v38 = vld [vmem:[%s7511_s24 + $0x27f0] sm:$0xff]  ;;  %v1619_v25 = vld [vmem:[%s7511_s24 + $0x29e0] sm:$0xff] }
 0x2e6   : > { %6604 = vmatprep.subr.bf16.mxu1 %v6603_v43  ;;  %v1566_v43 = vld [vmem:[%s7511_s24 + $0x2838] sm:$0xff]  ;;  %v6621_v45 = vpack.c.bf16 %v1557_v38, %v1553_v36  ;;  %v1592_v36 = vld [vmem:[%s7511_s24 + $0x2908] sm:$0xff] }
 0x2e7   : > { %v1594_v38 = vld [vmem:[%s7511_s24 + $0x2918] sm:$0xff] }
 0x2e8   : > { %5582 = vmatpush1.bf16.msra.mxu0 %v5581_v49  ;;  %v1561_v49 = vld [vmem:[%s7511_s24 + $0x2810] sm:$0xff]  ;;  %v6639_v48 = vpack.c.bf16 %v1598_v39, %v1594_v38  ;;  %v1623_v38 = vld [vmem:[%s7511_s24 + $0x2a00] sm:$0xff] }
 0x2e9   : > { %6606 = vmatpush1.bf16.msra.mxu1 %v6605_v50  ;;  %5584 = vmatprep.subr.bf16.mxu0 %v5583_v51  ;;  %v6623_v50 = vpack.c.bf16 %v1566_v43, %v1562_v42  ;;  %v1565_v51 = vld [vmem:[%s7511_s24 + $0x2830] sm:$0xff]  ;;  %v1627_v39 = vld [vmem:[%s7511_s24 + $0x2a20] sm:$0xff] }
 0x2ea   : > { %6608 = vmatprep.subr.bf16.mxu1 %v6607_v57  ;;  %v1570_v57 = vld [vmem:[%s7511_s24 + $0x2858] sm:$0xff]  ;;  %v6625_v60 = vpack.c.bf16 %v1565_v51, %v1561_v49  ;;  %v1600_v49 = vld [vmem:[%s7511_s24 + $0x2948] sm:$0xff] }
 0x2eb   : > { %v1602_v51 = vld [vmem:[%s7511_s24 + $0x2958] sm:$0xff] }
 0x2ec   : > { %5586 = vmatpush1.bf16.msra.mxu0 %v5585_v63  ;;  %v1571_v63 = vld [vmem:[%s7511_s24 + $0x2860] sm:$0xff] }
 0x2ed   : > { %6610 = vmatpush1.bf16.msra.mxu1 %v6609_v1  ;;  %5588 = vmatprep.subr.bf16.mxu0 %v5587_v2  ;;  %v1569_v1 = vld [vmem:[%s7511_s24 + $0x2850] sm:$0xff]  ;;  %v6627_v2 = vpack.c.bf16 %v1574_v58, %v1570_v57  ;;  %v5605_v9 = vpack.c.bf16 %v1571_v63, %v1567_v62  ;;  %v1599_v58 = vld [vmem:[%s7511_s24 + $0x2940] sm:$0xff]  ;;  %v1608_v63 = vld [vmem:[%s7511_s24 + $0x2988] sm:$0xff] }
 0x2ee   : > { %6612 = vmatprep.subr.bf16.mxu1 %v6611_v6  ;;  %v2419_v6 = vrot.slane %v8621_v34, %v7810_v46  ;;  %v6629_v10 = vpack.c.bf16 %v1573_v3, %v1569_v1  ;;  %v1605_v62 = vld [vmem:[%s7511_s24 + $0x2970] sm:$0xff]  ;;  %v1612_v1 = vld [vmem:[%s7511_s24 + $0x29a8] sm:$0xff]  ;;  %v1614_v3 = vld [vmem:[%s7511_s24 + $0x29b8] sm:$0xff] }
 0x2f0   : > { %5590 = vmatpush1.bf16.msra.mxu0 %v5589_v14  ;;  %v1575_v14 = vld [vmem:[%s7511_s24 + $0x2880] sm:$0xff] }
 0x2f1   : > { %6614 = vmatpush1.bf16.msra.mxu1 %v6613_v15  ;;  %5592 = vmatprep.subr.bf16.mxu0 %v5591_v16  ;;  %v1579_v15 = vld [vmem:[%s7511_s24 + $0x28a0] sm:$0xff]  ;;  %v1577_v16 = vld [vmem:[%s7511_s24 + $0x2890] sm:$0xff] }
 0x2f2   : > { %6616 = vmatprep.subr.bf16.mxu1 %v6615_v21  ;;  %v1588_v21 = vld [vmem:[%s7511_s24 + $0x28e8] sm:$0xff]  ;;  %v5609_v26 = vpack.c.bf16 %v1579_v15, %v1575_v14  ;;  %v6633_v27 = vpack.c.bf16 %v1581_v18, %v1577_v16  ;;  %v1618_v16 = vld [vmem:[%s7511_s24 + $0x29d8] sm:$0xff]  ;;  %v5625_v18 = vpack.c.bf16 %v1611_v8, %v1607_v7 }
 0x2f3   : > { %v5611_v28 = vpack.c.bf16 %v1588_v21, %v1584_v20  ;;  %v1616_v14 = vld [vmem:[%s7511_s24 + $0x29c8] sm:$0xff] }
 0x2f4   : > { %5594 = vmatpush1.bf16.msra.mxu0 %v5593_v29  ;;  %v1583_v29 = vld [vmem:[%s7511_s24 + $0x28c0] sm:$0xff]  ;;  %v1620_v15 = vld [vmem:[%s7511_s24 + $0x29e8] sm:$0xff] }
 0x2f5   : > { %6618 = vmatpush1.bf16.msra.mxu1 %v6617_v30  ;;  %5596 = vmatprep.subr.bf16.mxu0 %v5595_v31  ;;  %v1587_v30 = vld [vmem:[%s7511_s24 + $0x28e0] sm:$0xff]  ;;  %v1585_v31 = vld [vmem:[%s7511_s24 + $0x28d0] sm:$0xff]  ;;  %v5627_v21 = vpack.c.bf16 %v1620_v15, %v1616_v14  ;;  %v1648_v7 = vld [vmem:[%s7511_s24 + $0x2ac8] sm:$0xff] }
 0x2f6   : > { %6620 = vmatprep.subr.bf16.mxu1 %v6619_v37  ;;  %v1596_v37 = vld [vmem:[%s7511_s24 + $0x2928] sm:$0xff]  ;;  %v5613_v41 = vpack.c.bf16 %v1587_v30, %v1583_v29  ;;  %v6637_v42 = vpack.c.bf16 %v1589_v33, %v1585_v31  ;;  %v1626_v31 = vld [vmem:[%s7511_s24 + $0x2a18] sm:$0xff]  ;;  %v5629_v33 = vpack.c.bf16 %v1619_v25, %v1615_v22 }
 0x2f7   : > { %v5615_v43 = vpack.c.bf16 %v1596_v37, %v1592_v36  ;;  %v1624_v29 = vld [vmem:[%s7511_s24 + $0x2a08] sm:$0xff] }
 0x2f8   : > { %5598 = vmatpush1.bf16.msra.mxu0 %v5597_v44  ;;  %v1591_v44 = vld [vmem:[%s7511_s24 + $0x2900] sm:$0xff]  ;;  %v1628_v30 = vld [vmem:[%s7511_s24 + $0x2a28] sm:$0xff] }
 0x2f9   : > { %6622 = vmatpush1.bf16.msra.mxu1 %v6621_v45  ;;  %5600 = vmatprep.subr.bf16.mxu0 %v5599_v47  ;;  %v1595_v45 = vld [vmem:[%s7511_s24 + $0x2920] sm:$0xff]  ;;  %v1593_v47 = vld [vmem:[%s7511_s24 + $0x2910] sm:$0xff]  ;;  %v5631_v37 = vpack.c.bf16 %v1628_v30, %v1624_v29  ;;  %v1652_v8 = vld [vmem:[%s7511_s24 + $0x2ae8] sm:$0xff] }
 0x2fa   : > { %6624 = vmatprep.subr.bf16.mxu1 %v6623_v50  ;;  %v1604_v50 = vld [vmem:[%s7511_s24 + $0x2968] sm:$0xff]  ;;  %v5617_v53 = vpack.c.bf16 %v1595_v45, %v1591_v44  ;;  %v5643_v15 = vpack.c.bf16 %v1652_v8, %v1648_v7 }
 0x2fb   : > { %3217 = vmatmul.mubr.f32.vlgmr.msra.gmra.mrb[0].mxu0 %v2407_v55  ;;  %v5619_v57 = vpack.c.bf16 %v1604_v50, %v1600_v49  ;;  %v1632_v44 = vld [vmem:[%s7511_s24 + $0x2a48] sm:$0xff] }
 0x2fc   : > { %5602 = vmatpush1.bf16.msra.mxu0 %v5601_v59  ;;  %4353 = vmatmul.mubr.f32.vlgmr.msra.gmra.mrb[0].mxu1 %v2407_v55  ;;  %v6641_v55 = vpack.c.bf16 %v1597_v54, %v1593_v47  ;;  %v1603_v59 = vld [vmem:[%s7511_s24 + $0x2960] sm:$0xff]  ;;  %v1636_v45 = vld [vmem:[%s7511_s24 + $0x2a68] sm:$0xff]  ;;  %v1634_v47 = vld [vmem:[%s7511_s24 + $0x2a58] sm:$0xff]  ;;  %v5633_v54 = vpack.c.bf16 %v1627_v39, %v1623_v38 }
 0x2fd   : > { %6626 = vmatpush1.bf16.msra.mxu1 %v6625_v60  ;;  %5604 = vmatprep.subr.bf16.mxu0 %v5603_v61  ;;  %v1601_v60 = vld [vmem:[%s7511_s24 + $0x2950] sm:$0xff]  ;;  %v6643_v61 = vpack.c.bf16 %v1606_v52, %v1602_v51  ;;  %v5621_v24 = vpack.c.bf16 %v1603_v59, %v1599_v58  ;;  %v5635_v50 = vpack.c.bf16 %v1636_v45, %v1632_v44  ;;  %v1631_v51 = vld [vmem:[%s7511_s24 + $0x2a40] sm:$0xff]  ;;  %v1640_v58 = vld [vmem:[%s7511_s24 + $0x2a88] sm:$0xff] }
 0x2fe   : > { %6628 = vmatprep.subr.bf16.mxu1 %v6627_v2  ;;  %3287 = vmatprep.mubr.f32.mxu0 %v2419_v6  ;;  %v1610_v2 = vld [vmem:[%s7511_s24 + $0x2998] sm:$0xff]  ;;  %v6645_v4 = vpack.c.bf16 %v1605_v62, %v1601_v60  ;;  %v1635_v52 = vld [vmem:[%s7511_s24 + $0x2a60] sm:$0xff]  ;;  %v1644_v59 = vld [vmem:[%s7511_s24 + $0x2aa8] sm:$0xff] }
 0x2ff   : > { %4423 = vmatprep.mubr.f32.mxu1 %v2419_v6  ;;  %v5623_v6 = vpack.c.bf16 %v1612_v1, %v1608_v63  ;;  %v1642_v60 = vld [vmem:[%s7511_s24 + $0x2a98] sm:$0xff]  ;;  %v5637_v62 = vpack.c.bf16 %v1635_v52, %v1631_v51  ;;  %v5639_v1 = vpack.c.bf16 %v1644_v59, %v1640_v58  ;;  %v1656_v22 = vld [vmem:[%s7511_s24 + $0x2b08] sm:$0xff] }
 0x300   : > { %5606 = vmatpush1.bf16.msra.mxu0 %v5605_v9  ;;  %v1609_v9 = vld [vmem:[%s7511_s24 + $0x2990] sm:$0xff]  ;;  %v1660_v25 = vld [vmem:[%s7511_s24 + $0x2b28] sm:$0xff] }
 0x301   : > { %6630 = vmatpush1.bf16.msra.mxu1 %v6629_v10  ;;  %5608 = vmatprep.subr.bf16.mxu0 %v5607_v12  ;;  %v6647_v10 = vpack.c.bf16 %v1614_v3, %v1610_v2  ;;  %v1613_v12 = vld [vmem:[%s7511_s24 + $0x29b0] sm:$0xff]  ;;  %v1639_v2 = vld [vmem:[%s7511_s24 + $0x2a80] sm:$0xff]  ;;  %v5647_v30 = vpack.c.bf16 %v1660_v25, %v1656_v22  ;;  %v1664_v38 = vld [vmem:[%s7511_s24 + $0x2b48] sm:$0xff] }
 0x302   : > { %6632 = vmatprep.subr.bf16.mxu1 %v6631_v17  ;;  %v1622_v17 = vld [vmem:[%s7511_s24 + $0x29f8] sm:$0xff]  ;;  %v6649_v20 = vpack.c.bf16 %v1613_v12, %v1609_v9  ;;  %v1643_v3 = vld [vmem:[%s7511_s24 + $0x2aa0] sm:$0xff]  ;;  %v1668_v39 = vld [vmem:[%s7511_s24 + $0x2b68] sm:$0xff] }
 0x303   : > { %v1650_v9 = vld [vmem:[%s7511_s24 + $0x2ad8] sm:$0xff]  ;;  %v5641_v12 = vpack.c.bf16 %v1643_v3, %v1639_v2  ;;  %v5651_v45 = vpack.c.bf16 %v1668_v39, %v1664_v38  ;;  %v1672_v51 = vld [vmem:[%s7511_s24 + $0x2b88] sm:$0xff] }
 0x304   : > { %5610 = vmatpush1.bf16.msra.mxu0 %v5609_v26  ;;  %v1617_v26 = vld [vmem:[%s7511_s24 + $0x29d0] sm:$0xff]  ;;  %v1676_v52 = vld [vmem:[%s7511_s24 + $0x2ba8] sm:$0xff] }
 0x305   : > { %6634 = vmatpush1.bf16.msra.mxu1 %v6633_v27  ;;  %5612 = vmatprep.subr.bf16.mxu0 %v5611_v28  ;;  %v6651_v27 = vpack.c.bf16 %v1622_v17, %v1618_v16  ;;  %v1621_v28 = vld [vmem:[%s7511_s24 + $0x29f0] sm:$0xff]  ;;  %v1647_v16 = vld [vmem:[%s7511_s24 + $0x2ac0] sm:$0xff]  ;;  %v5655_v59 = vpack.c.bf16 %v1676_v52, %v1672_v51  ;;  %v1680_v2 = vld [vmem:[%s7511_s24 + $0x2bc8] sm:$0xff] }
 0x306   : > { %6636 = vmatprep.subr.bf16.mxu1 %v6635_v32  ;;  %v1630_v32 = vld [vmem:[%s7511_s24 + $0x2a38] sm:$0xff]  ;;  %v6653_v36 = vpack.c.bf16 %v1621_v28, %v1617_v26  ;;  %v1651_v17 = vld [vmem:[%s7511_s24 + $0x2ae0] sm:$0xff]  ;;  %v1684_v3 = vld [vmem:[%s7511_s24 + $0x2be8] sm:$0xff] }
 0x307   : > { %v1658_v26 = vld [vmem:[%s7511_s24 + $0x2b18] sm:$0xff]  ;;  %v5645_v28 = vpack.c.bf16 %v1651_v17, %v1647_v16  ;;  %v5659_v8 = vpack.c.bf16 %v1684_v3, %v1680_v2  ;;  %v1688_v16 = vld [vmem:[%s7511_s24 + $0x2c08] sm:$0xff] }
 0x308   : > { %5614 = vmatpush1.bf16.msra.mxu0 %v5613_v41  ;;  %v1625_v41 = vld [vmem:[%s7511_s24 + $0x2a10] sm:$0xff]  ;;  %v1692_v17 = vld [vmem:[%s7511_s24 + $0x2c28] sm:$0xff]  ;;  %v1710_v51 = vld [vmem:[%s7511_s24 + $0x2cb8] sm:$0xff] }
 0x309   : > { %6638 = vmatpush1.bf16.msra.mxu1 %v6637_v42  ;;  %5616 = vmatprep.subr.bf16.mxu0 %v5615_v43  ;;  %v6655_v42 = vpack.c.bf16 %v1630_v32, %v1626_v31  ;;  %v1629_v43 = vld [vmem:[%s7511_s24 + $0x2a30] sm:$0xff]  ;;  %v1655_v31 = vld [vmem:[%s7511_s24 + $0x2b00] sm:$0xff]  ;;  %v5663_v25 = vpack.c.bf16 %v1692_v17, %v1688_v16  ;;  %v1718_v2 = vld [vmem:[%s7511_s24 + $0x2cf8] sm:$0xff] }
 0x30a   : > { %6640 = vmatprep.subr.bf16.mxu1 %v6639_v48  ;;  %v1638_v48 = vld [vmem:[%s7511_s24 + $0x2a78] sm:$0xff]  ;;  %v6657_v49 = vpack.c.bf16 %v1629_v43, %v1625_v41  ;;  %v1659_v32 = vld [vmem:[%s7511_s24 + $0x2b20] sm:$0xff] }
 0x30b   : > { %v1666_v41 = vld [vmem:[%s7511_s24 + $0x2b58] sm:$0xff]  ;;  %v5649_v43 = vpack.c.bf16 %v1659_v32, %v1655_v31  ;;  %v1696_v31 = vld [vmem:[%s7511_s24 + $0x2c48] sm:$0xff] }
 0x30c   : > { %5618 = vmatpush1.bf16.msra.mxu0 %v5617_v53  ;;  %v1633_v53 = vld [vmem:[%s7511_s24 + $0x2a50] sm:$0xff]  ;;  %v1700_v32 = vld [vmem:[%s7511_s24 + $0x2c68] sm:$0xff]  ;;  %v1726_v16 = vld [vmem:[%s7511_s24 + $0x2d38] sm:$0xff] }
 0x30d   : > { %6642 = vmatpush1.bf16.msra.mxu1 %v6641_v55  ;;  %5620 = vmatprep.subr.bf16.mxu0 %v5619_v57  ;;  %v6659_v55 = vpack.c.bf16 %v1638_v48, %v1634_v47  ;;  %v1637_v57 = vld [vmem:[%s7511_s24 + $0x2a70] sm:$0xff]  ;;  %v1663_v47 = vld [vmem:[%s7511_s24 + $0x2b40] sm:$0xff] }
 0x30e   : > { %6644 = vmatprep.subr.bf16.mxu1 %v6643_v61  ;;  %v1646_v61 = vld [vmem:[%s7511_s24 + $0x2ab8] sm:$0xff]  ;;  %v6661_v63 = vpack.c.bf16 %v1637_v57, %v1633_v53  ;;  %v1667_v48 = vld [vmem:[%s7511_s24 + $0x2b60] sm:$0xff] }
 0x30f   : > { %v1674_v53 = vld [vmem:[%s7511_s24 + $0x2b98] sm:$0xff]  ;;  %v5653_v57 = vpack.c.bf16 %v1667_v48, %v1663_v47  ;;  %v1701_v47 = vld [vmem:[%s7511_s24 + $0x2c70] sm:$0xff]  ;;  %v1704_v48 = vld [vmem:[%s7511_s24 + $0x2c88] sm:$0xff] }
 0x310   : > { %5622 = vmatpush1.bf16.msra.mxu0 %v5621_v24  ;;  %v1641_v24 = vld [vmem:[%s7511_s24 + $0x2a90] sm:$0xff] }
 0x311   : > { %6646 = vmatpush1.bf16.msra.mxu1 %v6645_v4  ;;  %5624 = vmatprep.subr.bf16.mxu0 %v5623_v6  ;;  %v6663_v4 = vpack.c.bf16 %v1646_v61, %v1642_v60  ;;  %v1645_v6 = vld [vmem:[%s7511_s24 + $0x2ab0] sm:$0xff]  ;;  %v1671_v60 = vld [vmem:[%s7511_s24 + $0x2b80] sm:$0xff] }
 0x312   : > { %6648 = vmatprep.subr.bf16.mxu1 %v6647_v10  ;;  %v1654_v10 = vld [vmem:[%s7511_s24 + $0x2af8] sm:$0xff]  ;;  %v6665_v14 = vpack.c.bf16 %v1645_v6, %v1641_v24  ;;  %v1675_v61 = vld [vmem:[%s7511_s24 + $0x2ba0] sm:$0xff] }
 0x313   : > { %v1682_v24 = vld [vmem:[%s7511_s24 + $0x2bd8] sm:$0xff]  ;;  %v5657_v6 = vpack.c.bf16 %v1675_v61, %v1671_v60  ;;  %v1709_v61 = vld [vmem:[%s7511_s24 + $0x2cb0] sm:$0xff] }
 0x314   : > { %5626 = vmatpush1.bf16.msra.mxu0 %v5625_v18  ;;  %v1649_v18 = vld [vmem:[%s7511_s24 + $0x2ad0] sm:$0xff] }
 0x315   : > { %6650 = vmatpush1.bf16.msra.mxu1 %v6649_v20  ;;  %5628 = vmatprep.subr.bf16.mxu0 %v5627_v21  ;;  %v6667_v20 = vpack.c.bf16 %v1654_v10, %v1650_v9  ;;  %v1653_v21 = vld [vmem:[%s7511_s24 + $0x2af0] sm:$0xff]  ;;  %v1679_v9 = vld [vmem:[%s7511_s24 + $0x2bc0] sm:$0xff] }
 0x316   : > { %6652 = vmatprep.subr.bf16.mxu1 %v6651_v27  ;;  %v1662_v27 = vld [vmem:[%s7511_s24 + $0x2b38] sm:$0xff]  ;;  %v6669_v29 = vpack.c.bf16 %v1653_v21, %v1649_v18  ;;  %v1683_v10 = vld [vmem:[%s7511_s24 + $0x2be0] sm:$0xff] }
 0x317   : > { %v1690_v18 = vld [vmem:[%s7511_s24 + $0x2c18] sm:$0xff]  ;;  %v5661_v21 = vpack.c.bf16 %v1683_v10, %v1679_v9  ;;  %v1717_v10 = vld [vmem:[%s7511_s24 + $0x2cf0] sm:$0xff] }
 0x318   : > { %5630 = vmatpush1.bf16.msra.mxu0 %v5629_v33  ;;  %v1657_v33 = vld [vmem:[%s7511_s24 + $0x2b10] sm:$0xff] }
 0x319   : > { %6654 = vmatpush1.bf16.msra.mxu1 %v6653_v36  ;;  %5632 = vmatprep.subr.bf16.mxu0 %v5631_v37  ;;  %v6671_v36 = vpack.c.bf16 %v1662_v27, %v1658_v26  ;;  %v1661_v37 = vld [vmem:[%s7511_s24 + $0x2b30] sm:$0xff]  ;;  %v1687_v26 = vld [vmem:[%s7511_s24 + $0x2c00] sm:$0xff] }
 0x31a   : > { %6656 = vmatprep.subr.bf16.mxu1 %v6655_v42  ;;  %v1670_v42 = vld [vmem:[%s7511_s24 + $0x2b78] sm:$0xff]  ;;  %v6673_v44 = vpack.c.bf16 %v1661_v37, %v1657_v33  ;;  %v1691_v27 = vld [vmem:[%s7511_s24 + $0x2c20] sm:$0xff]  ;;  %v2415_v33 = vrot.slane %v8621_v34, %v7939_v0 }
 0x31b   : > { %v1702_v37 = vld [vmem:[%s7511_s24 + $0x2c78] sm:$0xff]  ;;  %v5665_v38 = vpack.c.bf16 %v1691_v27, %v1687_v26  ;;  %v1725_v27 = vld [vmem:[%s7511_s24 + $0x2d30] sm:$0xff] }
 0x31c   : > { %5634 = vmatpush1.bf16.msra.mxu0 %v5633_v54  ;;  %v1665_v54 = vld [vmem:[%s7511_s24 + $0x2b50] sm:$0xff] }
 0x31d   : > { %6658 = vmatpush1.bf16.msra.mxu1 %v6657_v49  ;;  %5636 = vmatprep.subr.bf16.mxu0 %v5635_v50  ;;  %v6675_v49 = vpack.c.bf16 %v1670_v42, %v1666_v41  ;;  %v1669_v50 = vld [vmem:[%s7511_s24 + $0x2b70] sm:$0xff]  ;;  %v5667_v41 = vpack.c.bf16 %v1700_v32, %v1696_v31  ;;  %v1695_v42 = vld [vmem:[%s7511_s24 + $0x2c40] sm:$0xff]  ;;  %v1734_v31 = vld [vmem:[%s7511_s24 + $0x2d78] sm:$0xff] }
 0x31e   : > { %6660 = vmatprep.subr.bf16.mxu1 %v6659_v55  ;;  %v1678_v55 = vld [vmem:[%s7511_s24 + $0x2bb8] sm:$0xff]  ;;  %v6677_v58 = vpack.c.bf16 %v1669_v50, %v1665_v54  ;;  %v1708_v54 = vld [vmem:[%s7511_s24 + $0x2ca8] sm:$0xff] }
 0x31f   : > { %v1706_v50 = vld [vmem:[%s7511_s24 + $0x2c98] sm:$0xff] }
 0x320   : > { %5638 = vmatpush1.bf16.msra.mxu0 %v5637_v62  ;;  %v1673_v62 = vld [vmem:[%s7511_s24 + $0x2b90] sm:$0xff]  ;;  %v6695_v60 = vpack.c.bf16 %v1710_v51, %v1706_v50  ;;  %v1735_v50 = vld [vmem:[%s7511_s24 + $0x2d80] sm:$0xff] }
 0x321   : > { %6662 = vmatpush1.bf16.msra.mxu1 %v6661_v63  ;;  %5640 = vmatprep.subr.bf16.mxu0 %v5639_v1  ;;  %v6679_v63 = vpack.c.bf16 %v1678_v55, %v1674_v53  ;;  %v1677_v1 = vld [vmem:[%s7511_s24 + $0x2bb0] sm:$0xff]  ;;  %v5671_v55 = vpack.c.bf16 %v1708_v54, %v1704_v48  ;;  %v1739_v51 = vld [vmem:[%s7511_s24 + $0x2da0] sm:$0xff] }
 0x322   : > { %6664 = vmatprep.subr.bf16.mxu1 %v6663_v4  ;;  %v1686_v4 = vld [vmem:[%s7511_s24 + $0x2bf8] sm:$0xff]  ;;  %v6681_v7 = vpack.c.bf16 %v1677_v1, %v1673_v62  ;;  %v1712_v62 = vld [vmem:[%s7511_s24 + $0x2cc8] sm:$0xff] }
 0x323   : > { %v1714_v1 = vld [vmem:[%s7511_s24 + $0x2cd8] sm:$0xff] }
 0x324   : > { %5642 = vmatpush1.bf16.msra.mxu0 %v5641_v12  ;;  %v1681_v12 = vld [vmem:[%s7511_s24 + $0x2bd0] sm:$0xff]  ;;  %v6699_v9 = vpack.c.bf16 %v1718_v2, %v1714_v1  ;;  %v1743_v1 = vld [vmem:[%s7511_s24 + $0x2dc0] sm:$0xff] }
 0x325   : > { %6666 = vmatpush1.bf16.msra.mxu1 %v6665_v14  ;;  %5644 = vmatprep.subr.bf16.mxu0 %v5643_v15  ;;  %v6683_v14 = vpack.c.bf16 %v1686_v4, %v1682_v24  ;;  %v1685_v15 = vld [vmem:[%s7511_s24 + $0x2bf0] sm:$0xff]  ;;  %v1747_v2 = vld [vmem:[%s7511_s24 + $0x2de0] sm:$0xff] }
 0x326   : > { %6668 = vmatprep.subr.bf16.mxu1 %v6667_v20  ;;  %v1694_v20 = vld [vmem:[%s7511_s24 + $0x2c38] sm:$0xff]  ;;  %v6685_v22 = vpack.c.bf16 %v1685_v15, %v1681_v12  ;;  %v1720_v12 = vld [vmem:[%s7511_s24 + $0x2d08] sm:$0xff] }
 0x327   : > { %v1722_v15 = vld [vmem:[%s7511_s24 + $0x2d18] sm:$0xff] }
 0x328   : > { %5646 = vmatpush1.bf16.msra.mxu0 %v5645_v28  ;;  %v1689_v28 = vld [vmem:[%s7511_s24 + $0x2c10] sm:$0xff]  ;;  %v6703_v26 = vpack.c.bf16 %v1726_v16, %v1722_v15  ;;  %v1751_v15 = vld [vmem:[%s7511_s24 + $0x2e00] sm:$0xff] }
 0x329   : > { %6670 = vmatpush1.bf16.msra.mxu1 %v6669_v29  ;;  %5648 = vmatprep.subr.bf16.mxu0 %v5647_v30  ;;  %v6687_v29 = vpack.c.bf16 %v1694_v20, %v1690_v18  ;;  %v1693_v30 = vld [vmem:[%s7511_s24 + $0x2c30] sm:$0xff]  ;;  %v1755_v16 = vld [vmem:[%s7511_s24 + $0x2e20] sm:$0xff] }
 0x32a   : > { %6672 = vmatprep.subr.bf16.mxu1 %v6671_v36  ;;  %v1698_v36 = vld [vmem:[%s7511_s24 + $0x2c58] sm:$0xff]  ;;  %v6689_v39 = vpack.c.bf16 %v1693_v30, %v1689_v28  ;;  %v1728_v28 = vld [vmem:[%s7511_s24 + $0x2d48] sm:$0xff] }
 0x32b   : > { %v1730_v30 = vld [vmem:[%s7511_s24 + $0x2d58] sm:$0xff] }
 0x32c   : > { %5650 = vmatpush1.bf16.msra.mxu0 %v5649_v43  ;;  %v1699_v43 = vld [vmem:[%s7511_s24 + $0x2c60] sm:$0xff] }
 0x32d   : > { %6674 = vmatpush1.bf16.msra.mxu1 %v6673_v44  ;;  %5652 = vmatprep.subr.bf16.mxu0 %v5651_v45  ;;  %v1697_v44 = vld [vmem:[%s7511_s24 + $0x2c50] sm:$0xff]  ;;  %v6691_v45 = vpack.c.bf16 %v1702_v37, %v1698_v36  ;;  %v5669_v52 = vpack.c.bf16 %v1699_v43, %v1695_v42  ;;  %v1727_v37 = vld [vmem:[%s7511_s24 + $0x2d40] sm:$0xff]  ;;  %v1736_v43 = vld [vmem:[%s7511_s24 + $0x2d88] sm:$0xff] }
 0x32e   : > { %6676 = vmatprep.subr.bf16.mxu1 %v6675_v49  ;;  %v2427_v49 = vrot.slane %v8621_v34, %v7948_v13  ;;  %v6693_v53 = vpack.c.bf16 %v1701_v47, %v1697_v44  ;;  %v1733_v42 = vld [vmem:[%s7511_s24 + $0x2d70] sm:$0xff]  ;;  %v1740_v44 = vld [vmem:[%s7511_s24 + $0x2da8] sm:$0xff]  ;;  %v1742_v47 = vld [vmem:[%s7511_s24 + $0x2db8] sm:$0xff] }
 0x330   : > { %5654 = vmatpush1.bf16.msra.mxu0 %v5653_v57  ;;  %v1703_v57 = vld [vmem:[%s7511_s24 + $0x2c80] sm:$0xff] }
 0x331   : > { %6678 = vmatpush1.bf16.msra.mxu1 %v6677_v58  ;;  %5656 = vmatprep.subr.bf16.mxu0 %v5655_v59  ;;  %v1707_v58 = vld [vmem:[%s7511_s24 + $0x2ca0] sm:$0xff]  ;;  %v1705_v59 = vld [vmem:[%s7511_s24 + $0x2c90] sm:$0xff] }
 0x332   : > { %6680 = vmatprep.subr.bf16.mxu1 %v6679_v63  ;;  %v1716_v63 = vld [vmem:[%s7511_s24 + $0x2ce8] sm:$0xff]  ;;  %v5673_v3 = vpack.c.bf16 %v1707_v58, %v1703_v57  ;;  %v6697_v24 = vpack.c.bf16 %v1709_v61, %v1705_v59  ;;  %v1746_v59 = vld [vmem:[%s7511_s24 + $0x2dd8] sm:$0xff]  ;;  %v5689_v61 = vpack.c.bf16 %v1739_v51, %v1735_v50 }
 0x333   : > { %v5675_v4 = vpack.c.bf16 %v1716_v63, %v1712_v62  ;;  %v1744_v57 = vld [vmem:[%s7511_s24 + $0x2dc8] sm:$0xff] }
 0x334   : > { %5658 = vmatpush1.bf16.msra.mxu0 %v5657_v6  ;;  %v1711_v6 = vld [vmem:[%s7511_s24 + $0x2cc0] sm:$0xff]  ;;  %v1748_v58 = vld [vmem:[%s7511_s24 + $0x2de8] sm:$0xff] }
 0x335   : > { %6682 = vmatpush1.bf16.msra.mxu1 %v6681_v7  ;;  %5660 = vmatprep.subr.bf16.mxu0 %v5659_v8  ;;  %v1715_v7 = vld [vmem:[%s7511_s24 + $0x2ce0] sm:$0xff]  ;;  %v1713_v8 = vld [vmem:[%s7511_s24 + $0x2cd0] sm:$0xff]  ;;  %v5691_v63 = vpack.c.bf16 %v1748_v58, %v1744_v57  ;;  %v1776_v50 = vld [vmem:[%s7511_s24 + $0x2ec8] sm:$0xff] }
 0x336   : > { %6684 = vmatprep.subr.bf16.mxu1 %v6683_v14  ;;  %v1724_v14 = vld [vmem:[%s7511_s24 + $0x2d28] sm:$0xff]  ;;  %v5677_v17 = vpack.c.bf16 %v1715_v7, %v1711_v6  ;;  %v6701_v18 = vpack.c.bf16 %v1717_v10, %v1713_v8  ;;  %v1754_v8 = vld [vmem:[%s7511_s24 + $0x2e18] sm:$0xff]  ;;  %v5693_v10 = vpack.c.bf16 %v1747_v2, %v1743_v1 }
 0x337   : > { %v5679_v20 = vpack.c.bf16 %v1724_v14, %v1720_v12  ;;  %v1752_v6 = vld [vmem:[%s7511_s24 + $0x2e08] sm:$0xff] }
 0x338   : > { %5662 = vmatpush1.bf16.msra.mxu0 %v5661_v21  ;;  %v1719_v21 = vld [vmem:[%s7511_s24 + $0x2d00] sm:$0xff]  ;;  %v1756_v7 = vld [vmem:[%s7511_s24 + $0x2e28] sm:$0xff] }
 0x339   : > { %6686 = vmatpush1.bf16.msra.mxu1 %v6685_v22  ;;  %5664 = vmatprep.subr.bf16.mxu0 %v5663_v25  ;;  %v1723_v22 = vld [vmem:[%s7511_s24 + $0x2d20] sm:$0xff]  ;;  %v1721_v25 = vld [vmem:[%s7511_s24 + $0x2d10] sm:$0xff]  ;;  %v5695_v14 = vpack.c.bf16 %v1756_v7, %v1752_v6  ;;  %v1780_v51 = vld [vmem:[%s7511_s24 + $0x2ee8] sm:$0xff] }
 0x33a   : > { %6688 = vmatprep.subr.bf16.mxu1 %v6687_v29  ;;  %v1732_v29 = vld [vmem:[%s7511_s24 + $0x2d68] sm:$0xff]  ;;  %v5681_v32 = vpack.c.bf16 %v1723_v22, %v1719_v21  ;;  %v5707_v58 = vpack.c.bf16 %v1780_v51, %v1776_v50  ;;  %v1807_v50 = vld [vmem:[%s7511_s24 + $0x2fc0] sm:$0xff] }
 0x33b   : > { %3288 = vmatmul.mubr.f32.vlgmr.msra.gmra.mrb[0].mxu0 %v2415_v33  ;;  %v5683_v36 = vpack.c.bf16 %v1732_v29, %v1728_v28  ;;  %v1760_v21 = vld [vmem:[%s7511_s24 + $0x2e48] sm:$0xff] }
 0x33c   : > { %5666 = vmatpush1.bf16.msra.mxu0 %v5665_v38  ;;  %4424 = vmatmul.mubr.f32.vlgmr.msra.gmra.mrb[0].mxu1 %v2415_v33  ;;  %v6705_v33 = vpack.c.bf16 %v1725_v27, %v1721_v25  ;;  %v1731_v38 = vld [vmem:[%s7511_s24 + $0x2d60] sm:$0xff]  ;;  %v1764_v22 = vld [vmem:[%s7511_s24 + $0x2e68] sm:$0xff]  ;;  %v1762_v25 = vld [vmem:[%s7511_s24 + $0x2e58] sm:$0xff]  ;;  %v5697_v27 = vpack.c.bf16 %v1755_v16, %v1751_v15 }
 0x33d   : > { %6690 = vmatpush1.bf16.msra.mxu1 %v6689_v39  ;;  %5668 = vmatprep.subr.bf16.mxu0 %v5667_v41  ;;  %v1729_v39 = vld [vmem:[%s7511_s24 + $0x2d50] sm:$0xff]  ;;  %v6707_v41 = vpack.c.bf16 %v1734_v31, %v1730_v30  ;;  %v5685_v48 = vpack.c.bf16 %v1731_v38, %v1727_v37  ;;  %v5699_v29 = vpack.c.bf16 %v1764_v22, %v1760_v21  ;;  %v1759_v30 = vld [vmem:[%s7511_s24 + $0x2e40] sm:$0xff]  ;;  %v1768_v37 = vld [vmem:[%s7511_s24 + $0x2e88] sm:$0xff] }
 0x33e   : > { %6692 = vmatprep.subr.bf16.mxu1 %v6691_v45  ;;  %3358 = vmatprep.mubr.f32.mxu0 %v2427_v49  ;;  %v1738_v45 = vld [vmem:[%s7511_s24 + $0x2d98] sm:$0xff]  ;;  %v6709_v54 = vpack.c.bf16 %v1733_v42, %v1729_v39  ;;  %v1763_v31 = vld [vmem:[%s7511_s24 + $0x2e60] sm:$0xff]  ;;  %v1772_v38 = vld [vmem:[%s7511_s24 + $0x2ea8] sm:$0xff] }
 0x33f   : > { %4494 = vmatprep.mubr.f32.mxu1 %v2427_v49  ;;  %v5687_v49 = vpack.c.bf16 %v1740_v44, %v1736_v43  ;;  %v1770_v39 = vld [vmem:[%s7511_s24 + $0x2e98] sm:$0xff]  ;;  %v5701_v42 = vpack.c.bf16 %v1763_v31, %v1759_v30  ;;  %v5703_v44 = vpack.c.bf16 %v1772_v38, %v1768_v37  ;;  %v1784_v1 = vld [vmem:[%s7511_s24 + $0x2f08] sm:$0xff] }
 0x340   : > { %5670 = vmatpush1.bf16.msra.mxu0 %v5669_v52  ;;  %v1737_v52 = vld [vmem:[%s7511_s24 + $0x2d90] sm:$0xff]  ;;  %v1788_v2 = vld [vmem:[%s7511_s24 + $0x2f28] sm:$0xff] }
 0x341   : > { %6694 = vmatpush1.bf16.msra.mxu1 %v6693_v53  ;;  %5672 = vmatprep.subr.bf16.mxu0 %v5671_v55  ;;  %v6711_v53 = vpack.c.bf16 %v1742_v47, %v1738_v45  ;;  %v1741_v55 = vld [vmem:[%s7511_s24 + $0x2db0] sm:$0xff]  ;;  %v1767_v45 = vld [vmem:[%s7511_s24 + $0x2e80] sm:$0xff]  ;;  %v5711_v7 = vpack.c.bf16 %v1788_v2, %v1784_v1  ;;  %v1792_v15 = vld [vmem:[%s7511_s24 + $0x2f48] sm:$0xff] }
 0x342   : > { %6696 = vmatprep.subr.bf16.mxu1 %v6695_v60  ;;  %v1750_v60 = vld [vmem:[%s7511_s24 + $0x2df8] sm:$0xff]  ;;  %v6713_v62 = vpack.c.bf16 %v1741_v55, %v1737_v52  ;;  %v1771_v47 = vld [vmem:[%s7511_s24 + $0x2ea0] sm:$0xff]  ;;  %v1796_v16 = vld [vmem:[%s7511_s24 + $0x2f68] sm:$0xff] }
 0x343   : > { %v1778_v52 = vld [vmem:[%s7511_s24 + $0x2ed8] sm:$0xff]  ;;  %v5705_v55 = vpack.c.bf16 %v1771_v47, %v1767_v45  ;;  %v5715_v22 = vpack.c.bf16 %v1796_v16, %v1792_v15  ;;  %v1800_v30 = vld [vmem:[%s7511_s24 + $0x2f88] sm:$0xff]  ;;  %v2423_v15 = vrot.slane %v8621_v34, %v8077_v40 }
 0x344   : > { %5674 = vmatpush1.bf16.msra.mxu0 %v5673_v3  ;;  %v1745_v3 = vld [vmem:[%s7511_s24 + $0x2dd0] sm:$0xff]  ;;  %v1804_v31 = vld [vmem:[%s7511_s24 + $0x2fa8] sm:$0xff]  ;;  %v274_v1 = vld [vmem:[%s9732_s1 + $0x18] sm:$0xff] }
 0x345   : > { %6698 = vmatpush1.bf16.msra.mxu1 %v6697_v24  ;;  %5676 = vmatprep.subr.bf16.mxu0 %v5675_v4  ;;  %v6715_v24 = vpack.c.bf16 %v1750_v60, %v1746_v59  ;;  %v1749_v4 = vld [vmem:[%s7511_s24 + $0x2df0] sm:$0xff]  ;;  %v1775_v59 = vld [vmem:[%s7511_s24 + $0x2ec0] sm:$0xff]  ;;  %v5719_v38 = vpack.c.bf16 %v1804_v31, %v1800_v30  ;;  %v1808_v45 = vld [vmem:[%s7511_s24 + $0x2fc8] sm:$0xff] }
 0x346   : > { %6700 = vmatprep.subr.bf16.mxu1 %v6699_v9  ;;  %v1758_v9 = vld [vmem:[%s7511_s24 + $0x2e38] sm:$0xff]  ;;  %v6717_v12 = vpack.c.bf16 %v1749_v4, %v1745_v3  ;;  %v1779_v60 = vld [vmem:[%s7511_s24 + $0x2ee0] sm:$0xff]  ;;  %v1812_v47 = vld [vmem:[%s7511_s24 + $0x2fe8] sm:$0xff] }
 0x347   : > { %v1786_v3 = vld [vmem:[%s7511_s24 + $0x2f18] sm:$0xff]  ;;  %v5709_v4 = vpack.c.bf16 %v1779_v60, %v1775_v59  ;;  %v1816_v59 = vld [vmem:[%s7511_s24 + $0x3008] sm:$0xff] }
 0x348   : > { %5678 = vmatpush1.bf16.msra.mxu0 %v5677_v17  ;;  %v1753_v17 = vld [vmem:[%s7511_s24 + $0x2e10] sm:$0xff]  ;;  %v1820_v60 = vld [vmem:[%s7511_s24 + $0x3028] sm:$0xff]  ;;  %v1826_v16 = vld [vmem:[%s7511_s24 + $0x3058] sm:$0xff] }
 0x349   : > { %6702 = vmatpush1.bf16.msra.mxu1 %v6701_v18  ;;  %5680 = vmatprep.subr.bf16.mxu0 %v5679_v20  ;;  %v6719_v18 = vpack.c.bf16 %v1758_v9, %v1754_v8  ;;  %v1757_v20 = vld [vmem:[%s7511_s24 + $0x2e30] sm:$0xff]  ;;  %v1783_v8 = vld [vmem:[%s7511_s24 + $0x2f00] sm:$0xff]  ;;  %v1832_v34 = vld [vmem:[%s7511_s24 + $0x3088] sm:$0xff] }
 0x34a   : > { %6704 = vmatprep.subr.bf16.mxu1 %v6703_v26  ;;  %v1766_v26 = vld [vmem:[%s7511_s24 + $0x2e78] sm:$0xff]  ;;  %v6721_v28 = vpack.c.bf16 %v1757_v20, %v1753_v17  ;;  %v1787_v9 = vld [vmem:[%s7511_s24 + $0x2f20] sm:$0xff] }
 0x34b   : > { %v1794_v17 = vld [vmem:[%s7511_s24 + $0x2f58] sm:$0xff]  ;;  %v5713_v20 = vpack.c.bf16 %v1787_v9, %v1783_v8  ;;  %v1821_v9 = vld [vmem:[%s7511_s24 + $0x3030] sm:$0xff] }
 0x34c   : > { %5682 = vmatpush1.bf16.msra.mxu0 %v5681_v32  ;;  %v1761_v32 = vld [vmem:[%s7511_s24 + $0x2e50] sm:$0xff]  ;;  %v1834_v31 = vld [vmem:[%s7511_s24 + $0x3098] sm:$0xff] }
 0x34d   : > { %6706 = vmatpush1.bf16.msra.mxu1 %v6705_v33  ;;  %5684 = vmatprep.subr.bf16.mxu0 %v5683_v36  ;;  %v6723_v33 = vpack.c.bf16 %v1766_v26, %v1762_v25  ;;  %v1765_v36 = vld [vmem:[%s7511_s24 + $0x2e70] sm:$0xff]  ;;  %v1791_v25 = vld [vmem:[%s7511_s24 + $0x2f40] sm:$0xff] }
 0x34e   : > { %6708 = vmatprep.subr.bf16.mxu1 %v6707_v41  ;;  %v1774_v41 = vld [vmem:[%s7511_s24 + $0x2eb8] sm:$0xff]  ;;  %v6725_v43 = vpack.c.bf16 %v1765_v36, %v1761_v32  ;;  %v1795_v26 = vld [vmem:[%s7511_s24 + $0x2f60] sm:$0xff] }
 0x34f   : > { %v1802_v32 = vld [vmem:[%s7511_s24 + $0x2f98] sm:$0xff]  ;;  %v5717_v36 = vpack.c.bf16 %v1795_v26, %v1791_v25  ;;  %v1827_v25 = vld [vmem:[%s7511_s24 + $0x3060] sm:$0xff]  ;;  %v1825_v26 = vld [vmem:[%s7511_s24 + $0x3050] sm:$0xff] }
 0x350   : > { %5686 = vmatpush1.bf16.msra.mxu0 %v5685_v48  ;;  %v1769_v48 = vld [vmem:[%s7511_s24 + $0x2e90] sm:$0xff] }
 0x351   : > { %6710 = vmatpush1.bf16.msra.mxu1 %v6709_v54  ;;  %5688 = vmatprep.subr.bf16.mxu0 %v5687_v49  ;;  %v6727_v54 = vpack.c.bf16 %v1774_v41, %v1770_v39  ;;  %v1773_v49 = vld [vmem:[%s7511_s24 + $0x2eb0] sm:$0xff]  ;;  %v1799_v39 = vld [vmem:[%s7511_s24 + $0x2f80] sm:$0xff] }
 0x352   : > { %6712 = vmatprep.subr.bf16.mxu1 %v6711_v53  ;;  %v1782_v53 = vld [vmem:[%s7511_s24 + $0x2ef8] sm:$0xff]  ;;  %v6729_v57 = vpack.c.bf16 %v1773_v49, %v1769_v48  ;;  %v1803_v41 = vld [vmem:[%s7511_s24 + $0x2fa0] sm:$0xff] }
 0x353   : > { %v1810_v48 = vld [vmem:[%s7511_s24 + $0x2fd8] sm:$0xff]  ;;  %v5721_v49 = vpack.c.bf16 %v1803_v41, %v1799_v39  ;;  %v1835_v39 = vld [vmem:[%s7511_s24 + $0x30a0] sm:$0xff]  ;;  %v1833_v41 = vld [vmem:[%s7511_s24 + $0x3090] sm:$0xff] }
 0x354   : > { %5690 = vmatpush1.bf16.msra.mxu0 %v5689_v61  ;;  %v1777_v61 = vld [vmem:[%s7511_s24 + $0x2ed0] sm:$0xff] }
 0x355   : > { %6714 = vmatpush1.bf16.msra.mxu1 %v6713_v62  ;;  %5692 = vmatprep.subr.bf16.mxu0 %v5691_v63  ;;  %v6731_v62 = vpack.c.bf16 %v1782_v53, %v1778_v52  ;;  %v1781_v63 = vld [vmem:[%s7511_s24 + $0x2ef0] sm:$0xff]  ;;  %v5723_v52 = vpack.c.bf16 %v1812_v47, %v1808_v45  ;;  %v1811_v53 = vld [vmem:[%s7511_s24 + $0x2fe0] sm:$0xff]  ;;  %v1844_v45 = vld [vmem:[%s7511_s24 + $0x30e8] sm:$0xff] }
 0x356   : > { %6716 = vmatprep.subr.bf16.mxu1 %v6715_v24  ;;  %v1790_v24 = vld [vmem:[%s7511_s24 + $0x2f38] sm:$0xff]  ;;  %v6733_v6 = vpack.c.bf16 %v1781_v63, %v1777_v61  ;;  %v5725_v2 = vpack.c.bf16 %v1811_v53, %v1807_v50  ;;  %v1841_v53 = vld [vmem:[%s7511_s24 + $0x30d0] sm:$0xff] }
 0x357   : > { %v1818_v61 = vld [vmem:[%s7511_s24 + $0x3018] sm:$0xff] }
 0x358   : > { %5694 = vmatpush1.bf16.msra.mxu0 %v5693_v10  ;;  %v1785_v10 = vld [vmem:[%s7511_s24 + $0x2f10] sm:$0xff]  ;;  %v270_v63 = vld [vmem:[#allocation2 + $0x18] sm:$0xff] }
 0x359   : > { %6718 = vmatpush1.bf16.msra.mxu1 %v6717_v12  ;;  %5696 = vmatprep.subr.bf16.mxu0 %v5695_v14  ;;  %v6735_v12 = vpack.c.bf16 %v1790_v24, %v1786_v3  ;;  %v1789_v14 = vld [vmem:[%s7511_s24 + $0x2f30] sm:$0xff]  ;;  %v5727_v24 = vpack.c.bf16 %v1820_v60, %v1816_v59  ;;  %v1842_v47 = vld [vmem:[%s7511_s24 + $0x30d8] sm:$0xff]  ;;  %v1852_v59 = vld [vmem:[%s7511_s24 + $0x3128] sm:$0xff] }
 0x35a   : > { %6720 = vmatprep.subr.bf16.mxu1 %v6719_v18  ;;  %v1798_v18 = vld [vmem:[%s7511_s24 + $0x2f78] sm:$0xff]  ;;  %v6737_v21 = vpack.c.bf16 %v1789_v14, %v1785_v10  ;;  %v1824_v10 = vld [vmem:[%s7511_s24 + $0x3048] sm:$0xff]  ;;  %v9154_v14 = vmul.f32 %v274_v1, %v270_v63 }
 0x35b   : > { %v1850_v60 = vld [vmem:[%s7511_s24 + $0x3118] sm:$0xff] }
 0x35c   : > { %5698 = vmatpush1.bf16.msra.mxu0 %v5697_v27  ;;  %v1793_v27 = vld [vmem:[%s7511_s24 + $0x2f50] sm:$0xff]  ;;  %v2435_v30 = vrot.slane %v9154_v14, %v7619_v19 }
 0x35d   : > { %6722 = vmatpush1.bf16.msra.mxu1 %v6721_v28  ;;  %5700 = vmatprep.subr.bf16.mxu0 %v5699_v29  ;;  %v6739_v28 = vpack.c.bf16 %v1798_v18, %v1794_v17  ;;  %v1797_v29 = vld [vmem:[%s7511_s24 + $0x2f70] sm:$0xff]  ;;  %v1830_v17 = vld [vmem:[%s7511_s24 + $0x3078] sm:$0xff] }
 0x35e   : > { %6724 = vmatprep.subr.bf16.mxu1 %v6723_v33  ;;  %v1806_v33 = vld [vmem:[%s7511_s24 + $0x2fb8] sm:$0xff]  ;;  %v6741_v37 = vpack.c.bf16 %v1797_v29, %v1793_v27  ;;  %v6755_v27 = vpack.c.bf16 %v1830_v17, %v1826_v16  ;;  %v1836_v29 = vld [vmem:[%s7511_s24 + $0x30a8] sm:$0xff]  ;;  %v1855_v17 = vld [vmem:[%s7511_s24 + $0x3140] sm:$0xff] }
 0x360   : > { %5702 = vmatpush1.bf16.msra.mxu0 %v5701_v42  ;;  %v1801_v42 = vld [vmem:[%s7511_s24 + $0x2f90] sm:$0xff] }
 0x361   : > { %6726 = vmatpush1.bf16.msra.mxu1 %v6725_v43  ;;  %5704 = vmatprep.subr.bf16.mxu0 %v5703_v44  ;;  %v6743_v43 = vpack.c.bf16 %v1806_v33, %v1802_v32  ;;  %v1805_v44 = vld [vmem:[%s7511_s24 + $0x2fb0] sm:$0xff]  ;;  %v1838_v32 = vld [vmem:[%s7511_s24 + $0x30b8] sm:$0xff] }
 0x362   : > { %6728 = vmatprep.subr.bf16.mxu1 %v6727_v54  ;;  %v1814_v54 = vld [vmem:[%s7511_s24 + $0x2ff8] sm:$0xff]  ;;  %v6745_v51 = vpack.c.bf16 %v1805_v44, %v1801_v42  ;;  %v6759_v42 = vpack.c.bf16 %v1838_v32, %v1834_v31  ;;  %v1840_v44 = vld [vmem:[%s7511_s24 + $0x30c8] sm:$0xff]  ;;  %v1863_v31 = vld [vmem:[%s7511_s24 + $0x3180] sm:$0xff] }
 0x363   : > { %v5739_v50 = vpack.c.bf16 %v1844_v45, %v1840_v44  ;;  %v1867_v32 = vld [vmem:[%s7511_s24 + $0x31a0] sm:$0xff] }
 0x364   : > { %5706 = vmatpush1.bf16.msra.mxu0 %v5705_v55  ;;  %v1809_v55 = vld [vmem:[%s7511_s24 + $0x2fd0] sm:$0xff] }
 0x365   : > { %6730 = vmatpush1.bf16.msra.mxu1 %v6729_v57  ;;  %5708 = vmatprep.subr.bf16.mxu0 %v5707_v58  ;;  %v1813_v57 = vld [vmem:[%s7511_s24 + $0x2ff0] sm:$0xff]  ;;  %v6747_v58 = vpack.c.bf16 %v1814_v54, %v1810_v48  ;;  %v1846_v48 = vld [vmem:[%s7511_s24 + $0x30f8] sm:$0xff] }
 0x366   : > { %6732 = vmatprep.subr.bf16.mxu1 %v6731_v62  ;;  %v1822_v62 = vld [vmem:[%s7511_s24 + $0x3038] sm:$0xff]  ;;  %v6749_v3 = vpack.c.bf16 %v1813_v57, %v1809_v55  ;;  %v6763_v55 = vpack.c.bf16 %v1846_v48, %v1842_v47  ;;  %v1845_v57 = vld [vmem:[%s7511_s24 + $0x30f0] sm:$0xff]  ;;  %v1871_v47 = vld [vmem:[%s7511_s24 + $0x31c0] sm:$0xff] }
 0x367   : > { %v6751_v8 = vpack.c.bf16 %v1822_v62, %v1818_v61  ;;  %v1854_v61 = vld [vmem:[%s7511_s24 + $0x3138] sm:$0xff]  ;;  %v6765_v63 = vpack.c.bf16 %v1845_v57, %v1841_v53  ;;  %v1875_v48 = vld [vmem:[%s7511_s24 + $0x31e0] sm:$0xff] }
 0x368   : > { %5710 = vmatpush1.bf16.msra.mxu0 %v5709_v4  ;;  %v1815_v4 = vld [vmem:[%s7511_s24 + $0x3000] sm:$0xff]  ;;  %v1882_v53 = vld [vmem:[%s7511_s24 + $0x3218] sm:$0xff]  ;;  %v5757_v57 = vpack.c.bf16 %v1875_v48, %v1871_v47  ;;  %v1912_v47 = vld [vmem:[%s7511_s24 + $0x3308] sm:$0xff] }
 0x369   : > { %6734 = vmatpush1.bf16.msra.mxu1 %v6733_v6  ;;  %5712 = vmatprep.subr.bf16.mxu0 %v5711_v7  ;;  %v1819_v6 = vld [vmem:[%s7511_s24 + $0x3020] sm:$0xff]  ;;  %v1817_v7 = vld [vmem:[%s7511_s24 + $0x3010] sm:$0xff]  ;;  %v1916_v48 = vld [vmem:[%s7511_s24 + $0x3328] sm:$0xff] }
 0x36a   : > { %6736 = vmatprep.subr.bf16.mxu1 %v6735_v12  ;;  %v1828_v12 = vld [vmem:[%s7511_s24 + $0x3068] sm:$0xff]  ;;  %v5729_v18 = vpack.c.bf16 %v1819_v6, %v1815_v4  ;;  %v6767_v4 = vpack.c.bf16 %v1854_v61, %v1850_v60  ;;  %v1853_v6 = vld [vmem:[%s7511_s24 + $0x3130] sm:$0xff]  ;;  %v1879_v60 = vld [vmem:[%s7511_s24 + $0x3200] sm:$0xff] }
 0x36b   : > { %v1883_v61 = vld [vmem:[%s7511_s24 + $0x3220] sm:$0xff] }
 0x36c   : > { %5714 = vmatpush1.bf16.msra.mxu0 %v5713_v20  ;;  %v6753_v20 = vpack.c.bf16 %v1821_v9, %v1817_v7  ;;  %v1856_v7 = vld [vmem:[%s7511_s24 + $0x3148] sm:$0xff]  ;;  %v1858_v9 = vld [vmem:[%s7511_s24 + $0x3158] sm:$0xff] }
 0x36d   : > { %6738 = vmatpush1.bf16.msra.mxu1 %v6737_v21  ;;  %5716 = vmatprep.subr.bf16.mxu0 %v5715_v22  ;;  %v5731_v21 = vpack.c.bf16 %v1828_v12, %v1824_v10  ;;  %v1823_v22 = vld [vmem:[%s7511_s24 + $0x3040] sm:$0xff]  ;;  %v1862_v10 = vld [vmem:[%s7511_s24 + $0x3178] sm:$0xff] }
 0x36e   : > { %6740 = vmatprep.subr.bf16.mxu1 %v6739_v28  ;;  %v1829_v28 = vld [vmem:[%s7511_s24 + $0x3070] sm:$0xff]  ;;  %v5733_v33 = vpack.c.bf16 %v1827_v25, %v1823_v22  ;;  %v1864_v25 = vld [vmem:[%s7511_s24 + $0x3188] sm:$0xff] }
 0x36f   : > { %v1861_v22 = vld [vmem:[%s7511_s24 + $0x3170] sm:$0xff] }
 0x370   : > { %5718 = vmatpush1.bf16.msra.mxu0 %v5717_v36  ;;  %v6757_v36 = vpack.c.bf16 %v1829_v28, %v1825_v26  ;;  %v1868_v26 = vld [vmem:[%s7511_s24 + $0x31a8] sm:$0xff]  ;;  %v1870_v28 = vld [vmem:[%s7511_s24 + $0x31b8] sm:$0xff] }
 0x371   : > { %6742 = vmatpush1.bf16.msra.mxu1 %v6741_v37  ;;  %5720 = vmatprep.subr.bf16.mxu0 %v5719_v38  ;;  %v5735_v37 = vpack.c.bf16 %v1836_v29, %v1832_v34  ;;  %v1831_v38 = vld [vmem:[%s7511_s24 + $0x3080] sm:$0xff] }
 0x372   : > { %6744 = vmatprep.subr.bf16.mxu1 %v6743_v43  ;;  %v1837_v43 = vld [vmem:[%s7511_s24 + $0x30b0] sm:$0xff]  ;;  %v5737_v54 = vpack.c.bf16 %v1835_v39, %v1831_v38  ;;  %v1872_v38 = vld [vmem:[%s7511_s24 + $0x31c8] sm:$0xff] }
 0x373   : > { %v1876_v39 = vld [vmem:[%s7511_s24 + $0x31e8] sm:$0xff] }
 0x374   : > { %5722 = vmatpush1.bf16.msra.mxu0 %v5721_v49  ;;  %v6761_v49 = vpack.c.bf16 %v1837_v43, %v1833_v41  ;;  %v1874_v41 = vld [vmem:[%s7511_s24 + $0x31d8] sm:$0xff]  ;;  %v5753_v43 = vpack.c.bf16 %v1867_v32, %v1863_v31  ;;  %v5755_v45 = vpack.c.bf16 %v1876_v39, %v1872_v38  ;;  %v1904_v31 = vld [vmem:[%s7511_s24 + $0x32c8] sm:$0xff] }
 0x375   : > { %6746 = vmatpush1.bf16.msra.mxu1 %v6745_v51  ;;  %5724 = vmatprep.subr.bf16.mxu0 %v5723_v52  ;;  %v1839_v51 = vld [vmem:[%s7511_s24 + $0x30c0] sm:$0xff]  ;;  %v1908_v32 = vld [vmem:[%s7511_s24 + $0x32e8] sm:$0xff] }
 0x376   : > { %6748 = vmatprep.subr.bf16.mxu1 %v6747_v58  ;;  %v1843_v52 = vld [vmem:[%s7511_s24 + $0x30e0] sm:$0xff]  ;;  %v1848_v58 = vld [vmem:[%s7511_s24 + $0x3108] sm:$0xff]  ;;  %v5771_v39 = vpack.c.bf16 %v1908_v32, %v1904_v31 }
 0x377   : > { %v5741_v62 = vpack.c.bf16 %v1843_v52, %v1839_v51  ;;  %v5743_v1 = vpack.c.bf16 %v1852_v59, %v1848_v58  ;;  %v1880_v51 = vld [vmem:[%s7511_s24 + $0x3208] sm:$0xff] }
 0x378   : > { %5726 = vmatpush1.bf16.msra.mxu0 %v5725_v2  ;;  %v1847_v2 = vld [vmem:[%s7511_s24 + $0x3100] sm:$0xff]  ;;  %v1884_v52 = vld [vmem:[%s7511_s24 + $0x3228] sm:$0xff] }
 0x379   : > { %6750 = vmatpush1.bf16.msra.mxu1 %v6749_v3  ;;  %5728 = vmatprep.subr.bf16.mxu0 %v5727_v24  ;;  %v1851_v3 = vld [vmem:[%s7511_s24 + $0x3120] sm:$0xff]  ;;  %v1849_v24 = vld [vmem:[%s7511_s24 + $0x3110] sm:$0xff]  ;;  %v5759_v59 = vpack.c.bf16 %v1884_v52, %v1880_v51  ;;  %v5775_v52 = vpack.c.bf16 %v1916_v48, %v1912_v47 }
 0x37a   : > { %6752 = vmatprep.subr.bf16.mxu1 %v6751_v8  ;;  %v1860_v8 = vld [vmem:[%s7511_s24 + $0x3168] sm:$0xff]  ;;  %v5745_v12 = vpack.c.bf16 %v1851_v3, %v1847_v2 }
 0x37b   : > { %3359 = vmatmul.mubr.f32.vlgmr.msra.gmra.mrb[0].mxu0 %v2423_v15  ;;  %v5747_v16 = vpack.c.bf16 %v1860_v8, %v1856_v7  ;;  %v1888_v2 = vld [vmem:[%s7511_s24 + $0x3248] sm:$0xff] }
 0x37c   : > { %5730 = vmatpush1.bf16.msra.mxu0 %v5729_v18  ;;  %4495 = vmatmul.mubr.f32.vlgmr.msra.gmra.mrb[0].mxu1 %v2423_v15  ;;  %v6769_v15 = vpack.c.bf16 %v1853_v6, %v1849_v24  ;;  %v1859_v18 = vld [vmem:[%s7511_s24 + $0x3160] sm:$0xff]  ;;  %v1892_v3 = vld [vmem:[%s7511_s24 + $0x3268] sm:$0xff]  ;;  %v1890_v24 = vld [vmem:[%s7511_s24 + $0x3258] sm:$0xff]  ;;  %v5761_v6 = vpack.c.bf16 %v1883_v61, %v1879_v60 }
 0x37d   : > { %6754 = vmatpush1.bf16.msra.mxu1 %v6753_v20  ;;  %5732 = vmatprep.subr.bf16.mxu0 %v5731_v21  ;;  %v1857_v20 = vld [vmem:[%s7511_s24 + $0x3150] sm:$0xff]  ;;  %v6771_v21 = vpack.c.bf16 %v1862_v10, %v1858_v9  ;;  %v5749_v34 = vpack.c.bf16 %v1859_v18, %v1855_v17  ;;  %v5763_v8 = vpack.c.bf16 %v1892_v3, %v1888_v2  ;;  %v1887_v9 = vld [vmem:[%s7511_s24 + $0x3240] sm:$0xff]  ;;  %v1896_v17 = vld [vmem:[%s7511_s24 + $0x3288] sm:$0xff] }
 0x37e   : > { %6756 = vmatprep.subr.bf16.mxu1 %v6755_v27  ;;  %3429 = vmatprep.mubr.f32.mxu0 %v2435_v30  ;;  %v1866_v27 = vld [vmem:[%s7511_s24 + $0x3198] sm:$0xff]  ;;  %v6773_v29 = vpack.c.bf16 %v1861_v22, %v1857_v20  ;;  %v1891_v10 = vld [vmem:[%s7511_s24 + $0x3260] sm:$0xff]  ;;  %v1900_v18 = vld [vmem:[%s7511_s24 + $0x32a8] sm:$0xff] }
 0x37f   : > { %4565 = vmatprep.mubr.f32.mxu1 %v2435_v30  ;;  %v5751_v30 = vpack.c.bf16 %v1868_v26, %v1864_v25  ;;  %v1898_v20 = vld [vmem:[%s7511_s24 + $0x3298] sm:$0xff]  ;;  %v5765_v22 = vpack.c.bf16 %v1891_v10, %v1887_v9  ;;  %v5767_v26 = vpack.c.bf16 %v1900_v18, %v1896_v17  ;;  %v1920_v60 = vld [vmem:[%s7511_s24 + $0x3348] sm:$0xff] }
 0x380   : > { %5734 = vmatpush1.bf16.msra.mxu0 %v5733_v33  ;;  %v1865_v33 = vld [vmem:[%s7511_s24 + $0x3190] sm:$0xff]  ;;  %v1924_v61 = vld [vmem:[%s7511_s24 + $0x3368] sm:$0xff] }
 0x381   : > { %6758 = vmatpush1.bf16.msra.mxu1 %v6757_v36  ;;  %5736 = vmatprep.subr.bf16.mxu0 %v5735_v37  ;;  %v6775_v36 = vpack.c.bf16 %v1870_v28, %v1866_v27  ;;  %v1869_v37 = vld [vmem:[%s7511_s24 + $0x31b0] sm:$0xff]  ;;  %v1895_v27 = vld [vmem:[%s7511_s24 + $0x3280] sm:$0xff]  ;;  %v5779_v3 = vpack.c.bf16 %v1924_v61, %v1920_v60  ;;  %v1928_v9 = vld [vmem:[%s7511_s24 + $0x3388] sm:$0xff] }
 0x382   : > { %6760 = vmatprep.subr.bf16.mxu1 %v6759_v42  ;;  %v1878_v42 = vld [vmem:[%s7511_s24 + $0x31f8] sm:$0xff]  ;;  %v6777_v44 = vpack.c.bf16 %v1869_v37, %v1865_v33  ;;  %v1899_v28 = vld [vmem:[%s7511_s24 + $0x32a0] sm:$0xff]  ;;  %v1932_v10 = vld [vmem:[%s7511_s24 + $0x33a8] sm:$0xff] }
 0x383   : > { %v1906_v33 = vld [vmem:[%s7511_s24 + $0x32d8] sm:$0xff]  ;;  %v5769_v37 = vpack.c.bf16 %v1899_v28, %v1895_v27  ;;  %v5783_v18 = vpack.c.bf16 %v1932_v10, %v1928_v9  ;;  %v1936_v27 = vld [vmem:[%s7511_s24 + $0x33c8] sm:$0xff] }
 0x384   : > { %5738 = vmatpush1.bf16.msra.mxu0 %v5737_v54  ;;  %v1873_v54 = vld [vmem:[%s7511_s24 + $0x31d0] sm:$0xff]  ;;  %v1940_v28 = vld [vmem:[%s7511_s24 + $0x33e8] sm:$0xff]  ;;  %v1966_v9 = vld [vmem:[%s7511_s24 + $0x34b8] sm:$0xff] }
 0x385   : > { %6762 = vmatpush1.bf16.msra.mxu1 %v6761_v49  ;;  %5740 = vmatprep.subr.bf16.mxu0 %v5739_v50  ;;  %v6779_v49 = vpack.c.bf16 %v1878_v42, %v1874_v41  ;;  %v1877_v50 = vld [vmem:[%s7511_s24 + $0x31f0] sm:$0xff]  ;;  %v1903_v41 = vld [vmem:[%s7511_s24 + $0x32c0] sm:$0xff]  ;;  %v5787_v32 = vpack.c.bf16 %v1940_v28, %v1936_v27  ;;  %v1974_v27 = vld [vmem:[%s7511_s24 + $0x34f8] sm:$0xff] }
 0x386   : > { %6764 = vmatprep.subr.bf16.mxu1 %v6763_v55  ;;  %v1886_v55 = vld [vmem:[%s7511_s24 + $0x3238] sm:$0xff]  ;;  %v6781_v58 = vpack.c.bf16 %v1877_v50, %v1873_v54  ;;  %v1907_v42 = vld [vmem:[%s7511_s24 + $0x32e0] sm:$0xff] }
 0x387   : > { %v1914_v54 = vld [vmem:[%s7511_s24 + $0x3318] sm:$0xff]  ;;  %v5773_v50 = vpack.c.bf16 %v1907_v42, %v1903_v41  ;;  %v1944_v41 = vld [vmem:[%s7511_s24 + $0x3408] sm:$0xff] }
 0x388   : > { %5742 = vmatpush1.bf16.msra.mxu0 %v5741_v62  ;;  %v1881_v62 = vld [vmem:[%s7511_s24 + $0x3210] sm:$0xff]  ;;  %v1948_v42 = vld [vmem:[%s7511_s24 + $0x3428] sm:$0xff] }
 0x389   : > { %6766 = vmatpush1.bf16.msra.mxu1 %v6765_v63  ;;  %5744 = vmatprep.subr.bf16.mxu0 %v5743_v1  ;;  %v6783_v63 = vpack.c.bf16 %v1886_v55, %v1882_v53  ;;  %v1885_v1 = vld [vmem:[%s7511_s24 + $0x3230] sm:$0xff]  ;;  %v1911_v53 = vld [vmem:[%s7511_s24 + $0x3300] sm:$0xff]  ;;  %v5791_v48 = vpack.c.bf16 %v1948_v42, %v1944_v41  ;;  %v1982_v41 = vld [vmem:[%s7511_s24 + $0x3538] sm:$0xff] }
 0x38a   : > { %6768 = vmatprep.subr.bf16.mxu1 %v6767_v4  ;;  %v1894_v4 = vld [vmem:[%s7511_s24 + $0x3278] sm:$0xff]  ;;  %v6785_v7 = vpack.c.bf16 %v1885_v1, %v1881_v62  ;;  %v1915_v55 = vld [vmem:[%s7511_s24 + $0x3320] sm:$0xff] }
 0x38b   : > { %v1922_v62 = vld [vmem:[%s7511_s24 + $0x3358] sm:$0xff]  ;;  %v5777_v1 = vpack.c.bf16 %v1915_v55, %v1911_v53  ;;  %v1952_v53 = vld [vmem:[%s7511_s24 + $0x3448] sm:$0xff] }
 0x38c   : > { %5746 = vmatpush1.bf16.msra.mxu0 %v5745_v12  ;;  %v1889_v12 = vld [vmem:[%s7511_s24 + $0x3250] sm:$0xff]  ;;  %v1956_v55 = vld [vmem:[%s7511_s24 + $0x3468] sm:$0xff] }
 0x38d   : > { %6770 = vmatpush1.bf16.msra.mxu1 %v6769_v15  ;;  %5748 = vmatprep.subr.bf16.mxu0 %v5747_v16  ;;  %v6787_v15 = vpack.c.bf16 %v1894_v4, %v1890_v24  ;;  %v1893_v16 = vld [vmem:[%s7511_s24 + $0x3270] sm:$0xff]  ;;  %v1919_v24 = vld [vmem:[%s7511_s24 + $0x3340] sm:$0xff] }
 0x38e   : > { %6772 = vmatprep.subr.bf16.mxu1 %v6771_v21  ;;  %v1902_v21 = vld [vmem:[%s7511_s24 + $0x32b8] sm:$0xff]  ;;  %v6789_v25 = vpack.c.bf16 %v1893_v16, %v1889_v12  ;;  %v1923_v4 = vld [vmem:[%s7511_s24 + $0x3360] sm:$0xff] }
 0x38f   : > { %v1930_v12 = vld [vmem:[%s7511_s24 + $0x3398] sm:$0xff]  ;;  %v5781_v16 = vpack.c.bf16 %v1923_v4, %v1919_v24  ;;  %v1957_v24 = vld [vmem:[%s7511_s24 + $0x3470] sm:$0xff]  ;;  %v1960_v4 = vld [vmem:[%s7511_s24 + $0x3488] sm:$0xff] }
 0x390   : > { %5750 = vmatpush1.bf16.msra.mxu0 %v5749_v34  ;;  %v1897_v34 = vld [vmem:[%s7511_s24 + $0x3290] sm:$0xff] }
 0x391   : > { %6774 = vmatpush1.bf16.msra.mxu1 %v6773_v29  ;;  %5752 = vmatprep.subr.bf16.mxu0 %v5751_v30  ;;  %v6791_v29 = vpack.c.bf16 %v1902_v21, %v1898_v20  ;;  %v1901_v30 = vld [vmem:[%s7511_s24 + $0x32b0] sm:$0xff]  ;;  %v1927_v20 = vld [vmem:[%s7511_s24 + $0x3380] sm:$0xff] }
 0x392   : > { %6776 = vmatprep.subr.bf16.mxu1 %v6775_v36  ;;  %v1910_v36 = vld [vmem:[%s7511_s24 + $0x32f8] sm:$0xff]  ;;  %v6793_v38 = vpack.c.bf16 %v1901_v30, %v1897_v34  ;;  %v1931_v21 = vld [vmem:[%s7511_s24 + $0x33a0] sm:$0xff] }
 0x393   : > { %v1938_v34 = vld [vmem:[%s7511_s24 + $0x33d8] sm:$0xff]  ;;  %v5785_v30 = vpack.c.bf16 %v1931_v21, %v1927_v20  ;;  %v1965_v21 = vld [vmem:[%s7511_s24 + $0x34b0] sm:$0xff] }
 0x394   : > { %5754 = vmatpush1.bf16.msra.mxu0 %v5753_v43  ;;  %v1905_v43 = vld [vmem:[%s7511_s24 + $0x32d0] sm:$0xff] }
 0x395   : > { %6778 = vmatpush1.bf16.msra.mxu1 %v6777_v44  ;;  %5756 = vmatprep.subr.bf16.mxu0 %v5755_v45  ;;  %v6795_v44 = vpack.c.bf16 %v1910_v36, %v1906_v33  ;;  %v1909_v45 = vld [vmem:[%s7511_s24 + $0x32f0] sm:$0xff]  ;;  %v1935_v33 = vld [vmem:[%s7511_s24 + $0x33c0] sm:$0xff] }
 0x396   : > { %6780 = vmatprep.subr.bf16.mxu1 %v6779_v49  ;;  %v1918_v49 = vld [vmem:[%s7511_s24 + $0x3338] sm:$0xff]  ;;  %v6797_v51 = vpack.c.bf16 %v1909_v45, %v1905_v43  ;;  %v1939_v36 = vld [vmem:[%s7511_s24 + $0x33e0] sm:$0xff] }
 0x397   : > { %v1946_v43 = vld [vmem:[%s7511_s24 + $0x3418] sm:$0xff]  ;;  %v5789_v45 = vpack.c.bf16 %v1939_v36, %v1935_v33  ;;  %v1973_v36 = vld [vmem:[%s7511_s24 + $0x34f0] sm:$0xff] }
 0x398   : > { %5758 = vmatpush1.bf16.msra.mxu0 %v5757_v57  ;;  %v1913_v57 = vld [vmem:[%s7511_s24 + $0x3310] sm:$0xff] }
 0x399   : > { %6782 = vmatpush1.bf16.msra.mxu1 %v6781_v58  ;;  %5760 = vmatprep.subr.bf16.mxu0 %v5759_v59  ;;  %v6799_v58 = vpack.c.bf16 %v1918_v49, %v1914_v54  ;;  %v1917_v59 = vld [vmem:[%s7511_s24 + $0x3330] sm:$0xff]  ;;  %v1943_v54 = vld [vmem:[%s7511_s24 + $0x3400] sm:$0xff] }
 0x39a   : > { %6784 = vmatprep.subr.bf16.mxu1 %v6783_v63  ;;  %v1926_v63 = vld [vmem:[%s7511_s24 + $0x3378] sm:$0xff]  ;;  %v6801_v2 = vpack.c.bf16 %v1917_v59, %v1913_v57  ;;  %v1947_v49 = vld [vmem:[%s7511_s24 + $0x3420] sm:$0xff]  ;;  %v2431_v57 = vrot.slane %v9154_v14, %v7663_v11 }
 0x39b   : > { %v1958_v59 = vld [vmem:[%s7511_s24 + $0x3478] sm:$0xff]  ;;  %v5793_v60 = vpack.c.bf16 %v1947_v49, %v1943_v54  ;;  %v1981_v49 = vld [vmem:[%s7511_s24 + $0x3530] sm:$0xff] }
 0x39c   : > { %5762 = vmatpush1.bf16.msra.mxu0 %v5761_v6  ;;  %v1921_v6 = vld [vmem:[%s7511_s24 + $0x3350] sm:$0xff] }
 0x39d   : > { %6786 = vmatpush1.bf16.msra.mxu1 %v6785_v7  ;;  %5764 = vmatprep.subr.bf16.mxu0 %v5763_v8  ;;  %v6803_v7 = vpack.c.bf16 %v1926_v63, %v1922_v62  ;;  %v1925_v8 = vld [vmem:[%s7511_s24 + $0x3370] sm:$0xff]  ;;  %v5795_v62 = vpack.c.bf16 %v1956_v55, %v1952_v53  ;;  %v1951_v63 = vld [vmem:[%s7511_s24 + $0x3440] sm:$0xff]  ;;  %v1990_v53 = vld [vmem:[%s7511_s24 + $0x3578] sm:$0xff] }
 0x39e   : > { %6788 = vmatprep.subr.bf16.mxu1 %v6787_v15  ;;  %v1934_v15 = vld [vmem:[%s7511_s24 + $0x33b8] sm:$0xff]  ;;  %v6805_v17 = vpack.c.bf16 %v1925_v8, %v1921_v6  ;;  %v1964_v6 = vld [vmem:[%s7511_s24 + $0x34a8] sm:$0xff] }
 0x39f   : > { %v1962_v8 = vld [vmem:[%s7511_s24 + $0x3498] sm:$0xff] }
 0x3a0   : > { %5766 = vmatpush1.bf16.msra.mxu0 %v5765_v22  ;;  %v1929_v22 = vld [vmem:[%s7511_s24 + $0x3390] sm:$0xff]  ;;  %v6823_v20 = vpack.c.bf16 %v1966_v9, %v1962_v8  ;;  %v1991_v8 = vld [vmem:[%s7511_s24 + $0x3580] sm:$0xff] }
 0x3a1   : > { %6790 = vmatpush1.bf16.msra.mxu1 %v6789_v25  ;;  %5768 = vmatprep.subr.bf16.mxu0 %v5767_v26  ;;  %v6807_v25 = vpack.c.bf16 %v1934_v15, %v1930_v12  ;;  %v1933_v26 = vld [vmem:[%s7511_s24 + $0x33b0] sm:$0xff]  ;;  %v5799_v15 = vpack.c.bf16 %v1964_v6, %v1960_v4  ;;  %v1995_v9 = vld [vmem:[%s7511_s24 + $0x35a0] sm:$0xff] }
 0x3a2   : > { %6792 = vmatprep.subr.bf16.mxu1 %v6791_v29  ;;  %v1942_v29 = vld [vmem:[%s7511_s24 + $0x33f8] sm:$0xff]  ;;  %v6809_v31 = vpack.c.bf16 %v1933_v26, %v1929_v22  ;;  %v1968_v22 = vld [vmem:[%s7511_s24 + $0x34c8] sm:$0xff] }
 0x3a3   : > { %v1970_v26 = vld [vmem:[%s7511_s24 + $0x34d8] sm:$0xff] }
 0x3a4   : > { %5770 = vmatpush1.bf16.msra.mxu0 %v5769_v37  ;;  %v1937_v37 = vld [vmem:[%s7511_s24 + $0x33d0] sm:$0xff]  ;;  %v6827_v33 = vpack.c.bf16 %v1974_v27, %v1970_v26  ;;  %v1999_v26 = vld [vmem:[%s7511_s24 + $0x35c0] sm:$0xff] }
 0x3a5   : > { %6794 = vmatpush1.bf16.msra.mxu1 %v6793_v38  ;;  %5772 = vmatprep.subr.bf16.mxu0 %v5771_v39  ;;  %v6811_v38 = vpack.c.bf16 %v1942_v29, %v1938_v34  ;;  %v1941_v39 = vld [vmem:[%s7511_s24 + $0x33f0] sm:$0xff]  ;;  %v2003_v27 = vld [vmem:[%s7511_s24 + $0x35e0] sm:$0xff] }
 0x3a6   : > { %6796 = vmatprep.subr.bf16.mxu1 %v6795_v44  ;;  %v1950_v44 = vld [vmem:[%s7511_s24 + $0x3438] sm:$0xff]  ;;  %v6813_v47 = vpack.c.bf16 %v1941_v39, %v1937_v37  ;;  %v1976_v37 = vld [vmem:[%s7511_s24 + $0x3508] sm:$0xff] }
 0x3a7   : > { %v1978_v39 = vld [vmem:[%s7511_s24 + $0x3518] sm:$0xff] }
 0x3a8   : > { %5774 = vmatpush1.bf16.msra.mxu0 %v5773_v50  ;;  %v1945_v50 = vld [vmem:[%s7511_s24 + $0x3410] sm:$0xff]  ;;  %v6831_v54 = vpack.c.bf16 %v1982_v41, %v1978_v39  ;;  %v2007_v39 = vld [vmem:[%s7511_s24 + $0x3600] sm:$0xff] }
 0x3a9   : > { %6798 = vmatpush1.bf16.msra.mxu1 %v6797_v51  ;;  %5776 = vmatprep.subr.bf16.mxu0 %v5775_v52  ;;  %v6815_v51 = vpack.c.bf16 %v1950_v44, %v1946_v43  ;;  %v1949_v52 = vld [vmem:[%s7511_s24 + $0x3430] sm:$0xff]  ;;  %v2011_v41 = vld [vmem:[%s7511_s24 + $0x3620] sm:$0xff] }
 0x3aa   : > { %6800 = vmatprep.subr.bf16.mxu1 %v6799_v58  ;;  %v1954_v58 = vld [vmem:[%s7511_s24 + $0x3458] sm:$0xff]  ;;  %v6817_v61 = vpack.c.bf16 %v1949_v52, %v1945_v50  ;;  %v1984_v50 = vld [vmem:[%s7511_s24 + $0x3548] sm:$0xff] }
 0x3ab   : > { %v1986_v52 = vld [vmem:[%s7511_s24 + $0x3558] sm:$0xff] }
 0x3ac   : > { %5778 = vmatpush1.bf16.msra.mxu0 %v5777_v1  ;;  %v1955_v1 = vld [vmem:[%s7511_s24 + $0x3460] sm:$0xff] }
 0x3ad   : > { %6802 = vmatpush1.bf16.msra.mxu1 %v6801_v2  ;;  %5780 = vmatprep.subr.bf16.mxu0 %v5779_v3  ;;  %v1953_v2 = vld [vmem:[%s7511_s24 + $0x3450] sm:$0xff]  ;;  %v6819_v3 = vpack.c.bf16 %v1958_v59, %v1954_v58  ;;  %v5797_v10 = vpack.c.bf16 %v1955_v1, %v1951_v63  ;;  %v1983_v59 = vld [vmem:[%s7511_s24 + $0x3540] sm:$0xff]  ;;  %v1992_v1 = vld [vmem:[%s7511_s24 + $0x3588] sm:$0xff] }
 0x3ae   : > { %6804 = vmatprep.subr.bf16.mxu1 %v6803_v7  ;;  %v2443_v7 = vrot.slane %v9154_v14, %v7672_v23  ;;  %v6821_v12 = vpack.c.bf16 %v1957_v24, %v1953_v2  ;;  %v1989_v63 = vld [vmem:[%s7511_s24 + $0x3570] sm:$0xff]  ;;  %v1996_v2 = vld [vmem:[%s7511_s24 + $0x35a8] sm:$0xff]  ;;  %v1998_v24 = vld [vmem:[%s7511_s24 + $0x35b8] sm:$0xff] }
 0x3b0   : > { %5782 = vmatpush1.bf16.msra.mxu0 %v5781_v16  ;;  %v1959_v16 = vld [vmem:[%s7511_s24 + $0x3480] sm:$0xff] }
 0x3b1   : > { %6806 = vmatpush1.bf16.msra.mxu1 %v6805_v17  ;;  %5784 = vmatprep.subr.bf16.mxu0 %v5783_v18  ;;  %v1963_v17 = vld [vmem:[%s7511_s24 + $0x34a0] sm:$0xff]  ;;  %v1961_v18 = vld [vmem:[%s7511_s24 + $0x3490] sm:$0xff] }
 0x3b2   : > { %6808 = vmatprep.subr.bf16.mxu1 %v6807_v25  ;;  %v1972_v25 = vld [vmem:[%s7511_s24 + $0x34e8] sm:$0xff]  ;;  %v5801_v28 = vpack.c.bf16 %v1963_v17, %v1959_v16  ;;  %v6825_v34 = vpack.c.bf16 %v1965_v21, %v1961_v18  ;;  %v2002_v18 = vld [vmem:[%s7511_s24 + $0x35d8] sm:$0xff]  ;;  %v5817_v21 = vpack.c.bf16 %v1995_v9, %v1991_v8 }
 0x3b3   : > { %v5803_v29 = vpack.c.bf16 %v1972_v25, %v1968_v22  ;;  %v2000_v16 = vld [vmem:[%s7511_s24 + $0x35c8] sm:$0xff] }
 0x3b4   : > { %5786 = vmatpush1.bf16.msra.mxu0 %v5785_v30  ;;  %v1967_v30 = vld [vmem:[%s7511_s24 + $0x34c0] sm:$0xff]  ;;  %v2004_v17 = vld [vmem:[%s7511_s24 + $0x35e8] sm:$0xff] }
 0x3b5   : > { %6810 = vmatpush1.bf16.msra.mxu1 %v6809_v31  ;;  %5788 = vmatprep.subr.bf16.mxu0 %v5787_v32  ;;  %v1971_v31 = vld [vmem:[%s7511_s24 + $0x34e0] sm:$0xff]  ;;  %v1969_v32 = vld [vmem:[%s7511_s24 + $0x34d0] sm:$0xff]  ;;  %v5819_v25 = vpack.c.bf16 %v2004_v17, %v2000_v16  ;;  %v2032_v8 = vld [vmem:[%s7511_s24 + $0x36c8] sm:$0xff] }
 0x3b6   : > { %6812 = vmatprep.subr.bf16.mxu1 %v6811_v38  ;;  %v1980_v38 = vld [vmem:[%s7511_s24 + $0x3528] sm:$0xff]  ;;  %v5805_v42 = vpack.c.bf16 %v1971_v31, %v1967_v30  ;;  %v6829_v43 = vpack.c.bf16 %v1973_v36, %v1969_v32  ;;  %v2010_v32 = vld [vmem:[%s7511_s24 + $0x3618] sm:$0xff]  ;;  %v5821_v36 = vpack.c.bf16 %v2003_v27, %v1999_v26 }
 0x3b7   : > { %v5807_v44 = vpack.c.bf16 %v1980_v38, %v1976_v37  ;;  %v2008_v30 = vld [vmem:[%s7511_s24 + $0x3608] sm:$0xff] }
 0x3b8   : > { %5790 = vmatpush1.bf16.msra.mxu0 %v5789_v45  ;;  %v1975_v45 = vld [vmem:[%s7511_s24 + $0x3500] sm:$0xff]  ;;  %v2012_v31 = vld [vmem:[%s7511_s24 + $0x3628] sm:$0xff] }
 0x3b9   : > { %6814 = vmatpush1.bf16.msra.mxu1 %v6813_v47  ;;  %5792 = vmatprep.subr.bf16.mxu0 %v5791_v48  ;;  %v1979_v47 = vld [vmem:[%s7511_s24 + $0x3520] sm:$0xff]  ;;  %v1977_v48 = vld [vmem:[%s7511_s24 + $0x3510] sm:$0xff]  ;;  %v5823_v38 = vpack.c.bf16 %v2012_v31, %v2008_v30  ;;  %v2036_v9 = vld [vmem:[%s7511_s24 + $0x36e8] sm:$0xff] }
 0x3ba   : > { %6816 = vmatprep.subr.bf16.mxu1 %v6815_v51  ;;  %v1988_v51 = vld [vmem:[%s7511_s24 + $0x3568] sm:$0xff]  ;;  %v5809_v55 = vpack.c.bf16 %v1979_v47, %v1975_v45  ;;  %v5835_v17 = vpack.c.bf16 %v2036_v9, %v2032_v8 }
 0x3bb   : > { %3430 = vmatmul.mubr.f32.vlgmr.msra.gmra.mrb[0].mxu0 %v2431_v57  ;;  %v5811_v58 = vpack.c.bf16 %v1988_v51, %v1984_v50  ;;  %v2016_v45 = vld [vmem:[%s7511_s24 + $0x3648] sm:$0xff] }
 0x3bc   : > { %5794 = vmatpush1.bf16.msra.mxu0 %v5793_v60  ;;  %4566 = vmatmul.mubr.f32.vlgmr.msra.gmra.mrb[0].mxu1 %v2431_v57  ;;  %v6833_v57 = vpack.c.bf16 %v1981_v49, %v1977_v48  ;;  %v1987_v60 = vld [vmem:[%s7511_s24 + $0x3560] sm:$0xff]  ;;  %v2020_v47 = vld [vmem:[%s7511_s24 + $0x3668] sm:$0xff]  ;;  %v2018_v48 = vld [vmem:[%s7511_s24 + $0x3658] sm:$0xff]  ;;  %v5825_v49 = vpack.c.bf16 %v2011_v41, %v2007_v39 }
 0x3bd   : > { %6818 = vmatpush1.bf16.msra.mxu1 %v6817_v61  ;;  %5796 = vmatprep.subr.bf16.mxu0 %v5795_v62  ;;  %v1985_v61 = vld [vmem:[%s7511_s24 + $0x3550] sm:$0xff]  ;;  %v6835_v62 = vpack.c.bf16 %v1990_v53, %v1986_v52  ;;  %v5813_v4 = vpack.c.bf16 %v1987_v60, %v1983_v59  ;;  %v5827_v51 = vpack.c.bf16 %v2020_v47, %v2016_v45  ;;  %v2015_v52 = vld [vmem:[%s7511_s24 + $0x3640] sm:$0xff]  ;;  %v2024_v59 = vld [vmem:[%s7511_s24 + $0x3688] sm:$0xff] }
 0x3be   : > { %6820 = vmatprep.subr.bf16.mxu1 %v6819_v3  ;;  %3500 = vmatprep.mubr.f32.mxu0 %v2443_v7  ;;  %v1994_v3 = vld [vmem:[%s7511_s24 + $0x3598] sm:$0xff]  ;;  %v6837_v6 = vpack.c.bf16 %v1989_v63, %v1985_v61  ;;  %v2019_v53 = vld [vmem:[%s7511_s24 + $0x3660] sm:$0xff]  ;;  %v2028_v60 = vld [vmem:[%s7511_s24 + $0x36a8] sm:$0xff] }
 0x3bf   : > { %4636 = vmatprep.mubr.f32.mxu1 %v2443_v7  ;;  %v5815_v7 = vpack.c.bf16 %v1996_v2, %v1992_v1  ;;  %v2026_v61 = vld [vmem:[%s7511_s24 + $0x3698] sm:$0xff]  ;;  %v5829_v63 = vpack.c.bf16 %v2019_v53, %v2015_v52  ;;  %v5831_v2 = vpack.c.bf16 %v2028_v60, %v2024_v59  ;;  %v2040_v26 = vld [vmem:[%s7511_s24 + $0x3708] sm:$0xff] }
 0x3c0   : > { %5798 = vmatpush1.bf16.msra.mxu0 %v5797_v10  ;;  %v1993_v10 = vld [vmem:[%s7511_s24 + $0x3590] sm:$0xff]  ;;  %v2044_v27 = vld [vmem:[%s7511_s24 + $0x3728] sm:$0xff] }
 0x3c1   : > { %6822 = vmatpush1.bf16.msra.mxu1 %v6821_v12  ;;  %5800 = vmatprep.subr.bf16.mxu0 %v5799_v15  ;;  %v6839_v12 = vpack.c.bf16 %v1998_v24, %v1994_v3  ;;  %v1997_v15 = vld [vmem:[%s7511_s24 + $0x35b0] sm:$0xff]  ;;  %v2023_v3 = vld [vmem:[%s7511_s24 + $0x3680] sm:$0xff]  ;;  %v5839_v31 = vpack.c.bf16 %v2044_v27, %v2040_v26  ;;  %v2048_v39 = vld [vmem:[%s7511_s24 + $0x3748] sm:$0xff] }
 0x3c2   : > { %6824 = vmatprep.subr.bf16.mxu1 %v6823_v20  ;;  %v2006_v20 = vld [vmem:[%s7511_s24 + $0x35f8] sm:$0xff]  ;;  %v6841_v22 = vpack.c.bf16 %v1997_v15, %v1993_v10  ;;  %v2027_v24 = vld [vmem:[%s7511_s24 + $0x36a0] sm:$0xff]  ;;  %v2052_v41 = vld [vmem:[%s7511_s24 + $0x3768] sm:$0xff] }
 0x3c3   : > { %v2034_v10 = vld [vmem:[%s7511_s24 + $0x36d8] sm:$0xff]  ;;  %v5833_v15 = vpack.c.bf16 %v2027_v24, %v2023_v3  ;;  %v5843_v47 = vpack.c.bf16 %v2052_v41, %v2048_v39  ;;  %v2056_v52 = vld [vmem:[%s7511_s24 + $0x3788] sm:$0xff] }
 0x3c4   : > { %5802 = vmatpush1.bf16.msra.mxu0 %v5801_v28  ;;  %v2001_v28 = vld [vmem:[%s7511_s24 + $0x35d0] sm:$0xff]  ;;  %v2060_v53 = vld [vmem:[%s7511_s24 + $0x37a8] sm:$0xff] }
 0x3c5   : > { %6826 = vmatpush1.bf16.msra.mxu1 %v6825_v34  ;;  %5804 = vmatprep.subr.bf16.mxu0 %v5803_v29  ;;  %v6843_v34 = vpack.c.bf16 %v2006_v20, %v2002_v18  ;;  %v2005_v29 = vld [vmem:[%s7511_s24 + $0x35f0] sm:$0xff]  ;;  %v2031_v18 = vld [vmem:[%s7511_s24 + $0x36c0] sm:$0xff]  ;;  %v5847_v60 = vpack.c.bf16 %v2060_v53, %v2056_v52  ;;  %v2064_v3 = vld [vmem:[%s7511_s24 + $0x37c8] sm:$0xff] }
 0x3c6   : > { %6828 = vmatprep.subr.bf16.mxu1 %v6827_v33  ;;  %v2014_v33 = vld [vmem:[%s7511_s24 + $0x3638] sm:$0xff]  ;;  %v6845_v37 = vpack.c.bf16 %v2005_v29, %v2001_v28  ;;  %v2035_v20 = vld [vmem:[%s7511_s24 + $0x36e0] sm:$0xff]  ;;  %v2068_v24 = vld [vmem:[%s7511_s24 + $0x37e8] sm:$0xff] }
 0x3c7   : > { %v2042_v28 = vld [vmem:[%s7511_s24 + $0x3718] sm:$0xff]  ;;  %v5837_v29 = vpack.c.bf16 %v2035_v20, %v2031_v18  ;;  %v5851_v9 = vpack.c.bf16 %v2068_v24, %v2064_v3  ;;  %v2072_v18 = vld [vmem:[%s7511_s24 + $0x3808] sm:$0xff] }
 0x3c8   : > { %5806 = vmatpush1.bf16.msra.mxu0 %v5805_v42  ;;  %v2009_v42 = vld [vmem:[%s7511_s24 + $0x3610] sm:$0xff]  ;;  %v2076_v20 = vld [vmem:[%s7511_s24 + $0x3828] sm:$0xff]  ;;  %v2094_v52 = vld [vmem:[%s7511_s24 + $0x38b8] sm:$0xff] }
 0x3c9   : > { %6830 = vmatpush1.bf16.msra.mxu1 %v6829_v43  ;;  %5808 = vmatprep.subr.bf16.mxu0 %v5807_v44  ;;  %v6847_v43 = vpack.c.bf16 %v2014_v33, %v2010_v32  ;;  %v2013_v44 = vld [vmem:[%s7511_s24 + $0x3630] sm:$0xff]  ;;  %v2039_v32 = vld [vmem:[%s7511_s24 + $0x3700] sm:$0xff]  ;;  %v5855_v27 = vpack.c.bf16 %v2076_v20, %v2072_v18 }
 0x3ca   : > { %6832 = vmatprep.subr.bf16.mxu1 %v6831_v54  ;;  %v2022_v54 = vld [vmem:[%s7511_s24 + $0x3678] sm:$0xff]  ;;  %v6849_v50 = vpack.c.bf16 %v2013_v44, %v2009_v42  ;;  %v2043_v33 = vld [vmem:[%s7511_s24 + $0x3720] sm:$0xff] }
 0x3cb   : > { %v2050_v42 = vld [vmem:[%s7511_s24 + $0x3758] sm:$0xff]  ;;  %v5841_v44 = vpack.c.bf16 %v2043_v33, %v2039_v32  ;;  %v2080_v32 = vld [vmem:[%s7511_s24 + $0x3848] sm:$0xff] }
 0x3cc   : > { %5810 = vmatpush1.bf16.msra.mxu0 %v5809_v55  ;;  %v2017_v55 = vld [vmem:[%s7511_s24 + $0x3650] sm:$0xff]  ;;  %v2084_v33 = vld [vmem:[%s7511_s24 + $0x3868] sm:$0xff] }
 0x3cd   : > { %6834 = vmatpush1.bf16.msra.mxu1 %v6833_v57  ;;  %5812 = vmatprep.subr.bf16.mxu0 %v5811_v58  ;;  %v6851_v57 = vpack.c.bf16 %v2022_v54, %v2018_v48  ;;  %v2021_v58 = vld [vmem:[%s7511_s24 + $0x3670] sm:$0xff]  ;;  %v2047_v48 = vld [vmem:[%s7511_s24 + $0x3740] sm:$0xff] }
 0x3ce   : > { %6836 = vmatprep.subr.bf16.mxu1 %v6835_v62  ;;  %v2030_v62 = vld [vmem:[%s7511_s24 + $0x36b8] sm:$0xff]  ;;  %v6853_v1 = vpack.c.bf16 %v2021_v58, %v2017_v55  ;;  %v2051_v54 = vld [vmem:[%s7511_s24 + $0x3760] sm:$0xff] }
 0x3cf   : > { %v2058_v55 = vld [vmem:[%s7511_s24 + $0x3798] sm:$0xff]  ;;  %v5845_v58 = vpack.c.bf16 %v2051_v54, %v2047_v48  ;;  %v2085_v48 = vld [vmem:[%s7511_s24 + $0x3870] sm:$0xff]  ;;  %v2088_v54 = vld [vmem:[%s7511_s24 + $0x3888] sm:$0xff] }
 0x3d0   : > { %5814 = vmatpush1.bf16.msra.mxu0 %v5813_v4  ;;  %v2025_v4 = vld [vmem:[%s7511_s24 + $0x3690] sm:$0xff] }
 0x3d1   : > { %6838 = vmatpush1.bf16.msra.mxu1 %v6837_v6  ;;  %5816 = vmatprep.subr.bf16.mxu0 %v5815_v7  ;;  %v6855_v6 = vpack.c.bf16 %v2030_v62, %v2026_v61  ;;  %v2029_v7 = vld [vmem:[%s7511_s24 + $0x36b0] sm:$0xff]  ;;  %v2055_v61 = vld [vmem:[%s7511_s24 + $0x3780] sm:$0xff] }
 0x3d2   : > { %6840 = vmatprep.subr.bf16.mxu1 %v6839_v12  ;;  %v2038_v12 = vld [vmem:[%s7511_s24 + $0x36f8] sm:$0xff]  ;;  %v6857_v16 = vpack.c.bf16 %v2029_v7, %v2025_v4  ;;  %v2059_v62 = vld [vmem:[%s7511_s24 + $0x37a0] sm:$0xff] }
 0x3d3   : > { %v2066_v4 = vld [vmem:[%s7511_s24 + $0x37d8] sm:$0xff]  ;;  %v5849_v7 = vpack.c.bf16 %v2059_v62, %v2055_v61  ;;  %v2093_v61 = vld [vmem:[%s7511_s24 + $0x38b0] sm:$0xff]  ;;  %v2096_v62 = vld [vmem:[%s7511_s24 + $0x38c8] sm:$0xff] }
 0x3d4   : > { %5818 = vmatpush1.bf16.msra.mxu0 %v5817_v21  ;;  %v2033_v21 = vld [vmem:[%s7511_s24 + $0x36d0] sm:$0xff] }
 0x3d5   : > { %6842 = vmatpush1.bf16.msra.mxu1 %v6841_v22  ;;  %5820 = vmatprep.subr.bf16.mxu0 %v5819_v25  ;;  %v6859_v22 = vpack.c.bf16 %v2038_v12, %v2034_v10  ;;  %v2037_v25 = vld [vmem:[%s7511_s24 + $0x36f0] sm:$0xff]  ;;  %v2063_v10 = vld [vmem:[%s7511_s24 + $0x37c0] sm:$0xff] }
 0x3d6   : > { %6844 = vmatprep.subr.bf16.mxu1 %v6843_v34  ;;  %v2046_v34 = vld [vmem:[%s7511_s24 + $0x3738] sm:$0xff]  ;;  %v6861_v30 = vpack.c.bf16 %v2037_v25, %v2033_v21  ;;  %v2067_v12 = vld [vmem:[%s7511_s24 + $0x37e0] sm:$0xff] }
 0x3d7   : > { %v2074_v21 = vld [vmem:[%s7511_s24 + $0x3818] sm:$0xff]  ;;  %v5853_v25 = vpack.c.bf16 %v2067_v12, %v2063_v10  ;;  %v2101_v10 = vld [vmem:[%s7511_s24 + $0x38f0] sm:$0xff]  ;;  %v2104_v12 = vld [vmem:[%s7511_s24 + $0x3908] sm:$0xff] }
 0x3d8   : > { %5822 = vmatpush1.bf16.msra.mxu0 %v5821_v36  ;;  %v2041_v36 = vld [vmem:[%s7511_s24 + $0x3710] sm:$0xff] }
 0x3d9   : > { %6846 = vmatpush1.bf16.msra.mxu1 %v6845_v37  ;;  %5824 = vmatprep.subr.bf16.mxu0 %v5823_v38  ;;  %v6863_v37 = vpack.c.bf16 %v2046_v34, %v2042_v28  ;;  %v2045_v38 = vld [vmem:[%s7511_s24 + $0x3730] sm:$0xff]  ;;  %v2071_v28 = vld [vmem:[%s7511_s24 + $0x3800] sm:$0xff] }
 0x3da   : > { %6848 = vmatprep.subr.bf16.mxu1 %v6847_v43  ;;  %v2054_v43 = vld [vmem:[%s7511_s24 + $0x3778] sm:$0xff]  ;;  %v6865_v45 = vpack.c.bf16 %v2045_v38, %v2041_v36  ;;  %v2075_v34 = vld [vmem:[%s7511_s24 + $0x3820] sm:$0xff]  ;;  %v2439_v36 = vrot.slane %v9154_v14, %v7801_v35 }
 0x3db   : > { %v2086_v38 = vld [vmem:[%s7511_s24 + $0x3878] sm:$0xff]  ;;  %v5857_v39 = vpack.c.bf16 %v2075_v34, %v2071_v28  ;;  %v2109_v28 = vld [vmem:[%s7511_s24 + $0x3930] sm:$0xff]  ;;  %v2112_v34 = vld [vmem:[%s7511_s24 + $0x3948] sm:$0xff] }
 0x3dc   : > { %5826 = vmatpush1.bf16.msra.mxu0 %v5825_v49  ;;  %v2049_v49 = vld [vmem:[%s7511_s24 + $0x3750] sm:$0xff] }
 0x3dd   : > { %6850 = vmatpush1.bf16.msra.mxu1 %v6849_v50  ;;  %5828 = vmatprep.subr.bf16.mxu0 %v5827_v51  ;;  %v6867_v50 = vpack.c.bf16 %v2054_v43, %v2050_v42  ;;  %v2053_v51 = vld [vmem:[%s7511_s24 + $0x3770] sm:$0xff]  ;;  %v5859_v42 = vpack.c.bf16 %v2084_v33, %v2080_v32  ;;  %v2079_v43 = vld [vmem:[%s7511_s24 + $0x3840] sm:$0xff] }
 0x3de   : > { %6852 = vmatprep.subr.bf16.mxu1 %v6851_v57  ;;  %v2062_v57 = vld [vmem:[%s7511_s24 + $0x37b8] sm:$0xff]  ;;  %v6869_v59 = vpack.c.bf16 %v2053_v51, %v2049_v49  ;;  %v2092_v49 = vld [vmem:[%s7511_s24 + $0x38a8] sm:$0xff] }
 0x3df   : > { %v2090_v51 = vld [vmem:[%s7511_s24 + $0x3898] sm:$0xff] }
 0x3e0   : > { %5830 = vmatpush1.bf16.msra.mxu0 %v5829_v63  ;;  %v2057_v63 = vld [vmem:[%s7511_s24 + $0x3790] sm:$0xff] }
 0x3e1   : > { %6854 = vmatpush1.bf16.msra.mxu1 %v6853_v1  ;;  %5832 = vmatprep.subr.bf16.mxu0 %v5831_v2  ;;  %v6871_v1 = vpack.c.bf16 %v2062_v57, %v2058_v55  ;;  %v2061_v2 = vld [vmem:[%s7511_s24 + $0x37b0] sm:$0xff]  ;;  %v5863_v57 = vpack.c.bf16 %v2092_v49, %v2088_v54 }
 0x3e2   : > { %6856 = vmatprep.subr.bf16.mxu1 %v6855_v6  ;;  %v2070_v6 = vld [vmem:[%s7511_s24 + $0x37f8] sm:$0xff]  ;;  %v6873_v8 = vpack.c.bf16 %v2061_v2, %v2057_v63  ;;  %v2100_v63 = vld [vmem:[%s7511_s24 + $0x38e8] sm:$0xff] }
 0x3e3   : > { %v2102_v2 = vld [vmem:[%s7511_s24 + $0x38f8] sm:$0xff] }
 0x3e4   : > { %5834 = vmatpush1.bf16.msra.mxu0 %v5833_v15  ;;  %v2065_v15 = vld [vmem:[%s7511_s24 + $0x37d0] sm:$0xff] }
 0x3e5   : > { %6858 = vmatpush1.bf16.msra.mxu1 %v6857_v16  ;;  %5836 = vmatprep.subr.bf16.mxu0 %v5835_v17  ;;  %v6875_v16 = vpack.c.bf16 %v2070_v6, %v2066_v4  ;;  %v2069_v17 = vld [vmem:[%s7511_s24 + $0x37f0] sm:$0xff]  ;;  %v5867_v4 = vpack.c.bf16 %v2100_v63, %v2096_v62  ;;  %v2095_v6 = vld [vmem:[%s7511_s24 + $0x38c0] sm:$0xff] }
 0x3e6   : > { %6860 = vmatprep.subr.bf16.mxu1 %v6859_v22  ;;  %v2078_v22 = vld [vmem:[%s7511_s24 + $0x3838] sm:$0xff]  ;;  %v6877_v26 = vpack.c.bf16 %v2069_v17, %v2065_v15  ;;  %v2108_v15 = vld [vmem:[%s7511_s24 + $0x3928] sm:$0xff]  ;;  %v2127_v63 = vld [vmem:[%s7511_s24 + $0x39c0] sm:$0xff] }
 0x3e7   : > { %v2110_v17 = vld [vmem:[%s7511_s24 + $0x3938] sm:$0xff] }
 0x3e8   : > { %5838 = vmatpush1.bf16.msra.mxu0 %v5837_v29  ;;  %v2073_v29 = vld [vmem:[%s7511_s24 + $0x3810] sm:$0xff] }
 0x3e9   : > { %6862 = vmatpush1.bf16.msra.mxu1 %v6861_v30  ;;  %5840 = vmatprep.subr.bf16.mxu0 %v5839_v31  ;;  %v6879_v30 = vpack.c.bf16 %v2078_v22, %v2074_v21  ;;  %v2077_v31 = vld [vmem:[%s7511_s24 + $0x3830] sm:$0xff]  ;;  %v5871_v21 = vpack.c.bf16 %v2108_v15, %v2104_v12  ;;  %v2103_v22 = vld [vmem:[%s7511_s24 + $0x3900] sm:$0xff] }
 0x3ea   : > { %6864 = vmatprep.subr.bf16.mxu1 %v6863_v37  ;;  %v2082_v37 = vld [vmem:[%s7511_s24 + $0x3858] sm:$0xff]  ;;  %v6881_v41 = vpack.c.bf16 %v2077_v31, %v2073_v29  ;;  %v2116_v29 = vld [vmem:[%s7511_s24 + $0x3968] sm:$0xff]  ;;  %v2135_v15 = vld [vmem:[%s7511_s24 + $0x3a00] sm:$0xff] }
 0x3eb   : > { %v2118_v31 = vld [vmem:[%s7511_s24 + $0x3978] sm:$0xff] }
 0x3ec   : > { %5842 = vmatpush1.bf16.msra.mxu0 %v5841_v44  ;;  %v2083_v44 = vld [vmem:[%s7511_s24 + $0x3860] sm:$0xff] }
 0x3ed   : > { %6866 = vmatpush1.bf16.msra.mxu1 %v6865_v45  ;;  %5844 = vmatprep.subr.bf16.mxu0 %v5843_v47  ;;  %v2081_v45 = vld [vmem:[%s7511_s24 + $0x3850] sm:$0xff]  ;;  %v6883_v47 = vpack.c.bf16 %v2086_v38, %v2082_v37  ;;  %v5861_v53 = vpack.c.bf16 %v2083_v44, %v2079_v43  ;;  %v2111_v37 = vld [vmem:[%s7511_s24 + $0x3940] sm:$0xff]  ;;  %v2120_v43 = vld [vmem:[%s7511_s24 + $0x3988] sm:$0xff] }
 0x3ee   : > { %6868 = vmatprep.subr.bf16.mxu1 %v6867_v50  ;;  %v2451_v50 = vrot.slane %v9154_v14, %v7810_v46  ;;  %v6885_v55 = vpack.c.bf16 %v2085_v48, %v2081_v45  ;;  %v6887_v46 = vpack.c.bf16 %v2094_v52, %v2090_v51  ;;  %v2115_v38 = vld [vmem:[%s7511_s24 + $0x3960] sm:$0xff]  ;;  %v2124_v44 = vld [vmem:[%s7511_s24 + $0x39a8] sm:$0xff]  ;;  %v2122_v45 = vld [vmem:[%s7511_s24 + $0x3998] sm:$0xff] }
 0x3ef   : > { %v5877_v48 = vpack.c.bf16 %v2115_v38, %v2111_v37  ;;  %v5879_v49 = vpack.c.bf16 %v2124_v44, %v2120_v43  ;;  %v2123_v51 = vld [vmem:[%s7511_s24 + $0x39a0] sm:$0xff]  ;;  %v2121_v52 = vld [vmem:[%s7511_s24 + $0x3990] sm:$0xff]  ;;  %v2156_v37 = vld [vmem:[%s7511_s24 + $0x3aa8] sm:$0xff] }
 0x3f0   : > { %5846 = vmatpush1.bf16.msra.mxu0 %v5845_v58  ;;  %v2087_v58 = vld [vmem:[%s7511_s24 + $0x3880] sm:$0xff]  ;;  %v2154_v38 = vld [vmem:[%s7511_s24 + $0x3a98] sm:$0xff] }
 0x3f1   : > { %6870 = vmatpush1.bf16.msra.mxu1 %v6869_v59  ;;  %5848 = vmatprep.subr.bf16.mxu0 %v5847_v60  ;;  %v2091_v59 = vld [vmem:[%s7511_s24 + $0x38a0] sm:$0xff]  ;;  %v2089_v60 = vld [vmem:[%s7511_s24 + $0x3890] sm:$0xff] }
 0x3f2   : > { %6872 = vmatprep.subr.bf16.mxu1 %v6871_v1  ;;  %v2098_v1 = vld [vmem:[%s7511_s24 + $0x38d8] sm:$0xff]  ;;  %v5865_v3 = vpack.c.bf16 %v2091_v59, %v2087_v58  ;;  %v6889_v24 = vpack.c.bf16 %v2093_v61, %v2089_v60  ;;  %v2132_v58 = vld [vmem:[%s7511_s24 + $0x39e8] sm:$0xff]  ;;  %v2151_v44 = vld [vmem:[%s7511_s24 + $0x3a80] sm:$0xff] }
 0x3f3   : > { %v2130_v59 = vld [vmem:[%s7511_s24 + $0x39d8] sm:$0xff] }
 0x3f4   : > { %5850 = vmatpush1.bf16.msra.mxu0 %v5849_v7  ;;  %v2099_v7 = vld [vmem:[%s7511_s24 + $0x38e0] sm:$0xff]  ;;  %v2134_v60 = vld [vmem:[%s7511_s24 + $0x39f8] sm:$0xff] }
 0x3f5   : > { %6874 = vmatpush1.bf16.msra.mxu1 %v6873_v8  ;;  %5852 = vmatprep.subr.bf16.mxu0 %v5851_v9  ;;  %v2097_v8 = vld [vmem:[%s7511_s24 + $0x38d0] sm:$0xff]  ;;  %v6891_v9 = vpack.c.bf16 %v2102_v2, %v2098_v1  ;;  %v5869_v18 = vpack.c.bf16 %v2099_v7, %v2095_v6  ;;  %v2131_v1 = vld [vmem:[%s7511_s24 + $0x39e0] sm:$0xff]  ;;  %v2140_v6 = vld [vmem:[%s7511_s24 + $0x3a28] sm:$0xff] }
 0x3f6   : > { %6876 = vmatprep.subr.bf16.mxu1 %v6875_v16  ;;  %v2106_v16 = vld [vmem:[%s7511_s24 + $0x3918] sm:$0xff]  ;;  %v6893_v20 = vpack.c.bf16 %v2101_v10, %v2097_v8  ;;  %v2129_v2 = vld [vmem:[%s7511_s24 + $0x39d0] sm:$0xff] }
 0x3f7   : > { %v2138_v7 = vld [vmem:[%s7511_s24 + $0x3a18] sm:$0xff] }
 0x3f8   : > { %5854 = vmatpush1.bf16.msra.mxu0 %v5853_v25  ;;  %v2107_v25 = vld [vmem:[%s7511_s24 + $0x3920] sm:$0xff]  ;;  %v2142_v8 = vld [vmem:[%s7511_s24 + $0x3a38] sm:$0xff] }
 0x3f9   : > { %6878 = vmatpush1.bf16.msra.mxu1 %v6877_v26  ;;  %5856 = vmatprep.subr.bf16.mxu0 %v5855_v27  ;;  %v2105_v26 = vld [vmem:[%s7511_s24 + $0x3910] sm:$0xff]  ;;  %v6895_v27 = vpack.c.bf16 %v2110_v17, %v2106_v16  ;;  %v5873_v32 = vpack.c.bf16 %v2107_v25, %v2103_v22  ;;  %v2139_v16 = vld [vmem:[%s7511_s24 + $0x3a20] sm:$0xff]  ;;  %v2148_v22 = vld [vmem:[%s7511_s24 + $0x3a68] sm:$0xff] }
 0x3fa   : > { %6880 = vmatprep.subr.bf16.mxu1 %v6879_v30  ;;  %v2114_v30 = vld [vmem:[%s7511_s24 + $0x3958] sm:$0xff]  ;;  %v6897_v33 = vpack.c.bf16 %v2109_v28, %v2105_v26  ;;  %v2137_v17 = vld [vmem:[%s7511_s24 + $0x3a10] sm:$0xff] }
 0x3fb   : > { %3501 = vmatmul.mubr.f32.vlgmr.msra.gmra.mrb[0].mxu0 %v2439_v36  ;;  %v2146_v25 = vld [vmem:[%s7511_s24 + $0x3a58] sm:$0xff] }
 0x3fc   : > { %5858 = vmatpush1.bf16.msra.mxu0 %v5857_v39  ;;  %4637 = vmatmul.mubr.f32.vlgmr.msra.gmra.mrb[0].mxu1 %v2439_v36  ;;  %v5875_v36 = vpack.c.bf16 %v2116_v29, %v2112_v34  ;;  %v2113_v39 = vld [vmem:[%s7511_s24 + $0x3950] sm:$0xff]  ;;  %v2150_v26 = vld [vmem:[%s7511_s24 + $0x3a78] sm:$0xff]  ;;  %v2143_v29 = vld [vmem:[%s7511_s24 + $0x3a40] sm:$0xff] }
 0x3fd   : > { %6882 = vmatpush1.bf16.msra.mxu1 %v6881_v41  ;;  %5860 = vmatprep.subr.bf16.mxu0 %v5859_v42  ;;  %v6899_v41 = vpack.c.bf16 %v2118_v31, %v2114_v30  ;;  %v2117_v42 = vld [vmem:[%s7511_s24 + $0x3970] sm:$0xff]  ;;  %v2147_v30 = vld [vmem:[%s7511_s24 + $0x3a60] sm:$0xff] }
 0x3fe   : > { %6884 = vmatprep.subr.bf16.mxu1 %v6883_v47  ;;  %3571 = vmatprep.mubr.f32.mxu0 %v2451_v50  ;;  %v2126_v47 = vld [vmem:[%s7511_s24 + $0x39b8] sm:$0xff]  ;;  %v6901_v54 = vpack.c.bf16 %v2117_v42, %v2113_v39  ;;  %v2145_v31 = vld [vmem:[%s7511_s24 + $0x3a50] sm:$0xff] }
 0x3ff   : > { %4707 = vmatprep.mubr.f32.mxu1 %v2451_v50  ;;  %v2119_v50 = vld [vmem:[%s7511_s24 + $0x3980] sm:$0xff]  ;;  %v2158_v39 = vld [vmem:[%s7511_s24 + $0x3ab8] sm:$0xff] }
 0x400   : > { %5862 = vmatpush1.bf16.msra.mxu0 %v5861_v53  ;;  %v6903_v53 = vpack.c.bf16 %v2126_v47, %v2122_v45  ;;  %v2155_v45 = vld [vmem:[%s7511_s24 + $0x3aa0] sm:$0xff]  ;;  %v2153_v47 = vld [vmem:[%s7511_s24 + $0x3a90] sm:$0xff] }
 0x401   : > { %6886 = vmatpush1.bf16.msra.mxu1 %v6885_v55  ;;  %5864 = vmatprep.subr.bf16.mxu0 %v5863_v57  ;;  %v2125_v55 = vld [vmem:[%s7511_s24 + $0x39b0] sm:$0xff]  ;;  %v2128_v57 = vld [vmem:[%s7511_s24 + $0x39c8] sm:$0xff] }
 0x402   : > { %6888 = vmatprep.subr.bf16.mxu1 %v6887_v46  ;;  %v5881_v46 = vpack.c.bf16 %v2123_v51, %v2119_v50  ;;  %v6905_v61 = vpack.c.bf16 %v2125_v55, %v2121_v52  ;;  %v5883_v62 = vpack.c.bf16 %v2132_v58, %v2128_v57  ;;  %v2164_v50 = vld [vmem:[%s7511_s24 + $0x3ae8] sm:$0xff]  ;;  %v2162_v51 = vld [vmem:[%s7511_s24 + $0x3ad8] sm:$0xff]  ;;  %v2159_v58 = vld [vmem:[%s7511_s24 + $0x3ac0] sm:$0xff] }
 0x403   : > { %v2166_v52 = vld [vmem:[%s7511_s24 + $0x3af8] sm:$0xff] }
 0x404   : > { %5866 = vmatpush1.bf16.msra.mxu0 %v5865_v3  ;;  %v6907_v3 = vpack.c.bf16 %v2134_v60, %v2130_v59  ;;  %v2163_v59 = vld [vmem:[%s7511_s24 + $0x3ae0] sm:$0xff]  ;;  %v2161_v60 = vld [vmem:[%s7511_s24 + $0x3ad0] sm:$0xff] }
 0x405   : > { %6890 = vmatpush1.bf16.msra.mxu1 %v6889_v24  ;;  %5868 = vmatprep.subr.bf16.mxu0 %v5867_v4  ;;  %v2133_v24 = vld [vmem:[%s7511_s24 + $0x39f0] sm:$0xff]  ;;  %v2136_v4 = vld [vmem:[%s7511_s24 + $0x3a08] sm:$0xff] }
 0x406   : > { %6892 = vmatprep.subr.bf16.mxu1 %v6891_v9  ;;  %v5885_v9 = vpack.c.bf16 %v2131_v1, %v2127_v63  ;;  %v6909_v10 = vpack.c.bf16 %v2133_v24, %v2129_v2  ;;  %v5887_v12 = vpack.c.bf16 %v2140_v6, %v2136_v4  ;;  %v2172_v63 = vld [vmem:[%s7511_s24 + $0x3b28] sm:$0xff]  ;;  %v2170_v1 = vld [vmem:[%s7511_s24 + $0x3b18] sm:$0xff]  ;;  %v2167_v6 = vld [vmem:[%s7511_s24 + $0x3b00] sm:$0xff] }
 0x407   : > { %v2174_v2 = vld [vmem:[%s7511_s24 + $0x3b38] sm:$0xff] }
 0x408   : > { %5870 = vmatpush1.bf16.msra.mxu0 %v5869_v18  ;;  %v6911_v18 = vpack.c.bf16 %v2142_v8, %v2138_v7  ;;  %v2171_v7 = vld [vmem:[%s7511_s24 + $0x3b20] sm:$0xff]  ;;  %v2169_v8 = vld [vmem:[%s7511_s24 + $0x3b10] sm:$0xff] }
 0x409   : > { %6894 = vmatpush1.bf16.msra.mxu1 %v6893_v20  ;;  %5872 = vmatprep.subr.bf16.mxu0 %v5871_v21  ;;  %v2141_v20 = vld [vmem:[%s7511_s24 + $0x3a30] sm:$0xff]  ;;  %v2144_v21 = vld [vmem:[%s7511_s24 + $0x3a48] sm:$0xff] }
 0x40a   : > { %6896 = vmatprep.subr.bf16.mxu1 %v6895_v27  ;;  %v5889_v27 = vpack.c.bf16 %v2139_v16, %v2135_v15  ;;  %v6913_v28 = vpack.c.bf16 %v2141_v20, %v2137_v17  ;;  %v5891_v34 = vpack.c.bf16 %v2148_v22, %v2144_v21  ;;  %v2180_v15 = vld [vmem:[%s7511_s24 + $0x3b68] sm:$0xff]  ;;  %v2178_v16 = vld [vmem:[%s7511_s24 + $0x3b58] sm:$0xff]  ;;  %v2175_v22 = vld [vmem:[%s7511_s24 + $0x3b40] sm:$0xff] }
 0x40b   : > { %v2182_v17 = vld [vmem:[%s7511_s24 + $0x3b78] sm:$0xff] }
 0x40c   : > { %5874 = vmatpush1.bf16.msra.mxu0 %v5873_v32  ;;  %v6915_v32 = vpack.c.bf16 %v2150_v26, %v2146_v25  ;;  %v2179_v25 = vld [vmem:[%s7511_s24 + $0x3b60] sm:$0xff]  ;;  %v2177_v26 = vld [vmem:[%s7511_s24 + $0x3b50] sm:$0xff] }
 0x40d   : > { %6898 = vmatpush1.bf16.msra.mxu1 %v6897_v33  ;;  %5876 = vmatprep.subr.bf16.mxu0 %v5875_v36  ;;  %v2149_v33 = vld [vmem:[%s7511_s24 + $0x3a70] sm:$0xff]  ;;  %v2152_v36 = vld [vmem:[%s7511_s24 + $0x3a88] sm:$0xff] }
 0x40e   : > { %6900 = vmatprep.subr.bf16.mxu1 %v6899_v41  ;;  %v5893_v41 = vpack.c.bf16 %v2147_v30, %v2143_v29  ;;  %v6917_v42 = vpack.c.bf16 %v2149_v33, %v2145_v31  ;;  %v5895_v43 = vpack.c.bf16 %v2156_v37, %v2152_v36  ;;  %v2188_v29 = vld [vmem:[%s7511_s24 + $0x3ba8] sm:$0xff]  ;;  %v2186_v30 = vld [vmem:[%s7511_s24 + $0x3b98] sm:$0xff]  ;;  %v2183_v37 = vld [vmem:[%s7511_s24 + $0x3b80] sm:$0xff] }
 0x40f   : > { %v2190_v31 = vld [vmem:[%s7511_s24 + $0x3bb8] sm:$0xff] }
 0x410   : > { %5878 = vmatpush1.bf16.msra.mxu0 %v5877_v48  ;;  %v6919_v48 = vpack.c.bf16 %v2158_v39, %v2154_v38  ;;  %v2187_v38 = vld [vmem:[%s7511_s24 + $0x3ba0] sm:$0xff]  ;;  %v2185_v39 = vld [vmem:[%s7511_s24 + $0x3b90] sm:$0xff] }
 0x411   : > { %6902 = vmatpush1.bf16.msra.mxu1 %v6901_v54  ;;  %5880 = vmatprep.subr.bf16.mxu0 %v5879_v49  ;;  %v2157_v54 = vld [vmem:[%s7511_s24 + $0x3ab0] sm:$0xff]  ;;  %v2160_v49 = vld [vmem:[%s7511_s24 + $0x3ac8] sm:$0xff] }
 0x412   : > { %6904 = vmatprep.subr.bf16.mxu1 %v6903_v53  ;;  %v5897_v53 = vpack.c.bf16 %v2155_v45, %v2151_v44  ;;  %v6921_v55 = vpack.c.bf16 %v2157_v54, %v2153_v47  ;;  %v5899_v57 = vpack.c.bf16 %v2164_v50, %v2160_v49  ;;  %v2196_v44 = vld [vmem:[%s7511_s24 + $0x3be8] sm:$0xff]  ;;  %v2194_v45 = vld [vmem:[%s7511_s24 + $0x3bd8] sm:$0xff]  ;;  %v2191_v50 = vld [vmem:[%s7511_s24 + $0x3bc0] sm:$0xff] }
 0x413   : > { %v2198_v47 = vld [vmem:[%s7511_s24 + $0x3bf8] sm:$0xff] }
 0x414   : > { %5882 = vmatpush1.bf16.msra.mxu0 %v5881_v46  ;;  %v6923_v46 = vpack.c.bf16 %v2166_v52, %v2162_v51  ;;  %v2195_v51 = vld [vmem:[%s7511_s24 + $0x3be0] sm:$0xff]  ;;  %v2193_v52 = vld [vmem:[%s7511_s24 + $0x3bd0] sm:$0xff] }
 0x415   : > { %6906 = vmatpush1.bf16.msra.mxu1 %v6905_v61  ;;  %5884 = vmatprep.subr.bf16.mxu0 %v5883_v62  ;;  %v2165_v61 = vld [vmem:[%s7511_s24 + $0x3af0] sm:$0xff]  ;;  %v2168_v62 = vld [vmem:[%s7511_s24 + $0x3b08] sm:$0xff] }
 0x416   : > { %6908 = vmatprep.subr.bf16.mxu1 %v6907_v3  ;;  %v5901_v3 = vpack.c.bf16 %v2163_v59, %v2159_v58  ;;  %v6925_v24 = vpack.c.bf16 %v2165_v61, %v2161_v60  ;;  %v5903_v4 = vpack.c.bf16 %v2172_v63, %v2168_v62  ;;  %v2204_v58 = vld [vmem:[%s7511_s24 + $0x3c28] sm:$0xff]  ;;  %v2202_v59 = vld [vmem:[%s7511_s24 + $0x3c18] sm:$0xff]  ;;  %v2199_v63 = vld [vmem:[%s7511_s24 + $0x3c00] sm:$0xff] }
 0x417   : > { %v2206_v60 = vld [vmem:[%s7511_s24 + $0x3c38] sm:$0xff] }
 0x418   : > { %5886 = vmatpush1.bf16.msra.mxu0 %v5885_v9  ;;  %v6927_v9 = vpack.c.bf16 %v2174_v2, %v2170_v1  ;;  %v2203_v1 = vld [vmem:[%s7511_s24 + $0x3c20] sm:$0xff]  ;;  %v2201_v2 = vld [vmem:[%s7511_s24 + $0x3c10] sm:$0xff] }
 0x419   : > { %6910 = vmatpush1.bf16.msra.mxu1 %v6909_v10  ;;  %5888 = vmatprep.subr.bf16.mxu0 %v5887_v12  ;;  %v2173_v10 = vld [vmem:[%s7511_s24 + $0x3b30] sm:$0xff]  ;;  %v2176_v12 = vld [vmem:[%s7511_s24 + $0x3b48] sm:$0xff] }
 0x41a   : > { %6912 = vmatprep.subr.bf16.mxu1 %v6911_v18  ;;  %v5905_v18 = vpack.c.bf16 %v2171_v7, %v2167_v6  ;;  %v6929_v20 = vpack.c.bf16 %v2173_v10, %v2169_v8  ;;  %v5907_v21 = vpack.c.bf16 %v2180_v15, %v2176_v12  ;;  %v2212_v6 = vld [vmem:[%s7511_s24 + $0x3c68] sm:$0xff]  ;;  %v2447_v7 = vrot.slane %v9154_v14, %v7939_v0  ;;  %v2210_v8 = vld [vmem:[%s7511_s24 + $0x3c58] sm:$0xff] }
 0x41b   : > { %v5921_v10 = vpack.c.bf16 %v2203_v1, %v2199_v63  ;;  %v2216_v0 = vld [vmem:[%s7511_s24 + $0x3c88] sm:$0xff]  ;;  %v2242_v1 = vld [vmem:[%s7511_s24 + $0x3d58] sm:$0xff] }
 0x41c   : > { %5890 = vmatpush1.bf16.msra.mxu0 %v5889_v27  ;;  %v6931_v27 = vpack.c.bf16 %v2182_v17, %v2178_v16  ;;  %v2207_v16 = vld [vmem:[%s7511_s24 + $0x3c40] sm:$0xff]  ;;  %v2244_v63 = vld [vmem:[%s7511_s24 + $0x3d68] sm:$0xff] }
 0x41d   : > { %6914 = vmatpush1.bf16.msra.mxu1 %v6913_v28  ;;  %5892 = vmatprep.subr.bf16.mxu0 %v5891_v34  ;;  %v2181_v28 = vld [vmem:[%s7511_s24 + $0x3b70] sm:$0xff]  ;;  %v2184_v34 = vld [vmem:[%s7511_s24 + $0x3b88] sm:$0xff]  ;;  %v2211_v17 = vld [vmem:[%s7511_s24 + $0x3c60] sm:$0xff] }
 0x41e   : > { %6916 = vmatprep.subr.bf16.mxu1 %v6915_v32  ;;  %v5909_v32 = vpack.c.bf16 %v2179_v25, %v2175_v22  ;;  %v6933_v33 = vpack.c.bf16 %v2181_v28, %v2177_v26  ;;  %v5911_v36 = vpack.c.bf16 %v2188_v29, %v2184_v34  ;;  %v2220_v22 = vld [vmem:[%s7511_s24 + $0x3ca8] sm:$0xff]  ;;  %v2459_v25 = vrot.slane %v9154_v14, %v7948_v13  ;;  %v2218_v26 = vld [vmem:[%s7511_s24 + $0x3c98] sm:$0xff] }
 0x41f   : > { %v5925_v28 = vpack.c.bf16 %v2211_v17, %v2207_v16  ;;  %v5927_v29 = vpack.c.bf16 %v2220_v22, %v2216_v0  ;;  %v2250_v16 = vld [vmem:[%s7511_s24 + $0x3d98] sm:$0xff]  ;;  %v2247_v0 = vld [vmem:[%s7511_s24 + $0x3d80] sm:$0xff] }
 0x420   : > { %5894 = vmatpush1.bf16.msra.mxu0 %v5893_v41  ;;  %v6935_v41 = vpack.c.bf16 %v2190_v31, %v2186_v30  ;;  %v2215_v30 = vld [vmem:[%s7511_s24 + $0x3c80] sm:$0xff]  ;;  %v2254_v17 = vld [vmem:[%s7511_s24 + $0x3db8] sm:$0xff] }
 0x421   : > { %6918 = vmatpush1.bf16.msra.mxu1 %v6917_v42  ;;  %5896 = vmatprep.subr.bf16.mxu0 %v5895_v43  ;;  %v2189_v42 = vld [vmem:[%s7511_s24 + $0x3bb0] sm:$0xff]  ;;  %v2192_v43 = vld [vmem:[%s7511_s24 + $0x3bc8] sm:$0xff]  ;;  %v2219_v31 = vld [vmem:[%s7511_s24 + $0x3ca0] sm:$0xff] }
 0x422   : > { %6920 = vmatprep.subr.bf16.mxu1 %v6919_v48  ;;  %v5913_v48 = vpack.c.bf16 %v2187_v38, %v2183_v37  ;;  %v6937_v54 = vpack.c.bf16 %v2189_v42, %v2185_v39  ;;  %v5915_v49 = vpack.c.bf16 %v2196_v44, %v2192_v43  ;;  %v2228_v37 = vld [vmem:[%s7511_s24 + $0x3ce8] sm:$0xff]  ;;  %v2226_v38 = vld [vmem:[%s7511_s24 + $0x3cd8] sm:$0xff]  ;;  %v2223_v44 = vld [vmem:[%s7511_s24 + $0x3cc0] sm:$0xff] }
 0x423   : > { %v2230_v39 = vld [vmem:[%s7511_s24 + $0x3cf8] sm:$0xff]  ;;  %v2251_v22 = vld [vmem:[%s7511_s24 + $0x3da0] sm:$0xff] }
 0x424   : > { %5898 = vmatpush1.bf16.msra.mxu0 %v5897_v53  ;;  %v6939_v53 = vpack.c.bf16 %v2198_v47, %v2194_v45  ;;  %v2227_v45 = vld [vmem:[%s7511_s24 + $0x3ce0] sm:$0xff]  ;;  %v2225_v47 = vld [vmem:[%s7511_s24 + $0x3cd0] sm:$0xff] }
 0x425   : > { %6922 = vmatpush1.bf16.msra.mxu1 %v6921_v55  ;;  %5900 = vmatprep.subr.bf16.mxu0 %v5899_v57  ;;  %v2197_v55 = vld [vmem:[%s7511_s24 + $0x3bf0] sm:$0xff]  ;;  %v2200_v57 = vld [vmem:[%s7511_s24 + $0x3c08] sm:$0xff] }
 0x426   : > { %6924 = vmatprep.subr.bf16.mxu1 %v6923_v46  ;;  %v5917_v46 = vpack.c.bf16 %v2195_v51, %v2191_v50  ;;  %v6941_v61 = vpack.c.bf16 %v2197_v55, %v2193_v52  ;;  %v5919_v62 = vpack.c.bf16 %v2204_v58, %v2200_v57  ;;  %v2236_v50 = vld [vmem:[%s7511_s24 + $0x3d28] sm:$0xff]  ;;  %v2234_v51 = vld [vmem:[%s7511_s24 + $0x3d18] sm:$0xff]  ;;  %v2231_v58 = vld [vmem:[%s7511_s24 + $0x3d00] sm:$0xff] }
 0x427   : > { %v2238_v52 = vld [vmem:[%s7511_s24 + $0x3d38] sm:$0xff] }
 0x428   : > { %5902 = vmatpush1.bf16.msra.mxu0 %v5901_v3  ;;  %v6943_v3 = vpack.c.bf16 %v2206_v60, %v2202_v59  ;;  %v2235_v59 = vld [vmem:[%s7511_s24 + $0x3d20] sm:$0xff]  ;;  %v2233_v60 = vld [vmem:[%s7511_s24 + $0x3d10] sm:$0xff] }
 0x429   : > { %6926 = vmatpush1.bf16.msra.mxu1 %v6925_v24  ;;  %5904 = vmatprep.subr.bf16.mxu0 %v5903_v4  ;;  %v2205_v24 = vld [vmem:[%s7511_s24 + $0x3c30] sm:$0xff]  ;;  %v2208_v4 = vld [vmem:[%s7511_s24 + $0x3c48] sm:$0xff] }
 0x42a   : > { %6928 = vmatprep.subr.bf16.mxu1 %v6927_v9  ;;  %v2214_v9 = vld [vmem:[%s7511_s24 + $0x3c78] sm:$0xff]  ;;  %v6945_v12 = vpack.c.bf16 %v2205_v24, %v2201_v2  ;;  %v5923_v15 = vpack.c.bf16 %v2212_v6, %v2208_v4  ;;  %v2239_v6 = vld [vmem:[%s7511_s24 + $0x3d40] sm:$0xff] }
 0x42b   : > { %v2246_v2 = vld [vmem:[%s7511_s24 + $0x3d78] sm:$0xff] }
 0x42c   : > { %5906 = vmatpush1.bf16.msra.mxu0 %v5905_v18  ;;  %v2209_v18 = vld [vmem:[%s7511_s24 + $0x3c50] sm:$0xff] }
 0x42d   : > { %6930 = vmatpush1.bf16.msra.mxu1 %v6929_v20  ;;  %5908 = vmatprep.subr.bf16.mxu0 %v5907_v21  ;;  %v6947_v20 = vpack.c.bf16 %v2214_v9, %v2210_v8  ;;  %v2213_v21 = vld [vmem:[%s7511_s24 + $0x3c70] sm:$0xff]  ;;  %v6963_v9 = vpack.c.bf16 %v2246_v2, %v2242_v1 }
 0x42e   : > { %6932 = vmatprep.subr.bf16.mxu1 %v6931_v27  ;;  %v2222_v27 = vld [vmem:[%s7511_s24 + $0x3cb8] sm:$0xff]  ;;  %v6949_v34 = vpack.c.bf16 %v2213_v21, %v2209_v18  ;;  %v2241_v8 = vld [vmem:[%s7511_s24 + $0x3d50] sm:$0xff] }
 0x42f   : > { %v6951_v13 = vpack.c.bf16 %v2222_v27, %v2218_v26  ;;  %v6967_v26 = vpack.c.bf16 %v2254_v17, %v2250_v16  ;;  %v2253_v27 = vld [vmem:[%s7511_s24 + $0x3db0] sm:$0xff] }
 0x430   : > { %5910 = vmatpush1.bf16.msra.mxu0 %v5909_v32  ;;  %v2217_v32 = vld [vmem:[%s7511_s24 + $0x3c90] sm:$0xff] }
 0x431   : > { %6934 = vmatpush1.bf16.msra.mxu1 %v6933_v33  ;;  %5912 = vmatprep.subr.bf16.mxu0 %v5911_v36  ;;  %v2221_v33 = vld [vmem:[%s7511_s24 + $0x3cb0] sm:$0xff]  ;;  %v2224_v36 = vld [vmem:[%s7511_s24 + $0x3cc8] sm:$0xff] }
 0x432   : > { %6936 = vmatprep.subr.bf16.mxu1 %v6935_v41  ;;  %v5929_v41 = vpack.c.bf16 %v2219_v31, %v2215_v30  ;;  %v6953_v42 = vpack.c.bf16 %v2221_v33, %v2217_v32  ;;  %v5931_v43 = vpack.c.bf16 %v2228_v37, %v2224_v36  ;;  %v2262_v30 = vld [vmem:[%s7511_s24 + $0x3df8] sm:$0xff]  ;;  %v5945_v31 = vpack.c.bf16 %v2251_v22, %v2247_v0  ;;  %v2255_v33 = vld [vmem:[%s7511_s24 + $0x3dc0] sm:$0xff]  ;;  %v2257_v37 = vld [vmem:[%s7511_s24 + $0x3dd0] sm:$0xff] }
 0x433   : > { %v2259_v36 = vld [vmem:[%s7511_s24 + $0x3de0] sm:$0xff]  ;;  %v2277_v2 = vld [vmem:[%s7511_s24 + $0x3e70] sm:$0xff]  ;;  %v2294_v0 = vld [vmem:[%s7511_s24 + $0x3ef8] sm:$0xff] }
 0x434   : > { %5914 = vmatpush1.bf16.msra.mxu0 %v5913_v48  ;;  %v6955_v48 = vpack.c.bf16 %v2230_v39, %v2226_v38  ;;  %v2261_v39 = vld [vmem:[%s7511_s24 + $0x3df0] sm:$0xff] }
 0x435   : > { %6938 = vmatpush1.bf16.msra.mxu1 %v6937_v54  ;;  %5916 = vmatprep.subr.bf16.mxu0 %v5915_v49  ;;  %v2229_v54 = vld [vmem:[%s7511_s24 + $0x3cf0] sm:$0xff]  ;;  %v2232_v49 = vld [vmem:[%s7511_s24 + $0x3d08] sm:$0xff] }
 0x436   : > { %6940 = vmatprep.subr.bf16.mxu1 %v6939_v53  ;;  %v5933_v53 = vpack.c.bf16 %v2227_v45, %v2223_v44  ;;  %v6957_v55 = vpack.c.bf16 %v2229_v54, %v2225_v47  ;;  %v5935_v57 = vpack.c.bf16 %v2236_v50, %v2232_v49  ;;  %v2270_v44 = vld [vmem:[%s7511_s24 + $0x3e38] sm:$0xff]  ;;  %v5949_v45 = vpack.c.bf16 %v2259_v36, %v2255_v33  ;;  %v2263_v54 = vld [vmem:[%s7511_s24 + $0x3e00] sm:$0xff]  ;;  %v2265_v50 = vld [vmem:[%s7511_s24 + $0x3e10] sm:$0xff] }
 0x437   : > { %v6973_v47 = vpack.c.bf16 %v2261_v39, %v2257_v37  ;;  %v2267_v49 = vld [vmem:[%s7511_s24 + $0x3e20] sm:$0xff]  ;;  %v2285_v17 = vld [vmem:[%s7511_s24 + $0x3eb0] sm:$0xff]  ;;  %v2302_v33 = vld [vmem:[%s7511_s24 + $0x3f38] sm:$0xff] }
 0x438   : > { %5918 = vmatpush1.bf16.msra.mxu0 %v5917_v46  ;;  %v6959_v46 = vpack.c.bf16 %v2238_v52, %v2234_v51  ;;  %v2269_v52 = vld [vmem:[%s7511_s24 + $0x3e30] sm:$0xff]  ;;  %v2295_v39 = vld [vmem:[%s7511_s24 + $0x3f00] sm:$0xff] }
 0x439   : > { %6942 = vmatpush1.bf16.msra.mxu1 %v6941_v61  ;;  %5920 = vmatprep.subr.bf16.mxu0 %v5919_v62  ;;  %v2237_v61 = vld [vmem:[%s7511_s24 + $0x3d30] sm:$0xff]  ;;  %v2240_v62 = vld [vmem:[%s7511_s24 + $0x3d48] sm:$0xff] }
 0x43a   : > { %6944 = vmatprep.subr.bf16.mxu1 %v6943_v3  ;;  %v5937_v3 = vpack.c.bf16 %v2235_v59, %v2231_v58  ;;  %v6961_v24 = vpack.c.bf16 %v2237_v61, %v2233_v60  ;;  %v5939_v4 = vpack.c.bf16 %v2244_v63, %v2240_v62  ;;  %v2278_v58 = vld [vmem:[%s7511_s24 + $0x3e78] sm:$0xff]  ;;  %v5953_v59 = vpack.c.bf16 %v2267_v49, %v2263_v54  ;;  %v2271_v61 = vld [vmem:[%s7511_s24 + $0x3e40] sm:$0xff]  ;;  %v2273_v63 = vld [vmem:[%s7511_s24 + $0x3e50] sm:$0xff] }
 0x43b   : > { %3572 = vmatmul.mubr.f32.vlgmr.msra.gmra.mrb[0].mxu0 %v2447_v7  ;;  %v6977_v60 = vpack.c.bf16 %v2269_v52, %v2265_v50  ;;  %v2275_v62 = vld [vmem:[%s7511_s24 + $0x3e60] sm:$0xff]  ;;  %v2310_v54 = vld [vmem:[%s7511_s24 + $0x3f78] sm:$0xff] }
 0x43c   : > { %5922 = vmatpush1.bf16.msra.mxu0 %v5921_v10  ;;  %4708 = vmatmul.mubr.f32.vlgmr.msra.gmra.mrb[0].mxu1 %v2447_v7  ;;  %v2243_v7 = vld [vmem:[%s7511_s24 + $0x3d60] sm:$0xff]  ;;  %v2245_v10 = vld [vmem:[%s7511_s24 + $0x3d70] sm:$0xff] }
 0x43d   : > { %6946 = vmatpush1.bf16.msra.mxu1 %v6945_v12  ;;  %5924 = vmatprep.subr.bf16.mxu0 %v5923_v15  ;;  %v2248_v12 = vld [vmem:[%s7511_s24 + $0x3d88] sm:$0xff]  ;;  %v5941_v18 = vpack.c.bf16 %v2243_v7, %v2239_v6  ;;  %v2286_v6 = vld [vmem:[%s7511_s24 + $0x3eb8] sm:$0xff]  ;;  %v5957_v7 = vpack.c.bf16 %v2275_v62, %v2271_v61  ;;  %v2303_v52 = vld [vmem:[%s7511_s24 + $0x3f40] sm:$0xff] }
 0x43e   : > { %6948 = vmatprep.subr.bf16.mxu1 %v6947_v20  ;;  %3642 = vmatprep.mubr.f32.mxu0 %v2459_v25  ;;  %v2252_v15 = vld [vmem:[%s7511_s24 + $0x3da8] sm:$0xff]  ;;  %v6965_v20 = vpack.c.bf16 %v2245_v10, %v2241_v8  ;;  %v6981_v8 = vpack.c.bf16 %v2277_v2, %v2273_v63  ;;  %v2279_v10 = vld [vmem:[%s7511_s24 + $0x3e80] sm:$0xff]  ;;  %v2318_v61 = vld [vmem:[%s7511_s24 + $0x3fb8] sm:$0xff] }
 0x43f   : > { %4778 = vmatprep.mubr.f32.mxu1 %v2459_v25  ;;  %v5943_v21 = vpack.c.bf16 %v2252_v15, %v2248_v12  ;;  %v2249_v25 = vld [vmem:[%s7511_s24 + $0x3d90] sm:$0xff]  ;;  %v2283_v12 = vld [vmem:[%s7511_s24 + $0x3ea0] sm:$0xff] }
 0x440   : > { %5926 = vmatpush1.bf16.msra.mxu0 %v5925_v28  ;;  %v2256_v28 = vld [vmem:[%s7511_s24 + $0x3dc8] sm:$0xff]  ;;  %v6969_v32 = vpack.c.bf16 %v2253_v27, %v2249_v25  ;;  %v2281_v15 = vld [vmem:[%s7511_s24 + $0x3e90] sm:$0xff]  ;;  %v5961_v22 = vpack.c.bf16 %v2283_v12, %v2279_v10  ;;  %v2287_v27 = vld [vmem:[%s7511_s24 + $0x3ec0] sm:$0xff] }
 0x441   : > { %6950 = vmatpush1.bf16.msra.mxu1 %v6949_v34  ;;  %5928 = vmatprep.subr.bf16.mxu0 %v5927_v29  ;;  %v2260_v34 = vld [vmem:[%s7511_s24 + $0x3de8] sm:$0xff]  ;;  %v2258_v29 = vld [vmem:[%s7511_s24 + $0x3dd8] sm:$0xff]  ;;  %v6985_v25 = vpack.c.bf16 %v2285_v17, %v2281_v15  ;;  %v2311_v2 = vld [vmem:[%s7511_s24 + $0x3f80] sm:$0xff] }
 0x442   : > { %6952 = vmatprep.subr.bf16.mxu1 %v6951_v13  ;;  %v5947_v13 = vpack.c.bf16 %v2260_v34, %v2256_v28  ;;  %v6971_v38 = vpack.c.bf16 %v2262_v30, %v2258_v29  ;;  %v2291_v28 = vld [vmem:[%s7511_s24 + $0x3ee0] sm:$0xff]  ;;  %v2289_v34 = vld [vmem:[%s7511_s24 + $0x3ed0] sm:$0xff]  ;;  %v2326_v10 = vld [vmem:[%s7511_s24 + $0x3ff8] sm:$0xff] }
 0x443   : > { %v2293_v30 = vld [vmem:[%s7511_s24 + $0x3ef0] sm:$0xff]  ;;  %v5965_v36 = vpack.c.bf16 %v2291_v28, %v2287_v27  ;;  %v2319_v17 = vld [vmem:[%s7511_s24 + $0x3fc0] sm:$0xff]  ;;  %v7303_v28 = vmov 1966171168  }
 0x444   : > { %5930 = vmatpush1.bf16.msra.mxu0 %v5929_v41  ;;  %v2264_v41 = vld [vmem:[%s7511_s24 + $0x3e08] sm:$0xff]  ;;  %v6989_v37 = vpack.c.bf16 %v2293_v30, %v2289_v34  ;;  %v2327_v27 = vld [vmem:[%s234_s11] sm:$0xf]  ;;  %v4792_v34 = vunpack.c.l.s4 %v7303_v28 }
 0x445   : > { %6954 = vmatpush1.bf16.msra.mxu1 %v6953_v42  ;;  %5932 = vmatprep.subr.bf16.mxu0 %v5931_v43  ;;  %v2268_v42 = vld [vmem:[%s7511_s24 + $0x3e28] sm:$0xff]  ;;  %v2266_v43 = vld [vmem:[%s7511_s24 + $0x3e18] sm:$0xff]  ;;  %v2504_v30 = vrot.slane %v2327_v27, %v7801_v35 }
 0x446   : > { %6956 = vmatprep.subr.bf16.mxu1 %v6955_v48  ;;  %v5951_v48 = vpack.c.bf16 %v2268_v42, %v2264_v41  ;;  %v6975_v51 = vpack.c.bf16 %v2270_v44, %v2266_v43  ;;  %v2299_v41 = vld [vmem:[%s7511_s24 + $0x3f20] sm:$0xff]  ;;  %v2297_v42 = vld [vmem:[%s7511_s24 + $0x3f10] sm:$0xff] }
 0x447   : > { %v2301_v44 = vld [vmem:[%s7511_s24 + $0x3f30] sm:$0xff]  ;;  %v5969_v49 = vpack.c.bf16 %v2299_v41, %v2295_v39 }
 0x448   : > { %5934 = vmatpush1.bf16.msra.mxu0 %v5933_v53  ;;  %v2272_v53 = vld [vmem:[%s7511_s24 + $0x3e48] sm:$0xff]  ;;  %v6993_v50 = vpack.c.bf16 %v2301_v44, %v2297_v42 }
 0x449   : > { %6958 = vmatpush1.bf16.msra.mxu1 %v6957_v55  ;;  %5936 = vmatprep.subr.bf16.mxu0 %v5935_v57  ;;  %v2276_v55 = vld [vmem:[%s7511_s24 + $0x3e68] sm:$0xff]  ;;  %v2274_v57 = vld [vmem:[%s7511_s24 + $0x3e58] sm:$0xff] }
 0x44a   : > { %6960 = vmatprep.subr.bf16.mxu1 %v6959_v46  ;;  %v5955_v46 = vpack.c.bf16 %v2276_v55, %v2272_v53  ;;  %v6979_v1 = vpack.c.bf16 %v2278_v58, %v2274_v57  ;;  %v2307_v53 = vld [vmem:[%s7511_s24 + $0x3f60] sm:$0xff]  ;;  %v2305_v55 = vld [vmem:[%s7511_s24 + $0x3f50] sm:$0xff] }
 0x44b   : > { %v2309_v58 = vld [vmem:[%s7511_s24 + $0x3f70] sm:$0xff]  ;;  %v5973_v62 = vpack.c.bf16 %v2307_v53, %v2303_v52 }
 0x44c   : > { %5938 = vmatpush1.bf16.msra.mxu0 %v5937_v3  ;;  %v2280_v3 = vld [vmem:[%s7511_s24 + $0x3e88] sm:$0xff]  ;;  %v6997_v63 = vpack.c.bf16 %v2309_v58, %v2305_v55 }
 0x44d   : > { %6962 = vmatpush1.bf16.msra.mxu1 %v6961_v24  ;;  %5940 = vmatprep.subr.bf16.mxu0 %v5939_v4  ;;  %v2284_v24 = vld [vmem:[%s7511_s24 + $0x3ea8] sm:$0xff]  ;;  %v2282_v4 = vld [vmem:[%s7511_s24 + $0x3e98] sm:$0xff] }
 0x44e   : > { %6964 = vmatprep.subr.bf16.mxu1 %v6963_v9  ;;  %v5959_v9 = vpack.c.bf16 %v2284_v24, %v2280_v3  ;;  %v6983_v16 = vpack.c.bf16 %v2286_v6, %v2282_v4  ;;  %v2315_v3 = vld [vmem:[%s7511_s24 + $0x3fa0] sm:$0xff]  ;;  %v2313_v24 = vld [vmem:[%s7511_s24 + $0x3f90] sm:$0xff] }
 0x44f   : > { %v2317_v6 = vld [vmem:[%s7511_s24 + $0x3fb0] sm:$0xff]  ;;  %v5977_v12 = vpack.c.bf16 %v2315_v3, %v2311_v2 }
 0x450   : > { %5942 = vmatpush1.bf16.msra.mxu0 %v5941_v18  ;;  %v2288_v18 = vld [vmem:[%s7511_s24 + $0x3ec8] sm:$0xff]  ;;  %v7001_v15 = vpack.c.bf16 %v2317_v6, %v2313_v24 }
 0x451   : > { %6966 = vmatpush1.bf16.msra.mxu1 %v6965_v20  ;;  %5944 = vmatprep.subr.bf16.mxu0 %v5943_v21  ;;  %v2292_v20 = vld [vmem:[%s7511_s24 + $0x3ee8] sm:$0xff]  ;;  %v2290_v21 = vld [vmem:[%s7511_s24 + $0x3ed8] sm:$0xff] }
 0x452   : > { %6968 = vmatprep.subr.bf16.mxu1 %v6967_v26  ;;  %v5963_v26 = vpack.c.bf16 %v2292_v20, %v2288_v18  ;;  %v6987_v29 = vpack.c.bf16 %v2294_v0, %v2290_v21  ;;  %v2323_v18 = vld [vmem:[%s7511_s24 + $0x3fe0] sm:$0xff]  ;;  %v2321_v21 = vld [vmem:[%s7511_s24 + $0x3fd0] sm:$0xff] }
 0x453   : > { %v2325_v0 = vld [vmem:[%s7511_s24 + $0x3ff0] sm:$0xff] }
 0x454   : > { %5946 = vmatpush1.bf16.msra.mxu0 %v5945_v31  ;;  %v2296_v31 = vld [vmem:[%s7511_s24 + $0x3f08] sm:$0xff] }
 0x455   : > { %6970 = vmatpush1.bf16.msra.mxu1 %v6969_v32  ;;  %5948 = vmatprep.subr.bf16.mxu0 %v5947_v13  ;;  %v2300_v32 = vld [vmem:[%s7511_s24 + $0x3f28] sm:$0xff]  ;;  %v2298_v13 = vld [vmem:[%s7511_s24 + $0x3f18] sm:$0xff] }
 0x456   : > { %6972 = vmatprep.subr.bf16.mxu1 %v6971_v38  ;;  %v5967_v38 = vpack.c.bf16 %v2300_v32, %v2296_v31  ;;  %v6991_v43 = vpack.c.bf16 %v2302_v33, %v2298_v13  ;;  %v2500_v31 = vrot.slane %v2327_v27, %v7619_v19  ;;  %v4793_v32 = vunpack.c.0.s8 %v4792_v34 }
 0x457   : > { %v2508_v13 = vrot.slane %v2327_v27, %v7672_v23 }
 0x458   : > { %5950 = vmatpush1.bf16.msra.mxu0 %v5949_v45  ;;  %v2304_v45 = vld [vmem:[%s7511_s24 + $0x3f48] sm:$0xff]  ;;  %v4796_v39 = vsub.s32 %v4793_v32, %v7608_v5 }
 0x459   : > { %6974 = vmatpush1.bf16.msra.mxu1 %v6973_v47  ;;  %5952 = vmatprep.subr.bf16.mxu0 %v5951_v48  ;;  %v2308_v47 = vld [vmem:[%s7511_s24 + $0x3f68] sm:$0xff]  ;;  %v2306_v48 = vld [vmem:[%s7511_s24 + $0x3f58] sm:$0xff] }
 0x45a   : > { %6976 = vmatprep.subr.bf16.mxu1 %v6975_v51  ;;  %v5971_v51 = vpack.c.bf16 %v2308_v47, %v2304_v45  ;;  %v6995_v57 = vpack.c.bf16 %v2310_v54, %v2306_v48 }
 0x45c   : > { %5954 = vmatpush1.bf16.msra.mxu0 %v5953_v59  ;;  %v2312_v59 = vld [vmem:[%s7511_s24 + $0x3f88] sm:$0xff] }
 0x45d   : > { %6978 = vmatpush1.bf16.msra.mxu1 %v6977_v60  ;;  %5956 = vmatprep.subr.bf16.mxu0 %v5955_v46  ;;  %v2316_v60 = vld [vmem:[%s7511_s24 + $0x3fa8] sm:$0xff]  ;;  %v2314_v46 = vld [vmem:[%s7511_s24 + $0x3f98] sm:$0xff] }
 0x45e   : > { %6980 = vmatprep.subr.bf16.mxu1 %v6979_v1  ;;  %v5975_v1 = vpack.c.bf16 %v2316_v60, %v2312_v59  ;;  %v6999_v4 = vpack.c.bf16 %v2318_v61, %v2314_v46 }
 0x460   : > { %5958 = vmatpush1.bf16.msra.mxu0 %v5957_v7  ;;  %v2320_v7 = vld [vmem:[%s7511_s24 + $0x3fc8] sm:$0xff] }
 0x461   : > { %6982 = vmatpush1.bf16.msra.mxu1 %v6981_v8  ;;  %5960 = vmatprep.subr.bf16.mxu0 %v5959_v9  ;;  %v2324_v8 = vld [vmem:[%s7511_s24 + $0x3fe8] sm:$0xff]  ;;  %v2322_v9 = vld [vmem:[%s7511_s24 + $0x3fd8] sm:$0xff]  ;;  %s4820_s24 = scalar_lea.sflag [#allocation4], %s7508_s25 }
 0x462   : > { %6984 = vmatprep.subr.bf16.mxu1 %v6983_v16  ;;  %v5979_v16 = vpack.c.bf16 %v2324_v8, %v2320_v7  ;;  %v7003_v20 = vpack.c.bf16 %v2326_v10, %v2322_v9 }
 0x464   : > { %5962 = vmatpush1.bf16.msra.mxu0 %v5961_v22  ;;  %v5981_v22 = vpack.c.bf16 %v2323_v18, %v2319_v17 }
 0x465   : > { %6986 = vmatpush1.bf16.msra.mxu1 %v6985_v25  ;;  %5964 = vmatprep.subr.bf16.mxu0 %v5963_v26  ;;  %v7005_v25 = vpack.c.bf16 %v2325_v0, %v2321_v21  ;;  %v2455_v26 = vrot.slane %v9154_v14, %v8077_v40 }
 0x466   : > { %6988 = vmatprep.subr.bf16.mxu1 %v6987_v29  ;;  %v2496_v29 = vrot.slane %v2327_v27, %v7663_v11 }
 0x468   : > { %5966 = vmatpush1.bf16.msra.mxu0 %v5965_v36 }
 0x469   : > { %6990 = vmatpush1.bf16.msra.mxu1 %v6989_v37  ;;  %5968 = vmatprep.subr.bf16.mxu0 %v5967_v38 }
 0x46a   : > { %6992 = vmatprep.subr.bf16.mxu1 %v6991_v43 }
 0x46c   : > { %5970 = vmatpush1.bf16.msra.mxu0 %v5969_v49 }
 0x46d   : > { %6994 = vmatpush1.bf16.msra.mxu1 %v6993_v50  ;;  %5972 = vmatprep.subr.bf16.mxu0 %v5971_v51 }
 0x46e   : > { %6996 = vmatprep.subr.bf16.mxu1 %v6995_v57 }
 0x470   : > { %5974 = vmatpush1.bf16.msra.mxu0 %v5973_v62 }
 0x471   : > { %6998 = vmatpush1.bf16.msra.mxu1 %v6997_v63  ;;  %5976 = vmatprep.subr.bf16.mxu0 %v5975_v1 }
 0x472   : > { %7000 = vmatprep.subr.bf16.mxu1 %v6999_v4 }
 0x474   : > { %5978 = vmatpush1.bf16.msra.mxu0 %v5977_v12 }
 0x475   : > { %7002 = vmatpush1.bf16.msra.mxu1 %v7001_v15  ;;  %5980 = vmatprep.subr.bf16.mxu0 %v5979_v16 }
 0x476   : > { %7004 = vmatprep.subr.bf16.mxu1 %v7003_v20 }
 0x478   : > { %5982 = vmatpush1.bf16.msra.mxu0 %v5981_v22 }
 0x479   : > { %7006 = vmatpush1.bf16.msra.mxu1 %v7005_v25 }
 0x47b   : > { %3643 = vmatmul.mubr.f32.vlgmr.msra.gmra.mrb[0].mxu0 %v2455_v26 }
 0x47c   : > { %4779 = vmatmul.mubr.f32.vlgmr.msra.gmra.mrb[0].mxu1 %v2455_v26 }
 0x54e   : > { %v3644_v40 = vpop.f32.mrb[0].mxu0 }
 0x54f   : > { %v7007_v14 = vadd.f32 %v3644_v40, %v2496_v29  ;;  %v4780_v33 = vpop.f32.mrb[0].mxu1  ;;  %v3646_v36 = vpop.f32.mrb[1].mxu0 }
 0x550   : > { %v7009_v37 = vadd.f32 %v4780_v33, %v2504_v30  ;;  %v7008_v38 = vadd.f32 %v3646_v36, %v2500_v31  ;;  %v4782_v41 = vpop.f32.mrb[1].mxu1 }
 0x551   : > { %v7010_v42 = vadd.f32 %v4782_v41, %v2508_v13 }
 0x552   : > { %v4789_v11 = vcombine.low %v7007_v14, %v7008_v38 }
 0x553   : > { %v4790_v35 = vcombine.low %v7009_v37, %v7010_v42 }
 0x554   : > { %v4797_v43 = vrot.slane %v4789_v11, %v4796_v39 }
 0x555   : > { %v4804_v19 = vrot.slane %v4790_v35, %v4796_v39 }
 0x557   : > { %v4805_v23 = vcombine.low %v4797_v43, %v4804_v19 }
 0x559   : > { %v4812_v44 = vrot.slane %v4805_v23, %v4796_v39 }
 0x55b   : > { %4818 = vst.msk [vmem:[%s263_s14] sm:$0xf] %vm4816_vm0, %v4812_v44 }
 0x55c   : > { %7238 = shalt.err (!%p7235_p1)
}
 0x55d   : > { %s7239_s25 = scalar_lea.hbm %s9687_s2, 64  ;;  %s7243_s27 = scalar_lea.hbm %s9735_s4, 128 }
 0x55e   : > { %p7240_p6 = scmp.ne.s32.totalorder %s9687_s2, %s7239_s25  ;;  %p7244_p7 = scmp.lt.u32.totalorder %s9687_s2, %s9735_s4 }
 0x55f   : > { %p7245_p9 = scmp.lt.u32.totalorder %s7243_s27, %s7239_s25  ;;  %p7247_p12 = scmp.lt.u32.totalorder %s7239_s25, %s9687_s2 }
 0x560   : > { %p7241_p5 = pnand %p7240_p6, %p9758_p4 }
 0x561   : > { %p7246_p10 = por %p7245_p9, %p7244_p7 }
 0x562   : > { %p7242_p2 = pneg %p7241_p5 }
 0x563   : > { %p7248_p0 = por %p7247_p12, %p7246_p10 }
 0x565   : > { %p7249_p11 = pnand %p7248_p0, %p7242_p2 }
 0x567   : > { %7252 = shalt.err (!%p7249_p11)
}
 0x568   : > { %7079 = dma.vmem_to_hbm [thread:$0]  (%p9758_p4), %s9689_s13, 64, %s9687_s2, %s4820_s24  }
 0x569 PF: > { %s4846_s10 = sand.u32 1, %s7283_s15   ;;  %p9759_p13 = scmp.ne.s32.totalorder %s9748_s5, 0 }
 0x56a   : > { %p9760_p3 = scmp.ge.s32.totalorder %s7295_s18, 2  ;;  %s4847_s11 = scalar_lea.sflag [#allocation4], %s4846_s10 }
 0x56c   : > { %p7093_p8 = pnand %p9760_p3, %p9759_p13 }
 0x56e   : > { %7278 = dma.done.wait (!%p7093_p8), %s4847_s11, 64  }
 0x56f   : > { %7280 = vsyncadd (!%p7093_p8), %s4847_s11, 4294967232  ;;  %p18_p1 = scmp.ge.s32.totalorder %s7351_s19, 4   ;;  %s9761_s15 = smov %s7287_s16 }
 0x570   : > { %s9762_s16 = smov %s7291_s17  ;;  %s9763_s17 = smov %s7362_s22 }
 0x571   : > { %s9764_s18 = smov %s7351_s19  ;;  %20 = sbr.rel (!%p18_p1) target bundleno = 8 (0x8), region = 97 }
 0x578   :  { %4852 = vsyncpa [#allocation3], 1 }
 0x579   :  { %4854 = vsyncpa [#allocation3 + $0x1], 1 }
 0x57a   :  { %4855 = vsyncpa [#allocation6], 1 }
 0x57b   :  { %4857 = vsyncpa [#allocation6 + $0x1], 1 }
 0x57c   :  { %4858 = vsyncpa [#allocation4], 1 }
 0x57d   :  { %4860 = vsyncpa [#allocation4 + $0x1], 1 }

</bundles_post_ra>
